<compile_context>
chip_gen: v7x
topology: tpu7x:2x2x1
jax: 0.10.0
libtpu: 0.0.40
codegen_flags: <defaults>
</compile_context>

<pallas_src>
import numpy as np

import jax
import jax.numpy as jnp
from jax.experimental import pallas as pl
from jax.experimental.pallas import tpu as pltpu


# ----------------------------------------------------------------------------
# Fused conv stack: 4 x [Conv3x3(pad=1) + ReLU] in one kernel, VMEM resident.
# ----------------------------------------------------------------------------
def _conv_stack_kernel(s_ref, x_ref, *refs):
    """refs = (w1, b1, w2, b2, w3, b3, w4, b4, o_ref)."""
    o_ref = refs[-1]
    layer_refs = refs[:-1]

    x = x_ref[...].astype(jnp.bfloat16)                     # (M, Cin0)
    m = x.shape[0]
    for li in range(0, len(layer_refs), 2):
        w_ref, b_ref = layer_refs[li], layer_refs[li + 1]   # (9,Cin,Cout), (1,Cout)
        cout = w_ref.shape[-1]
        acc = jnp.zeros((m, cout), jnp.float32)
        for k in range(9):                                  # 3x3 taps, unrolled
            if k == 4:                                      # centre tap: identity shift
                shifted = x
            else:
                shifted = jnp.dot(
                    s_ref[k], x, preferred_element_type=jnp.float32
                ).astype(jnp.bfloat16)                      # shifted/zero-padded copy of x
            acc = acc + jnp.dot(
                shifted, w_ref[k], preferred_element_type=jnp.float32
            )
        x = jnp.maximum(acc + b_ref[...], 0.0).astype(jnp.bfloat16)   # bias + ReLU
    o_ref[...] = x                                          # (M, 512) bf16


def conv_stack(shift_mats, x_col, conv_params):
    """x_col: (M, Cin0) rows in (b, h, w) order; returns (M, Cout_last) bf16."""
    m, cin0 = x_col.shape
    cout_last = conv_params[-1][0].shape[-1]

    in_specs = [
        pl.BlockSpec(shift_mats.shape, lambda i: (0, 0, 0)),   # (9, M, M) shift matrices
        pl.BlockSpec((m, cin0), lambda i: (0, 0)),             # input activation
    ]
    args = [shift_mats, x_col]
    for w, b in conv_params:
        in_specs.append(pl.BlockSpec(w.shape, lambda i: (0, 0, 0)))
        in_specs.append(pl.BlockSpec(b.shape, lambda i: (0, 0)))
        args.extend([w, b])

    return pl.pallas_call(
        _conv_stack_kernel,
        out_shape=jax.ShapeDtypeStruct((m, cout_last), jnp.bfloat16),
        grid_spec=pltpu.PrefetchScalarGridSpec(
            num_scalar_prefetch=0,
            grid=(1,),
            in_specs=in_specs,
            out_specs=pl.BlockSpec((m, cout_last), lambda i: (0, 0)),
        ),
        compiler_params=pltpu.CompilerParams(
            dimension_semantics=("arbitrary",),
            vmem_limit_bytes=16 * 1024 * 1024,   # actual need ~7 MiB; keep v7x headroom
        ),
    )(*args)


# ----------------------------------------------------------------------------
# Fused heads: [probs fc1 | value fc1] K-tiled GEMV + both fc2s in the epilogue.
# ----------------------------------------------------------------------------
def _head_kernel(feat_ref, w1_ref, b1_ref, w2p_ref, b2p_ref, w2v_ref, b2v_ref,
                 probs_ref, value_ref, acc_ref):
    k = pl.program_id(0)

    @pl.when(k == 0)
    def _():
        acc_ref[...] = jnp.zeros_like(acc_ref)

    # fc1 of both heads (concatenated along N), accumulated over K tiles.
    acc_ref[...] += jnp.dot(
        feat_ref[...], w1_ref[...], preferred_element_type=jnp.float32
    )

    @pl.when(k == pl.num_programs(0) - 1)
    def _():
        # Linear -> Dropout(identity, eval) -> ReLU
        h = jnp.maximum(acc_ref[...] + b1_ref[...], 0.0).astype(jnp.bfloat16)
        n_p = w2p_ref.shape[0]                               # 256: probs half of fc1
        probs_ref[...] = (
            jnp.dot(h[:, :n_p], w2p_ref[...], preferred_element_type=jnp.float32)
            + b2p_ref[...]
        ).astype(probs_ref.dtype)
        value_ref[...] = (
            jnp.dot(h[:, n_p:], w2v_ref[...], preferred_element_type=jnp.float32)
            + b2v_ref[...]
        ).astype(value_ref.dtype)


def fused_heads(feat, head, *, tk=2048):
    b, k_total = feat.shape
    n1 = head["fc1_w"].shape[1]
    assert k_total % tk == 0

    return pl.pallas_call(
        _head_kernel,
        out_shape=(jax.ShapeDtypeStruct((b, 4), jnp.float32),
                   jax.ShapeDtypeStruct((b, 1), jnp.float32)),
        grid_spec=pltpu.PrefetchScalarGridSpec(
            num_scalar_prefetch=0,
            grid=(k_total // tk,),
            in_specs=[
                pl.BlockSpec((b, tk), lambda kk: (0, kk)),    # feat slab (bf16)
                pl.BlockSpec((tk, n1), lambda kk: (kk, 0)),   # fused fc1 weight slab (bf16)
                pl.BlockSpec((1, n1), lambda kk: (0, 0)),     # fused fc1 bias (resident)
                pl.BlockSpec(head["fc2p_w"].shape, lambda kk: (0, 0)),
                pl.BlockSpec(head["fc2p_b"].shape, lambda kk: (0, 0)),
                pl.BlockSpec(head["fc2v_w"].shape, lambda kk: (0, 0)),
                pl.BlockSpec(head["fc2v_b"].shape, lambda kk: (0, 0)),
            ],
            out_specs=[pl.BlockSpec((b, 4), lambda kk: (0, 0)),
                       pl.BlockSpec((b, 1), lambda kk: (0, 0))],
            scratch_shapes=[pltpu.VMEM((b, n1), jnp.float32)],
        ),
        compiler_params=pltpu.CompilerParams(
            dimension_semantics=("arbitrary",),
            vmem_limit_bytes=16 * 1024 * 1024,   # actual need ~5 MiB; keep v7x headroom
        ),
    )(feat, head["fc1_w"], head["fc1_b"], head["fc2p_w"], head["fc2p_b"],
      head["fc2v_w"], head["fc2v_b"])


# ----------------------------------------------------------------------------
# Shift matrices realizing the 3x3 / pad=1 neighbourhood as 0/1 matmuls.
# ----------------------------------------------------------------------------
def build_shift_mats(batch, height, width):
    """S[k, r_out, r_in] = 1 iff input row r_in is the (dh-1, dw-1)-shifted
    neighbour of output row r_out (k = dh*3 + dw), rows in (b, h, w) order,
    zero-padding at the spatial boundary (row stays all-zero)."""
    m = batch * height * width
    s = np.zeros((9, m, m), np.float32)
    for k in range(9):
        dh, dw = k // 3 - 1, k % 3 - 1
        for b in range(batch):
            for h in range(height):
                for w in range(width):
                    hh, ww = h + dh, w + dw
                    if 0 <= hh < height and 0 <= ww < width:
                        s[k, (b * height + h) * width + w,
                             (b * height + hh) * width + ww] = 1.0
    return jnp.asarray(s, dtype=jnp.bfloat16)


# ----------------------------------------------------------------------------
# Parameters: raw (PyTorch layout, f32) + one-time conversion to kernel layout.
# ----------------------------------------------------------------------------
def init_raw_params(key):
    ks = iter(jax.random.split(key, 16))

    def rnd(shape, fan_in):
        return jax.random.normal(next(ks), shape, jnp.float32) / np.sqrt(fan_in)

    chans = [16, 64, 128, 256, 512]                     # cfg['VGGMe3'], in_channels=16
    convs = [(rnd((co, ci, 3, 3), ci * 9), rnd((co,), ci * 9))
             for ci, co in zip(chans[:-1], chans[1:])]

    def linear(cin, cout):                              # stored (in, out) for x @ w
        return (rnd((cin, cout), cin), rnd((cout,), cin))

    return {
        "convs": convs,
        "probs": [linear(512 * 16, 256), linear(256, 4)],
        "value": [linear(512 * 16, 256), linear(256, 1)],
    }


def prepare_params(raw):
    """One-time layout prep (hoisted out of the forward path):
    conv OIHW -> (9, Cin, Cout) bf16; probs/value fc1 concatenated and their rows
    permuted from PyTorch's NCHW flatten (j = c*16 + hw) to the kernel's NHWC
    flatten (j' = hw*512 + c); biases as (1, N) f32; fc2 weights bf16."""
    conv = []
    for w, b in raw["convs"]:
        co, ci = w.shape[0], w.shape[1]
        wk = jnp.transpose(w, (2, 3, 1, 0)).reshape(9, ci, co)
        conv.append((wk.astype(jnp.bfloat16), b.reshape(1, co).astype(jnp.float32)))

    (pw1, pb1), (pw2, pb2) = raw["probs"]
    (vw1, vb1), (vw2, vb2) = raw["value"]
    w1 = jnp.concatenate([pw1, vw1], axis=1)            # (8192, 512), rows j = c*16+hw
    n1 = w1.shape[1]
    w1 = w1.reshape(512, 16, n1).transpose(1, 0, 2).reshape(16 * 512, n1)  # rows j'
    b1 = jnp.concatenate([pb1, vb1]).reshape(1, n1)

    head = {
        "fc1_w": w1.astype(jnp.bfloat16),
        "fc1_b": b1.astype(jnp.float32),
        "fc2p_w": pw2.astype(jnp.bfloat16),
        "fc2p_b": pb2.reshape(1, -1).astype(jnp.float32),
        "fc2v_w": vw2.astype(jnp.bfloat16),
        "fc2v_b": vb2.reshape(1, -1).astype(jnp.float32),
    }
    return {"conv": conv, "head": head}


# ----------------------------------------------------------------------------
# Forward pass (matches VGG_Alpha.forward, eval-mode dropout).
# ----------------------------------------------------------------------------
def vgg_alpha_forward(params, x):
    x = x.reshape(-1, 16, 4, 4)                         # PyTorch: x.reshape(-1, 16, 4, 4)
    bsz = x.shape[0]
    shift = build_shift_mats(bsz, 4, 4)                 # trace-time constant (9, M, M)
    x_col = jnp.transpose(x, (0, 2, 3, 1)).reshape(bsz * 16, 16)   # rows (b,h,w), cols Cin
    act = conv_stack(shift, x_col, params["conv"])      # (B*16, 512) bf16, whole conv stack
    feat = act.reshape(bsz, 16 * 512)                   # matches permuted fc1 rows
    probs, value = fused_heads(feat, params["head"])    # both heads in one kernel
    return probs, value


# ----------------------------------------------------------------------------
# Pure-JAX f32 reference mirroring the PyTorch module exactly (for validation).
# ----------------------------------------------------------------------------
def reference_forward(raw, x):
    x = x.reshape(-1, 16, 4, 4)
    h = jnp.transpose(x, (0, 2, 3, 1))                  # NHWC
    for w, b in raw["convs"]:
        h = jax.lax.conv_general_dilated(
            h, jnp.transpose(w, (2, 3, 1, 0)), (1, 1), "SAME",
            dimension_numbers=("NHWC", "HWIO", "NHWC"))
        h = jnp.maximum(h + b, 0.0)
    feat = jnp.transpose(h, (0, 3, 1, 2)).reshape(h.shape[0], -1)   # NCHW flatten

    (pw1, pb1), (pw2, pb2) = raw["probs"]
    (vw1, vb1), (vw2, vb2) = raw["value"]
    p = jnp.maximum(feat @ pw1 + pb1, 0.0)
    probs = p @ pw2 + pb2
    v = jnp.maximum(feat @ vw1 + vb1, 0.0)
    value = v @ vw2 + vb2
    return probs, value


if __name__ == "__main__":
    key = jax.random.PRNGKey(0)
    pkey, xkey = jax.random.split(key)
    raw = init_raw_params(pkey)
    params = prepare_params(raw)

    # batch=2, input reshaped by the module to (-1, 16, 4, 4)
    x = jax.random.normal(xkey, (2, 16, 4, 4), jnp.float32)

    probs, value = jax.jit(vgg_alpha_forward)(params, x)
    jax.block_until_ready((probs, value))

    assert probs.shape == (2, 4), probs.shape
    assert value.shape == (2, 1), value.shape
    assert jnp.all(jnp.isfinite(probs)) and jnp.all(jnp.isfinite(value))

    # Cross-check against the f32 reference (bf16 weights/activations => loose tol).
    probs_ref, value_ref = jax.jit(reference_forward)(raw, x)
    assert jnp.allclose(probs, probs_ref, atol=5e-2, rtol=5e-2), (
        np.asarray(probs), np.asarray(probs_ref))
    assert jnp.allclose(value, value_ref, atol=5e-2, rtol=5e-2), (
        np.asarray(value), np.asarray(value_ref))

    print("KERNEL_OK")
</pallas_src>

<mosaic_0001>
module attributes {stable_mosaic.version = 11 : i64} {
  func.func @_head_kernel(%arg0: i32, %arg1: memref<2x2048xbf16, #tpu.memory_space<vmem>>, %arg2: memref<2048x512xbf16, #tpu.memory_space<vmem>>, %arg3: memref<1x512xf32, #tpu.memory_space<vmem>>, %arg4: memref<256x4xbf16, #tpu.memory_space<vmem>>, %arg5: memref<1x4xf32, #tpu.memory_space<vmem>>, %arg6: memref<256x1xbf16, #tpu.memory_space<vmem>>, %arg7: memref<1x1xf32, #tpu.memory_space<vmem>>, %arg8: memref<2x4xf32, #tpu.memory_space<vmem>>, %arg9: memref<2x1xf32, #tpu.memory_space<vmem>>, %arg10: memref<2x512xf32, #tpu.memory_space<vmem>>) attributes {dimension_semantics = [#tpu.dimension_semantics<arbitrary>], iteration_bounds = array<i64: 4>, scalar_prefetch = 0 : i64, scratch_operands = 1 : i64, tpu.core_type = #tpu.core_type<tc>, window_params = [{transform_indices = @transform_0, window_bounds = array<i64: 2, 2048>}, {transform_indices = @transform_1, window_bounds = array<i64: 2048, 512>}, {pipeline_mode = #tpu.pipeline_mode<synchronous>, transform_indices = @transform_2, window_bounds = array<i64: 1, 512>}, {pipeline_mode = #tpu.pipeline_mode<synchronous>, transform_indices = @transform_3, window_bounds = array<i64: 256, 4>}, {pipeline_mode = #tpu.pipeline_mode<synchronous>, transform_indices = @transform_4, window_bounds = array<i64: 1, 4>}, {pipeline_mode = #tpu.pipeline_mode<synchronous>, transform_indices = @transform_5, window_bounds = array<i64: 256, 1>}, {pipeline_mode = #tpu.pipeline_mode<synchronous>, transform_indices = @transform_6, window_bounds = array<i64: 1, 1>}, {pipeline_mode = #tpu.pipeline_mode<synchronous>, transform_indices = @transform_7, window_bounds = array<i64: 2, 4>}, {pipeline_mode = #tpu.pipeline_mode<synchronous>, transform_indices = @transform_8, window_bounds = array<i64: 2, 1>}]} {
    %c0_i32 = arith.constant 0 : i32
    %0 = arith.cmpi eq, %arg0, %c0_i32 : i32
    %1 = arith.extui %0 : i1 to i32
    %c0_i32_0 = arith.constant 0 : i32
    %2 = arith.cmpi ne, %1, %c0_i32_0 : i32
    scf.if %2 {
      %cst_9 = arith.constant 0.000000e+00 : f32
      %12 = vector.broadcast %cst_9 : f32 to vector<2x512xf32>
      %c0_10 = arith.constant 0 : index
      %c0_11 = arith.constant 0 : index
      %13 = vector.load %arg10[%c0_10, %c0_11] : memref<2x512xf32, #tpu.memory_space<vmem>>, vector<2x512xf32>
      tpu.vector_store %arg10[%c0_10, %c0_11], %12 {strides = array<i32>} : memref<2x512xf32, #tpu.memory_space<vmem>>, vector<2x512xf32>,
    } else {
    }
    %c0 = arith.constant 0 : index
    %c0_1 = arith.constant 0 : index
    %3 = vector.load %arg10[%c0, %c0_1] : memref<2x512xf32, #tpu.memory_space<vmem>>, vector<2x512xf32>
    %c0_2 = arith.constant 0 : index
    %c0_3 = arith.constant 0 : index
    %4 = vector.load %arg1[%c0_2, %c0_3] : memref<2x2048xbf16, #tpu.memory_space<vmem>>, vector<2x2048xbf16>
    %c0_4 = arith.constant 0 : index
    %c0_5 = arith.constant 0 : index
    %5 = vector.load %arg2[%c0_4, %c0_5] : memref<2048x512xbf16, #tpu.memory_space<vmem>>, vector<2048x512xbf16>
    %cst = arith.constant dense<0.000000e+00> : vector<2x512xf32>
    %6 = tpu.matmul %4, %5, %cst {dimension_numbers = #tpu.dot_dimension_numbers<[1], [0], [0], [1], [0, 0, 1, 1], [], []>} : vector<2x2048xbf16>, vector<2048x512xbf16>, vector<2x512xf32> -> vector<2x512xf32>
    %7 = arith.addf %3, %6 : vector<2x512xf32>
    %c0_6 = arith.constant 0 : index
    %c0_7 = arith.constant 0 : index
    %8 = vector.load %arg10[%c0_6, %c0_7] : memref<2x512xf32, #tpu.memory_space<vmem>>, vector<2x512xf32>
    tpu.vector_store %arg10[%c0_6, %c0_7], %7 {strides = array<i32>} : memref<2x512xf32, #tpu.memory_space<vmem>>, vector<2x512xf32>,
    %c3_i32 = arith.constant 3 : i32
    %9 = arith.cmpi eq, %arg0, %c3_i32 : i32
    %10 = arith.extui %9 : i1 to i32
    %c0_i32_8 = arith.constant 0 : i32
    %11 = arith.cmpi ne, %10, %c0_i32_8 : i32
    scf.if %11 {
      %c0_9 = arith.constant 0 : index
      %c0_10 = arith.constant 0 : index
      %12 = vector.load %arg10[%c0_9, %c0_10] : memref<2x512xf32, #tpu.memory_space<vmem>>, vector<2x512xf32>
      %c0_11 = arith.constant 0 : index
      %c0_12 = arith.constant 0 : index
      %13 = vector.load %arg3[%c0_11, %c0_12] : memref<1x512xf32, #tpu.memory_space<vmem>>, vector<1x512xf32>
      %14 = vector.broadcast %13 : vector<1x512xf32> to vector<2x512xf32>
      %15 = arith.addf %12, %14 : vector<2x512xf32>
      %cst_13 = arith.constant 0.000000e+00 : f32
      %16 = vector.broadcast %cst_13 : f32 to vector<2x512xf32>
      %17 = arith.maximumf %15, %16 : vector<2x512xf32>
      %18 = arith.truncf %17 : vector<2x512xf32> to vector<2x512xbf16>
      %19 = vector.extract_strided_slice %18 {offsets = [0, 0], sizes = [2, 256], strides = [1, 1]} : vector<2x512xbf16> to vector<2x256xbf16>
      %c0_14 = arith.constant 0 : index
      %c0_15 = arith.constant 0 : index
      %20 = vector.load %arg4[%c0_14, %c0_15] : memref<256x4xbf16, #tpu.memory_space<vmem>>, vector<256x4xbf16>
      %cst_16 = arith.constant dense<0.000000e+00> : vector<2x4xf32>
      %21 = tpu.matmul %19, %20, %cst_16 {dimension_numbers = #tpu.dot_dimension_numbers<[1], [0], [0], [1], [0, 0, 1, 1], [], []>} : vector<2x256xbf16>, vector<256x4xbf16>, vector<2x4xf32> -> vector<2x4xf32>
      %c0_17 = arith.constant 0 : index
      %c0_18 = arith.constant 0 : index
      %22 = vector.load %arg5[%c0_17, %c0_18] : memref<1x4xf32, #tpu.memory_space<vmem>>, vector<1x4xf32>
      %23 = vector.broadcast %22 : vector<1x4xf32> to vector<2x4xf32>
      %24 = arith.addf %21, %23 : vector<2x4xf32>
      %c0_19 = arith.constant 0 : index
      %c0_20 = arith.constant 0 : index
      %25 = vector.load %arg8[%c0_19, %c0_20] : memref<2x4xf32, #tpu.memory_space<vmem>>, vector<2x4xf32>
      tpu.vector_store %arg8[%c0_19, %c0_20], %24 {strides = array<i32>} : memref<2x4xf32, #tpu.memory_space<vmem>>, vector<2x4xf32>,
      %26 = vector.extract_strided_slice %18 {offsets = [0, 256], sizes = [2, 256], strides = [1, 1]} : vector<2x512xbf16> to vector<2x256xbf16>
      %c0_21 = arith.constant 0 : index
      %c0_22 = arith.constant 0 : index
      %27 = vector.load %arg6[%c0_21, %c0_22] : memref<256x1xbf16, #tpu.memory_space<vmem>>, vector<256x1xbf16>
      %cst_23 = arith.constant dense<0.000000e+00> : vector<2x1xf32>
      %28 = tpu.matmul %26, %27, %cst_23 {dimension_numbers = #tpu.dot_dimension_numbers<[1], [0], [0], [1], [0, 0, 1, 1], [], []>} : vector<2x256xbf16>, vector<256x1xbf16>, vector<2x1xf32> -> vector<2x1xf32>
      %c0_24 = arith.constant 0 : index
      %c0_25 = arith.constant 0 : index
      %29 = vector.load %arg7[%c0_24, %c0_25] : memref<1x1xf32, #tpu.memory_space<vmem>>, vector<1x1xf32>
      %30 = vector.broadcast %29 : vector<1x1xf32> to vector<2x1xf32>
      %31 = arith.addf %28, %30 : vector<2x1xf32>
      %c0_26 = arith.constant 0 : index
      %c0_27 = arith.constant 0 : index
      %32 = vector.load %arg9[%c0_26, %c0_27] : memref<2x1xf32, #tpu.memory_space<vmem>>, vector<2x1xf32>
      tpu.vector_store %arg9[%c0_26, %c0_27], %31 {strides = array<i32>} : memref<2x1xf32, #tpu.memory_space<vmem>>, vector<2x1xf32>,
    } else {
    }
    return
  }
  func.func @transform_0(%arg0: i32) -> (i32, i32) {
    %c0_i32 = arith.constant 0 : i32
    %c0_i32_0 = arith.constant 0 : i32
    return %c0_i32, %arg0 : i32, i32
  }
  func.func @transform_1(%arg0: i32) -> (i32, i32) {
    %c0_i32 = arith.constant 0 : i32
    %c0_i32_0 = arith.constant 0 : i32
    return %arg0, %c0_i32 : i32, i32
  }
  func.func @transform_2(%arg0: i32) -> (i32, i32) {
    %c0_i32 = arith.constant 0 : i32
    %c0_i32_0 = arith.constant 0 : i32
    %c0_i32_1 = arith.constant 0 : i32
    return %c0_i32, %c0_i32_0 : i32, i32
  }
  func.func @transform_3(%arg0: i32) -> (i32, i32) {
    %c0_i32 = arith.constant 0 : i32
    %c0_i32_0 = arith.constant 0 : i32
    %c0_i32_1 = arith.constant 0 : i32
    return %c0_i32, %c0_i32_0 : i32, i32
  }
  func.func @transform_4(%arg0: i32) -> (i32, i32) {
    %c0_i32 = arith.constant 0 : i32
    %c0_i32_0 = arith.constant 0 : i32
    %c0_i32_1 = arith.constant 0 : i32
    return %c0_i32, %c0_i32_0 : i32, i32
  }
  func.func @transform_5(%arg0: i32) -> (i32, i32) {
    %c0_i32 = arith.constant 0 : i32
    %c0_i32_0 = arith.constant 0 : i32
    %c0_i32_1 = arith.constant 0 : i32
    return %c0_i32, %c0_i32_0 : i32, i32
  }
  func.func @transform_6(%arg0: i32) -> (i32, i32) {
    %c0_i32 = arith.constant 0 : i32
    %c0_i32_0 = arith.constant 0 : i32
    %c0_i32_1 = arith.constant 0 : i32
    return %c0_i32, %c0_i32_0 : i32, i32
  }
  func.func @transform_7(%arg0: i32) -> (i32, i32) {
    %c0_i32 = arith.constant 0 : i32
    %c0_i32_0 = arith.constant 0 : i32
    %c0_i32_1 = arith.constant 0 : i32
    return %c0_i32, %c0_i32_0 : i32, i32
  }
  func.func @transform_8(%arg0: i32) -> (i32, i32) {
    %c0_i32 = arith.constant 0 : i32
    %c0_i32_0 = arith.constant 0 : i32
    %c0_i32_1 = arith.constant 0 : i32
    return %c0_i32, %c0_i32_0 : i32, i32
  }
}

module attributes {stable_mosaic.version = 11 : i64} {
  func.func @_conv_stack_kernel(%arg0: i32, %arg1: memref<9x32x32xbf16, #tpu.memory_space<vmem>>, %arg2: memref<32x16xf32, #tpu.memory_space<vmem>>, %arg3: memref<9x16x64xbf16, #tpu.memory_space<vmem>>, %arg4: memref<1x64xf32, #tpu.memory_space<vmem>>, %arg5: memref<9x64x128xbf16, #tpu.memory_space<vmem>>, %arg6: memref<1x128xf32, #tpu.memory_space<vmem>>, %arg7: memref<9x128x256xbf16, #tpu.memory_space<vmem>>, %arg8: memref<1x256xf32, #tpu.memory_space<vmem>>, %arg9: memref<9x256x512xbf16, #tpu.memory_space<vmem>>, %arg10: memref<1x512xf32, #tpu.memory_space<vmem>>, %arg11: memref<32x512xbf16, #tpu.memory_space<vmem>>) attributes {dimension_semantics = [#tpu.dimension_semantics<arbitrary>], iteration_bounds = array<i64: 1>, scalar_prefetch = 0 : i64, scratch_operands = 0 : i64, tpu.core_type = #tpu.core_type<tc>, window_params = [{pipeline_mode = #tpu.pipeline_mode<synchronous>, transform_indices = @transform_0, window_bounds = array<i64: 9, 32, 32>}, {pipeline_mode = #tpu.pipeline_mode<synchronous>, transform_indices = @transform_1, window_bounds = array<i64: 32, 16>}, {pipeline_mode = #tpu.pipeline_mode<synchronous>, transform_indices = @transform_2, window_bounds = array<i64: 9, 16, 64>}, {pipeline_mode = #tpu.pipeline_mode<synchronous>, transform_indices = @transform_3, window_bounds = array<i64: 1, 64>}, {pipeline_mode = #tpu.pipeline_mode<synchronous>, transform_indices = @transform_4, window_bounds = array<i64: 9, 64, 128>}, {pipeline_mode = #tpu.pipeline_mode<synchronous>, transform_indices = @transform_5, window_bounds = array<i64: 1, 128>}, {pipeline_mode = #tpu.pipeline_mode<synchronous>, transform_indices = @transform_6, window_bounds = array<i64: 9, 128, 256>}, {pipeline_mode = #tpu.pipeline_mode<synchronous>, transform_indices = @transform_7, window_bounds = array<i64: 1, 256>}, {pipeline_mode = #tpu.pipeline_mode<synchronous>, transform_indices = @transform_8, window_bounds = array<i64: 9, 256, 512>}, {pipeline_mode = #tpu.pipeline_mode<synchronous>, transform_indices = @transform_9, window_bounds = array<i64: 1, 512>}, {pipeline_mode = #tpu.pipeline_mode<synchronous>, transform_indices = @transform_10, window_bounds = array<i64: 32, 512>}]} {
    %c0 = arith.constant 0 : index
    %c0_0 = arith.constant 0 : index
    %0 = vector.load %arg2[%c0, %c0_0] : memref<32x16xf32, #tpu.memory_space<vmem>>, vector<32x16xf32>
    %1 = arith.truncf %0 : vector<32x16xf32> to vector<32x16xbf16>
    %cst = arith.constant 0.000000e+00 : f32
    %2 = vector.broadcast %cst : f32 to vector<32x64xf32>
    %c0_1 = arith.constant 0 : index
    %c0_2 = arith.constant 0 : index
    %c0_3 = arith.constant 0 : index
    %3 = vector.load %arg1[%c0_1, %c0_2, %c0_3] : memref<9x32x32xbf16, #tpu.memory_space<vmem>>, vector<1x32x32xbf16>
    %4 = vector.shape_cast %3 : vector<1x32x32xbf16> to vector<32x32xbf16>
    %cst_4 = arith.constant dense<0.000000e+00> : vector<32x16xf32>
    %5 = tpu.matmul %4, %1, %cst_4 {dimension_numbers = #tpu.dot_dimension_numbers<[1], [0], [0], [1], [0, 0, 1, 1], [], []>} : vector<32x32xbf16>, vector<32x16xbf16>, vector<32x16xf32> -> vector<32x16xf32>
    %6 = arith.truncf %5 : vector<32x16xf32> to vector<32x16xbf16>
    %c0_5 = arith.constant 0 : index
    %c0_6 = arith.constant 0 : index
    %c0_7 = arith.constant 0 : index
    %7 = vector.load %arg3[%c0_5, %c0_6, %c0_7] : memref<9x16x64xbf16, #tpu.memory_space<vmem>>, vector<1x16x64xbf16>
    %8 = vector.shape_cast %7 : vector<1x16x64xbf16> to vector<16x64xbf16>
    %cst_8 = arith.constant dense<0.000000e+00> : vector<32x64xf32>
    %9 = tpu.matmul %6, %8, %cst_8 {dimension_numbers = #tpu.dot_dimension_numbers<[1], [0], [0], [1], [0, 0, 1, 1], [], []>} : vector<32x16xbf16>, vector<16x64xbf16>, vector<32x64xf32> -> vector<32x64xf32>
    %10 = arith.addf %2, %9 : vector<32x64xf32>
    %c1 = arith.constant 1 : index
    %c0_9 = arith.constant 0 : index
    %c0_10 = arith.constant 0 : index
    %11 = vector.load %arg1[%c1, %c0_9, %c0_10] : memref<9x32x32xbf16, #tpu.memory_space<vmem>>, vector<1x32x32xbf16>
    %12 = vector.shape_cast %11 : vector<1x32x32xbf16> to vector<32x32xbf16>
    %cst_11 = arith.constant dense<0.000000e+00> : vector<32x16xf32>
    %13 = tpu.matmul %12, %1, %cst_11 {dimension_numbers = #tpu.dot_dimension_numbers<[1], [0], [0], [1], [0, 0, 1, 1], [], []>} : vector<32x32xbf16>, vector<32x16xbf16>, vector<32x16xf32> -> vector<32x16xf32>
    %14 = arith.truncf %13 : vector<32x16xf32> to vector<32x16xbf16>
    %c1_12 = arith.constant 1 : index
    %c0_13 = arith.constant 0 : index
    %c0_14 = arith.constant 0 : index
    %15 = vector.load %arg3[%c1_12, %c0_13, %c0_14] : memref<9x16x64xbf16, #tpu.memory_space<vmem>>, vector<1x16x64xbf16>
    %16 = vector.shape_cast %15 : vector<1x16x64xbf16> to vector<16x64xbf16>
    %cst_15 = arith.constant dense<0.000000e+00> : vector<32x64xf32>
    %17 = tpu.matmul %14, %16, %cst_15 {dimension_numbers = #tpu.dot_dimension_numbers<[1], [0], [0], [1], [0, 0, 1, 1], [], []>} : vector<32x16xbf16>, vector<16x64xbf16>, vector<32x64xf32> -> vector<32x64xf32>
    %18 = arith.addf %10, %17 : vector<32x64xf32>
    %c2 = arith.constant 2 : index
    %c0_16 = arith.constant 0 : index
    %c0_17 = arith.constant 0 : index
    %19 = vector.load %arg1[%c2, %c0_16, %c0_17] : memref<9x32x32xbf16, #tpu.memory_space<vmem>>, vector<1x32x32xbf16>
    %20 = vector.shape_cast %19 : vector<1x32x32xbf16> to vector<32x32xbf16>
    %cst_18 = arith.constant dense<0.000000e+00> : vector<32x16xf32>
    %21 = tpu.matmul %20, %1, %cst_18 {dimension_numbers = #tpu.dot_dimension_numbers<[1], [0], [0], [1], [0, 0, 1, 1], [], []>} : vector<32x32xbf16>, vector<32x16xbf16>, vector<32x16xf32> -> vector<32x16xf32>
    %22 = arith.truncf %21 : vector<32x16xf32> to vector<32x16xbf16>
    %c2_19 = arith.constant 2 : index
    %c0_20 = arith.constant 0 : index
    %c0_21 = arith.constant 0 : index
    %23 = vector.load %arg3[%c2_19, %c0_20, %c0_21] : memref<9x16x64xbf16, #tpu.memory_space<vmem>>, vector<1x16x64xbf16>
    %24 = vector.shape_cast %23 : vector<1x16x64xbf16> to vector<16x64xbf16>
    %cst_22 = arith.constant dense<0.000000e+00> : vector<32x64xf32>
    %25 = tpu.matmul %22, %24, %cst_22 {dimension_numbers = #tpu.dot_dimension_numbers<[1], [0], [0], [1], [0, 0, 1, 1], [], []>} : vector<32x16xbf16>, vector<16x64xbf16>, vector<32x64xf32> -> vector<32x64xf32>
    %26 = arith.addf %18, %25 : vector<32x64xf32>
    %c3 = arith.constant 3 : index
    %c0_23 = arith.constant 0 : index
    %c0_24 = arith.constant 0 : index
    %27 = vector.load %arg1[%c3, %c0_23, %c0_24] : memref<9x32x32xbf16, #tpu.memory_space<vmem>>, vector<1x32x32xbf16>
    %28 = vector.shape_cast %27 : vector<1x32x32xbf16> to vector<32x32xbf16>
    %cst_25 = arith.constant dense<0.000000e+00> : vector<32x16xf32>
    %29 = tpu.matmul %28, %1, %cst_25 {dimension_numbers = #tpu.dot_dimension_numbers<[1], [0], [0], [1], [0, 0, 1, 1], [], []>} : vector<32x32xbf16>, vector<32x16xbf16>, vector<32x16xf32> -> vector<32x16xf32>
    %30 = arith.truncf %29 : vector<32x16xf32> to vector<32x16xbf16>
    %c3_26 = arith.constant 3 : index
    %c0_27 = arith.constant 0 : index
    %c0_28 = arith.constant 0 : index
    %31 = vector.load %arg3[%c3_26, %c0_27, %c0_28] : memref<9x16x64xbf16, #tpu.memory_space<vmem>>, vector<1x16x64xbf16>
    %32 = vector.shape_cast %31 : vector<1x16x64xbf16> to vector<16x64xbf16>
    %cst_29 = arith.constant dense<0.000000e+00> : vector<32x64xf32>
    %33 = tpu.matmul %30, %32, %cst_29 {dimension_numbers = #tpu.dot_dimension_numbers<[1], [0], [0], [1], [0, 0, 1, 1], [], []>} : vector<32x16xbf16>, vector<16x64xbf16>, vector<32x64xf32> -> vector<32x64xf32>
    %34 = arith.addf %26, %33 : vector<32x64xf32>
    %c4 = arith.constant 4 : index
    %c0_30 = arith.constant 0 : index
    %c0_31 = arith.constant 0 : index
    %35 = vector.load %arg3[%c4, %c0_30, %c0_31] : memref<9x16x64xbf16, #tpu.memory_space<vmem>>, vector<1x16x64xbf16>
    %36 = vector.shape_cast %35 : vector<1x16x64xbf16> to vector<16x64xbf16>
    %cst_32 = arith.constant dense<0.000000e+00> : vector<32x64xf32>
    %37 = tpu.matmul %1, %36, %cst_32 {dimension_numbers = #tpu.dot_dimension_numbers<[1], [0], [0], [1], [0, 0, 1, 1], [], []>} : vector<32x16xbf16>, vector<16x64xbf16>, vector<32x64xf32> -> vector<32x64xf32>
    %38 = arith.addf %34, %37 : vector<32x64xf32>
    %c5 = arith.constant 5 : index
    %c0_33 = arith.constant 0 : index
    %c0_34 = arith.constant 0 : index
    %39 = vector.load %arg1[%c5, %c0_33, %c0_34] : memref<9x32x32xbf16, #tpu.memory_space<vmem>>, vector<1x32x32xbf16>
    %40 = vector.shape_cast %39 : vector<1x32x32xbf16> to vector<32x32xbf16>
    %cst_35 = arith.constant dense<0.000000e+00> : vector<32x16xf32>
    %41 = tpu.matmul %40, %1, %cst_35 {dimension_numbers = #tpu.dot_dimension_numbers<[1], [0], [0], [1], [0, 0, 1, 1], [], []>} : vector<32x32xbf16>, vector<32x16xbf16>, vector<32x16xf32> -> vector<32x16xf32>
    %42 = arith.truncf %41 : vector<32x16xf32> to vector<32x16xbf16>
    %c5_36 = arith.constant 5 : index
    %c0_37 = arith.constant 0 : index
    %c0_38 = arith.constant 0 : index
    %43 = vector.load %arg3[%c5_36, %c0_37, %c0_38] : memref<9x16x64xbf16, #tpu.memory_space<vmem>>, vector<1x16x64xbf16>
    %44 = vector.shape_cast %43 : vector<1x16x64xbf16> to vector<16x64xbf16>
    %cst_39 = arith.constant dense<0.000000e+00> : vector<32x64xf32>
    %45 = tpu.matmul %42, %44, %cst_39 {dimension_numbers = #tpu.dot_dimension_numbers<[1], [0], [0], [1], [0, 0, 1, 1], [], []>} : vector<32x16xbf16>, vector<16x64xbf16>, vector<32x64xf32> -> vector<32x64xf32>
    %46 = arith.addf %38, %45 : vector<32x64xf32>
    %c6 = arith.constant 6 : index
    %c0_40 = arith.constant 0 : index
    %c0_41 = arith.constant 0 : index
    %47 = vector.load %arg1[%c6, %c0_40, %c0_41] : memref<9x32x32xbf16, #tpu.memory_space<vmem>>, vector<1x32x32xbf16>
    %48 = vector.shape_cast %47 : vector<1x32x32xbf16> to vector<32x32xbf16>
    %cst_42 = arith.constant dense<0.000000e+00> : vector<32x16xf32>
    %49 = tpu.matmul %48, %1, %cst_42 {dimension_numbers = #tpu.dot_dimension_numbers<[1], [0], [0], [1], [0, 0, 1, 1], [], []>} : vector<32x32xbf16>, vector<32x16xbf16>, vector<32x16xf32> -> vector<32x16xf32>
    %50 = arith.truncf %49 : vector<32x16xf32> to vector<32x16xbf16>
    %c6_43 = arith.constant 6 : index
    %c0_44 = arith.constant 0 : index
    %c0_45 = arith.constant 0 : index
    %51 = vector.load %arg3[%c6_43, %c0_44, %c0_45] : memref<9x16x64xbf16, #tpu.memory_space<vmem>>, vector<1x16x64xbf16>
    %52 = vector.shape_cast %51 : vector<1x16x64xbf16> to vector<16x64xbf16>
    %cst_46 = arith.constant dense<0.000000e+00> : vector<32x64xf32>
    %53 = tpu.matmul %50, %52, %cst_46 {dimension_numbers = #tpu.dot_dimension_numbers<[1], [0], [0], [1], [0, 0, 1, 1], [], []>} : vector<32x16xbf16>, vector<16x64xbf16>, vector<32x64xf32> -> vector<32x64xf32>
    %54 = arith.addf %46, %53 : vector<32x64xf32>
    %c7 = arith.constant 7 : index
    %c0_47 = arith.constant 0 : index
    %c0_48 = arith.constant 0 : index
    %55 = vector.load %arg1[%c7, %c0_47, %c0_48] : memref<9x32x32xbf16, #tpu.memory_space<vmem>>, vector<1x32x32xbf16>
    %56 = vector.shape_cast %55 : vector<1x32x32xbf16> to vector<32x32xbf16>
    %cst_49 = arith.constant dense<0.000000e+00> : vector<32x16xf32>
    %57 = tpu.matmul %56, %1, %cst_49 {dimension_numbers = #tpu.dot_dimension_numbers<[1], [0], [0], [1], [0, 0, 1, 1], [], []>} : vector<32x32xbf16>, vector<32x16xbf16>, vector<32x16xf32> -> vector<32x16xf32>
    %58 = arith.truncf %57 : vector<32x16xf32> to vector<32x16xbf16>
    %c7_50 = arith.constant 7 : index
    %c0_51 = arith.constant 0 : index
    %c0_52 = arith.constant 0 : index
    %59 = vector.load %arg3[%c7_50, %c0_51, %c0_52] : memref<9x16x64xbf16, #tpu.memory_space<vmem>>, vector<1x16x64xbf16>
    %60 = vector.shape_cast %59 : vector<1x16x64xbf16> to vector<16x64xbf16>
    %cst_53 = arith.constant dense<0.000000e+00> : vector<32x64xf32>
    %61 = tpu.matmul %58, %60, %cst_53 {dimension_numbers = #tpu.dot_dimension_numbers<[1], [0], [0], [1], [0, 0, 1, 1], [], []>} : vector<32x16xbf16>, vector<16x64xbf16>, vector<32x64xf32> -> vector<32x64xf32>
    %62 = arith.addf %54, %61 : vector<32x64xf32>
    %c8 = arith.constant 8 : index
    %c0_54 = arith.constant 0 : index
    %c0_55 = arith.constant 0 : index
    %63 = vector.load %arg1[%c8, %c0_54, %c0_55] : memref<9x32x32xbf16, #tpu.memory_space<vmem>>, vector<1x32x32xbf16>
    %64 = vector.shape_cast %63 : vector<1x32x32xbf16> to vector<32x32xbf16>
    %cst_56 = arith.constant dense<0.000000e+00> : vector<32x16xf32>
    %65 = tpu.matmul %64, %1, %cst_56 {dimension_numbers = #tpu.dot_dimension_numbers<[1], [0], [0], [1], [0, 0, 1, 1], [], []>} : vector<32x32xbf16>, vector<32x16xbf16>, vector<32x16xf32> -> vector<32x16xf32>
    %66 = arith.truncf %65 : vector<32x16xf32> to vector<32x16xbf16>
    %c8_57 = arith.constant 8 : index
    %c0_58 = arith.constant 0 : index
    %c0_59 = arith.constant 0 : index
    %67 = vector.load %arg3[%c8_57, %c0_58, %c0_59] : memref<9x16x64xbf16, #tpu.memory_space<vmem>>, vector<1x16x64xbf16>
    %68 = vector.shape_cast %67 : vector<1x16x64xbf16> to vector<16x64xbf16>
    %cst_60 = arith.constant dense<0.000000e+00> : vector<32x64xf32>
    %69 = tpu.matmul %66, %68, %cst_60 {dimension_numbers = #tpu.dot_dimension_numbers<[1], [0], [0], [1], [0, 0, 1, 1], [], []>} : vector<32x16xbf16>, vector<16x64xbf16>, vector<32x64xf32> -> vector<32x64xf32>
    %70 = arith.addf %62, %69 : vector<32x64xf32>
    %c0_61 = arith.constant 0 : index
    %c0_62 = arith.constant 0 : index
    %71 = vector.load %arg4[%c0_61, %c0_62] : memref<1x64xf32, #tpu.memory_space<vmem>>, vector<1x64xf32>
    %72 = vector.broadcast %71 : vector<1x64xf32> to vector<32x64xf32>
    %73 = arith.addf %70, %72 : vector<32x64xf32>
    %cst_63 = arith.constant 0.000000e+00 : f32
    %74 = vector.broadcast %cst_63 : f32 to vector<32x64xf32>
    %75 = arith.maximumf %73, %74 : vector<32x64xf32>
    %76 = arith.truncf %75 : vector<32x64xf32> to vector<32x64xbf16>
    %cst_64 = arith.constant 0.000000e+00 : f32
    %77 = vector.broadcast %cst_64 : f32 to vector<32x128xf32>
    %c0_65 = arith.constant 0 : index
    %c0_66 = arith.constant 0 : index
    %c0_67 = arith.constant 0 : index
    %78 = vector.load %arg1[%c0_65, %c0_66, %c0_67] : memref<9x32x32xbf16, #tpu.memory_space<vmem>>, vector<1x32x32xbf16>
    %79 = vector.shape_cast %78 : vector<1x32x32xbf16> to vector<32x32xbf16>
    %cst_68 = arith.constant dense<0.000000e+00> : vector<32x64xf32>
    %80 = tpu.matmul %79, %76, %cst_68 {dimension_numbers = #tpu.dot_dimension_numbers<[1], [0], [0], [1], [0, 0, 1, 1], [], []>} : vector<32x32xbf16>, vector<32x64xbf16>, vector<32x64xf32> -> vector<32x64xf32>
    %81 = arith.truncf %80 : vector<32x64xf32> to vector<32x64xbf16>
    %c0_69 = arith.constant 0 : index
    %c0_70 = arith.constant 0 : index
    %c0_71 = arith.constant 0 : index
    %82 = vector.load %arg5[%c0_69, %c0_70, %c0_71] : memref<9x64x128xbf16, #tpu.memory_space<vmem>>, vector<1x64x128xbf16>
    %83 = vector.shape_cast %82 : vector<1x64x128xbf16> to vector<64x128xbf16>
    %cst_72 = arith.constant dense<0.000000e+00> : vector<32x128xf32>
    %84 = tpu.matmul %81, %83, %cst_72 {dimension_numbers = #tpu.dot_dimension_numbers<[1], [0], [0], [1], [0, 0, 1, 1], [], []>} : vector<32x64xbf16>, vector<64x128xbf16>, vector<32x128xf32> -> vector<32x128xf32>
    %85 = arith.addf %77, %84 : vector<32x128xf32>
    %c1_73 = arith.constant 1 : index
    %c0_74 = arith.constant 0 : index
    %c0_75 = arith.constant 0 : index
    %86 = vector.load %arg1[%c1_73, %c0_74, %c0_75] : memref<9x32x32xbf16, #tpu.memory_space<vmem>>, vector<1x32x32xbf16>
    %87 = vector.shape_cast %86 : vector<1x32x32xbf16> to vector<32x32xbf16>
    %cst_76 = arith.constant dense<0.000000e+00> : vector<32x64xf32>
    %88 = tpu.matmul %87, %76, %cst_76 {dimension_numbers = #tpu.dot_dimension_numbers<[1], [0], [0], [1], [0, 0, 1, 1], [], []>} : vector<32x32xbf16>, vector<32x64xbf16>, vector<32x64xf32> -> vector<32x64xf32>
    %89 = arith.truncf %88 : vector<32x64xf32> to vector<32x64xbf16>
    %c1_77 = arith.constant 1 : index
    %c0_78 = arith.constant 0 : index
    %c0_79 = arith.constant 0 : index
    %90 = vector.load %arg5[%c1_77, %c0_78, %c0_79] : memref<9x64x128xbf16, #tpu.memory_space<vmem>>, vector<1x64x128xbf16>
    %91 = vector.shape_cast %90 : vector<1x64x128xbf16> to vector<64x128xbf16>
    %cst_80 = arith.constant dense<0.000000e+00> : vector<32x128xf32>
    %92 = tpu.matmul %89, %91, %cst_80 {dimension_numbers = #tpu.dot_dimension_numbers<[1], [0], [0], [1], [0, 0, 1, 1], [], []>} : vector<32x64xbf16>, vector<64x128xbf16>, vector<32x128xf32> -> vector<32x128xf32>
    %93 = arith.addf %85, %92 : vector<32x128xf32>
    %c2_81 = arith.constant 2 : index
    %c0_82 = arith.constant 0 : index
    %c0_83 = arith.constant 0 : index
    %94 = vector.load %arg1[%c2_81, %c0_82, %c0_83] : memref<9x32x32xbf16, #tpu.memory_space<vmem>>, vector<1x32x32xbf16>
    %95 = vector.shape_cast %94 : vector<1x32x32xbf16> to vector<32x32xbf16>
    %cst_84 = arith.constant dense<0.000000e+00> : vector<32x64xf32>
    %96 = tpu.matmul %95, %76, %cst_84 {dimension_numbers = #tpu.dot_dimension_numbers<[1], [0], [0], [1], [0, 0, 1, 1], [], []>} : vector<32x32xbf16>, vector<32x64xbf16>, vector<32x64xf32> -> vector<32x64xf32>
    %97 = arith.truncf %96 : vector<32x64xf32> to vector<32x64xbf16>
    %c2_85 = arith.constant 2 : index
    %c0_86 = arith.constant 0 : index
    %c0_87 = arith.constant 0 : index
    %98 = vector.load %arg5[%c2_85, %c0_86, %c0_87] : memref<9x64x128xbf16, #tpu.memory_space<vmem>>, vector<1x64x128xbf16>
    %99 = vector.shape_cast %98 : vector<1x64x128xbf16> to vector<64x128xbf16>
    %cst_88 = arith.constant dense<0.000000e+00> : vector<32x128xf32>
    %100 = tpu.matmul %97, %99, %cst_88 {dimension_numbers = #tpu.dot_dimension_numbers<[1], [0], [0], [1], [0, 0, 1, 1], [], []>} : vector<32x64xbf16>, vector<64x128xbf16>, vector<32x128xf32> -> vector<32x128xf32>
    %101 = arith.addf %93, %100 : vector<32x128xf32>
    %c3_89 = arith.constant 3 : index
    %c0_90 = arith.constant 0 : index
    %c0_91 = arith.constant 0 : index
    %102 = vector.load %arg1[%c3_89, %c0_90, %c0_91] : memref<9x32x32xbf16, #tpu.memory_space<vmem>>, vector<1x32x32xbf16>
    %103 = vector.shape_cast %102 : vector<1x32x32xbf16> to vector<32x32xbf16>
    %cst_92 = arith.constant dense<0.000000e+00> : vector<32x64xf32>
    %104 = tpu.matmul %103, %76, %cst_92 {dimension_numbers = #tpu.dot_dimension_numbers<[1], [0], [0], [1], [0, 0, 1, 1], [], []>} : vector<32x32xbf16>, vector<32x64xbf16>, vector<32x64xf32> -> vector<32x64xf32>
    %105 = arith.truncf %104 : vector<32x64xf32> to vector<32x64xbf16>
    %c3_93 = arith.constant 3 : index
    %c0_94 = arith.constant 0 : index
    %c0_95 = arith.constant 0 : index
    %106 = vector.load %arg5[%c3_93, %c0_94, %c0_95] : memref<9x64x128xbf16, #tpu.memory_space<vmem>>, vector<1x64x128xbf16>
    %107 = vector.shape_cast %106 : vector<1x64x128xbf16> to vector<64x128xbf16>
    %cst_96 = arith.constant dense<0.000000e+00> : vector<32x128xf32>
    %108 = tpu.matmul %105, %107, %cst_96 {dimension_numbers = #tpu.dot_dimension_numbers<[1], [0], [0], [1], [0, 0, 1, 1], [], []>} : vector<32x64xbf16>, vector<64x128xbf16>, vector<32x128xf32> -> vector<32x128xf32>
    %109 = arith.addf %101, %108 : vector<32x128xf32>
    %c4_97 = arith.constant 4 : index
    %c0_98 = arith.constant 0 : index
    %c0_99 = arith.constant 0 : index
    %110 = vector.load %arg5[%c4_97, %c0_98, %c0_99] : memref<9x64x128xbf16, #tpu.memory_space<vmem>>, vector<1x64x128xbf16>
    %111 = vector.shape_cast %110 : vector<1x64x128xbf16> to vector<64x128xbf16>
    %cst_100 = arith.constant dense<0.000000e+00> : vector<32x128xf32>
    %112 = tpu.matmul %76, %111, %cst_100 {dimension_numbers = #tpu.dot_dimension_numbers<[1], [0], [0], [1], [0, 0, 1, 1], [], []>} : vector<32x64xbf16>, vector<64x128xbf16>, vector<32x128xf32> -> vector<32x128xf32>
    %113 = arith.addf %109, %112 : vector<32x128xf32>
    %c5_101 = arith.constant 5 : index
    %c0_102 = arith.constant 0 : index
    %c0_103 = arith.constant 0 : index
    %114 = vector.load %arg1[%c5_101, %c0_102, %c0_103] : memref<9x32x32xbf16, #tpu.memory_space<vmem>>, vector<1x32x32xbf16>
    %115 = vector.shape_cast %114 : vector<1x32x32xbf16> to vector<32x32xbf16>
    %cst_104 = arith.constant dense<0.000000e+00> : vector<32x64xf32>
    %116 = tpu.matmul %115, %76, %cst_104 {dimension_numbers = #tpu.dot_dimension_numbers<[1], [0], [0], [1], [0, 0, 1, 1], [], []>} : vector<32x32xbf16>, vector<32x64xbf16>, vector<32x64xf32> -> vector<32x64xf32>
    %117 = arith.truncf %116 : vector<32x64xf32> to vector<32x64xbf16>
    %c5_105 = arith.constant 5 : index
    %c0_106 = arith.constant 0 : index
    %c0_107 = arith.constant 0 : index
    %118 = vector.load %arg5[%c5_105, %c0_106, %c0_107] : memref<9x64x128xbf16, #tpu.memory_space<vmem>>, vector<1x64x128xbf16>
    %119 = vector.shape_cast %118 : vector<1x64x128xbf16> to vector<64x128xbf16>
    %cst_108 = arith.constant dense<0.000000e+00> : vector<32x128xf32>
    %120 = tpu.matmul %117, %119, %cst_108 {dimension_numbers = #tpu.dot_dimension_numbers<[1], [0], [0], [1], [0, 0, 1, 1], [], []>} : vector<32x64xbf16>, vector<64x128xbf16>, vector<32x128xf32> -> vector<32x128xf32>
    %121 = arith.addf %113, %120 : vector<32x128xf32>
    %c6_109 = arith.constant 6 : index
    %c0_110 = arith.constant 0 : index
    %c0_111 = arith.constant 0 : index
    %122 = vector.load %arg1[%c6_109, %c0_110, %c0_111] : memref<9x32x32xbf16, #tpu.memory_space<vmem>>, vector<1x32x32xbf16>
    %123 = vector.shape_cast %122 : vector<1x32x32xbf16> to vector<32x32xbf16>
    %cst_112 = arith.constant dense<0.000000e+00> : vector<32x64xf32>
    %124 = tpu.matmul %123, %76, %cst_112 {dimension_numbers = #tpu.dot_dimension_numbers<[1], [0], [0], [1], [0, 0, 1, 1], [], []>} : vector<32x32xbf16>, vector<32x64xbf16>, vector<32x64xf32> -> vector<32x64xf32>
    %125 = arith.truncf %124 : vector<32x64xf32> to vector<32x64xbf16>
    %c6_113 = arith.constant 6 : index
    %c0_114 = arith.constant 0 : index
    %c0_115 = arith.constant 0 : index
    %126 = vector.load %arg5[%c6_113, %c0_114, %c0_115] : memref<9x64x128xbf16, #tpu.memory_space<vmem>>, vector<1x64x128xbf16>
    %127 = vector.shape_cast %126 : vector<1x64x128xbf16> to vector<64x128xbf16>
    %cst_116 = arith.constant dense<0.000000e+00> : vector<32x128xf32>
    %128 = tpu.matmul %125, %127, %cst_116 {dimension_numbers = #tpu.dot_dimension_numbers<[1], [0], [0], [1], [0, 0, 1, 1], [], []>} : vector<32x64xbf16>, vector<64x128xbf16>, vector<32x128xf32> -> vector<32x128xf32>
    %129 = arith.addf %121, %128 : vector<32x128xf32>
    %c7_117 = arith.constant 7 : index
    %c0_118 = arith.constant 0 : index
    %c0_119 = arith.constant 0 : index
    %130 = vector.load %arg1[%c7_117, %c0_118, %c0_119] : memref<9x32x32xbf16, #tpu.memory_space<vmem>>, vector<1x32x32xbf16>
    %131 = vector.shape_cast %130 : vector<1x32x32xbf16> to vector<32x32xbf16>
    %cst_120 = arith.constant dense<0.000000e+00> : vector<32x64xf32>
    %132 = tpu.matmul %131, %76, %cst_120 {dimension_numbers = #tpu.dot_dimension_numbers<[1], [0], [0], [1], [0, 0, 1, 1], [], []>} : vector<32x32xbf16>, vector<32x64xbf16>, vector<32x64xf32> -> vector<32x64xf32>
    %133 = arith.truncf %132 : vector<32x64xf32> to vector<32x64xbf16>
    %c7_121 = arith.constant 7 : index
    %c0_122 = arith.constant 0 : index
    %c0_123 = arith.constant 0 : index
    %134 = vector.load %arg5[%c7_121, %c0_122, %c0_123] : memref<9x64x128xbf16, #tpu.memory_space<vmem>>, vector<1x64x128xbf16>
    %135 = vector.shape_cast %134 : vector<1x64x128xbf16> to vector<64x128xbf16>
    %cst_124 = arith.constant dense<0.000000e+00> : vector<32x128xf32>
    %136 = tpu.matmul %133, %135, %cst_124 {dimension_numbers = #tpu.dot_dimension_numbers<[1], [0], [0], [1], [0, 0, 1, 1], [], []>} : vector<32x64xbf16>, vector<64x128xbf16>, vector<32x128xf32> -> vector<32x128xf32>
    %137 = arith.addf %129, %136 : vector<32x128xf32>
    %c8_125 = arith.constant 8 : index
    %c0_126 = arith.constant 0 : index
    %c0_127 = arith.constant 0 : index
    %138 = vector.load %arg1[%c8_125, %c0_126, %c0_127] : memref<9x32x32xbf16, #tpu.memory_space<vmem>>, vector<1x32x32xbf16>
    %139 = vector.shape_cast %138 : vector<1x32x32xbf16> to vector<32x32xbf16>
    %cst_128 = arith.constant dense<0.000000e+00> : vector<32x64xf32>
    %140 = tpu.matmul %139, %76, %cst_128 {dimension_numbers = #tpu.dot_dimension_numbers<[1], [0], [0], [1], [0, 0, 1, 1], [], []>} : vector<32x32xbf16>, vector<32x64xbf16>, vector<32x64xf32> -> vector<32x64xf32>
    %141 = arith.truncf %140 : vector<32x64xf32> to vector<32x64xbf16>
    %c8_129 = arith.constant 8 : index
    %c0_130 = arith.constant 0 : index
    %c0_131 = arith.constant 0 : index
    %142 = vector.load %arg5[%c8_129, %c0_130, %c0_131] : memref<9x64x128xbf16, #tpu.memory_space<vmem>>, vector<1x64x128xbf16>
    %143 = vector.shape_cast %142 : vector<1x64x128xbf16> to vector<64x128xbf16>
    %cst_132 = arith.constant dense<0.000000e+00> : vector<32x128xf32>
    %144 = tpu.matmul %141, %143, %cst_132 {dimension_numbers = #tpu.dot_dimension_numbers<[1], [0], [0], [1], [0, 0, 1, 1], [], []>} : vector<32x64xbf16>, vector<64x128xbf16>, vector<32x128xf32> -> vector<32x128xf32>
    %145 = arith.addf %137, %144 : vector<32x128xf32>
    %c0_133 = arith.constant 0 : index
    %c0_134 = arith.constant 0 : index
    %146 = vector.load %arg6[%c0_133, %c0_134] : memref<1x128xf32, #tpu.memory_space<vmem>>, vector<1x128xf32>
    %147 = vector.broadcast %146 : vector<1x128xf32> to vector<32x128xf32>
    %148 = arith.addf %145, %147 : vector<32x128xf32>
    %cst_135 = arith.constant 0.000000e+00 : f32
    %149 = vector.broadcast %cst_135 : f32 to vector<32x128xf32>
    %150 = arith.maximumf %148, %149 : vector<32x128xf32>
    %151 = arith.truncf %150 : vector<32x128xf32> to vector<32x128xbf16>
    %cst_136 = arith.constant 0.000000e+00 : f32
    %152 = vector.broadcast %cst_136 : f32 to vector<32x256xf32>
    %c0_137 = arith.constant 0 : index
    %c0_138 = arith.constant 0 : index
    %c0_139 = arith.constant 0 : index
    %153 = vector.load %arg1[%c0_137, %c0_138, %c0_139] : memref<9x32x32xbf16, #tpu.memory_space<vmem>>, vector<1x32x32xbf16>
    %154 = vector.shape_cast %153 : vector<1x32x32xbf16> to vector<32x32xbf16>
    %cst_140 = arith.constant dense<0.000000e+00> : vector<32x128xf32>
    %155 = tpu.matmul %154, %151, %cst_140 {dimension_numbers = #tpu.dot_dimension_numbers<[1], [0], [0], [1], [0, 0, 1, 1], [], []>} : vector<32x32xbf16>, vector<32x128xbf16>, vector<32x128xf32> -> vector<32x128xf32>
    %156 = arith.truncf %155 : vector<32x128xf32> to vector<32x128xbf16>
    %c0_141 = arith.constant 0 : index
    %c0_142 = arith.constant 0 : index
    %c0_143 = arith.constant 0 : index
    %157 = vector.load %arg7[%c0_141, %c0_142, %c0_143] : memref<9x128x256xbf16, #tpu.memory_space<vmem>>, vector<1x128x256xbf16>
    %158 = vector.shape_cast %157 : vector<1x128x256xbf16> to vector<128x256xbf16>
    %cst_144 = arith.constant dense<0.000000e+00> : vector<32x256xf32>
    %159 = tpu.matmul %156, %158, %cst_144 {dimension_numbers = #tpu.dot_dimension_numbers<[1], [0], [0], [1], [0, 0, 1, 1], [], []>} : vector<32x128xbf16>, vector<128x256xbf16>, vector<32x256xf32> -> vector<32x256xf32>
    %160 = arith.addf %152, %159 : vector<32x256xf32>
    %c1_145 = arith.constant 1 : index
    %c0_146 = arith.constant 0 : index
    %c0_147 = arith.constant 0 : index
    %161 = vector.load %arg1[%c1_145, %c0_146, %c0_147] : memref<9x32x32xbf16, #tpu.memory_space<vmem>>, vector<1x32x32xbf16>
    %162 = vector.shape_cast %161 : vector<1x32x32xbf16> to vector<32x32xbf16>
    %cst_148 = arith.constant dense<0.000000e+00> : vector<32x128xf32>
    %163 = tpu.matmul %162, %151, %cst_148 {dimension_numbers = #tpu.dot_dimension_numbers<[1], [0], [0], [1], [0, 0, 1, 1], [], []>} : vector<32x32xbf16>, vector<32x128xbf16>, vector<32x128xf32> -> vector<32x128xf32>
    %164 = arith.truncf %163 : vector<32x128xf32> to vector<32x128xbf16>
    %c1_149 = arith.constant 1 : index
    %c0_150 = arith.constant 0 : index
    %c0_151 = arith.constant 0 : index
    %165 = vector.load %arg7[%c1_149, %c0_150, %c0_151] : memref<9x128x256xbf16, #tpu.memory_space<vmem>>, vector<1x128x256xbf16>
    %166 = vector.shape_cast %165 : vector<1x128x256xbf16> to vector<128x256xbf16>
    %cst_152 = arith.constant dense<0.000000e+00> : vector<32x256xf32>
    %167 = tpu.matmul %164, %166, %cst_152 {dimension_numbers = #tpu.dot_dimension_numbers<[1], [0], [0], [1], [0, 0, 1, 1], [], []>} : vector<32x128xbf16>, vector<128x256xbf16>, vector<32x256xf32> -> vector<32x256xf32>
    %168 = arith.addf %160, %167 : vector<32x256xf32>
    %c2_153 = arith.constant 2 : index
    %c0_154 = arith.constant 0 : index
    %c0_155 = arith.constant 0 : index
    %169 = vector.load %arg1[%c2_153, %c0_154, %c0_155] : memref<9x32x32xbf16, #tpu.memory_space<vmem>>, vector<1x32x32xbf16>
    %170 = vector.shape_cast %169 : vector<1x32x32xbf16> to vector<32x32xbf16>
    %cst_156 = arith.constant dense<0.000000e+00> : vector<32x128xf32>
    %171 = tpu.matmul %170, %151, %cst_156 {dimension_numbers = #tpu.dot_dimension_numbers<[1], [0], [0], [1], [0, 0, 1, 1], [], []>} : vector<32x32xbf16>, vector<32x128xbf16>, vector<32x128xf32> -> vector<32x128xf32>
    %172 = arith.truncf %171 : vector<32x128xf32> to vector<32x128xbf16>
    %c2_157 = arith.constant 2 : index
    %c0_158 = arith.constant 0 : index
    %c0_159 = arith.constant 0 : index
    %173 = vector.load %arg7[%c2_157, %c0_158, %c0_159] : memref<9x128x256xbf16, #tpu.memory_space<vmem>>, vector<1x128x256xbf16>
    %174 = vector.shape_cast %173 : vector<1x128x256xbf16> to vector<128x256xbf16>
    %cst_160 = arith.constant dense<0.000000e+00> : vector<32x256xf32>
    %175 = tpu.matmul %172, %174, %cst_160 {dimension_numbers = #tpu.dot_dimension_numbers<[1], [0], [0], [1], [0, 0, 1, 1], [], []>} : vector<32x128xbf16>, vector<128x256xbf16>, vector<32x256xf32> -> vector<32x256xf32>
    %176 = arith.addf %168, %175 : vector<32x256xf32>
    %c3_161 = arith.constant 3 : index
    %c0_162 = arith.constant 0 : index
    %c0_163 = arith.constant 0 : index
    %177 = vector.load %arg1[%c3_161, %c0_162, %c0_163] : memref<9x32x32xbf16, #tpu.memory_space<vmem>>, vector<1x32x32xbf16>
    %178 = vector.shape_cast %177 : vector<1x32x32xbf16> to vector<32x32xbf16>
    %cst_164 = arith.constant dense<0.000000e+00> : vector<32x128xf32>
    %179 = tpu.matmul %178, %151, %cst_164 {dimension_numbers = #tpu.dot_dimension_numbers<[1], [0], [0], [1], [0, 0, 1, 1], [], []>} : vector<32x32xbf16>, vector<32x128xbf16>, vector<32x128xf32> -> vector<32x128xf32>
    %180 = arith.truncf %179 : vector<32x128xf32> to vector<32x128xbf16>
    %c3_165 = arith.constant 3 : index
    %c0_166 = arith.constant 0 : index
    %c0_167 = arith.constant 0 : index
    %181 = vector.load %arg7[%c3_165, %c0_166, %c0_167] : memref<9x128x256xbf16, #tpu.memory_space<vmem>>, vector<1x128x256xbf16>
    %182 = vector.shape_cast %181 : vector<1x128x256xbf16> to vector<128x256xbf16>
    %cst_168 = arith.constant dense<0.000000e+00> : vector<32x256xf32>
    %183 = tpu.matmul %180, %182, %cst_168 {dimension_numbers = #tpu.dot_dimension_numbers<[1], [0], [0], [1], [0, 0, 1, 1], [], []>} : vector<32x128xbf16>, vector<128x256xbf16>, vector<32x256xf32> -> vector<32x256xf32>
    %184 = arith.addf %176, %183 : vector<32x256xf32>
    %c4_169 = arith.constant 4 : index
    %c0_170 = arith.constant 0 : index
    %c0_171 = arith.constant 0 : index
    %185 = vector.load %arg7[%c4_169, %c0_170, %c0_171] : memref<9x128x256xbf16, #tpu.memory_space<vmem>>, vector<1x128x256xbf16>
    %186 = vector.shape_cast %185 : vector<1x128x256xbf16> to vector<128x256xbf16>
    %cst_172 = arith.constant dense<0.000000e+00> : vector<32x256xf32>
    %187 = tpu.matmul %151, %186, %cst_172 {dimension_numbers = #tpu.dot_dimension_numbers<[1], [0], [0], [1], [0, 0, 1, 1], [], []>} : vector<32x128xbf16>, vector<128x256xbf16>, vector<32x256xf32> -> vector<32x256xf32>
    %188 = arith.addf %184, %187 : vector<32x256xf32>
    %c5_173 = arith.constant 5 : index
    %c0_174 = arith.constant 0 : index
    %c0_175 = arith.constant 0 : index
    %189 = vector.load %arg1[%c5_173, %c0_174, %c0_175] : memref<9x32x32xbf16, #tpu.memory_space<vmem>>, vector<1x32x32xbf16>
    %190 = vector.shape_cast %189 : vector<1x32x32xbf16> to vector<32x32xbf16>
    %cst_176 = arith.constant dense<0.000000e+00> : vector<32x128xf32>
    %191 = tpu.matmul %190, %151, %cst_176 {dimension_numbers = #tpu.dot_dimension_numbers<[1], [0], [0], [1], [0, 0, 1, 1], [], []>} : vector<32x32xbf16>, vector<32x128xbf16>, vector<32x128xf32> -> vector<32x128xf32>
    %192 = arith.truncf %191 : vector<32x128xf32> to vector<32x128xbf16>
    %c5_177 = arith.constant 5 : index
    %c0_178 = arith.constant 0 : index
    %c0_179 = arith.constant 0 : index
    %193 = vector.load %arg7[%c5_177, %c0_178, %c0_179] : memref<9x128x256xbf16, #tpu.memory_space<vmem>>, vector<1x128x256xbf16>
    %194 = vector.shape_cast %193 : vector<1x128x256xbf16> to vector<128x256xbf16>
    %cst_180 = arith.constant dense<0.000000e+00> : vector<32x256xf32>
    %195 = tpu.matmul %192, %194, %cst_180 {dimension_numbers = #tpu.dot_dimension_numbers<[1], [0], [0], [1], [0, 0, 1, 1], [], []>} : vector<32x128xbf16>, vector<128x256xbf16>, vector<32x256xf32> -> vector<32x256xf32>
    %196 = arith.addf %188, %195 : vector<32x256xf32>
    %c6_181 = arith.constant 6 : index
    %c0_182 = arith.constant 0 : index
    %c0_183 = arith.constant 0 : index
    %197 = vector.load %arg1[%c6_181, %c0_182, %c0_183] : memref<9x32x32xbf16, #tpu.memory_space<vmem>>, vector<1x32x32xbf16>
    %198 = vector.shape_cast %197 : vector<1x32x32xbf16> to vector<32x32xbf16>
    %cst_184 = arith.constant dense<0.000000e+00> : vector<32x128xf32>
    %199 = tpu.matmul %198, %151, %cst_184 {dimension_numbers = #tpu.dot_dimension_numbers<[1], [0], [0], [1], [0, 0, 1, 1], [], []>} : vector<32x32xbf16>, vector<32x128xbf16>, vector<32x128xf32> -> vector<32x128xf32>
    %200 = arith.truncf %199 : vector<32x128xf32> to vector<32x128xbf16>
    %c6_185 = arith.constant 6 : index
    %c0_186 = arith.constant 0 : index
    %c0_187 = arith.constant 0 : index
    %201 = vector.load %arg7[%c6_185, %c0_186, %c0_187] : memref<9x128x256xbf16, #tpu.memory_space<vmem>>, vector<1x128x256xbf16>
    %202 = vector.shape_cast %201 : vector<1x128x256xbf16> to vector<128x256xbf16>
    %cst_188 = arith.constant dense<0.000000e+00> : vector<32x256xf32>
    %203 = tpu.matmul %200, %202, %cst_188 {dimension_numbers = #tpu.dot_dimension_numbers<[1], [0], [0], [1], [0, 0, 1, 1], [], []>} : vector<32x128xbf16>, vector<128x256xbf16>, vector<32x256xf32> -> vector<32x256xf32>
    %204 = arith.addf %196, %203 : vector<32x256xf32>
    %c7_189 = arith.constant 7 : index
    %c0_190 = arith.constant 0 : index
    %c0_191 = arith.constant 0 : index
    %205 = vector.load %arg1[%c7_189, %c0_190, %c0_191] : memref<9x32x32xbf16, #tpu.memory_space<vmem>>, vector<1x32x32xbf16>
    %206 = vector.shape_cast %205 : vector<1x32x32xbf16> to vector<32x32xbf16>
    %cst_192 = arith.constant dense<0.000000e+00> : vector<32x128xf32>
    %207 = tpu.matmul %206, %151, %cst_192 {dimension_numbers = #tpu.dot_dimension_numbers<[1], [0], [0], [1], [0, 0, 1, 1], [], []>} : vector<32x32xbf16>, vector<32x128xbf16>, vector<32x128xf32> -> vector<32x128xf32>
    %208 = arith.truncf %207 : vector<32x128xf32> to vector<32x128xbf16>
    %c7_193 = arith.constant 7 : index
    %c0_194 = arith.constant 0 : index
    %c0_195 = arith.constant 0 : index
    %209 = vector.load %arg7[%c7_193, %c0_194, %c0_195] : memref<9x128x256xbf16, #tpu.memory_space<vmem>>, vector<1x128x256xbf16>
    %210 = vector.shape_cast %209 : vector<1x128x256xbf16> to vector<128x256xbf16>
    %cst_196 = arith.constant dense<0.000000e+00> : vector<32x256xf32>
    %211 = tpu.matmul %208, %210, %cst_196 {dimension_numbers = #tpu.dot_dimension_numbers<[1], [0], [0], [1], [0, 0, 1, 1], [], []>} : vector<32x128xbf16>, vector<128x256xbf16>, vector<32x256xf32> -> vector<32x256xf32>
    %212 = arith.addf %204, %211 : vector<32x256xf32>
    %c8_197 = arith.constant 8 : index
    %c0_198 = arith.constant 0 : index
    %c0_199 = arith.constant 0 : index
    %213 = vector.load %arg1[%c8_197, %c0_198, %c0_199] : memref<9x32x32xbf16, #tpu.memory_space<vmem>>, vector<1x32x32xbf16>
    %214 = vector.shape_cast %213 : vector<1x32x32xbf16> to vector<32x32xbf16>
    %cst_200 = arith.constant dense<0.000000e+00> : vector<32x128xf32>
    %215 = tpu.matmul %214, %151, %cst_200 {dimension_numbers = #tpu.dot_dimension_numbers<[1], [0], [0], [1], [0, 0, 1, 1], [], []>} : vector<32x32xbf16>, vector<32x128xbf16>, vector<32x128xf32> -> vector<32x128xf32>
    %216 = arith.truncf %215 : vector<32x128xf32> to vector<32x128xbf16>
    %c8_201 = arith.constant 8 : index
    %c0_202 = arith.constant 0 : index
    %c0_203 = arith.constant 0 : index
    %217 = vector.load %arg7[%c8_201, %c0_202, %c0_203] : memref<9x128x256xbf16, #tpu.memory_space<vmem>>, vector<1x128x256xbf16>
    %218 = vector.shape_cast %217 : vector<1x128x256xbf16> to vector<128x256xbf16>
    %cst_204 = arith.constant dense<0.000000e+00> : vector<32x256xf32>
    %219 = tpu.matmul %216, %218, %cst_204 {dimension_numbers = #tpu.dot_dimension_numbers<[1], [0], [0], [1], [0, 0, 1, 1], [], []>} : vector<32x128xbf16>, vector<128x256xbf16>, vector<32x256xf32> -> vector<32x256xf32>
    %220 = arith.addf %212, %219 : vector<32x256xf32>
    %c0_205 = arith.constant 0 : index
    %c0_206 = arith.constant 0 : index
    %221 = vector.load %arg8[%c0_205, %c0_206] : memref<1x256xf32, #tpu.memory_space<vmem>>, vector<1x256xf32>
    %222 = vector.broadcast %221 : vector<1x256xf32> to vector<32x256xf32>
    %223 = arith.addf %220, %222 : vector<32x256xf32>
    %cst_207 = arith.constant 0.000000e+00 : f32
    %224 = vector.broadcast %cst_207 : f32 to vector<32x256xf32>
    %225 = arith.maximumf %223, %224 : vector<32x256xf32>
    %226 = arith.truncf %225 : vector<32x256xf32> to vector<32x256xbf16>
    %cst_208 = arith.constant 0.000000e+00 : f32
    %227 = vector.broadcast %cst_208 : f32 to vector<32x512xf32>
    %c0_209 = arith.constant 0 : index
    %c0_210 = arith.constant 0 : index
    %c0_211 = arith.constant 0 : index
    %228 = vector.load %arg1[%c0_209, %c0_210, %c0_211] : memref<9x32x32xbf16, #tpu.memory_space<vmem>>, vector<1x32x32xbf16>
    %229 = vector.shape_cast %228 : vector<1x32x32xbf16> to vector<32x32xbf16>
    %cst_212 = arith.constant dense<0.000000e+00> : vector<32x256xf32>
    %230 = tpu.matmul %229, %226, %cst_212 {dimension_numbers = #tpu.dot_dimension_numbers<[1], [0], [0], [1], [0, 0, 1, 1], [], []>} : vector<32x32xbf16>, vector<32x256xbf16>, vector<32x256xf32> -> vector<32x256xf32>
    %231 = arith.truncf %230 : vector<32x256xf32> to vector<32x256xbf16>
    %c0_213 = arith.constant 0 : index
    %c0_214 = arith.constant 0 : index
    %c0_215 = arith.constant 0 : index
    %232 = vector.load %arg9[%c0_213, %c0_214, %c0_215] : memref<9x256x512xbf16, #tpu.memory_space<vmem>>, vector<1x256x512xbf16>
    %233 = vector.shape_cast %232 : vector<1x256x512xbf16> to vector<256x512xbf16>
    %cst_216 = arith.constant dense<0.000000e+00> : vector<32x512xf32>
    %234 = tpu.matmul %231, %233, %cst_216 {dimension_numbers = #tpu.dot_dimension_numbers<[1], [0], [0], [1], [0, 0, 1, 1], [], []>} : vector<32x256xbf16>, vector<256x512xbf16>, vector<32x512xf32> -> vector<32x512xf32>
    %235 = arith.addf %227, %234 : vector<32x512xf32>
    %c1_217 = arith.constant 1 : index
    %c0_218 = arith.constant 0 : index
    %c0_219 = arith.constant 0 : index
    %236 = vector.load %arg1[%c1_217, %c0_218, %c0_219] : memref<9x32x32xbf16, #tpu.memory_space<vmem>>, vector<1x32x32xbf16>
    %237 = vector.shape_cast %236 : vector<1x32x32xbf16> to vector<32x32xbf16>
    %cst_220 = arith.constant dense<0.000000e+00> : vector<32x256xf32>
    %238 = tpu.matmul %237, %226, %cst_220 {dimension_numbers = #tpu.dot_dimension_numbers<[1], [0], [0], [1], [0, 0, 1, 1], [], []>} : vector<32x32xbf16>, vector<32x256xbf16>, vector<32x256xf32> -> vector<32x256xf32>
    %239 = arith.truncf %238 : vector<32x256xf32> to vector<32x256xbf16>
    %c1_221 = arith.constant 1 : index
    %c0_222 = arith.constant 0 : index
    %c0_223 = arith.constant 0 : index
    %240 = vector.load %arg9[%c1_221, %c0_222, %c0_223] : memref<9x256x512xbf16, #tpu.memory_space<vmem>>, vector<1x256x512xbf16>
    %241 = vector.shape_cast %240 : vector<1x256x512xbf16> to vector<256x512xbf16>
    %cst_224 = arith.constant dense<0.000000e+00> : vector<32x512xf32>
    %242 = tpu.matmul %239, %241, %cst_224 {dimension_numbers = #tpu.dot_dimension_numbers<[1], [0], [0], [1], [0, 0, 1, 1], [], []>} : vector<32x256xbf16>, vector<256x512xbf16>, vector<32x512xf32> -> vector<32x512xf32>
    %243 = arith.addf %235, %242 : vector<32x512xf32>
    %c2_225 = arith.constant 2 : index
    %c0_226 = arith.constant 0 : index
    %c0_227 = arith.constant 0 : index
    %244 = vector.load %arg1[%c2_225, %c0_226, %c0_227] : memref<9x32x32xbf16, #tpu.memory_space<vmem>>, vector<1x32x32xbf16>
    %245 = vector.shape_cast %244 : vector<1x32x32xbf16> to vector<32x32xbf16>
    %cst_228 = arith.constant dense<0.000000e+00> : vector<32x256xf32>
    %246 = tpu.matmul %245, %226, %cst_228 {dimension_numbers = #tpu.dot_dimension_numbers<[1], [0], [0], [1], [0, 0, 1, 1], [], []>} : vector<32x32xbf16>, vector<32x256xbf16>, vector<32x256xf32> -> vector<32x256xf32>
    %247 = arith.truncf %246 : vector<32x256xf32> to vector<32x256xbf16>
    %c2_229 = arith.constant 2 : index
    %c0_230 = arith.constant 0 : index
    %c0_231 = arith.constant 0 : index
    %248 = vector.load %arg9[%c2_229, %c0_230, %c0_231] : memref<9x256x512xbf16, #tpu.memory_space<vmem>>, vector<1x256x512xbf16>
    %249 = vector.shape_cast %248 : vector<1x256x512xbf16> to vector<256x512xbf16>
    %cst_232 = arith.constant dense<0.000000e+00> : vector<32x512xf32>
    %250 = tpu.matmul %247, %249, %cst_232 {dimension_numbers = #tpu.dot_dimension_numbers<[1], [0], [0], [1], [0, 0, 1, 1], [], []>} : vector<32x256xbf16>, vector<256x512xbf16>, vector<32x512xf32> -> vector<32x512xf32>
    %251 = arith.addf %243, %250 : vector<32x512xf32>
    %c3_233 = arith.constant 3 : index
    %c0_234 = arith.constant 0 : index
    %c0_235 = arith.constant 0 : index
    %252 = vector.load %arg1[%c3_233, %c0_234, %c0_235] : memref<9x32x32xbf16, #tpu.memory_space<vmem>>, vector<1x32x32xbf16>
    %253 = vector.shape_cast %252 : vector<1x32x32xbf16> to vector<32x32xbf16>
    %cst_236 = arith.constant dense<0.000000e+00> : vector<32x256xf32>
    %254 = tpu.matmul %253, %226, %cst_236 {dimension_numbers = #tpu.dot_dimension_numbers<[1], [0], [0], [1], [0, 0, 1, 1], [], []>} : vector<32x32xbf16>, vector<32x256xbf16>, vector<32x256xf32> -> vector<32x256xf32>
    %255 = arith.truncf %254 : vector<32x256xf32> to vector<32x256xbf16>
    %c3_237 = arith.constant 3 : index
    %c0_238 = arith.constant 0 : index
    %c0_239 = arith.constant 0 : index
    %256 = vector.load %arg9[%c3_237, %c0_238, %c0_239] : memref<9x256x512xbf16, #tpu.memory_space<vmem>>, vector<1x256x512xbf16>
    %257 = vector.shape_cast %256 : vector<1x256x512xbf16> to vector<256x512xbf16>
    %cst_240 = arith.constant dense<0.000000e+00> : vector<32x512xf32>
    %258 = tpu.matmul %255, %257, %cst_240 {dimension_numbers = #tpu.dot_dimension_numbers<[1], [0], [0], [1], [0, 0, 1, 1], [], []>} : vector<32x256xbf16>, vector<256x512xbf16>, vector<32x512xf32> -> vector<32x512xf32>
    %259 = arith.addf %251, %258 : vector<32x512xf32>
    %c4_241 = arith.constant 4 : index
    %c0_242 = arith.constant 0 : index
    %c0_243 = arith.constant 0 : index
    %260 = vector.load %arg9[%c4_241, %c0_242, %c0_243] : memref<9x256x512xbf16, #tpu.memory_space<vmem>>, vector<1x256x512xbf16>
    %261 = vector.shape_cast %260 : vector<1x256x512xbf16> to vector<256x512xbf16>
    %cst_244 = arith.constant dense<0.000000e+00> : vector<32x512xf32>
    %262 = tpu.matmul %226, %261, %cst_244 {dimension_numbers = #tpu.dot_dimension_numbers<[1], [0], [0], [1], [0, 0, 1, 1], [], []>} : vector<32x256xbf16>, vector<256x512xbf16>, vector<32x512xf32> -> vector<32x512xf32>
    %263 = arith.addf %259, %262 : vector<32x512xf32>
    %c5_245 = arith.constant 5 : index
    %c0_246 = arith.constant 0 : index
    %c0_247 = arith.constant 0 : index
    %264 = vector.load %arg1[%c5_245, %c0_246, %c0_247] : memref<9x32x32xbf16, #tpu.memory_space<vmem>>, vector<1x32x32xbf16>
    %265 = vector.shape_cast %264 : vector<1x32x32xbf16> to vector<32x32xbf16>
    %cst_248 = arith.constant dense<0.000000e+00> : vector<32x256xf32>
    %266 = tpu.matmul %265, %226, %cst_248 {dimension_numbers = #tpu.dot_dimension_numbers<[1], [0], [0], [1], [0, 0, 1, 1], [], []>} : vector<32x32xbf16>, vector<32x256xbf16>, vector<32x256xf32> -> vector<32x256xf32>
    %267 = arith.truncf %266 : vector<32x256xf32> to vector<32x256xbf16>
    %c5_249 = arith.constant 5 : index
    %c0_250 = arith.constant 0 : index
    %c0_251 = arith.constant 0 : index
    %268 = vector.load %arg9[%c5_249, %c0_250, %c0_251] : memref<9x256x512xbf16, #tpu.memory_space<vmem>>, vector<1x256x512xbf16>
    %269 = vector.shape_cast %268 : vector<1x256x512xbf16> to vector<256x512xbf16>
    %cst_252 = arith.constant dense<0.000000e+00> : vector<32x512xf32>
    %270 = tpu.matmul %267, %269, %cst_252 {dimension_numbers = #tpu.dot_dimension_numbers<[1], [0], [0], [1], [0, 0, 1, 1], [], []>} : vector<32x256xbf16>, vector<256x512xbf16>, vector<32x512xf32> -> vector<32x512xf32>
    %271 = arith.addf %263, %270 : vector<32x512xf32>
    %c6_253 = arith.constant 6 : index
    %c0_254 = arith.constant 0 : index
    %c0_255 = arith.constant 0 : index
    %272 = vector.load %arg1[%c6_253, %c0_254, %c0_255] : memref<9x32x32xbf16, #tpu.memory_space<vmem>>, vector<1x32x32xbf16>
    %273 = vector.shape_cast %272 : vector<1x32x32xbf16> to vector<32x32xbf16>
    %cst_256 = arith.constant dense<0.000000e+00> : vector<32x256xf32>
    %274 = tpu.matmul %273, %226, %cst_256 {dimension_numbers = #tpu.dot_dimension_numbers<[1], [0], [0], [1], [0, 0, 1, 1], [], []>} : vector<32x32xbf16>, vector<32x256xbf16>, vector<32x256xf32> -> vector<32x256xf32>
    %275 = arith.truncf %274 : vector<32x256xf32> to vector<32x256xbf16>
    %c6_257 = arith.constant 6 : index
    %c0_258 = arith.constant 0 : index
    %c0_259 = arith.constant 0 : index
    %276 = vector.load %arg9[%c6_257, %c0_258, %c0_259] : memref<9x256x512xbf16, #tpu.memory_space<vmem>>, vector<1x256x512xbf16>
    %277 = vector.shape_cast %276 : vector<1x256x512xbf16> to vector<256x512xbf16>
    %cst_260 = arith.constant dense<0.000000e+00> : vector<32x512xf32>
    %278 = tpu.matmul %275, %277, %cst_260 {dimension_numbers = #tpu.dot_dimension_numbers<[1], [0], [0], [1], [0, 0, 1, 1], [], []>} : vector<32x256xbf16>, vector<256x512xbf16>, vector<32x512xf32> -> vector<32x512xf32>
    %279 = arith.addf %271, %278 : vector<32x512xf32>
    %c7_261 = arith.constant 7 : index
    %c0_262 = arith.constant 0 : index
    %c0_263 = arith.constant 0 : index
    %280 = vector.load %arg1[%c7_261, %c0_262, %c0_263] : memref<9x32x32xbf16, #tpu.memory_space<vmem>>, vector<1x32x32xbf16>
    %281 = vector.shape_cast %280 : vector<1x32x32xbf16> to vector<32x32xbf16>
    %cst_264 = arith.constant dense<0.000000e+00> : vector<32x256xf32>
    %282 = tpu.matmul %281, %226, %cst_264 {dimension_numbers = #tpu.dot_dimension_numbers<[1], [0], [0], [1], [0, 0, 1, 1], [], []>} : vector<32x32xbf16>, vector<32x256xbf16>, vector<32x256xf32> -> vector<32x256xf32>
    %283 = arith.truncf %282 : vector<32x256xf32> to vector<32x256xbf16>
    %c7_265 = arith.constant 7 : index
    %c0_266 = arith.constant 0 : index
    %c0_267 = arith.constant 0 : index
    %284 = vector.load %arg9[%c7_265, %c0_266, %c0_267] : memref<9x256x512xbf16, #tpu.memory_space<vmem>>, vector<1x256x512xbf16>
    %285 = vector.shape_cast %284 : vector<1x256x512xbf16> to vector<256x512xbf16>
    %cst_268 = arith.constant dense<0.000000e+00> : vector<32x512xf32>
    %286 = tpu.matmul %283, %285, %cst_268 {dimension_numbers = #tpu.dot_dimension_numbers<[1], [0], [0], [1], [0, 0, 1, 1], [], []>} : vector<32x256xbf16>, vector<256x512xbf16>, vector<32x512xf32> -> vector<32x512xf32>
    %287 = arith.addf %279, %286 : vector<32x512xf32>
    %c8_269 = arith.constant 8 : index
    %c0_270 = arith.constant 0 : index
    %c0_271 = arith.constant 0 : index
    %288 = vector.load %arg1[%c8_269, %c0_270, %c0_271] : memref<9x32x32xbf16, #tpu.memory_space<vmem>>, vector<1x32x32xbf16>
    %289 = vector.shape_cast %288 : vector<1x32x32xbf16> to vector<32x32xbf16>
    %cst_272 = arith.constant dense<0.000000e+00> : vector<32x256xf32>
    %290 = tpu.matmul %289, %226, %cst_272 {dimension_numbers = #tpu.dot_dimension_numbers<[1], [0], [0], [1], [0, 0, 1, 1], [], []>} : vector<32x32xbf16>, vector<32x256xbf16>, vector<32x256xf32> -> vector<32x256xf32>
    %291 = arith.truncf %290 : vector<32x256xf32> to vector<32x256xbf16>
    %c8_273 = arith.constant 8 : index
    %c0_274 = arith.constant 0 : index
    %c0_275 = arith.constant 0 : index
    %292 = vector.load %arg9[%c8_273, %c0_274, %c0_275] : memref<9x256x512xbf16, #tpu.memory_space<vmem>>, vector<1x256x512xbf16>
    %293 = vector.shape_cast %292 : vector<1x256x512xbf16> to vector<256x512xbf16>
    %cst_276 = arith.constant dense<0.000000e+00> : vector<32x512xf32>
    %294 = tpu.matmul %291, %293, %cst_276 {dimension_numbers = #tpu.dot_dimension_numbers<[1], [0], [0], [1], [0, 0, 1, 1], [], []>} : vector<32x256xbf16>, vector<256x512xbf16>, vector<32x512xf32> -> vector<32x512xf32>
    %295 = arith.addf %287, %294 : vector<32x512xf32>
    %c0_277 = arith.constant 0 : index
    %c0_278 = arith.constant 0 : index
    %296 = vector.load %arg10[%c0_277, %c0_278] : memref<1x512xf32, #tpu.memory_space<vmem>>, vector<1x512xf32>
    %297 = vector.broadcast %296 : vector<1x512xf32> to vector<32x512xf32>
    %298 = arith.addf %295, %297 : vector<32x512xf32>
    %cst_279 = arith.constant 0.000000e+00 : f32
    %299 = vector.broadcast %cst_279 : f32 to vector<32x512xf32>
    %300 = arith.maximumf %298, %299 : vector<32x512xf32>
    %301 = arith.truncf %300 : vector<32x512xf32> to vector<32x512xbf16>
    %c0_280 = arith.constant 0 : index
    %c0_281 = arith.constant 0 : index
    %302 = vector.load %arg11[%c0_280, %c0_281] : memref<32x512xbf16, #tpu.memory_space<vmem>>, vector<32x512xbf16>
    tpu.vector_store %arg11[%c0_280, %c0_281], %301 {strides = array<i32>} : memref<32x512xbf16, #tpu.memory_space<vmem>>, vector<32x512xbf16>,
    return
  }
  func.func @transform_0(%arg0: i32) -> (i32, i32, i32) {
    %c0_i32 = arith.constant 0 : i32
    %c0_i32_0 = arith.constant 0 : i32
    %c0_i32_1 = arith.constant 0 : i32
    %c0_i32_2 = arith.constant 0 : i32
    return %c0_i32, %c0_i32_0, %c0_i32_1 : i32, i32, i32
  }
  func.func @transform_1(%arg0: i32) -> (i32, i32) {
    %c0_i32 = arith.constant 0 : i32
    %c0_i32_0 = arith.constant 0 : i32
    %c0_i32_1 = arith.constant 0 : i32
    return %c0_i32, %c0_i32_0 : i32, i32
  }
  func.func @transform_2(%arg0: i32) -> (i32, i32, i32) {
    %c0_i32 = arith.constant 0 : i32
    %c0_i32_0 = arith.constant 0 : i32
    %c0_i32_1 = arith.constant 0 : i32
    %c0_i32_2 = arith.constant 0 : i32
    return %c0_i32, %c0_i32_0, %c0_i32_1 : i32, i32, i32
  }
  func.func @transform_3(%arg0: i32) -> (i32, i32) {
    %c0_i32 = arith.constant 0 : i32
    %c0_i32_0 = arith.constant 0 : i32
    %c0_i32_1 = arith.constant 0 : i32
    return %c0_i32, %c0_i32_0 : i32, i32
  }
  func.func @transform_4(%arg0: i32) -> (i32, i32, i32) {
    %c0_i32 = arith.constant 0 : i32
    %c0_i32_0 = arith.constant 0 : i32
    %c0_i32_1 = arith.constant 0 : i32
    %c0_i32_2 = arith.constant 0 : i32
    return %c0_i32, %c0_i32_0, %c0_i32_1 : i32, i32, i32
  }
  func.func @transform_5(%arg0: i32) -> (i32, i32) {
    %c0_i32 = arith.constant 0 : i32
    %c0_i32_0 = arith.constant 0 : i32
    %c0_i32_1 = arith.constant 0 : i32
    return %c0_i32, %c0_i32_0 : i32, i32
  }
  func.func @transform_6(%arg0: i32) -> (i32, i32, i32) {
    %c0_i32 = arith.constant 0 : i32
    %c0_i32_0 = arith.constant 0 : i32
    %c0_i32_1 = arith.constant 0 : i32
    %c0_i32_2 = arith.constant 0 : i32
    return %c0_i32, %c0_i32_0, %c0_i32_1 : i32, i32, i32
  }
  func.func @transform_7(%arg0: i32) -> (i32, i32) {
    %c0_i32 = arith.constant 0 : i32
    %c0_i32_0 = arith.constant 0 : i32
    %c0_i32_1 = arith.constant 0 : i32
    return %c0_i32, %c0_i32_0 : i32, i32
  }
  func.func @transform_8(%arg0: i32) -> (i32, i32, i32) {
    %c0_i32 = arith.constant 0 : i32
    %c0_i32_0 = arith.constant 0 : i32
    %c0_i32_1 = arith.constant 0 : i32
    %c0_i32_2 = arith.constant 0 : i32
    return %c0_i32, %c0_i32_0, %c0_i32_1 : i32, i32, i32
  }
  func.func @transform_9(%arg0: i32) -> (i32, i32) {
    %c0_i32 = arith.constant 0 : i32
    %c0_i32_0 = arith.constant 0 : i32
    %c0_i32_1 = arith.constant 0 : i32
    return %c0_i32, %c0_i32_0 : i32, i32
  }
  func.func @transform_10(%arg0: i32) -> (i32, i32) {
    %c0_i32 = arith.constant 0 : i32
    %c0_i32_0 = arith.constant 0 : i32
    %c0_i32_1 = arith.constant 0 : i32
    return %c0_i32, %c0_i32_0 : i32, i32
  }
}

</mosaic_0001>

<bundles_post_ra>
// kernel: vgg_alpha_forward.3
= control target key start
LH: loop header
LB: loop body
LE: loop exit
PB: predicated region body
PF: predicated region fallthrough
CT: control target
= control target key end

     0   :  { %s7430_s0 = inlined_call_operand.vmem [shape: bf16[2,8192], index: 0, kind: input, shape index: {}]   ;;  %s7431_s1 = inlined_call_operand.hbm [shape: bf16[8192,512], index: 1, kind: input, shape index: {}]   ;;  %s7432_s2 = inlined_call_operand.hbm [shape: f32[1,512], index: 2, kind: input, shape index: {}]   ;;  %s7433_s3 = inlined_call_operand.vmem [shape: bf16[256,4], index: 3, kind: input, shape index: {}]   ;;  %s7434_s4 = inlined_call_operand.hbm [shape: f32[1,4], index: 4, kind: input, shape index: {}]   ;;  %s7435_s5 = inlined_call_operand.vmem [shape: bf16[256,1], index: 5, kind: input, shape index: {}]   ;;  %s7436_s6 = inlined_call_operand.<no memory space> [shape: f32[1,1], index: 6, kind: input, shape index: {}]   ;;  %s7437_s7 = inlined_call_operand.hbm [shape: f32[2,4], index: 7, kind: output, shape index: {0}]   ;;  %s7438_s8 = inlined_call_operand.vmem [shape: f32[2,1], index: 8, kind: output, shape index: {1}]  }
   0x1   :  { %v14_v0 = vstv %s7436_s6 }
   0x2   :  { %15 = vst [vmem:[#allocation3] sm:$0x1] %v14_v0 }
   0x3   :  { %16 = vsyncpa [#allocation5], 0 }
   0x4   :  { %18 = vsyncpa [#allocation5 + $0x1], 0 }
   0x5   :  { %19 = vsyncpa [#allocation8], 0 }
   0x6   :  { %20 = vsyncpa [#allocation6], 0  ;;  %s6504_s29 = smov 0   ;;  %s6506_s30 = smov 0  }
   0x7   :  { %s6508_s9 = smov 0   ;;  %s6510_s10 = smov 0  }
   0x8 LB: > { %s6523_s6 = sadd.s32 4294967295, %s6445_s10   ;;  %s6526_s11 = sadd.s32 1, %s6445_s10   ;;  %s6445_s10 = sphi %s6510_s10, %s7457_s10   ;;  %s6441_s9 = sphi %s6508_s9, %s7456_s9   ;;  %s6437_s30 = sphi %s6506_s30, %s7455_s30   ;;  %s6433_s29 = sphi %s6504_s29, %s7454_s29  }
   0x9   : > { %s56_s12 = ssub.s32 %s6445_s10, %s6526_s11  ;;  %s59_s13 = sadd.s32 1, %s6441_s9 }
   0xa   : > { %p57_p0 = scmp.eq.s32.totalorder %s56_s12, 0  ;;  %p66_p1 = scmp.ne.s32.totalorder %s6441_s9, %s6437_s30 }
   0xb   : > { %p67_p2 = scmp.eq.s32.totalorder %s6445_s10, 0  ;;  %p72_p3 = scmp.ne.s32.totalorder %s6437_s30, %s6433_s29 }
   0xc   : > { %s6536_s14 = scalar_select %p57_p0, %s6441_s9, %s59_s13  }
   0xd   : > { %p6538_p4 = por %p67_p2, %p66_p1  ;;  %p7439_p5 = scmp.eq.s32.totalorder %s6523_s6, 0 }
   0xe   : > { %p4750_p6 = scmp.ge.s32.totalorder %s6445_s10, 1  ;;  %p230_p7 = scmp.lt.s32.totalorder %s6445_s10, 5 }
   0xf   : > { %p6547_p8 = por %p7439_p5, %p72_p3  ;;  %s6447_s18 = smov [#allocation7]  }
  0x10   : > { %p6552_p10 = pnand %p4750_p6, %p230_p7  ;;  %s243_s19 = sshll.u32 %s6447_s18, 4  ;;  %s244_s19 = int_to_ptr.vmem [resolvable:$true] %s243_s19 }
  0x11   : > { %s7444_s16 = scalar_select %p6547_p8, 1, 0 }
  0x12   : > { %s7445_s17 = scalar_select %p6552_p10, 1, 0 }
  0x13   : > { %p5431_p11 = pneg %p6552_p10  ;;  %p5444_p12 = scmp.lt.s32.totalorder %s6445_s10, 4 }
  0x14   : > { %s6448_s21 = smov [#allocation9]   ;;  %s282_s24 = sand.u32 1, %s6441_s9  }
  0x15   : > { %p6561_p13 = pnand %p5431_p11, %p7439_p5  ;;  %s257_s22 = sshll.u32 %s6448_s21, 4  ;;  %s6571_s22 = int_to_ptr.vmem [resolvable:$true] %s257_s22 }
  0x16   : > { %p6567_p0 = pnand %p5444_p12, %p6538_p4  ;;  %s6291_s27 = scalar_lea.hbm %s7432_s2, 64 }
  0x17   : > { %p6292_p1 = scmp.ne.s32.totalorder %s7432_s2, %s6291_s27  ;;  %p6293_p2 = pneg %p6561_p13 }
  0x18   : > { %s7447_s23 = scalar_select %p6567_p0, 1, 0 }
  0x19   : > { %p6294_p3 = pnand %p6293_p2, %p6292_p1  ;;  %p6298_p6 = scmp.lt.u32.totalorder %s6291_s27, %s7432_s2 }
  0x1b   : > { %p6295_p4 = pneg %p6294_p3 }
  0x1d   : > { %p6300_p7 = pnand %p6298_p6, %p6295_p4 }
  0x1f   : > { %6303 = shalt.err (!%p6300_p7)
}
  0x20   : > { %s6304_s15 = scalar_lea.vmem %s244_s19, 64  ;;  %p6312_p5 = scmp.lt.s32.totalorder %s244_s19, %s244_s19 }
  0x21   : > { %p6305_p11 = scmp.ne.s32.totalorder %s244_s19, %s6304_s15  ;;  %p6313_p8 = scmp.lt.s32.totalorder %s6304_s15, %s6304_s15 }
  0x23   : > { %p6307_p12 = pnand %p6305_p11, %p6293_p2  ;;  %p6314_p10 = por %p6313_p8, %p6312_p5 }
  0x25   : > { %p6308_p9 = pneg %p6307_p12 }
  0x27   : > { %p6315_p0 = pnand %p6314_p10, %p6308_p9 }
  0x29   : > { %6318 = shalt.err (!%p6315_p0)
}
  0x2a   : > { %5434 = dma.hbm_to_vmem [thread:$0]  (!%p6561_p13), %s7432_s2, 64, %s244_s19, [#allocation8]  }
  0x2b   : > { %s6319_s27 = scalar_lea.hbm %s7434_s4, 16 }
  0x2c   : > { %p6320_p1 = scmp.ne.s32.totalorder %s7434_s4, %s6319_s27  ;;  %p6326_p9 = scmp.lt.u32.totalorder %s6319_s27, %s7434_s4 }
  0x2e   : > { %p6322_p5 = pnand %p6320_p1, %p6293_p2 }
  0x30   : > { %p6323_p8 = pneg %p6322_p5 }
  0x32   : > { %p6328_p10 = pnand %p6326_p9, %p6323_p8 }
  0x34   : > { %6331 = shalt.err (!%p6328_p10)
}
  0x35   : > { %s6332_s19 = scalar_lea.vmem %s6571_s22, 16  ;;  %s6339_s15 = scalar_lea.vmem %s6571_s22, 32 }
  0x36   : > { %p6333_p0 = scmp.ne.s32.totalorder %s6571_s22, %s6332_s19  ;;  %p6340_p6 = scmp.lt.s32.totalorder %s6571_s22, %s6571_s22 }
  0x37   : > { %p6341_p7 = scmp.lt.s32.totalorder %s6339_s15, %s6332_s19 }
  0x38   : > { %p6335_p3 = pnand %p6333_p0, %p6293_p2 }
  0x39   : > { %p6342_p11 = por %p6341_p7, %p6340_p6 }
  0x3a   : > { %p6336_p4 = pneg %p6335_p3 }
  0x3c   : > { %p6343_p12 = pnand %p6342_p11, %p6336_p4 }
  0x3e   : > { %6346 = shalt.err (!%p6343_p12)
}
  0x3f   : > { %5437 = dma.hbm_to_vmem [thread:$0]  (!%p6561_p13), %s7434_s4, 16, %s6571_s22, [#allocation8]  }
  0x40   : > { %s4754_s25 = sshll.u32 %s282_s24, 12  ;;  %s5316_s26 = sshll.u32 %s6445_s10, 16 }
  0x41   : > { %s6628_s29 = scalar_lea.hbm %s7431_s1, %s5316_s26  ;;  %s286_s20 = scalar_lea.vmem [#allocation4], %s4754_s25 }
  0x42   : > { %s294_s12 = sshll.u32 %s286_s20, 4  ;;  %s6634_s13 = scalar_lea.sflag [#allocation5], %s282_s24  ;;  %s6630_s12 = int_to_ptr.vmem [resolvable:$true] %s294_s12 }
  0x43   : > { %s6347_s22 = scalar_lea.hbm %s6628_s29, 65536  ;;  %p7448_p2 = scmp.ne.s32.totalorder %s7447_s23, 0 }
  0x44   : > { %p6348_p13 = scmp.ne.s32.totalorder %s6628_s29, %s6347_s22  ;;  %s6352_s15 = scalar_lea.hbm %s7431_s1, 262144 }
  0x45   : > { %p6349_p1 = pneg %p7448_p2  ;;  %p6353_p9 = scmp.lt.u32.totalorder %s6628_s29, %s7431_s1 }
  0x46   : > { %p6354_p10 = scmp.lt.u32.totalorder %s6352_s15, %s6347_s22  ;;  %p6356_p3 = scmp.lt.u32.totalorder %s6347_s22, %s6628_s29 }
  0x47   : > { %p6350_p5 = pnand %p6349_p1, %p6348_p13 }
  0x48   : > { %p6355_p0 = por %p6354_p10, %p6353_p9 }
  0x49   : > { %p6351_p8 = pneg %p6350_p5 }
  0x4a   : > { %p6357_p4 = por %p6356_p3, %p6355_p0 }
  0x4c   : > { %p6358_p6 = pnand %p6357_p4, %p6351_p8 }
  0x4e   : > { %6361 = shalt.err (!%p6358_p6)
}
  0x4f   : > { %s6362_s24 = scalar_lea.vmem %s6630_s12, 65536  ;;  %s6449_s25 = smov [#allocation4]  }
  0x50   : > { %p6363_p7 = scmp.ne.s32.totalorder %s6630_s12, %s6362_s24  ;;  %s6367_s26 = sshll.u32 %s6449_s25, 4  ;;  %s6368_s26 = int_to_ptr.vmem [resolvable:$false] %s6367_s26 }
  0x51   : > { %s6369_s27 = scalar_lea.vmem %s6368_s26, 131072  ;;  %p6370_p13 = scmp.lt.s32.totalorder %s6630_s12, %s6368_s26 }
  0x52   : > { %p6365_p11 = pnand %p6363_p7, %p6349_p1  ;;  %p6371_p5 = scmp.lt.s32.totalorder %s6369_s27, %s6362_s24 }
  0x54   : > { %p6366_p12 = pneg %p6365_p11  ;;  %p6372_p9 = por %p6371_p5, %p6370_p13 }
  0x56   : > { %p6373_p10 = pnand %p6372_p9, %p6366_p12 }
  0x58   : > { %6376 = shalt.err (!%p6373_p10)
}
  0x59   : > { %s6450_s28 = smov 256   ;;  %s6451_s20 = smov 16  }
  0x5a   : > { %5441 = dma.hbm_to_vmem [thread:$0]  (!%p7448_p2), %s6628_s29, 65536, %s6630_s12, %s6634_s13, %s6450_s28, %s6450_s28, %s6451_s20  }
  0x5b   : > { %p7449_p1 = scmp.ne.s32.totalorder %s7445_s17, 0 }
  0x5c   : > { %s308_s22 = sand.u32 (!%p7449_p1), 1, %s6437_s30   ;;  %p7450_p8 = scmp.ne.s32.totalorder (!%p7449_p1), %s7444_s16, 0 }
  0x5d   : > { %306 = sbr.rel (%p7449_p1) target bundleno = 1111 (0x457), region = 48  ;;  %s4759_s10 = sshll.u32 (!%p7449_p1), %s308_s22, 12 }
  0x5e   : > { %s309_s19 = scalar_lea.sflag (!%p7449_p1), [#allocation5], %s308_s22  ;;  %s6665_s15 = scalar_lea.vmem (!%p7449_p1), [#allocation4], %s4759_s10 }
  0x64   : > { %6420 = dma.done.wait (%p7450_p8), %s309_s19, 65536  }
  0x65   : > { %6422 = vsyncadd (%p7450_p8), %s309_s19, 4294901760  ;;  %p7451_p0 = scmp.eq.s32.totalorder %s6523_s6, 0 }
  0x67   : > { %6424 = dma.done.wait (%p7451_p0), [#allocation8], 80   ;;  %p7452_p2 = pmov %p7451_p0 }
  0x68   : > { %s4762_s17 = sshll.u32 %s6523_s6, 4  ;;  %p7453_p4 = scmp.ne.s32.totalorder %s6523_s6, 0 }
  0x69   : > { %6426 = vsyncadd (%p7452_p2), [#allocation8], 4294967216  ;;  %p353_p3 = scmp.lt.s32.totalorder %s4762_s17, 63  ;;  %v6452_v1 = vmov (!%p7453_p4), 0.0  }
  0x6a   : > { %362 = sbr.rel (%p7453_p4) target bundleno = 113 (0x71), region = 64  ;;  %363 = vst [vmem:[#allocation2] sm:$0xff] (!%p7453_p4), %v6452_v1 }
  0x6b   : > { %s7459_s17 = smov (!%p353_p3, %s4762_s17), 63 }
  0x6c   : > { %s6679_s12 = scalar_lea.vmem %s7430_s0, %s7459_s17 }
  0x71 PF: > { %v5489_v2 = vld [vmem:[%s6665_s15 + $0x4] ss:$16 sps:$4 sm:$0xff]   ;;  %v5491_v3 = vld [vmem:[%s6665_s15 + $0xc] ss:$16 sps:$4 sm:$0xff]   ;;  %v5493_v4 = vld [vmem:[%s6665_s15] ss:$16 sps:$4 sm:$0xff]   ;;  %v885_v40 = vlaneseq }
  0x72   : > { %3555 = vmatprep.subr.bf16.mxu0 %v5489_v2  ;;  %v5494_v5 = vld [vmem:[%s6665_s15 + $0x8] ss:$16 sps:$4 sm:$0xff]   ;;  %3883 = vmatprep.subr.bf16.mxu1 %v5491_v3  ;;  %v5495_v6 = vld [vmem:[%s6665_s15 + $0x24] ss:$16 sps:$4 sm:$0xff]   ;;  %v5497_v7 = vld [vmem:[%s6665_s15 + $0x2c] ss:$16 sps:$4 sm:$0xff]  }
  0x73   : > { %3556 = vmatpush1.bf16.msra.mxu0 %v5493_v4  ;;  %3884 = vmatpush1.bf16.msra.mxu1 %v5494_v5  ;;  %v5499_v8 = vld [vmem:[%s6665_s15 + $0x20] ss:$16 sps:$4 sm:$0xff]   ;;  %v5500_v9 = vld [vmem:[%s6665_s15 + $0x28] ss:$16 sps:$4 sm:$0xff]   ;;  %v5501_v10 = vld [vmem:[%s6665_s15 + $0x44] ss:$16 sps:$4 sm:$0xff]  }
  0x74   : > { %3557 = vmatprep.subr.bf16.mxu0 %v5495_v6  ;;  %3885 = vmatprep.subr.bf16.mxu1 %v5497_v7  ;;  %v5503_v11 = vld [vmem:[%s6665_s15 + $0x4c] ss:$16 sps:$4 sm:$0xff]   ;;  %v5505_v12 = vld [vmem:[%s6665_s15 + $0x40] ss:$16 sps:$4 sm:$0xff]   ;;  %v5506_v13 = vld [vmem:[%s6665_s15 + $0x48] ss:$16 sps:$4 sm:$0xff]  }
  0x75   : > { %v5507_v14 = vld [vmem:[%s6665_s15 + $0x64] ss:$16 sps:$4 sm:$0xff]   ;;  %v5509_v15 = vld [vmem:[%s6665_s15 + $0x6c] ss:$16 sps:$4 sm:$0xff]   ;;  %v5511_v16 = vld [vmem:[%s6665_s15 + $0x60] ss:$16 sps:$4 sm:$0xff]  }
  0x76   : > { %v5512_v17 = vld [vmem:[%s6665_s15 + $0x68] ss:$16 sps:$4 sm:$0xff]   ;;  %v5513_v18 = vld [vmem:[%s6665_s15 + $0x84] ss:$16 sps:$4 sm:$0xff]   ;;  %v5515_v19 = vld [vmem:[%s6665_s15 + $0x8c] ss:$16 sps:$4 sm:$0xff]  }
  0x77   : > { %3558 = vmatpush1.bf16.msra.mxu0 %v5499_v8  ;;  %3886 = vmatpush1.bf16.msra.mxu1 %v5500_v9  ;;  %v5517_v20 = vld [vmem:[%s6665_s15 + $0x80] ss:$16 sps:$4 sm:$0xff]   ;;  %v5518_v21 = vld [vmem:[%s6665_s15 + $0x88] ss:$16 sps:$4 sm:$0xff]   ;;  %v5519_v22 = vld [vmem:[%s6665_s15 + $0xa4] ss:$16 sps:$4 sm:$0xff]  }
  0x78   : > { %3559 = vmatprep.subr.bf16.mxu0 %v5501_v10  ;;  %3887 = vmatprep.subr.bf16.mxu1 %v5503_v11  ;;  %v5521_v23 = vld [vmem:[%s6665_s15 + $0xac] ss:$16 sps:$4 sm:$0xff]   ;;  %v5523_v24 = vld [vmem:[%s6665_s15 + $0xa0] ss:$16 sps:$4 sm:$0xff]   ;;  %v5524_v25 = vld [vmem:[%s6665_s15 + $0xa8] ss:$16 sps:$4 sm:$0xff]  }
  0x79   : > { %v5525_v26 = vld [vmem:[%s6665_s15 + $0xc4] ss:$16 sps:$4 sm:$0xff]   ;;  %v5527_v27 = vld [vmem:[%s6665_s15 + $0xcc] ss:$16 sps:$4 sm:$0xff]   ;;  %v5529_v28 = vld [vmem:[%s6665_s15 + $0xc0] ss:$16 sps:$4 sm:$0xff]  }
  0x7a   : > { %v5530_v29 = vld [vmem:[%s6665_s15 + $0xc8] ss:$16 sps:$4 sm:$0xff]   ;;  %v5531_v30 = vld [vmem:[%s6665_s15 + $0xe4] ss:$16 sps:$4 sm:$0xff]   ;;  %v5533_v31 = vld [vmem:[%s6665_s15 + $0xec] ss:$16 sps:$4 sm:$0xff]  }
  0x7b   : > { %3560 = vmatpush1.bf16.msra.mxu0 %v5505_v12  ;;  %3888 = vmatpush1.bf16.msra.mxu1 %v5506_v13  ;;  %v5535_v32 = vld [vmem:[%s6665_s15 + $0xe0] ss:$16 sps:$4 sm:$0xff]   ;;  %v5536_v33 = vld [vmem:[%s6665_s15 + $0xe8] ss:$16 sps:$4 sm:$0xff]   ;;  %v5537_v34 = vld [vmem:[%s6665_s15 + $0x104] ss:$16 sps:$4 sm:$0xff]  }
  0x7c   : > { %3561 = vmatprep.subr.bf16.mxu0 %v5507_v14  ;;  %3889 = vmatprep.subr.bf16.mxu1 %v5509_v15  ;;  %v5539_v35 = vld [vmem:[%s6665_s15 + $0x10c] ss:$16 sps:$4 sm:$0xff]   ;;  %v5541_v36 = vld [vmem:[%s6665_s15 + $0x100] ss:$16 sps:$4 sm:$0xff]   ;;  %v5542_v37 = vld [vmem:[%s6665_s15 + $0x108] ss:$16 sps:$4 sm:$0xff]  }
  0x7d   : > { %v6453_v38 = vmov 1966171168   ;;  %v5543_v41 = vld [vmem:[%s6665_s15 + $0x124] ss:$16 sps:$4 sm:$0xff]   ;;  %v5545_v42 = vld [vmem:[%s6665_s15 + $0x12c] ss:$16 sps:$4 sm:$0xff]  }
  0x7e   : > { %v883_v39 = vunpack.c.l.s4 %v6453_v38  ;;  %v5547_v43 = vld [vmem:[%s6665_s15 + $0x120] ss:$16 sps:$4 sm:$0xff]   ;;  %v6722_v45 = vshrl.u32 %v885_v40, 7  ;;  %v5548_v46 = vld [vmem:[%s6665_s15 + $0x128] ss:$16 sps:$4 sm:$0xff]   ;;  %p5276_p6 = scmp.ne.s32.totalorder %s6523_s6, 3 }
  0x7f   : > { %3562 = vmatpush1.bf16.msra.mxu0 %v5511_v16  ;;  %3890 = vmatpush1.bf16.msra.mxu1 %v5512_v17  ;;  %v5549_v47 = vld [vmem:[%s6665_s15 + $0x144] ss:$16 sps:$4 sm:$0xff]   ;;  %v5551_v48 = vld [vmem:[%s6665_s15 + $0x14c] ss:$16 sps:$4 sm:$0xff]   ;;  %v5553_v49 = vld [vmem:[%s6665_s15 + $0x140] ss:$16 sps:$4 sm:$0xff]  }
  0x80   : > { %3563 = vmatprep.subr.bf16.mxu0 %v5513_v18  ;;  %3891 = vmatprep.subr.bf16.mxu1 %v5515_v19  ;;  %v884_v44 = vunpack.c.0.s8 %v883_v39  ;;  %v5554_v50 = vld [vmem:[%s6665_s15 + $0x148] ss:$16 sps:$4 sm:$0xff]   ;;  %v5555_v52 = vld [vmem:[%s6665_s15 + $0x164] ss:$16 sps:$4 sm:$0xff]   ;;  %v5557_v53 = vld [vmem:[%s6665_s15 + $0x16c] ss:$16 sps:$4 sm:$0xff]  }
  0x81   : > { %v6735_v54 = vld [vmem:[%s6679_s12] sm:$0xff]  ;;  %v5559_v55 = vld [vmem:[%s6665_s15 + $0x160] ss:$16 sps:$4 sm:$0xff]   ;;  %vm4479_vm0 = vcmask (!%p5276_p6), 25600   ;;  %vm4656_vm1 = vcmask (!%p5276_p6), 1024  }
  0x82   : > { %v6730_v51 = vsub.s32 %v884_v44, %v6722_v45  ;;  %v5560_v57 = vld [vmem:[%s6665_s15 + $0x168] ss:$16 sps:$4 sm:$0xff]   ;;  %v5561_v58 = vld [vmem:[%s6665_s15 + $0x184] ss:$16 sps:$4 sm:$0xff]   ;;  %v5563_v59 = vld [vmem:[%s6665_s15 + $0x18c] ss:$16 sps:$4 sm:$0xff]  }
  0x83   : > { %3564 = vmatpush1.bf16.msra.mxu0 %v5517_v20  ;;  %3892 = vmatpush1.bf16.msra.mxu1 %v5518_v21  ;;  %v5565_v61 = vld [vmem:[%s6665_s15 + $0x180] ss:$16 sps:$4 sm:$0xff]   ;;  %v5566_v63 = vld [vmem:[%s6665_s15 + $0x188] ss:$16 sps:$4 sm:$0xff]   ;;  %v5567_v0 = vld [vmem:[%s6665_s15 + $0x1a4] ss:$16 sps:$4 sm:$0xff]  }
  0x84   : > { %3565 = vmatprep.subr.bf16.mxu0 %v5519_v22  ;;  %3893 = vmatprep.subr.bf16.mxu1 %v5521_v23  ;;  %v888_v56 = vrot.slane %v6735_v54, %v6730_v51  ;;  %v5569_v1 = vld [vmem:[%s6665_s15 + $0x1ac] ss:$16 sps:$4 sm:$0xff]   ;;  %v5571_v2 = vld [vmem:[%s6665_s15 + $0x1a0] ss:$16 sps:$4 sm:$0xff]   ;;  %v5572_v3 = vld [vmem:[%s6665_s15 + $0x1a8] ss:$16 sps:$4 sm:$0xff]  }
  0x85   : > { %v5573_v4 = vld [vmem:[%s6665_s15 + $0x1c4] ss:$16 sps:$4 sm:$0xff]   ;;  %v5575_v5 = vld [vmem:[%s6665_s15 + $0x1cc] ss:$16 sps:$4 sm:$0xff]   ;;  %v5577_v6 = vld [vmem:[%s6665_s15 + $0x1c0] ss:$16 sps:$4 sm:$0xff]  }
  0x86   : > { %v896_v60 = vcombine.high %v888_v56, %v888_v56  ;;  %v5578_v7 = vld [vmem:[%s6665_s15 + $0x1c8] ss:$16 sps:$4 sm:$0xff]   ;;  %v5579_v8 = vld [vmem:[%s6665_s15 + $0x1e4] ss:$16 sps:$4 sm:$0xff]   ;;  %v5581_v9 = vld [vmem:[%s6665_s15 + $0x1ec] ss:$16 sps:$4 sm:$0xff]   ;;  %v6762_v15 = vrot.slane %v888_v56, %v6730_v51 }
  0x87   : > { %3566 = vmatpush1.bf16.msra.mxu0 %v5523_v24  ;;  %3894 = vmatpush1.bf16.msra.mxu1 %v5524_v25  ;;  %v5583_v10 = vld [vmem:[%s6665_s15 + $0x1e0] ss:$16 sps:$4 sm:$0xff]   ;;  %v5584_v11 = vld [vmem:[%s6665_s15 + $0x1e8] ss:$16 sps:$4 sm:$0xff]   ;;  %v5587_v12 = vld [vmem:[%s6665_s15 + $0x204] ss:$16 sps:$4 sm:$0xff]  }
  0x88   : > { %3567 = vmatprep.subr.bf16.mxu0 %v5525_v26  ;;  %3895 = vmatprep.subr.bf16.mxu1 %v5527_v27  ;;  %v918_v62 = vrot.slane %v896_v60, %v6730_v51  ;;  %v5590_v13 = vld [vmem:[%s6665_s15 + $0x20c] ss:$16 sps:$4 sm:$0xff]   ;;  %v5585_v14 = vld [vmem:[%s6665_s15 + $0x200] ss:$16 sps:$4 sm:$0xff]   ;;  %v5588_v16 = vld [vmem:[%s6665_s15 + $0x208] ss:$16 sps:$4 sm:$0xff]  }
  0x89   : > { %v5593_v17 = vld [vmem:[%s6665_s15 + $0x224] ss:$16 sps:$4 sm:$0xff]   ;;  %v5596_v18 = vld [vmem:[%s6665_s15 + $0x22c] ss:$16 sps:$4 sm:$0xff]   ;;  %v5591_v20 = vld [vmem:[%s6665_s15 + $0x220] ss:$16 sps:$4 sm:$0xff]  }
  0x8a   : > { %3587 = vmatprep.mubr.bf16.mxu0 %v918_v62  ;;  %3915 = vmatprep.mubr.bf16.mxu1 %v918_v62  ;;  %v928_v19 = vcombine.high %v918_v62, %v918_v62  ;;  %v5594_v21 = vld [vmem:[%s6665_s15 + $0x228] ss:$16 sps:$4 sm:$0xff]   ;;  %v5599_v22 = vld [vmem:[%s6665_s15 + $0x244] ss:$16 sps:$4 sm:$0xff]   ;;  %v5602_v23 = vld [vmem:[%s6665_s15 + $0x24c] ss:$16 sps:$4 sm:$0xff]  }
  0x8b   : > { %3568 = vmatpush1.bf16.msra.mxu0 %v5529_v28  ;;  %3896 = vmatpush1.bf16.msra.mxu1 %v5530_v29  ;;  %v5597_v24 = vld [vmem:[%s6665_s15 + $0x240] ss:$16 sps:$4 sm:$0xff]   ;;  %v5600_v25 = vld [vmem:[%s6665_s15 + $0x248] ss:$16 sps:$4 sm:$0xff]   ;;  %v5605_v26 = vld [vmem:[%s6665_s15 + $0x264] ss:$16 sps:$4 sm:$0xff]  }
  0x8c   : > { %3569 = vmatprep.subr.bf16.mxu0 %v5531_v30  ;;  %3897 = vmatprep.subr.bf16.mxu1 %v5533_v31  ;;  %v5608_v27 = vld [vmem:[%s6665_s15 + $0x26c] ss:$16 sps:$4 sm:$0xff]   ;;  %v5603_v28 = vld [vmem:[%s6665_s15 + $0x260] ss:$16 sps:$4 sm:$0xff]   ;;  %v5606_v29 = vld [vmem:[%s6665_s15 + $0x268] ss:$16 sps:$4 sm:$0xff]  }
  0x8d   : > { %v5611_v30 = vld [vmem:[%s6665_s15 + $0x284] ss:$16 sps:$4 sm:$0xff]   ;;  %v5614_v31 = vld [vmem:[%s6665_s15 + $0x28c] ss:$16 sps:$4 sm:$0xff]   ;;  %v5621_v40 = vld [vmem:[%s6665_s15 + $0x2c0] ss:$16 sps:$4 sm:$0xff]  }
  0x8e   : > { %v5623_v38 = vld [vmem:[%s6665_s15 + $0x2c4] ss:$16 sps:$4 sm:$0xff]   ;;  %v5626_v39 = vld [vmem:[%s6665_s15 + $0x2cc] ss:$16 sps:$4 sm:$0xff]   ;;  %v5627_v44 = vld [vmem:[%s6665_s15 + $0x2e0] ss:$16 sps:$4 sm:$0xff]  }
  0x8f   : > { %3570 = vmatpush1.bf16.msra.mxu0 %v5535_v32  ;;  %3898 = vmatpush1.bf16.msra.mxu1 %v5536_v33  ;;  %v5609_v32 = vld [vmem:[%s6665_s15 + $0x280] ss:$16 sps:$4 sm:$0xff]   ;;  %v5612_v33 = vld [vmem:[%s6665_s15 + $0x288] ss:$16 sps:$4 sm:$0xff]   ;;  %v5656_v62 = vld [vmem:[%s6665_s15 + $0x36c] ss:$16 sps:$4 sm:$0xff]  }
  0x90   : > { %3571 = vmatprep.subr.bf16.mxu0 %v5537_v34  ;;  %3899 = vmatprep.subr.bf16.mxu1 %v5539_v35  ;;  %v5617_v34 = vld [vmem:[%s6665_s15 + $0x2a4] ss:$16 sps:$4 sm:$0xff]   ;;  %v5620_v35 = vld [vmem:[%s6665_s15 + $0x2ac] ss:$16 sps:$4 sm:$0xff]   ;;  %v5642_v56 = vld [vmem:[%s6665_s15 + $0x328] ss:$16 sps:$4 sm:$0xff]  }
  0x91   : > { %v5648_v60 = vld [vmem:[%s6665_s15 + $0x348] ss:$16 sps:$4 sm:$0xff]  }
  0x93   : > { %3572 = vmatpush1.bf16.msra.mxu0 %v5541_v36  ;;  %3900 = vmatpush1.bf16.msra.mxu1 %v5542_v37  ;;  %v5615_v36 = vld [vmem:[%s6665_s15 + $0x2a0] ss:$16 sps:$4 sm:$0xff]   ;;  %v5618_v37 = vld [vmem:[%s6665_s15 + $0x2a8] ss:$16 sps:$4 sm:$0xff]  }
  0x94   : > { %3573 = vmatprep.subr.bf16.mxu0 %v5543_v41  ;;  %3901 = vmatprep.subr.bf16.mxu1 %v5545_v42  ;;  %v5624_v41 = vld [vmem:[%s6665_s15 + $0x2c8] ss:$16 sps:$4 sm:$0xff]   ;;  %v5629_v42 = vld [vmem:[%s6665_s15 + $0x2e4] ss:$16 sps:$4 sm:$0xff]  }
  0x97   : > { %3574 = vmatpush1.bf16.msra.mxu0 %v5547_v43  ;;  %3902 = vmatpush1.bf16.msra.mxu1 %v5548_v46  ;;  %v5632_v43 = vld [vmem:[%s6665_s15 + $0x2ec] ss:$16 sps:$4 sm:$0xff]   ;;  %v5630_v46 = vld [vmem:[%s6665_s15 + $0x2e8] ss:$16 sps:$4 sm:$0xff]  }
  0x98   : > { %3575 = vmatprep.subr.bf16.mxu0 %v5549_v47  ;;  %3903 = vmatprep.subr.bf16.mxu1 %v5551_v48  ;;  %v5635_v47 = vld [vmem:[%s6665_s15 + $0x304] ss:$16 sps:$4 sm:$0xff]   ;;  %v5638_v48 = vld [vmem:[%s6665_s15 + $0x30c] ss:$16 sps:$4 sm:$0xff]  }
  0x9b   : > { %3576 = vmatpush1.bf16.msra.mxu0 %v5553_v49  ;;  %3904 = vmatpush1.bf16.msra.mxu1 %v5554_v50  ;;  %v5633_v49 = vld [vmem:[%s6665_s15 + $0x300] ss:$16 sps:$4 sm:$0xff]   ;;  %v5636_v50 = vld [vmem:[%s6665_s15 + $0x308] ss:$16 sps:$4 sm:$0xff]  }
  0x9c   : > { %3577 = vmatprep.subr.bf16.mxu0 %v5555_v52  ;;  %3905 = vmatprep.subr.bf16.mxu1 %v5557_v53  ;;  %v5641_v52 = vld [vmem:[%s6665_s15 + $0x324] ss:$16 sps:$4 sm:$0xff]   ;;  %v5644_v53 = vld [vmem:[%s6665_s15 + $0x32c] ss:$16 sps:$4 sm:$0xff]  }
  0x9f   : > { %3578 = vmatpush1.bf16.msra.mxu0 %v5559_v55  ;;  %3906 = vmatpush1.bf16.msra.mxu1 %v5560_v57  ;;  %v5639_v55 = vld [vmem:[%s6665_s15 + $0x320] ss:$16 sps:$4 sm:$0xff]   ;;  %v5647_v57 = vld [vmem:[%s6665_s15 + $0x344] ss:$16 sps:$4 sm:$0xff]  }
  0xa0   : > { %3579 = vmatprep.subr.bf16.mxu0 %v5561_v58  ;;  %3907 = vmatprep.subr.bf16.mxu1 %v5563_v59  ;;  %v5650_v58 = vld [vmem:[%s6665_s15 + $0x34c] ss:$16 sps:$4 sm:$0xff]   ;;  %v5645_v59 = vld [vmem:[%s6665_s15 + $0x340] ss:$16 sps:$4 sm:$0xff]  }
  0xa3   : > { %3580 = vmatpush1.bf16.msra.mxu0 %v5565_v61  ;;  %3908 = vmatpush1.bf16.msra.mxu1 %v5566_v63  ;;  %v5653_v61 = vld [vmem:[%s6665_s15 + $0x364] ss:$16 sps:$4 sm:$0xff]   ;;  %v5651_v63 = vld [vmem:[%s6665_s15 + $0x360] ss:$16 sps:$4 sm:$0xff]  }
  0xa4   : > { %3581 = vmatprep.subr.bf16.mxu0 %v5567_v0  ;;  %3909 = vmatprep.subr.bf16.mxu1 %v5569_v1  ;;  %v5654_v0 = vld [vmem:[%s6665_s15 + $0x368] ss:$16 sps:$4 sm:$0xff]   ;;  %v5659_v1 = vld [vmem:[%s6665_s15 + $0x384] ss:$16 sps:$4 sm:$0xff]  }
  0xa7   : > { %3582 = vmatpush1.bf16.msra.mxu0 %v5571_v2  ;;  %3910 = vmatpush1.bf16.msra.mxu1 %v5572_v3  ;;  %v5662_v2 = vld [vmem:[%s6665_s15 + $0x38c] ss:$16 sps:$4 sm:$0xff]   ;;  %v5657_v3 = vld [vmem:[%s6665_s15 + $0x380] ss:$16 sps:$4 sm:$0xff]  }
  0xa8   : > { %3583 = vmatprep.subr.bf16.mxu0 %v5573_v4  ;;  %3911 = vmatprep.subr.bf16.mxu1 %v5575_v5  ;;  %v5660_v4 = vld [vmem:[%s6665_s15 + $0x388] ss:$16 sps:$4 sm:$0xff]   ;;  %v5665_v5 = vld [vmem:[%s6665_s15 + $0x3a4] ss:$16 sps:$4 sm:$0xff]  }
  0xab   : > { %3584 = vmatpush1.bf16.msra.mxu0 %v5577_v6  ;;  %3912 = vmatpush1.bf16.msra.mxu1 %v5578_v7  ;;  %v5668_v6 = vld [vmem:[%s6665_s15 + $0x3ac] ss:$16 sps:$4 sm:$0xff]   ;;  %v5663_v7 = vld [vmem:[%s6665_s15 + $0x3a0] ss:$16 sps:$4 sm:$0xff]  }
  0xac   : > { %3585 = vmatprep.subr.bf16.mxu0 %v5579_v8  ;;  %3913 = vmatprep.subr.bf16.mxu1 %v5581_v9  ;;  %v5666_v8 = vld [vmem:[%s6665_s15 + $0x3a8] ss:$16 sps:$4 sm:$0xff]   ;;  %v5671_v9 = vld [vmem:[%s6665_s15 + $0x3c4] ss:$16 sps:$4 sm:$0xff]  }
  0xaf   : > { %3586 = vmatpush1.bf16.msra.mxu0 %v5583_v10  ;;  %3914 = vmatpush1.bf16.msra.mxu1 %v5584_v11  ;;  %v5674_v10 = vld [vmem:[%s6665_s15 + $0x3cc] ss:$16 sps:$4 sm:$0xff]   ;;  %v881_v11 = vcombine.high %v6735_v54, %v6735_v54  ;;  %v5678_v54 = vld [vmem:[%s6665_s15 + $0x3e8] ss:$16 sps:$4 sm:$0xff]  }
  0xb0   : > { %3596 = vmatprep.subr.bf16.mxu0 %v5587_v12  ;;  %3924 = vmatprep.subr.bf16.mxu1 %v5590_v13  ;;  %v5669_v12 = vld [vmem:[%s6665_s15 + $0x3c0] ss:$16 sps:$4 sm:$0xff]   ;;  %v5672_v13 = vld [vmem:[%s6665_s15 + $0x3c8] ss:$16 sps:$4 sm:$0xff]  }
  0xb2   : > { %3588 = vmatmul.mubr.bf16.vlgmr.msra.gmra.mrb[0].mxu0 %v6762_v15  ;;  %3916 = vmatmul.mubr.bf16.vlgmr.msra.gmra.mrb[0].mxu1 %v6762_v15 }
  0xb3   : > { %3597 = vmatpush1.bf16.msra.mxu0 %v5585_v14  ;;  %3925 = vmatpush1.bf16.msra.mxu1 %v5588_v16  ;;  %v5677_v14 = vld [vmem:[%s6665_s15 + $0x3e4] ss:$16 sps:$4 sm:$0xff]   ;;  %v5680_v16 = vld [vmem:[%s6665_s15 + $0x3ec] ss:$16 sps:$4 sm:$0xff]  }
  0xb4   : > { %3598 = vmatprep.subr.bf16.mxu0 %v5593_v17  ;;  %3926 = vmatprep.subr.bf16.mxu1 %v5596_v18  ;;  %v6828_v17 = vrot.slane %v881_v11, %v6730_v51  ;;  %v5675_v18 = vld [vmem:[%s6665_s15 + $0x3e0] ss:$16 sps:$4 sm:$0xff]   ;;  %v5756_v11 = vld [vmem:[%s6665_s15 + $0x588] ss:$16 sps:$4 sm:$0xff]  }
  0xb5   : > { %3628 = vmatprep.mubr.bf16.mxu0 %v928_v19  ;;  %3956 = vmatprep.mubr.bf16.mxu1 %v928_v19  ;;  %v5683_v19 = vld [vmem:[%s6665_s15 + $0x404] ss:$16 sps:$4 sm:$0xff]  }
  0xb7   : > { %3599 = vmatpush1.bf16.msra.mxu0 %v5591_v20  ;;  %3927 = vmatpush1.bf16.msra.mxu1 %v5594_v21  ;;  %v5686_v20 = vld [vmem:[%s6665_s15 + $0x40c] ss:$16 sps:$4 sm:$0xff]   ;;  %v897_v21 = vcombine.high %v6828_v17, %v6828_v17 }
  0xb8   : > { %3600 = vmatprep.subr.bf16.mxu0 %v5599_v22  ;;  %3928 = vmatprep.subr.bf16.mxu1 %v5602_v23  ;;  %v5681_v22 = vld [vmem:[%s6665_s15 + $0x400] ss:$16 sps:$4 sm:$0xff]   ;;  %v926_v23 = vcombine.high %v6762_v15, %v6762_v15  ;;  %v5690_v15 = vld [vmem:[%s6665_s15 + $0x428] ss:$16 sps:$4 sm:$0xff]  }
  0xbb   : > { %3601 = vmatpush1.bf16.msra.mxu0 %v5597_v24  ;;  %3929 = vmatpush1.bf16.msra.mxu1 %v5600_v25  ;;  %v5684_v24 = vld [vmem:[%s6665_s15 + $0x408] ss:$16 sps:$4 sm:$0xff]   ;;  %v5689_v25 = vld [vmem:[%s6665_s15 + $0x424] ss:$16 sps:$4 sm:$0xff]  }
  0xbc   : > { %3602 = vmatprep.subr.bf16.mxu0 %v5605_v26  ;;  %3930 = vmatprep.subr.bf16.mxu1 %v5608_v27  ;;  %v5692_v26 = vld [vmem:[%s6665_s15 + $0x42c] ss:$16 sps:$4 sm:$0xff]   ;;  %v6843_v27 = vrot.slane %v897_v21, %v6730_v51  ;;  %v5773_v21 = vld [vmem:[%s6665_s15 + $0x5e4] ss:$16 sps:$4 sm:$0xff]  }
  0xbf   : > { %3603 = vmatpush1.bf16.msra.mxu0 %v5603_v28  ;;  %3931 = vmatpush1.bf16.msra.mxu1 %v5606_v29  ;;  %v5687_v28 = vld [vmem:[%s6665_s15 + $0x420] ss:$16 sps:$4 sm:$0xff]   ;;  %v5695_v29 = vld [vmem:[%s6665_s15 + $0x444] ss:$16 sps:$4 sm:$0xff]  }
  0xc0   : > { %3604 = vmatprep.subr.bf16.mxu0 %v5611_v30  ;;  %3932 = vmatprep.subr.bf16.mxu1 %v5614_v31  ;;  %v5698_v30 = vld [vmem:[%s6665_s15 + $0x44c] ss:$16 sps:$4 sm:$0xff]   ;;  %v5693_v31 = vld [vmem:[%s6665_s15 + $0x440] ss:$16 sps:$4 sm:$0xff]  }
  0xc3   : > { %3605 = vmatpush1.bf16.msra.mxu0 %v5609_v32  ;;  %3933 = vmatpush1.bf16.msra.mxu1 %v5612_v33  ;;  %v5696_v32 = vld [vmem:[%s6665_s15 + $0x448] ss:$16 sps:$4 sm:$0xff]   ;;  %v5701_v33 = vld [vmem:[%s6665_s15 + $0x464] ss:$16 sps:$4 sm:$0xff]  }
  0xc4   : > { %3606 = vmatprep.subr.bf16.mxu0 %v5617_v34  ;;  %3934 = vmatprep.subr.bf16.mxu1 %v5620_v35  ;;  %v5704_v34 = vld [vmem:[%s6665_s15 + $0x46c] ss:$16 sps:$4 sm:$0xff]   ;;  %v5699_v35 = vld [vmem:[%s6665_s15 + $0x460] ss:$16 sps:$4 sm:$0xff]  }
  0xc7   : > { %3607 = vmatpush1.bf16.msra.mxu0 %v5615_v36  ;;  %3935 = vmatpush1.bf16.msra.mxu1 %v5618_v37  ;;  %v5702_v36 = vld [vmem:[%s6665_s15 + $0x468] ss:$16 sps:$4 sm:$0xff]   ;;  %v5707_v37 = vld [vmem:[%s6665_s15 + $0x484] ss:$16 sps:$4 sm:$0xff]  }
  0xc8   : > { %3608 = vmatprep.subr.bf16.mxu0 %v5623_v38  ;;  %3936 = vmatprep.subr.bf16.mxu1 %v5626_v39  ;;  %v5710_v38 = vld [vmem:[%s6665_s15 + $0x48c] ss:$16 sps:$4 sm:$0xff]   ;;  %v5705_v39 = vld [vmem:[%s6665_s15 + $0x480] ss:$16 sps:$4 sm:$0xff]  }
  0xcb   : > { %3609 = vmatpush1.bf16.msra.mxu0 %v5621_v40  ;;  %3937 = vmatpush1.bf16.msra.mxu1 %v5624_v41  ;;  %v5708_v40 = vld [vmem:[%s6665_s15 + $0x488] ss:$16 sps:$4 sm:$0xff]   ;;  %v5713_v41 = vld [vmem:[%s6665_s15 + $0x4a4] ss:$16 sps:$4 sm:$0xff]  }
  0xcc   : > { %3610 = vmatprep.subr.bf16.mxu0 %v5629_v42  ;;  %3938 = vmatprep.subr.bf16.mxu1 %v5632_v43  ;;  %v5716_v42 = vld [vmem:[%s6665_s15 + $0x4ac] ss:$16 sps:$4 sm:$0xff]   ;;  %v5711_v43 = vld [vmem:[%s6665_s15 + $0x4a0] ss:$16 sps:$4 sm:$0xff]  }
  0xcf   : > { %3611 = vmatpush1.bf16.msra.mxu0 %v5627_v44  ;;  %3939 = vmatpush1.bf16.msra.mxu1 %v5630_v46  ;;  %v5714_v44 = vld [vmem:[%s6665_s15 + $0x4a8] ss:$16 sps:$4 sm:$0xff]   ;;  %v5719_v46 = vld [vmem:[%s6665_s15 + $0x4c4] ss:$16 sps:$4 sm:$0xff]  }
  0xd0   : > { %3612 = vmatprep.subr.bf16.mxu0 %v5635_v47  ;;  %3940 = vmatprep.subr.bf16.mxu1 %v5638_v48  ;;  %v5722_v47 = vld [vmem:[%s6665_s15 + $0x4cc] ss:$16 sps:$4 sm:$0xff]   ;;  %v5717_v48 = vld [vmem:[%s6665_s15 + $0x4c0] ss:$16 sps:$4 sm:$0xff]  }
  0xd3   : > { %3613 = vmatpush1.bf16.msra.mxu0 %v5633_v49  ;;  %3941 = vmatpush1.bf16.msra.mxu1 %v5636_v50  ;;  %v5720_v49 = vld [vmem:[%s6665_s15 + $0x4c8] ss:$16 sps:$4 sm:$0xff]   ;;  %v5725_v50 = vld [vmem:[%s6665_s15 + $0x4e4] ss:$16 sps:$4 sm:$0xff]  }
  0xd4   : > { %3614 = vmatprep.subr.bf16.mxu0 %v5641_v52  ;;  %3942 = vmatprep.subr.bf16.mxu1 %v5644_v53  ;;  %v5728_v52 = vld [vmem:[%s6665_s15 + $0x4ec] ss:$16 sps:$4 sm:$0xff]   ;;  %v5723_v53 = vld [vmem:[%s6665_s15 + $0x4e0] ss:$16 sps:$4 sm:$0xff]  }
  0xd7   : > { %3615 = vmatpush1.bf16.msra.mxu0 %v5639_v55  ;;  %3943 = vmatpush1.bf16.msra.mxu1 %v5642_v56  ;;  %v5726_v55 = vld [vmem:[%s6665_s15 + $0x4e8] ss:$16 sps:$4 sm:$0xff]   ;;  %v5731_v56 = vld [vmem:[%s6665_s15 + $0x504] ss:$16 sps:$4 sm:$0xff]  }
  0xd8   : > { %3616 = vmatprep.subr.bf16.mxu0 %v5647_v57  ;;  %3944 = vmatprep.subr.bf16.mxu1 %v5650_v58  ;;  %v5734_v57 = vld [vmem:[%s6665_s15 + $0x50c] ss:$16 sps:$4 sm:$0xff]   ;;  %v5729_v58 = vld [vmem:[%s6665_s15 + $0x500] ss:$16 sps:$4 sm:$0xff]  }
  0xdb   : > { %3617 = vmatpush1.bf16.msra.mxu0 %v5645_v59  ;;  %3945 = vmatpush1.bf16.msra.mxu1 %v5648_v60  ;;  %v5732_v59 = vld [vmem:[%s6665_s15 + $0x508] ss:$16 sps:$4 sm:$0xff]   ;;  %v5737_v60 = vld [vmem:[%s6665_s15 + $0x524] ss:$16 sps:$4 sm:$0xff]  }
  0xdc   : > { %3618 = vmatprep.subr.bf16.mxu0 %v5653_v61  ;;  %3946 = vmatprep.subr.bf16.mxu1 %v5656_v62  ;;  %v5740_v61 = vld [vmem:[%s6665_s15 + $0x52c] ss:$16 sps:$4 sm:$0xff]   ;;  %v5735_v62 = vld [vmem:[%s6665_s15 + $0x520] ss:$16 sps:$4 sm:$0xff]  }
  0xdf   : > { %3619 = vmatpush1.bf16.msra.mxu0 %v5651_v63  ;;  %3947 = vmatpush1.bf16.msra.mxu1 %v5654_v0  ;;  %v5738_v63 = vld [vmem:[%s6665_s15 + $0x528] ss:$16 sps:$4 sm:$0xff]   ;;  %v5743_v0 = vld [vmem:[%s6665_s15 + $0x544] ss:$16 sps:$4 sm:$0xff]  }
  0xe0   : > { %3620 = vmatprep.subr.bf16.mxu0 %v5659_v1  ;;  %3948 = vmatprep.subr.bf16.mxu1 %v5662_v2  ;;  %v5746_v1 = vld [vmem:[%s6665_s15 + $0x54c] ss:$16 sps:$4 sm:$0xff]   ;;  %v5741_v2 = vld [vmem:[%s6665_s15 + $0x540] ss:$16 sps:$4 sm:$0xff]  }
  0xe3   : > { %3621 = vmatpush1.bf16.msra.mxu0 %v5657_v3  ;;  %3949 = vmatpush1.bf16.msra.mxu1 %v5660_v4  ;;  %v5744_v3 = vld [vmem:[%s6665_s15 + $0x548] ss:$16 sps:$4 sm:$0xff]   ;;  %v5749_v4 = vld [vmem:[%s6665_s15 + $0x564] ss:$16 sps:$4 sm:$0xff]  }
  0xe4   : > { %3622 = vmatprep.subr.bf16.mxu0 %v5665_v5  ;;  %3950 = vmatprep.subr.bf16.mxu1 %v5668_v6  ;;  %v5752_v5 = vld [vmem:[%s6665_s15 + $0x56c] ss:$16 sps:$4 sm:$0xff]   ;;  %v5747_v6 = vld [vmem:[%s6665_s15 + $0x560] ss:$16 sps:$4 sm:$0xff]  }
  0xe7   : > { %3623 = vmatpush1.bf16.msra.mxu0 %v5663_v7  ;;  %3951 = vmatpush1.bf16.msra.mxu1 %v5666_v8  ;;  %v5750_v7 = vld [vmem:[%s6665_s15 + $0x568] ss:$16 sps:$4 sm:$0xff]   ;;  %v5755_v8 = vld [vmem:[%s6665_s15 + $0x584] ss:$16 sps:$4 sm:$0xff]  }
  0xe8   : > { %3624 = vmatprep.subr.bf16.mxu0 %v5671_v9  ;;  %3952 = vmatprep.subr.bf16.mxu1 %v5674_v10  ;;  %v5758_v9 = vld [vmem:[%s6665_s15 + $0x58c] ss:$16 sps:$4 sm:$0xff]   ;;  %v5753_v10 = vld [vmem:[%s6665_s15 + $0x580] ss:$16 sps:$4 sm:$0xff]  }
  0xeb   : > { %3625 = vmatpush1.bf16.msra.mxu0 %v5669_v12  ;;  %3953 = vmatpush1.bf16.msra.mxu1 %v5672_v13  ;;  %v5761_v12 = vld [vmem:[%s6665_s15 + $0x5a4] ss:$16 sps:$4 sm:$0xff]   ;;  %v5764_v13 = vld [vmem:[%s6665_s15 + $0x5ac] ss:$16 sps:$4 sm:$0xff]  }
  0xec   : > { %3626 = vmatprep.subr.bf16.mxu0 %v5677_v14  ;;  %3954 = vmatprep.subr.bf16.mxu1 %v5680_v16  ;;  %v5759_v14 = vld [vmem:[%s6665_s15 + $0x5a0] ss:$16 sps:$4 sm:$0xff]   ;;  %v5762_v16 = vld [vmem:[%s6665_s15 + $0x5a8] ss:$16 sps:$4 sm:$0xff]  }
  0xef   : > { %3627 = vmatpush1.bf16.msra.mxu0 %v5675_v18  ;;  %3955 = vmatpush1.bf16.msra.mxu1 %v5678_v54  ;;  %v5767_v18 = vld [vmem:[%s6665_s15 + $0x5c4] ss:$16 sps:$4 sm:$0xff]   ;;  %v5770_v54 = vld [vmem:[%s6665_s15 + $0x5cc] ss:$16 sps:$4 sm:$0xff]  }
  0xf0   : > { %3637 = vmatprep.subr.bf16.mxu0 %v5683_v19  ;;  %3965 = vmatprep.subr.bf16.mxu1 %v5686_v20  ;;  %v5765_v19 = vld [vmem:[%s6665_s15 + $0x5c0] ss:$16 sps:$4 sm:$0xff]   ;;  %v5768_v20 = vld [vmem:[%s6665_s15 + $0x5c8] ss:$16 sps:$4 sm:$0xff]  }
  0xf2   : > { %3629 = vmatmul.mubr.bf16.vlgmr.msra.gmra.mrb[0].mxu0 %v926_v23  ;;  %3957 = vmatmul.mubr.bf16.vlgmr.msra.gmra.mrb[0].mxu1 %v926_v23  ;;  %v5771_v23 = vld [vmem:[%s6665_s15 + $0x5e0] ss:$16 sps:$4 sm:$0xff]  }
  0xf3   : > { %3638 = vmatpush1.bf16.msra.mxu0 %v5681_v22  ;;  %3966 = vmatpush1.bf16.msra.mxu1 %v5684_v24  ;;  %v5776_v22 = vld [vmem:[%s6665_s15 + $0x5ec] ss:$16 sps:$4 sm:$0xff]   ;;  %v5774_v24 = vld [vmem:[%s6665_s15 + $0x5e8] ss:$16 sps:$4 sm:$0xff]  }
  0xf4   : > { %3639 = vmatprep.subr.bf16.mxu0 %v5689_v25  ;;  %3967 = vmatprep.subr.bf16.mxu1 %v5692_v26  ;;  %v5780_v25 = vld [vmem:[%s6665_s15 + $0x604] ss:$16 sps:$4 sm:$0xff]   ;;  %v5783_v26 = vld [vmem:[%s6665_s15 + $0x60c] ss:$16 sps:$4 sm:$0xff]  }
  0xf5   : > { %3669 = vmatprep.mubr.bf16.mxu0 %v6843_v27  ;;  %3997 = vmatprep.mubr.bf16.mxu1 %v6843_v27 }
  0xf7   : > { %3640 = vmatpush1.bf16.msra.mxu0 %v5687_v28  ;;  %3968 = vmatpush1.bf16.msra.mxu1 %v5690_v15  ;;  %v5778_v28 = vld [vmem:[%s6665_s15 + $0x600] ss:$16 sps:$4 sm:$0xff]   ;;  %v6910_v15 = vrot.slane %v6828_v17, %v6730_v51 }
  0xf8   : > { %3641 = vmatprep.subr.bf16.mxu0 %v5695_v29  ;;  %3969 = vmatprep.subr.bf16.mxu1 %v5698_v30  ;;  %v5781_v29 = vld [vmem:[%s6665_s15 + $0x608] ss:$16 sps:$4 sm:$0xff]   ;;  %v5786_v30 = vld [vmem:[%s6665_s15 + $0x624] ss:$16 sps:$4 sm:$0xff]   ;;  %v5784_v17 = vld [vmem:[%s6665_s15 + $0x620] ss:$16 sps:$4 sm:$0xff]  }
  0xfb   : > { %3642 = vmatpush1.bf16.msra.mxu0 %v5693_v31  ;;  %3970 = vmatpush1.bf16.msra.mxu1 %v5696_v32  ;;  %v5789_v31 = vld [vmem:[%s6665_s15 + $0x62c] ss:$16 sps:$4 sm:$0xff]   ;;  %v929_v32 = vcombine.high %v6843_v27, %v6843_v27  ;;  %v5790_v27 = vld [vmem:[%s6665_s15 + $0x640] ss:$16 sps:$4 sm:$0xff]  }
  0xfc   : > { %3643 = vmatprep.subr.bf16.mxu0 %v5701_v33  ;;  %3971 = vmatprep.subr.bf16.mxu1 %v5704_v34  ;;  %v5787_v33 = vld [vmem:[%s6665_s15 + $0x628] ss:$16 sps:$4 sm:$0xff]   ;;  %v5792_v34 = vld [vmem:[%s6665_s15 + $0x644] ss:$16 sps:$4 sm:$0xff]  }
  0xff   : > { %3644 = vmatpush1.bf16.msra.mxu0 %v5699_v35  ;;  %3972 = vmatpush1.bf16.msra.mxu1 %v5702_v36  ;;  %v5795_v35 = vld [vmem:[%s6665_s15 + $0x64c] ss:$16 sps:$4 sm:$0xff]   ;;  %v5793_v36 = vld [vmem:[%s6665_s15 + $0x648] ss:$16 sps:$4 sm:$0xff]  }
 0x100   : > { %3645 = vmatprep.subr.bf16.mxu0 %v5707_v37  ;;  %3973 = vmatprep.subr.bf16.mxu1 %v5710_v38  ;;  %v5798_v37 = vld [vmem:[%s6665_s15 + $0x664] ss:$16 sps:$4 sm:$0xff]   ;;  %v5801_v38 = vld [vmem:[%s6665_s15 + $0x66c] ss:$16 sps:$4 sm:$0xff]  }
 0x103   : > { %3646 = vmatpush1.bf16.msra.mxu0 %v5705_v39  ;;  %3974 = vmatpush1.bf16.msra.mxu1 %v5708_v40  ;;  %v5796_v39 = vld [vmem:[%s6665_s15 + $0x660] ss:$16 sps:$4 sm:$0xff]   ;;  %v5799_v40 = vld [vmem:[%s6665_s15 + $0x668] ss:$16 sps:$4 sm:$0xff]  }
 0x104   : > { %3647 = vmatprep.subr.bf16.mxu0 %v5713_v41  ;;  %3975 = vmatprep.subr.bf16.mxu1 %v5716_v42  ;;  %v5804_v41 = vld [vmem:[%s6665_s15 + $0x684] ss:$16 sps:$4 sm:$0xff]   ;;  %v5807_v42 = vld [vmem:[%s6665_s15 + $0x68c] ss:$16 sps:$4 sm:$0xff]  }
 0x107   : > { %3648 = vmatpush1.bf16.msra.mxu0 %v5711_v43  ;;  %3976 = vmatpush1.bf16.msra.mxu1 %v5714_v44  ;;  %v5802_v43 = vld [vmem:[%s6665_s15 + $0x680] ss:$16 sps:$4 sm:$0xff]   ;;  %v5805_v44 = vld [vmem:[%s6665_s15 + $0x688] ss:$16 sps:$4 sm:$0xff]  }
 0x108   : > { %3649 = vmatprep.subr.bf16.mxu0 %v5719_v46  ;;  %3977 = vmatprep.subr.bf16.mxu1 %v5722_v47  ;;  %v5810_v46 = vld [vmem:[%s6665_s15 + $0x6a4] ss:$16 sps:$4 sm:$0xff]   ;;  %v5813_v47 = vld [vmem:[%s6665_s15 + $0x6ac] ss:$16 sps:$4 sm:$0xff]  }
 0x10b   : > { %3650 = vmatpush1.bf16.msra.mxu0 %v5717_v48  ;;  %3978 = vmatpush1.bf16.msra.mxu1 %v5720_v49  ;;  %v5808_v48 = vld [vmem:[%s6665_s15 + $0x6a0] ss:$16 sps:$4 sm:$0xff]   ;;  %v5811_v49 = vld [vmem:[%s6665_s15 + $0x6a8] ss:$16 sps:$4 sm:$0xff]  }
 0x10c   : > { %3651 = vmatprep.subr.bf16.mxu0 %v5725_v50  ;;  %3979 = vmatprep.subr.bf16.mxu1 %v5728_v52  ;;  %v5816_v50 = vld [vmem:[%s6665_s15 + $0x6c4] ss:$16 sps:$4 sm:$0xff]   ;;  %v5819_v52 = vld [vmem:[%s6665_s15 + $0x6cc] ss:$16 sps:$4 sm:$0xff]  }
 0x10f   : > { %3652 = vmatpush1.bf16.msra.mxu0 %v5723_v53  ;;  %3980 = vmatpush1.bf16.msra.mxu1 %v5726_v55  ;;  %v5814_v53 = vld [vmem:[%s6665_s15 + $0x6c0] ss:$16 sps:$4 sm:$0xff]   ;;  %v5817_v55 = vld [vmem:[%s6665_s15 + $0x6c8] ss:$16 sps:$4 sm:$0xff]  }
 0x110   : > { %3653 = vmatprep.subr.bf16.mxu0 %v5731_v56  ;;  %3981 = vmatprep.subr.bf16.mxu1 %v5734_v57  ;;  %v5822_v56 = vld [vmem:[%s6665_s15 + $0x6e4] ss:$16 sps:$4 sm:$0xff]   ;;  %v5825_v57 = vld [vmem:[%s6665_s15 + $0x6ec] ss:$16 sps:$4 sm:$0xff]  }
 0x113   : > { %3654 = vmatpush1.bf16.msra.mxu0 %v5729_v58  ;;  %3982 = vmatpush1.bf16.msra.mxu1 %v5732_v59  ;;  %v5820_v58 = vld [vmem:[%s6665_s15 + $0x6e0] ss:$16 sps:$4 sm:$0xff]   ;;  %v5823_v59 = vld [vmem:[%s6665_s15 + $0x6e8] ss:$16 sps:$4 sm:$0xff]  }
 0x114   : > { %3655 = vmatprep.subr.bf16.mxu0 %v5737_v60  ;;  %3983 = vmatprep.subr.bf16.mxu1 %v5740_v61  ;;  %v5828_v60 = vld [vmem:[%s6665_s15 + $0x704] ss:$16 sps:$4 sm:$0xff]   ;;  %v5831_v61 = vld [vmem:[%s6665_s15 + $0x70c] ss:$16 sps:$4 sm:$0xff]  }
 0x117   : > { %3656 = vmatpush1.bf16.msra.mxu0 %v5735_v62  ;;  %3984 = vmatpush1.bf16.msra.mxu1 %v5738_v63  ;;  %v5826_v62 = vld [vmem:[%s6665_s15 + $0x700] ss:$16 sps:$4 sm:$0xff]   ;;  %v5829_v63 = vld [vmem:[%s6665_s15 + $0x708] ss:$16 sps:$4 sm:$0xff]  }
 0x118   : > { %3657 = vmatprep.subr.bf16.mxu0 %v5743_v0  ;;  %3985 = vmatprep.subr.bf16.mxu1 %v5746_v1  ;;  %v5834_v0 = vld [vmem:[%s6665_s15 + $0x724] ss:$16 sps:$4 sm:$0xff]   ;;  %v5837_v1 = vld [vmem:[%s6665_s15 + $0x72c] ss:$16 sps:$4 sm:$0xff]  }
 0x11b   : > { %3658 = vmatpush1.bf16.msra.mxu0 %v5741_v2  ;;  %3986 = vmatpush1.bf16.msra.mxu1 %v5744_v3  ;;  %v5832_v2 = vld [vmem:[%s6665_s15 + $0x720] ss:$16 sps:$4 sm:$0xff]   ;;  %v5835_v3 = vld [vmem:[%s6665_s15 + $0x728] ss:$16 sps:$4 sm:$0xff]  }
 0x11c   : > { %3659 = vmatprep.subr.bf16.mxu0 %v5749_v4  ;;  %3987 = vmatprep.subr.bf16.mxu1 %v5752_v5  ;;  %v5840_v4 = vld [vmem:[%s6665_s15 + $0x744] ss:$16 sps:$4 sm:$0xff]   ;;  %v5843_v5 = vld [vmem:[%s6665_s15 + $0x74c] ss:$16 sps:$4 sm:$0xff]  }
 0x11f   : > { %3660 = vmatpush1.bf16.msra.mxu0 %v5747_v6  ;;  %3988 = vmatpush1.bf16.msra.mxu1 %v5750_v7  ;;  %v5838_v6 = vld [vmem:[%s6665_s15 + $0x740] ss:$16 sps:$4 sm:$0xff]   ;;  %v5841_v7 = vld [vmem:[%s6665_s15 + $0x748] ss:$16 sps:$4 sm:$0xff]  }
 0x120   : > { %3661 = vmatprep.subr.bf16.mxu0 %v5755_v8  ;;  %3989 = vmatprep.subr.bf16.mxu1 %v5758_v9  ;;  %v5846_v8 = vld [vmem:[%s6665_s15 + $0x764] ss:$16 sps:$4 sm:$0xff]   ;;  %v5849_v9 = vld [vmem:[%s6665_s15 + $0x76c] ss:$16 sps:$4 sm:$0xff]  }
 0x123   : > { %3662 = vmatpush1.bf16.msra.mxu0 %v5753_v10  ;;  %3990 = vmatpush1.bf16.msra.mxu1 %v5756_v11  ;;  %v5844_v10 = vld [vmem:[%s6665_s15 + $0x760] ss:$16 sps:$4 sm:$0xff]   ;;  %v5847_v11 = vld [vmem:[%s6665_s15 + $0x768] ss:$16 sps:$4 sm:$0xff]  }
 0x124   : > { %3663 = vmatprep.subr.bf16.mxu0 %v5761_v12  ;;  %3991 = vmatprep.subr.bf16.mxu1 %v5764_v13  ;;  %v5852_v12 = vld [vmem:[%s6665_s15 + $0x784] ss:$16 sps:$4 sm:$0xff]   ;;  %v5855_v13 = vld [vmem:[%s6665_s15 + $0x78c] ss:$16 sps:$4 sm:$0xff]  }
 0x127   : > { %3664 = vmatpush1.bf16.msra.mxu0 %v5759_v14  ;;  %3992 = vmatpush1.bf16.msra.mxu1 %v5762_v16  ;;  %v5850_v14 = vld [vmem:[%s6665_s15 + $0x780] ss:$16 sps:$4 sm:$0xff]   ;;  %v5853_v16 = vld [vmem:[%s6665_s15 + $0x788] ss:$16 sps:$4 sm:$0xff]  }
 0x128   : > { %3665 = vmatprep.subr.bf16.mxu0 %v5767_v18  ;;  %3993 = vmatprep.subr.bf16.mxu1 %v5770_v54  ;;  %v5858_v18 = vld [vmem:[%s6665_s15 + $0x7a4] ss:$16 sps:$4 sm:$0xff]   ;;  %v5861_v54 = vld [vmem:[%s6665_s15 + $0x7ac] ss:$16 sps:$4 sm:$0xff]  }
 0x12b   : > { %3666 = vmatpush1.bf16.msra.mxu0 %v5765_v19  ;;  %3994 = vmatpush1.bf16.msra.mxu1 %v5768_v20  ;;  %v5856_v19 = vld [vmem:[%s6665_s15 + $0x7a0] ss:$16 sps:$4 sm:$0xff]   ;;  %v5859_v20 = vld [vmem:[%s6665_s15 + $0x7a8] ss:$16 sps:$4 sm:$0xff]  }
 0x12c   : > { %3667 = vmatprep.subr.bf16.mxu0 %v5773_v21  ;;  %3995 = vmatprep.subr.bf16.mxu1 %v5776_v22  ;;  %v5864_v21 = vld [vmem:[%s6665_s15 + $0x7c4] ss:$16 sps:$4 sm:$0xff]   ;;  %v5867_v22 = vld [vmem:[%s6665_s15 + $0x7cc] ss:$16 sps:$4 sm:$0xff]  }
 0x12f   : > { %3668 = vmatpush1.bf16.msra.mxu0 %v5771_v23  ;;  %3996 = vmatpush1.bf16.msra.mxu1 %v5774_v24  ;;  %v6972_v23 = vld [vmem:[%s6679_s12 + $0x8] sm:$0xff] }
 0x130   : > { %3678 = vmatprep.subr.bf16.mxu0 %v5780_v25  ;;  %4006 = vmatprep.subr.bf16.mxu1 %v5783_v26  ;;  %v5862_v24 = vld [vmem:[%s6665_s15 + $0x7c0] ss:$16 sps:$4 sm:$0xff]   ;;  %v5865_v25 = vld [vmem:[%s6665_s15 + $0x7c8] ss:$16 sps:$4 sm:$0xff]   ;;  %v5870_v26 = vld [vmem:[%s6665_s15 + $0x7e4] ss:$16 sps:$4 sm:$0xff]  }
 0x132   : > { %3670 = vmatmul.mubr.bf16.vlgmr.msra.gmra.mrb[0].mxu0 %v6910_v15  ;;  %3998 = vmatmul.mubr.bf16.vlgmr.msra.gmra.mrb[0].mxu1 %v6910_v15 }
 0x133   : > { %3679 = vmatpush1.bf16.msra.mxu0 %v5778_v28  ;;  %4007 = vmatpush1.bf16.msra.mxu1 %v5781_v29  ;;  %v5873_v28 = vld [vmem:[%s6665_s15 + $0x7ec] ss:$16 sps:$4 sm:$0xff]   ;;  %v6980_v29 = vrot.slane %v6972_v23, %v6730_v51 }
 0x134   : > { %3680 = vmatprep.subr.bf16.mxu0 %v5786_v30  ;;  %4008 = vmatprep.subr.bf16.mxu1 %v5789_v31  ;;  %v5868_v30 = vld [vmem:[%s6665_s15 + $0x7e0] ss:$16 sps:$4 sm:$0xff]   ;;  %v5871_v31 = vld [vmem:[%s6665_s15 + $0x7e8] ss:$16 sps:$4 sm:$0xff]  }
 0x135   : > { %3710 = vmatprep.mubr.bf16.mxu0 %v929_v32  ;;  %4038 = vmatprep.mubr.bf16.mxu1 %v929_v32  ;;  %v5876_v32 = vld [vmem:[%s6665_s15 + $0x804] ss:$16 sps:$4 sm:$0xff]  }
 0x137   : > { %3681 = vmatpush1.bf16.msra.mxu0 %v5784_v17  ;;  %4009 = vmatpush1.bf16.msra.mxu1 %v5787_v33  ;;  %v5879_v17 = vld [vmem:[%s6665_s15 + $0x80c] ss:$16 sps:$4 sm:$0xff]   ;;  %v945_v33 = vcombine.high %v6980_v29, %v6980_v29 }
 0x138   : > { %3682 = vmatprep.subr.bf16.mxu0 %v5792_v34  ;;  %4010 = vmatprep.subr.bf16.mxu1 %v5795_v35  ;;  %v927_v34 = vcombine.high %v6910_v15, %v6910_v15  ;;  %v5874_v35 = vld [vmem:[%s6665_s15 + $0x800] ss:$16 sps:$4 sm:$0xff]  }
 0x139   : > { %v5880_v15 = vld [vmem:[%s6665_s15 + $0x820] ss:$16 sps:$4 sm:$0xff]  }
 0x13b   : > { %3683 = vmatpush1.bf16.msra.mxu0 %v5790_v27  ;;  %4011 = vmatpush1.bf16.msra.mxu1 %v5793_v36  ;;  %v5877_v27 = vld [vmem:[%s6665_s15 + $0x808] ss:$16 sps:$4 sm:$0xff]   ;;  %v5882_v36 = vld [vmem:[%s6665_s15 + $0x824] ss:$16 sps:$4 sm:$0xff]  }
 0x13c   : > { %3684 = vmatprep.subr.bf16.mxu0 %v5798_v37  ;;  %4012 = vmatprep.subr.bf16.mxu1 %v5801_v38  ;;  %v5885_v37 = vld [vmem:[%s6665_s15 + $0x82c] ss:$16 sps:$4 sm:$0xff]   ;;  %v6995_v38 = vrot.slane %v945_v33, %v6730_v51  ;;  %v5961_v33 = vld [vmem:[%s6665_s15 + $0x9c8] ss:$16 sps:$4 sm:$0xff]  }
 0x13f   : > { %3685 = vmatpush1.bf16.msra.mxu0 %v5796_v39  ;;  %4013 = vmatpush1.bf16.msra.mxu1 %v5799_v40  ;;  %v5883_v39 = vld [vmem:[%s6665_s15 + $0x828] ss:$16 sps:$4 sm:$0xff]   ;;  %v5888_v40 = vld [vmem:[%s6665_s15 + $0x844] ss:$16 sps:$4 sm:$0xff]  }
 0x140   : > { %3686 = vmatprep.subr.bf16.mxu0 %v5804_v41  ;;  %4014 = vmatprep.subr.bf16.mxu1 %v5807_v42  ;;  %v5891_v41 = vld [vmem:[%s6665_s15 + $0x84c] ss:$16 sps:$4 sm:$0xff]   ;;  %v5886_v42 = vld [vmem:[%s6665_s15 + $0x840] ss:$16 sps:$4 sm:$0xff]  }
 0x143   : > { %3687 = vmatpush1.bf16.msra.mxu0 %v5802_v43  ;;  %4015 = vmatpush1.bf16.msra.mxu1 %v5805_v44  ;;  %v5889_v43 = vld [vmem:[%s6665_s15 + $0x848] ss:$16 sps:$4 sm:$0xff]   ;;  %v5894_v44 = vld [vmem:[%s6665_s15 + $0x864] ss:$16 sps:$4 sm:$0xff]  }
 0x144   : > { %3688 = vmatprep.subr.bf16.mxu0 %v5810_v46  ;;  %4016 = vmatprep.subr.bf16.mxu1 %v5813_v47  ;;  %v5897_v46 = vld [vmem:[%s6665_s15 + $0x86c] ss:$16 sps:$4 sm:$0xff]   ;;  %v5892_v47 = vld [vmem:[%s6665_s15 + $0x860] ss:$16 sps:$4 sm:$0xff]  }
 0x147   : > { %3689 = vmatpush1.bf16.msra.mxu0 %v5808_v48  ;;  %4017 = vmatpush1.bf16.msra.mxu1 %v5811_v49  ;;  %v5895_v48 = vld [vmem:[%s6665_s15 + $0x868] ss:$16 sps:$4 sm:$0xff]   ;;  %v5900_v49 = vld [vmem:[%s6665_s15 + $0x884] ss:$16 sps:$4 sm:$0xff]  }
 0x148   : > { %3690 = vmatprep.subr.bf16.mxu0 %v5816_v50  ;;  %4018 = vmatprep.subr.bf16.mxu1 %v5819_v52  ;;  %v5903_v50 = vld [vmem:[%s6665_s15 + $0x88c] ss:$16 sps:$4 sm:$0xff]   ;;  %v5898_v52 = vld [vmem:[%s6665_s15 + $0x880] ss:$16 sps:$4 sm:$0xff]  }
 0x14b   : > { %3691 = vmatpush1.bf16.msra.mxu0 %v5814_v53  ;;  %4019 = vmatpush1.bf16.msra.mxu1 %v5817_v55  ;;  %v5901_v53 = vld [vmem:[%s6665_s15 + $0x888] ss:$16 sps:$4 sm:$0xff]   ;;  %v5906_v55 = vld [vmem:[%s6665_s15 + $0x8a4] ss:$16 sps:$4 sm:$0xff]  }
 0x14c   : > { %3692 = vmatprep.subr.bf16.mxu0 %v5822_v56  ;;  %4020 = vmatprep.subr.bf16.mxu1 %v5825_v57  ;;  %v5909_v56 = vld [vmem:[%s6665_s15 + $0x8ac] ss:$16 sps:$4 sm:$0xff]   ;;  %v5904_v57 = vld [vmem:[%s6665_s15 + $0x8a0] ss:$16 sps:$4 sm:$0xff]  }
 0x14f   : > { %3693 = vmatpush1.bf16.msra.mxu0 %v5820_v58  ;;  %4021 = vmatpush1.bf16.msra.mxu1 %v5823_v59  ;;  %v5907_v58 = vld [vmem:[%s6665_s15 + $0x8a8] ss:$16 sps:$4 sm:$0xff]   ;;  %v5912_v59 = vld [vmem:[%s6665_s15 + $0x8c4] ss:$16 sps:$4 sm:$0xff]  }
 0x150   : > { %3694 = vmatprep.subr.bf16.mxu0 %v5828_v60  ;;  %4022 = vmatprep.subr.bf16.mxu1 %v5831_v61  ;;  %v5915_v60 = vld [vmem:[%s6665_s15 + $0x8cc] ss:$16 sps:$4 sm:$0xff]   ;;  %v5910_v61 = vld [vmem:[%s6665_s15 + $0x8c0] ss:$16 sps:$4 sm:$0xff]  }
 0x153   : > { %3695 = vmatpush1.bf16.msra.mxu0 %v5826_v62  ;;  %4023 = vmatpush1.bf16.msra.mxu1 %v5829_v63  ;;  %v5913_v62 = vld [vmem:[%s6665_s15 + $0x8c8] ss:$16 sps:$4 sm:$0xff]   ;;  %v5918_v63 = vld [vmem:[%s6665_s15 + $0x8e4] ss:$16 sps:$4 sm:$0xff]  }
 0x154   : > { %3696 = vmatprep.subr.bf16.mxu0 %v5834_v0  ;;  %4024 = vmatprep.subr.bf16.mxu1 %v5837_v1  ;;  %v5921_v0 = vld [vmem:[%s6665_s15 + $0x8ec] ss:$16 sps:$4 sm:$0xff]   ;;  %v5916_v1 = vld [vmem:[%s6665_s15 + $0x8e0] ss:$16 sps:$4 sm:$0xff]  }
 0x157   : > { %3697 = vmatpush1.bf16.msra.mxu0 %v5832_v2  ;;  %4025 = vmatpush1.bf16.msra.mxu1 %v5835_v3  ;;  %v5919_v2 = vld [vmem:[%s6665_s15 + $0x8e8] ss:$16 sps:$4 sm:$0xff]   ;;  %v5924_v3 = vld [vmem:[%s6665_s15 + $0x904] ss:$16 sps:$4 sm:$0xff]  }
 0x158   : > { %3698 = vmatprep.subr.bf16.mxu0 %v5840_v4  ;;  %4026 = vmatprep.subr.bf16.mxu1 %v5843_v5  ;;  %v5927_v4 = vld [vmem:[%s6665_s15 + $0x90c] ss:$16 sps:$4 sm:$0xff]   ;;  %v5922_v5 = vld [vmem:[%s6665_s15 + $0x900] ss:$16 sps:$4 sm:$0xff]  }
 0x15b   : > { %3699 = vmatpush1.bf16.msra.mxu0 %v5838_v6  ;;  %4027 = vmatpush1.bf16.msra.mxu1 %v5841_v7  ;;  %v5925_v6 = vld [vmem:[%s6665_s15 + $0x908] ss:$16 sps:$4 sm:$0xff]   ;;  %v5930_v7 = vld [vmem:[%s6665_s15 + $0x924] ss:$16 sps:$4 sm:$0xff]  }
 0x15c   : > { %3700 = vmatprep.subr.bf16.mxu0 %v5846_v8  ;;  %4028 = vmatprep.subr.bf16.mxu1 %v5849_v9  ;;  %v5933_v8 = vld [vmem:[%s6665_s15 + $0x92c] ss:$16 sps:$4 sm:$0xff]   ;;  %v5928_v9 = vld [vmem:[%s6665_s15 + $0x920] ss:$16 sps:$4 sm:$0xff]  }
 0x15f   : > { %3701 = vmatpush1.bf16.msra.mxu0 %v5844_v10  ;;  %4029 = vmatpush1.bf16.msra.mxu1 %v5847_v11  ;;  %v5931_v10 = vld [vmem:[%s6665_s15 + $0x928] ss:$16 sps:$4 sm:$0xff]   ;;  %v5936_v11 = vld [vmem:[%s6665_s15 + $0x944] ss:$16 sps:$4 sm:$0xff]  }
 0x160   : > { %3702 = vmatprep.subr.bf16.mxu0 %v5852_v12  ;;  %4030 = vmatprep.subr.bf16.mxu1 %v5855_v13  ;;  %v5939_v12 = vld [vmem:[%s6665_s15 + $0x94c] ss:$16 sps:$4 sm:$0xff]   ;;  %v5934_v13 = vld [vmem:[%s6665_s15 + $0x940] ss:$16 sps:$4 sm:$0xff]  }
 0x163   : > { %3703 = vmatpush1.bf16.msra.mxu0 %v5850_v14  ;;  %4031 = vmatpush1.bf16.msra.mxu1 %v5853_v16  ;;  %v5937_v14 = vld [vmem:[%s6665_s15 + $0x948] ss:$16 sps:$4 sm:$0xff]   ;;  %v5942_v16 = vld [vmem:[%s6665_s15 + $0x964] ss:$16 sps:$4 sm:$0xff]  }
 0x164   : > { %3704 = vmatprep.subr.bf16.mxu0 %v5858_v18  ;;  %4032 = vmatprep.subr.bf16.mxu1 %v5861_v54  ;;  %v5945_v18 = vld [vmem:[%s6665_s15 + $0x96c] ss:$16 sps:$4 sm:$0xff]   ;;  %v5940_v54 = vld [vmem:[%s6665_s15 + $0x960] ss:$16 sps:$4 sm:$0xff]  }
 0x167   : > { %3705 = vmatpush1.bf16.msra.mxu0 %v5856_v19  ;;  %4033 = vmatpush1.bf16.msra.mxu1 %v5859_v20  ;;  %v5943_v19 = vld [vmem:[%s6665_s15 + $0x968] ss:$16 sps:$4 sm:$0xff]   ;;  %v5948_v20 = vld [vmem:[%s6665_s15 + $0x984] ss:$16 sps:$4 sm:$0xff]  }
 0x168   : > { %3706 = vmatprep.subr.bf16.mxu0 %v5864_v21  ;;  %4034 = vmatprep.subr.bf16.mxu1 %v5867_v22  ;;  %v5951_v21 = vld [vmem:[%s6665_s15 + $0x98c] ss:$16 sps:$4 sm:$0xff]   ;;  %v5946_v22 = vld [vmem:[%s6665_s15 + $0x980] ss:$16 sps:$4 sm:$0xff]  }
 0x16b   : > { %3707 = vmatpush1.bf16.msra.mxu0 %v5862_v24  ;;  %4035 = vmatpush1.bf16.msra.mxu1 %v5865_v25  ;;  %v5949_v24 = vld [vmem:[%s6665_s15 + $0x988] ss:$16 sps:$4 sm:$0xff]   ;;  %v5954_v25 = vld [vmem:[%s6665_s15 + $0x9a4] ss:$16 sps:$4 sm:$0xff]  }
 0x16c   : > { %3708 = vmatprep.subr.bf16.mxu0 %v5870_v26  ;;  %4036 = vmatprep.subr.bf16.mxu1 %v5873_v28  ;;  %v5957_v26 = vld [vmem:[%s6665_s15 + $0x9ac] ss:$16 sps:$4 sm:$0xff]   ;;  %v5952_v28 = vld [vmem:[%s6665_s15 + $0x9a0] ss:$16 sps:$4 sm:$0xff]  }
 0x16f   : > { %3709 = vmatpush1.bf16.msra.mxu0 %v5868_v30  ;;  %4037 = vmatpush1.bf16.msra.mxu1 %v5871_v31  ;;  %v5955_v30 = vld [vmem:[%s6665_s15 + $0x9a8] ss:$16 sps:$4 sm:$0xff]   ;;  %v5960_v31 = vld [vmem:[%s6665_s15 + $0x9c4] ss:$16 sps:$4 sm:$0xff]  }
 0x170   : > { %3719 = vmatprep.subr.bf16.mxu0 %v5876_v32  ;;  %4047 = vmatprep.subr.bf16.mxu1 %v5879_v17  ;;  %v5963_v32 = vld [vmem:[%s6665_s15 + $0x9cc] ss:$16 sps:$4 sm:$0xff]   ;;  %v5958_v17 = vld [vmem:[%s6665_s15 + $0x9c0] ss:$16 sps:$4 sm:$0xff]  }
 0x172   : > { %3711 = vmatmul.mubr.bf16.vlgmr.msra.gmra.mrb[0].mxu0 %v927_v34  ;;  %4039 = vmatmul.mubr.bf16.vlgmr.msra.gmra.mrb[0].mxu1 %v927_v34  ;;  %v5966_v34 = vld [vmem:[%s6665_s15 + $0x9e4] ss:$16 sps:$4 sm:$0xff]  }
 0x173   : > { %3720 = vmatpush1.bf16.msra.mxu0 %v5874_v35  ;;  %4048 = vmatpush1.bf16.msra.mxu1 %v5877_v27  ;;  %v5969_v35 = vld [vmem:[%s6665_s15 + $0x9ec] ss:$16 sps:$4 sm:$0xff]   ;;  %v5964_v27 = vld [vmem:[%s6665_s15 + $0x9e0] ss:$16 sps:$4 sm:$0xff]  }
 0x174   : > { %3721 = vmatprep.subr.bf16.mxu0 %v5882_v36  ;;  %4049 = vmatprep.subr.bf16.mxu1 %v5885_v37  ;;  %v5967_v36 = vld [vmem:[%s6665_s15 + $0x9e8] ss:$16 sps:$4 sm:$0xff]   ;;  %v5972_v37 = vld [vmem:[%s6665_s15 + $0xa04] ss:$16 sps:$4 sm:$0xff]  }
 0x175   : > { %3751 = vmatprep.mubr.bf16.mxu0 %v6995_v38  ;;  %4079 = vmatprep.mubr.bf16.mxu1 %v6995_v38 }
 0x177   : > { %3722 = vmatpush1.bf16.msra.mxu0 %v5880_v15  ;;  %4050 = vmatpush1.bf16.msra.mxu1 %v5883_v39  ;;  %v5975_v15 = vld [vmem:[%s6665_s15 + $0xa0c] ss:$16 sps:$4 sm:$0xff]   ;;  %v7061_v39 = vrot.slane %v6980_v29, %v6730_v51  ;;  %v5976_v29 = vld [vmem:[%s6665_s15 + $0xa20] ss:$16 sps:$4 sm:$0xff]  }
 0x178   : > { %3723 = vmatprep.subr.bf16.mxu0 %v5888_v40  ;;  %4051 = vmatprep.subr.bf16.mxu1 %v5891_v41  ;;  %v5970_v40 = vld [vmem:[%s6665_s15 + $0xa00] ss:$16 sps:$4 sm:$0xff]   ;;  %v5973_v41 = vld [vmem:[%s6665_s15 + $0xa08] ss:$16 sps:$4 sm:$0xff]  }
 0x17b   : > { %3724 = vmatpush1.bf16.msra.mxu0 %v5886_v42  ;;  %4052 = vmatpush1.bf16.msra.mxu1 %v5889_v43  ;;  %v5978_v42 = vld [vmem:[%s6665_s15 + $0xa24] ss:$16 sps:$4 sm:$0xff]   ;;  %v5981_v43 = vld [vmem:[%s6665_s15 + $0xa2c] ss:$16 sps:$4 sm:$0xff]  }
 0x17c   : > { %3725 = vmatprep.subr.bf16.mxu0 %v5894_v44  ;;  %4053 = vmatprep.subr.bf16.mxu1 %v5897_v46  ;;  %v977_v44 = vcombine.high %v6995_v38, %v6995_v38  ;;  %v5979_v46 = vld [vmem:[%s6665_s15 + $0xa28] ss:$16 sps:$4 sm:$0xff]   ;;  %v5982_v38 = vld [vmem:[%s6665_s15 + $0xa40] ss:$16 sps:$4 sm:$0xff]  }
 0x17f   : > { %3726 = vmatpush1.bf16.msra.mxu0 %v5892_v47  ;;  %4054 = vmatpush1.bf16.msra.mxu1 %v5895_v48  ;;  %v5984_v47 = vld [vmem:[%s6665_s15 + $0xa44] ss:$16 sps:$4 sm:$0xff]   ;;  %v5987_v48 = vld [vmem:[%s6665_s15 + $0xa4c] ss:$16 sps:$4 sm:$0xff]  }
 0x180   : > { %3727 = vmatprep.subr.bf16.mxu0 %v5900_v49  ;;  %4055 = vmatprep.subr.bf16.mxu1 %v5903_v50  ;;  %v5985_v49 = vld [vmem:[%s6665_s15 + $0xa48] ss:$16 sps:$4 sm:$0xff]   ;;  %v5990_v50 = vld [vmem:[%s6665_s15 + $0xa64] ss:$16 sps:$4 sm:$0xff]  }
 0x183   : > { %3728 = vmatpush1.bf16.msra.mxu0 %v5898_v52  ;;  %4056 = vmatpush1.bf16.msra.mxu1 %v5901_v53  ;;  %v5993_v52 = vld [vmem:[%s6665_s15 + $0xa6c] ss:$16 sps:$4 sm:$0xff]   ;;  %v5988_v53 = vld [vmem:[%s6665_s15 + $0xa60] ss:$16 sps:$4 sm:$0xff]  }
 0x184   : > { %3729 = vmatprep.subr.bf16.mxu0 %v5906_v55  ;;  %4057 = vmatprep.subr.bf16.mxu1 %v5909_v56  ;;  %v5991_v55 = vld [vmem:[%s6665_s15 + $0xa68] ss:$16 sps:$4 sm:$0xff]   ;;  %v5996_v56 = vld [vmem:[%s6665_s15 + $0xa84] ss:$16 sps:$4 sm:$0xff]  }
 0x187   : > { %3730 = vmatpush1.bf16.msra.mxu0 %v5904_v57  ;;  %4058 = vmatpush1.bf16.msra.mxu1 %v5907_v58  ;;  %v5999_v57 = vld [vmem:[%s6665_s15 + $0xa8c] ss:$16 sps:$4 sm:$0xff]   ;;  %v5994_v58 = vld [vmem:[%s6665_s15 + $0xa80] ss:$16 sps:$4 sm:$0xff]  }
 0x188   : > { %3731 = vmatprep.subr.bf16.mxu0 %v5912_v59  ;;  %4059 = vmatprep.subr.bf16.mxu1 %v5915_v60  ;;  %v5997_v59 = vld [vmem:[%s6665_s15 + $0xa88] ss:$16 sps:$4 sm:$0xff]   ;;  %v6002_v60 = vld [vmem:[%s6665_s15 + $0xaa4] ss:$16 sps:$4 sm:$0xff]  }
 0x18b   : > { %3732 = vmatpush1.bf16.msra.mxu0 %v5910_v61  ;;  %4060 = vmatpush1.bf16.msra.mxu1 %v5913_v62  ;;  %v6005_v61 = vld [vmem:[%s6665_s15 + $0xaac] ss:$16 sps:$4 sm:$0xff]   ;;  %v6000_v62 = vld [vmem:[%s6665_s15 + $0xaa0] ss:$16 sps:$4 sm:$0xff]  }
 0x18c   : > { %3733 = vmatprep.subr.bf16.mxu0 %v5918_v63  ;;  %4061 = vmatprep.subr.bf16.mxu1 %v5921_v0  ;;  %v6003_v63 = vld [vmem:[%s6665_s15 + $0xaa8] ss:$16 sps:$4 sm:$0xff]   ;;  %v6008_v0 = vld [vmem:[%s6665_s15 + $0xac4] ss:$16 sps:$4 sm:$0xff]  }
 0x18f   : > { %3734 = vmatpush1.bf16.msra.mxu0 %v5916_v1  ;;  %4062 = vmatpush1.bf16.msra.mxu1 %v5919_v2  ;;  %v6011_v1 = vld [vmem:[%s6665_s15 + $0xacc] ss:$16 sps:$4 sm:$0xff]   ;;  %v6006_v2 = vld [vmem:[%s6665_s15 + $0xac0] ss:$16 sps:$4 sm:$0xff]  }
 0x190   : > { %3735 = vmatprep.subr.bf16.mxu0 %v5924_v3  ;;  %4063 = vmatprep.subr.bf16.mxu1 %v5927_v4  ;;  %v6009_v3 = vld [vmem:[%s6665_s15 + $0xac8] ss:$16 sps:$4 sm:$0xff]   ;;  %v6014_v4 = vld [vmem:[%s6665_s15 + $0xae4] ss:$16 sps:$4 sm:$0xff]  }
 0x193   : > { %3736 = vmatpush1.bf16.msra.mxu0 %v5922_v5  ;;  %4064 = vmatpush1.bf16.msra.mxu1 %v5925_v6  ;;  %v6017_v5 = vld [vmem:[%s6665_s15 + $0xaec] ss:$16 sps:$4 sm:$0xff]   ;;  %v6012_v6 = vld [vmem:[%s6665_s15 + $0xae0] ss:$16 sps:$4 sm:$0xff]  }
 0x194   : > { %3737 = vmatprep.subr.bf16.mxu0 %v5930_v7  ;;  %4065 = vmatprep.subr.bf16.mxu1 %v5933_v8  ;;  %v6015_v7 = vld [vmem:[%s6665_s15 + $0xae8] ss:$16 sps:$4 sm:$0xff]   ;;  %v6020_v8 = vld [vmem:[%s6665_s15 + $0xb04] ss:$16 sps:$4 sm:$0xff]  }
 0x197   : > { %3738 = vmatpush1.bf16.msra.mxu0 %v5928_v9  ;;  %4066 = vmatpush1.bf16.msra.mxu1 %v5931_v10  ;;  %v6023_v9 = vld [vmem:[%s6665_s15 + $0xb0c] ss:$16 sps:$4 sm:$0xff]   ;;  %v6018_v10 = vld [vmem:[%s6665_s15 + $0xb00] ss:$16 sps:$4 sm:$0xff]  }
 0x198   : > { %3739 = vmatprep.subr.bf16.mxu0 %v5936_v11  ;;  %4067 = vmatprep.subr.bf16.mxu1 %v5939_v12  ;;  %v6021_v11 = vld [vmem:[%s6665_s15 + $0xb08] ss:$16 sps:$4 sm:$0xff]   ;;  %v6026_v12 = vld [vmem:[%s6665_s15 + $0xb24] ss:$16 sps:$4 sm:$0xff]  }
 0x19b   : > { %3740 = vmatpush1.bf16.msra.mxu0 %v5934_v13  ;;  %4068 = vmatpush1.bf16.msra.mxu1 %v5937_v14  ;;  %v6029_v13 = vld [vmem:[%s6665_s15 + $0xb2c] ss:$16 sps:$4 sm:$0xff]   ;;  %v6024_v14 = vld [vmem:[%s6665_s15 + $0xb20] ss:$16 sps:$4 sm:$0xff]  }
 0x19c   : > { %3741 = vmatprep.subr.bf16.mxu0 %v5942_v16  ;;  %4069 = vmatprep.subr.bf16.mxu1 %v5945_v18  ;;  %v6027_v16 = vld [vmem:[%s6665_s15 + $0xb28] ss:$16 sps:$4 sm:$0xff]   ;;  %v6032_v18 = vld [vmem:[%s6665_s15 + $0xb44] ss:$16 sps:$4 sm:$0xff]  }
 0x19f   : > { %3742 = vmatpush1.bf16.msra.mxu0 %v5940_v54  ;;  %4070 = vmatpush1.bf16.msra.mxu1 %v5943_v19  ;;  %v6035_v54 = vld [vmem:[%s6665_s15 + $0xb4c] ss:$16 sps:$4 sm:$0xff]   ;;  %v6030_v19 = vld [vmem:[%s6665_s15 + $0xb40] ss:$16 sps:$4 sm:$0xff]  }
 0x1a0   : > { %3743 = vmatprep.subr.bf16.mxu0 %v5948_v20  ;;  %4071 = vmatprep.subr.bf16.mxu1 %v5951_v21  ;;  %v6033_v20 = vld [vmem:[%s6665_s15 + $0xb48] ss:$16 sps:$4 sm:$0xff]   ;;  %v6038_v21 = vld [vmem:[%s6665_s15 + $0xb64] ss:$16 sps:$4 sm:$0xff]  }
 0x1a3   : > { %3744 = vmatpush1.bf16.msra.mxu0 %v5946_v22  ;;  %4072 = vmatpush1.bf16.msra.mxu1 %v5949_v24  ;;  %v6041_v22 = vld [vmem:[%s6665_s15 + $0xb6c] ss:$16 sps:$4 sm:$0xff]   ;;  %v6036_v24 = vld [vmem:[%s6665_s15 + $0xb60] ss:$16 sps:$4 sm:$0xff]  }
 0x1a4   : > { %3745 = vmatprep.subr.bf16.mxu0 %v5954_v25  ;;  %4073 = vmatprep.subr.bf16.mxu1 %v5957_v26  ;;  %v6039_v25 = vld [vmem:[%s6665_s15 + $0xb68] ss:$16 sps:$4 sm:$0xff]   ;;  %v6044_v26 = vld [vmem:[%s6665_s15 + $0xb84] ss:$16 sps:$4 sm:$0xff]  }
 0x1a7   : > { %3746 = vmatpush1.bf16.msra.mxu0 %v5952_v28  ;;  %4074 = vmatpush1.bf16.msra.mxu1 %v5955_v30  ;;  %v6047_v28 = vld [vmem:[%s6665_s15 + $0xb8c] ss:$16 sps:$4 sm:$0xff]   ;;  %v6042_v30 = vld [vmem:[%s6665_s15 + $0xb80] ss:$16 sps:$4 sm:$0xff]  }
 0x1a8   : > { %3747 = vmatprep.subr.bf16.mxu0 %v5960_v31  ;;  %4075 = vmatprep.subr.bf16.mxu1 %v5963_v32  ;;  %v6045_v31 = vld [vmem:[%s6665_s15 + $0xb88] ss:$16 sps:$4 sm:$0xff]   ;;  %v6050_v32 = vld [vmem:[%s6665_s15 + $0xba4] ss:$16 sps:$4 sm:$0xff]  }
 0x1ab   : > { %3748 = vmatpush1.bf16.msra.mxu0 %v5958_v17  ;;  %4076 = vmatpush1.bf16.msra.mxu1 %v5961_v33  ;;  %v6053_v17 = vld [vmem:[%s6665_s15 + $0xbac] ss:$16 sps:$4 sm:$0xff]   ;;  %v6048_v33 = vld [vmem:[%s6665_s15 + $0xba0] ss:$16 sps:$4 sm:$0xff]  }
 0x1ac   : > { %3749 = vmatprep.subr.bf16.mxu0 %v5966_v34  ;;  %4077 = vmatprep.subr.bf16.mxu1 %v5969_v35  ;;  %v6051_v34 = vld [vmem:[%s6665_s15 + $0xba8] ss:$16 sps:$4 sm:$0xff]   ;;  %v6056_v35 = vld [vmem:[%s6665_s15 + $0xbc4] ss:$16 sps:$4 sm:$0xff]  }
 0x1af   : > { %3750 = vmatpush1.bf16.msra.mxu0 %v5964_v27  ;;  %4078 = vmatpush1.bf16.msra.mxu1 %v5967_v36  ;;  %v6059_v27 = vld [vmem:[%s6665_s15 + $0xbcc] ss:$16 sps:$4 sm:$0xff]   ;;  %v930_v36 = vcombine.high %v6972_v23, %v6972_v23  ;;  %v6060_v23 = vld [vmem:[%s6665_s15 + $0xbe0] ss:$16 sps:$4 sm:$0xff]  }
 0x1b0   : > { %3760 = vmatprep.subr.bf16.mxu0 %v5972_v37  ;;  %4088 = vmatprep.subr.bf16.mxu1 %v5975_v15  ;;  %v6054_v37 = vld [vmem:[%s6665_s15 + $0xbc0] ss:$16 sps:$4 sm:$0xff]   ;;  %v6057_v15 = vld [vmem:[%s6665_s15 + $0xbc8] ss:$16 sps:$4 sm:$0xff]  }
 0x1b2   : > { %3752 = vmatmul.mubr.bf16.vlgmr.msra.gmra.mrb[0].mxu0 %v7061_v39  ;;  %4080 = vmatmul.mubr.bf16.vlgmr.msra.gmra.mrb[0].mxu1 %v7061_v39 }
 0x1b3   : > { %3761 = vmatpush1.bf16.msra.mxu0 %v5970_v40  ;;  %4089 = vmatpush1.bf16.msra.mxu1 %v5973_v41  ;;  %v6062_v40 = vld [vmem:[%s6665_s15 + $0xbe4] ss:$16 sps:$4 sm:$0xff]   ;;  %v6065_v41 = vld [vmem:[%s6665_s15 + $0xbec] ss:$16 sps:$4 sm:$0xff]  }
 0x1b4   : > { %3762 = vmatprep.subr.bf16.mxu0 %v5978_v42  ;;  %4090 = vmatprep.subr.bf16.mxu1 %v5981_v43  ;;  %v7130_v42 = vrot.slane %v930_v36, %v6730_v51  ;;  %v6063_v43 = vld [vmem:[%s6665_s15 + $0xbe8] ss:$16 sps:$4 sm:$0xff]  }
 0x1b5   : > { %3792 = vmatprep.mubr.bf16.mxu0 %v977_v44  ;;  %4120 = vmatprep.mubr.bf16.mxu1 %v977_v44  ;;  %v6068_v44 = vld [vmem:[%s6665_s15 + $0xc04] ss:$16 sps:$4 sm:$0xff]   ;;  %v6141_v36 = vld [vmem:[%s6665_s15 + $0xd88] ss:$16 sps:$4 sm:$0xff]  }
 0x1b7   : > { %3763 = vmatpush1.bf16.msra.mxu0 %v5976_v29  ;;  %4091 = vmatpush1.bf16.msra.mxu1 %v5979_v46  ;;  %v6071_v29 = vld [vmem:[%s6665_s15 + $0xc0c] ss:$16 sps:$4 sm:$0xff]   ;;  %v946_v46 = vcombine.high %v7130_v42, %v7130_v42 }
 0x1b8   : > { %3764 = vmatprep.subr.bf16.mxu0 %v5984_v47  ;;  %4092 = vmatprep.subr.bf16.mxu1 %v5987_v48  ;;  %v975_v47 = vcombine.high %v7061_v39, %v7061_v39  ;;  %v6066_v48 = vld [vmem:[%s6665_s15 + $0xc00] ss:$16 sps:$4 sm:$0xff]  }
 0x1b9   : > { %v6072_v39 = vld [vmem:[%s6665_s15 + $0xc20] ss:$16 sps:$4 sm:$0xff]  }
 0x1bb   : > { %3765 = vmatpush1.bf16.msra.mxu0 %v5982_v38  ;;  %4093 = vmatpush1.bf16.msra.mxu1 %v5985_v49  ;;  %v6069_v38 = vld [vmem:[%s6665_s15 + $0xc08] ss:$16 sps:$4 sm:$0xff]   ;;  %v6074_v49 = vld [vmem:[%s6665_s15 + $0xc24] ss:$16 sps:$4 sm:$0xff]  }
 0x1bc   : > { %3766 = vmatprep.subr.bf16.mxu0 %v5990_v50  ;;  %4094 = vmatprep.subr.bf16.mxu1 %v5993_v52  ;;  %v6077_v50 = vld [vmem:[%s6665_s15 + $0xc2c] ss:$16 sps:$4 sm:$0xff]   ;;  %v7145_v52 = vrot.slane %v946_v46, %v6730_v51  ;;  %v6158_v46 = vld [vmem:[%s6665_s15 + $0xde4] ss:$16 sps:$4 sm:$0xff]  }
 0x1bf   : > { %3767 = vmatpush1.bf16.msra.mxu0 %v5988_v53  ;;  %4095 = vmatpush1.bf16.msra.mxu1 %v5991_v55  ;;  %v6075_v53 = vld [vmem:[%s6665_s15 + $0xc28] ss:$16 sps:$4 sm:$0xff]   ;;  %v6080_v55 = vld [vmem:[%s6665_s15 + $0xc44] ss:$16 sps:$4 sm:$0xff]  }
 0x1c0   : > { %3768 = vmatprep.subr.bf16.mxu0 %v5996_v56  ;;  %4096 = vmatprep.subr.bf16.mxu1 %v5999_v57  ;;  %v6083_v56 = vld [vmem:[%s6665_s15 + $0xc4c] ss:$16 sps:$4 sm:$0xff]   ;;  %v6078_v57 = vld [vmem:[%s6665_s15 + $0xc40] ss:$16 sps:$4 sm:$0xff]  }
 0x1c3   : > { %3769 = vmatpush1.bf16.msra.mxu0 %v5994_v58  ;;  %4097 = vmatpush1.bf16.msra.mxu1 %v5997_v59  ;;  %v6081_v58 = vld [vmem:[%s6665_s15 + $0xc48] ss:$16 sps:$4 sm:$0xff]   ;;  %v6086_v59 = vld [vmem:[%s6665_s15 + $0xc64] ss:$16 sps:$4 sm:$0xff]  }
 0x1c4   : > { %3770 = vmatprep.subr.bf16.mxu0 %v6002_v60  ;;  %4098 = vmatprep.subr.bf16.mxu1 %v6005_v61  ;;  %v6089_v60 = vld [vmem:[%s6665_s15 + $0xc6c] ss:$16 sps:$4 sm:$0xff]   ;;  %v6084_v61 = vld [vmem:[%s6665_s15 + $0xc60] ss:$16 sps:$4 sm:$0xff]  }
 0x1c7   : > { %3771 = vmatpush1.bf16.msra.mxu0 %v6000_v62  ;;  %4099 = vmatpush1.bf16.msra.mxu1 %v6003_v63  ;;  %v6087_v62 = vld [vmem:[%s6665_s15 + $0xc68] ss:$16 sps:$4 sm:$0xff]   ;;  %v6092_v63 = vld [vmem:[%s6665_s15 + $0xc84] ss:$16 sps:$4 sm:$0xff]  }
 0x1c8   : > { %3772 = vmatprep.subr.bf16.mxu0 %v6008_v0  ;;  %4100 = vmatprep.subr.bf16.mxu1 %v6011_v1  ;;  %v6095_v0 = vld [vmem:[%s6665_s15 + $0xc8c] ss:$16 sps:$4 sm:$0xff]   ;;  %v6090_v1 = vld [vmem:[%s6665_s15 + $0xc80] ss:$16 sps:$4 sm:$0xff]  }
 0x1cb   : > { %3773 = vmatpush1.bf16.msra.mxu0 %v6006_v2  ;;  %4101 = vmatpush1.bf16.msra.mxu1 %v6009_v3  ;;  %v6093_v2 = vld [vmem:[%s6665_s15 + $0xc88] ss:$16 sps:$4 sm:$0xff]   ;;  %v6098_v3 = vld [vmem:[%s6665_s15 + $0xca4] ss:$16 sps:$4 sm:$0xff]  }
 0x1cc   : > { %3774 = vmatprep.subr.bf16.mxu0 %v6014_v4  ;;  %4102 = vmatprep.subr.bf16.mxu1 %v6017_v5  ;;  %v6101_v4 = vld [vmem:[%s6665_s15 + $0xcac] ss:$16 sps:$4 sm:$0xff]   ;;  %v6096_v5 = vld [vmem:[%s6665_s15 + $0xca0] ss:$16 sps:$4 sm:$0xff]  }
 0x1cf   : > { %3775 = vmatpush1.bf16.msra.mxu0 %v6012_v6  ;;  %4103 = vmatpush1.bf16.msra.mxu1 %v6015_v7  ;;  %v6099_v6 = vld [vmem:[%s6665_s15 + $0xca8] ss:$16 sps:$4 sm:$0xff]   ;;  %v6104_v7 = vld [vmem:[%s6665_s15 + $0xcc4] ss:$16 sps:$4 sm:$0xff]  }
 0x1d0   : > { %3776 = vmatprep.subr.bf16.mxu0 %v6020_v8  ;;  %4104 = vmatprep.subr.bf16.mxu1 %v6023_v9  ;;  %v6107_v8 = vld [vmem:[%s6665_s15 + $0xccc] ss:$16 sps:$4 sm:$0xff]   ;;  %v6102_v9 = vld [vmem:[%s6665_s15 + $0xcc0] ss:$16 sps:$4 sm:$0xff]  }
 0x1d3   : > { %3777 = vmatpush1.bf16.msra.mxu0 %v6018_v10  ;;  %4105 = vmatpush1.bf16.msra.mxu1 %v6021_v11  ;;  %v6105_v10 = vld [vmem:[%s6665_s15 + $0xcc8] ss:$16 sps:$4 sm:$0xff]   ;;  %v6110_v11 = vld [vmem:[%s6665_s15 + $0xce4] ss:$16 sps:$4 sm:$0xff]  }
 0x1d4   : > { %3778 = vmatprep.subr.bf16.mxu0 %v6026_v12  ;;  %4106 = vmatprep.subr.bf16.mxu1 %v6029_v13  ;;  %v6113_v12 = vld [vmem:[%s6665_s15 + $0xcec] ss:$16 sps:$4 sm:$0xff]   ;;  %v6108_v13 = vld [vmem:[%s6665_s15 + $0xce0] ss:$16 sps:$4 sm:$0xff]  }
 0x1d7   : > { %3779 = vmatpush1.bf16.msra.mxu0 %v6024_v14  ;;  %4107 = vmatpush1.bf16.msra.mxu1 %v6027_v16  ;;  %v6111_v14 = vld [vmem:[%s6665_s15 + $0xce8] ss:$16 sps:$4 sm:$0xff]   ;;  %v6116_v16 = vld [vmem:[%s6665_s15 + $0xd04] ss:$16 sps:$4 sm:$0xff]  }
 0x1d8   : > { %3780 = vmatprep.subr.bf16.mxu0 %v6032_v18  ;;  %4108 = vmatprep.subr.bf16.mxu1 %v6035_v54  ;;  %v6119_v18 = vld [vmem:[%s6665_s15 + $0xd0c] ss:$16 sps:$4 sm:$0xff]   ;;  %v6114_v54 = vld [vmem:[%s6665_s15 + $0xd00] ss:$16 sps:$4 sm:$0xff]  }
 0x1db   : > { %3781 = vmatpush1.bf16.msra.mxu0 %v6030_v19  ;;  %4109 = vmatpush1.bf16.msra.mxu1 %v6033_v20  ;;  %v6117_v19 = vld [vmem:[%s6665_s15 + $0xd08] ss:$16 sps:$4 sm:$0xff]   ;;  %v6122_v20 = vld [vmem:[%s6665_s15 + $0xd24] ss:$16 sps:$4 sm:$0xff]  }
 0x1dc   : > { %3782 = vmatprep.subr.bf16.mxu0 %v6038_v21  ;;  %4110 = vmatprep.subr.bf16.mxu1 %v6041_v22  ;;  %v6125_v21 = vld [vmem:[%s6665_s15 + $0xd2c] ss:$16 sps:$4 sm:$0xff]   ;;  %v6120_v22 = vld [vmem:[%s6665_s15 + $0xd20] ss:$16 sps:$4 sm:$0xff]  }
 0x1df   : > { %3783 = vmatpush1.bf16.msra.mxu0 %v6036_v24  ;;  %4111 = vmatpush1.bf16.msra.mxu1 %v6039_v25  ;;  %v6123_v24 = vld [vmem:[%s6665_s15 + $0xd28] ss:$16 sps:$4 sm:$0xff]   ;;  %v6128_v25 = vld [vmem:[%s6665_s15 + $0xd44] ss:$16 sps:$4 sm:$0xff]  }
 0x1e0   : > { %3784 = vmatprep.subr.bf16.mxu0 %v6044_v26  ;;  %4112 = vmatprep.subr.bf16.mxu1 %v6047_v28  ;;  %v6131_v26 = vld [vmem:[%s6665_s15 + $0xd4c] ss:$16 sps:$4 sm:$0xff]   ;;  %v6126_v28 = vld [vmem:[%s6665_s15 + $0xd40] ss:$16 sps:$4 sm:$0xff]  }
 0x1e3   : > { %3785 = vmatpush1.bf16.msra.mxu0 %v6042_v30  ;;  %4113 = vmatpush1.bf16.msra.mxu1 %v6045_v31  ;;  %v6129_v30 = vld [vmem:[%s6665_s15 + $0xd48] ss:$16 sps:$4 sm:$0xff]   ;;  %v6134_v31 = vld [vmem:[%s6665_s15 + $0xd64] ss:$16 sps:$4 sm:$0xff]  }
 0x1e4   : > { %3786 = vmatprep.subr.bf16.mxu0 %v6050_v32  ;;  %4114 = vmatprep.subr.bf16.mxu1 %v6053_v17  ;;  %v6137_v32 = vld [vmem:[%s6665_s15 + $0xd6c] ss:$16 sps:$4 sm:$0xff]   ;;  %v6132_v17 = vld [vmem:[%s6665_s15 + $0xd60] ss:$16 sps:$4 sm:$0xff]  }
 0x1e7   : > { %3787 = vmatpush1.bf16.msra.mxu0 %v6048_v33  ;;  %4115 = vmatpush1.bf16.msra.mxu1 %v6051_v34  ;;  %v6135_v33 = vld [vmem:[%s6665_s15 + $0xd68] ss:$16 sps:$4 sm:$0xff]   ;;  %v6140_v34 = vld [vmem:[%s6665_s15 + $0xd84] ss:$16 sps:$4 sm:$0xff]  }
 0x1e8   : > { %3788 = vmatprep.subr.bf16.mxu0 %v6056_v35  ;;  %4116 = vmatprep.subr.bf16.mxu1 %v6059_v27  ;;  %v6143_v35 = vld [vmem:[%s6665_s15 + $0xd8c] ss:$16 sps:$4 sm:$0xff]   ;;  %v6138_v27 = vld [vmem:[%s6665_s15 + $0xd80] ss:$16 sps:$4 sm:$0xff]  }
 0x1eb   : > { %3789 = vmatpush1.bf16.msra.mxu0 %v6054_v37  ;;  %4117 = vmatpush1.bf16.msra.mxu1 %v6057_v15  ;;  %v6146_v37 = vld [vmem:[%s6665_s15 + $0xda4] ss:$16 sps:$4 sm:$0xff]   ;;  %v6149_v15 = vld [vmem:[%s6665_s15 + $0xdac] ss:$16 sps:$4 sm:$0xff]  }
 0x1ec   : > { %3790 = vmatprep.subr.bf16.mxu0 %v6062_v40  ;;  %4118 = vmatprep.subr.bf16.mxu1 %v6065_v41  ;;  %v6144_v40 = vld [vmem:[%s6665_s15 + $0xda0] ss:$16 sps:$4 sm:$0xff]   ;;  %v6147_v41 = vld [vmem:[%s6665_s15 + $0xda8] ss:$16 sps:$4 sm:$0xff]  }
 0x1ef   : > { %3791 = vmatpush1.bf16.msra.mxu0 %v6060_v23  ;;  %4119 = vmatpush1.bf16.msra.mxu1 %v6063_v43  ;;  %v6152_v23 = vld [vmem:[%s6665_s15 + $0xdc4] ss:$16 sps:$4 sm:$0xff]   ;;  %v6155_v43 = vld [vmem:[%s6665_s15 + $0xdcc] ss:$16 sps:$4 sm:$0xff]  }
 0x1f0   : > { %3801 = vmatprep.subr.bf16.mxu0 %v6068_v44  ;;  %4129 = vmatprep.subr.bf16.mxu1 %v6071_v29  ;;  %v6150_v44 = vld [vmem:[%s6665_s15 + $0xdc0] ss:$16 sps:$4 sm:$0xff]   ;;  %v6153_v29 = vld [vmem:[%s6665_s15 + $0xdc8] ss:$16 sps:$4 sm:$0xff]  }
 0x1f2   : > { %3793 = vmatmul.mubr.bf16.vlgmr.msra.gmra.mrb[0].mxu0 %v975_v47  ;;  %4121 = vmatmul.mubr.bf16.vlgmr.msra.gmra.mrb[0].mxu1 %v975_v47  ;;  %v6161_v47 = vld [vmem:[%s6665_s15 + $0xdec] ss:$16 sps:$4 sm:$0xff]  }
 0x1f3   : > { %3802 = vmatpush1.bf16.msra.mxu0 %v6066_v48  ;;  %4130 = vmatpush1.bf16.msra.mxu1 %v6069_v38  ;;  %v6156_v48 = vld [vmem:[%s6665_s15 + $0xde0] ss:$16 sps:$4 sm:$0xff]   ;;  %v6159_v38 = vld [vmem:[%s6665_s15 + $0xde8] ss:$16 sps:$4 sm:$0xff]  }
 0x1f4   : > { %3803 = vmatprep.subr.bf16.mxu0 %v6074_v49  ;;  %4131 = vmatprep.subr.bf16.mxu1 %v6077_v50  ;;  %v6165_v49 = vld [vmem:[%s6665_s15 + $0xe04] ss:$16 sps:$4 sm:$0xff]   ;;  %v6168_v50 = vld [vmem:[%s6665_s15 + $0xe0c] ss:$16 sps:$4 sm:$0xff]  }
 0x1f5   : > { %3833 = vmatprep.mubr.bf16.mxu0 %v7145_v52  ;;  %4161 = vmatprep.mubr.bf16.mxu1 %v7145_v52 }
 0x1f7   : > { %3804 = vmatpush1.bf16.msra.mxu0 %v6072_v39  ;;  %4132 = vmatpush1.bf16.msra.mxu1 %v6075_v53  ;;  %v7211_v39 = vrot.slane %v7130_v42, %v6730_v51  ;;  %v6163_v53 = vld [vmem:[%s6665_s15 + $0xe00] ss:$16 sps:$4 sm:$0xff]   ;;  %v6172_v42 = vld [vmem:[%s6665_s15 + $0xe28] ss:$16 sps:$4 sm:$0xff]  }
 0x1f8   : > { %3805 = vmatprep.subr.bf16.mxu0 %v6080_v55  ;;  %4133 = vmatprep.subr.bf16.mxu1 %v6083_v56  ;;  %v6166_v55 = vld [vmem:[%s6665_s15 + $0xe08] ss:$16 sps:$4 sm:$0xff]   ;;  %v6171_v56 = vld [vmem:[%s6665_s15 + $0xe24] ss:$16 sps:$4 sm:$0xff]   ;;  %v6169_v51 = vld [vmem:[%s6665_s15 + $0xe20] ss:$16 sps:$4 sm:$0xff]  }
 0x1fb   : > { %3806 = vmatpush1.bf16.msra.mxu0 %v6078_v57  ;;  %4134 = vmatpush1.bf16.msra.mxu1 %v6081_v58  ;;  %v6174_v57 = vld [vmem:[%s6665_s15 + $0xe2c] ss:$16 sps:$4 sm:$0xff]   ;;  %v978_v58 = vcombine.high %v7145_v52, %v7145_v52  ;;  %v6175_v52 = vld [vmem:[%s6665_s15 + $0xe40] ss:$16 sps:$4 sm:$0xff]  }
 0x1fc   : > { %3807 = vmatprep.subr.bf16.mxu0 %v6086_v59  ;;  %4135 = vmatprep.subr.bf16.mxu1 %v6089_v60  ;;  %v6177_v59 = vld [vmem:[%s6665_s15 + $0xe44] ss:$16 sps:$4 sm:$0xff]   ;;  %v6180_v60 = vld [vmem:[%s6665_s15 + $0xe4c] ss:$16 sps:$4 sm:$0xff]  }
 0x1ff   : > { %3808 = vmatpush1.bf16.msra.mxu0 %v6084_v61  ;;  %4136 = vmatpush1.bf16.msra.mxu1 %v6087_v62  ;;  %v6178_v61 = vld [vmem:[%s6665_s15 + $0xe48] ss:$16 sps:$4 sm:$0xff]   ;;  %v6183_v62 = vld [vmem:[%s6665_s15 + $0xe64] ss:$16 sps:$4 sm:$0xff]  }
 0x200   : > { %3809 = vmatprep.subr.bf16.mxu0 %v6092_v63  ;;  %4137 = vmatprep.subr.bf16.mxu1 %v6095_v0  ;;  %v6186_v63 = vld [vmem:[%s6665_s15 + $0xe6c] ss:$16 sps:$4 sm:$0xff]   ;;  %v6181_v0 = vld [vmem:[%s6665_s15 + $0xe60] ss:$16 sps:$4 sm:$0xff]  }
 0x203   : > { %3810 = vmatpush1.bf16.msra.mxu0 %v6090_v1  ;;  %4138 = vmatpush1.bf16.msra.mxu1 %v6093_v2  ;;  %v6184_v1 = vld [vmem:[%s6665_s15 + $0xe68] ss:$16 sps:$4 sm:$0xff]   ;;  %v6189_v2 = vld [vmem:[%s6665_s15 + $0xe84] ss:$16 sps:$4 sm:$0xff]  }
 0x204   : > { %3811 = vmatprep.subr.bf16.mxu0 %v6098_v3  ;;  %4139 = vmatprep.subr.bf16.mxu1 %v6101_v4  ;;  %v6192_v3 = vld [vmem:[%s6665_s15 + $0xe8c] ss:$16 sps:$4 sm:$0xff]   ;;  %v6187_v4 = vld [vmem:[%s6665_s15 + $0xe80] ss:$16 sps:$4 sm:$0xff]  }
 0x207   : > { %3812 = vmatpush1.bf16.msra.mxu0 %v6096_v5  ;;  %4140 = vmatpush1.bf16.msra.mxu1 %v6099_v6  ;;  %v6190_v5 = vld [vmem:[%s6665_s15 + $0xe88] ss:$16 sps:$4 sm:$0xff]   ;;  %v6195_v6 = vld [vmem:[%s6665_s15 + $0xea4] ss:$16 sps:$4 sm:$0xff]  }
 0x208   : > { %3813 = vmatprep.subr.bf16.mxu0 %v6104_v7  ;;  %4141 = vmatprep.subr.bf16.mxu1 %v6107_v8  ;;  %v6198_v7 = vld [vmem:[%s6665_s15 + $0xeac] ss:$16 sps:$4 sm:$0xff]   ;;  %v6193_v8 = vld [vmem:[%s6665_s15 + $0xea0] ss:$16 sps:$4 sm:$0xff]  }
 0x20b   : > { %3814 = vmatpush1.bf16.msra.mxu0 %v6102_v9  ;;  %4142 = vmatpush1.bf16.msra.mxu1 %v6105_v10  ;;  %v6196_v9 = vld [vmem:[%s6665_s15 + $0xea8] ss:$16 sps:$4 sm:$0xff]   ;;  %v6201_v10 = vld [vmem:[%s6665_s15 + $0xec4] ss:$16 sps:$4 sm:$0xff]  }
 0x20c   : > { %3815 = vmatprep.subr.bf16.mxu0 %v6110_v11  ;;  %4143 = vmatprep.subr.bf16.mxu1 %v6113_v12  ;;  %v6204_v11 = vld [vmem:[%s6665_s15 + $0xecc] ss:$16 sps:$4 sm:$0xff]   ;;  %v6199_v12 = vld [vmem:[%s6665_s15 + $0xec0] ss:$16 sps:$4 sm:$0xff]  }
 0x20f   : > { %3816 = vmatpush1.bf16.msra.mxu0 %v6108_v13  ;;  %4144 = vmatpush1.bf16.msra.mxu1 %v6111_v14  ;;  %v6202_v13 = vld [vmem:[%s6665_s15 + $0xec8] ss:$16 sps:$4 sm:$0xff]   ;;  %v6207_v14 = vld [vmem:[%s6665_s15 + $0xee4] ss:$16 sps:$4 sm:$0xff]  }
 0x210   : > { %3817 = vmatprep.subr.bf16.mxu0 %v6116_v16  ;;  %4145 = vmatprep.subr.bf16.mxu1 %v6119_v18  ;;  %v6210_v16 = vld [vmem:[%s6665_s15 + $0xeec] ss:$16 sps:$4 sm:$0xff]   ;;  %v6205_v18 = vld [vmem:[%s6665_s15 + $0xee0] ss:$16 sps:$4 sm:$0xff]  }
 0x213   : > { %3818 = vmatpush1.bf16.msra.mxu0 %v6114_v54  ;;  %4146 = vmatpush1.bf16.msra.mxu1 %v6117_v19  ;;  %v6208_v54 = vld [vmem:[%s6665_s15 + $0xee8] ss:$16 sps:$4 sm:$0xff]   ;;  %v6213_v19 = vld [vmem:[%s6665_s15 + $0xf04] ss:$16 sps:$4 sm:$0xff]  }
 0x214   : > { %3819 = vmatprep.subr.bf16.mxu0 %v6122_v20  ;;  %4147 = vmatprep.subr.bf16.mxu1 %v6125_v21  ;;  %v6216_v20 = vld [vmem:[%s6665_s15 + $0xf0c] ss:$16 sps:$4 sm:$0xff]   ;;  %v6211_v21 = vld [vmem:[%s6665_s15 + $0xf00] ss:$16 sps:$4 sm:$0xff]  }
 0x217   : > { %3820 = vmatpush1.bf16.msra.mxu0 %v6120_v22  ;;  %4148 = vmatpush1.bf16.msra.mxu1 %v6123_v24  ;;  %v6214_v22 = vld [vmem:[%s6665_s15 + $0xf08] ss:$16 sps:$4 sm:$0xff]   ;;  %v6219_v24 = vld [vmem:[%s6665_s15 + $0xf24] ss:$16 sps:$4 sm:$0xff]  }
 0x218   : > { %3821 = vmatprep.subr.bf16.mxu0 %v6128_v25  ;;  %4149 = vmatprep.subr.bf16.mxu1 %v6131_v26  ;;  %v6222_v25 = vld [vmem:[%s6665_s15 + $0xf2c] ss:$16 sps:$4 sm:$0xff]   ;;  %v6217_v26 = vld [vmem:[%s6665_s15 + $0xf20] ss:$16 sps:$4 sm:$0xff]  }
 0x21b   : > { %3822 = vmatpush1.bf16.msra.mxu0 %v6126_v28  ;;  %4150 = vmatpush1.bf16.msra.mxu1 %v6129_v30  ;;  %v6220_v28 = vld [vmem:[%s6665_s15 + $0xf28] ss:$16 sps:$4 sm:$0xff]   ;;  %v6225_v30 = vld [vmem:[%s6665_s15 + $0xf44] ss:$16 sps:$4 sm:$0xff]  }
 0x21c   : > { %3823 = vmatprep.subr.bf16.mxu0 %v6134_v31  ;;  %4151 = vmatprep.subr.bf16.mxu1 %v6137_v32  ;;  %v6228_v31 = vld [vmem:[%s6665_s15 + $0xf4c] ss:$16 sps:$4 sm:$0xff]   ;;  %v6223_v32 = vld [vmem:[%s6665_s15 + $0xf40] ss:$16 sps:$4 sm:$0xff]  }
 0x21f   : > { %3824 = vmatpush1.bf16.msra.mxu0 %v6132_v17  ;;  %4152 = vmatpush1.bf16.msra.mxu1 %v6135_v33  ;;  %v6226_v17 = vld [vmem:[%s6665_s15 + $0xf48] ss:$16 sps:$4 sm:$0xff]   ;;  %v6231_v33 = vld [vmem:[%s6665_s15 + $0xf64] ss:$16 sps:$4 sm:$0xff]  }
 0x220   : > { %3825 = vmatprep.subr.bf16.mxu0 %v6140_v34  ;;  %4153 = vmatprep.subr.bf16.mxu1 %v6143_v35  ;;  %v6234_v34 = vld [vmem:[%s6665_s15 + $0xf6c] ss:$16 sps:$4 sm:$0xff]   ;;  %v6229_v35 = vld [vmem:[%s6665_s15 + $0xf60] ss:$16 sps:$4 sm:$0xff]  }
 0x223   : > { %3826 = vmatpush1.bf16.msra.mxu0 %v6138_v27  ;;  %4154 = vmatpush1.bf16.msra.mxu1 %v6141_v36  ;;  %v6232_v27 = vld [vmem:[%s6665_s15 + $0xf68] ss:$16 sps:$4 sm:$0xff]   ;;  %v6237_v36 = vld [vmem:[%s6665_s15 + $0xf84] ss:$16 sps:$4 sm:$0xff]  }
 0x224   : > { %3827 = vmatprep.subr.bf16.mxu0 %v6146_v37  ;;  %4155 = vmatprep.subr.bf16.mxu1 %v6149_v15  ;;  %v6240_v37 = vld [vmem:[%s6665_s15 + $0xf8c] ss:$16 sps:$4 sm:$0xff]   ;;  %v6235_v15 = vld [vmem:[%s6665_s15 + $0xf80] ss:$16 sps:$4 sm:$0xff]  }
 0x227   : > { %3828 = vmatpush1.bf16.msra.mxu0 %v6144_v40  ;;  %4156 = vmatpush1.bf16.msra.mxu1 %v6147_v41  ;;  %v6238_v40 = vld [vmem:[%s6665_s15 + $0xf88] ss:$16 sps:$4 sm:$0xff]   ;;  %v6243_v41 = vld [vmem:[%s6665_s15 + $0xfa4] ss:$16 sps:$4 sm:$0xff]  }
 0x228   : > { %3829 = vmatprep.subr.bf16.mxu0 %v6152_v23  ;;  %4157 = vmatprep.subr.bf16.mxu1 %v6155_v43  ;;  %v6246_v23 = vld [vmem:[%s6665_s15 + $0xfac] ss:$16 sps:$4 sm:$0xff]   ;;  %v6241_v43 = vld [vmem:[%s6665_s15 + $0xfa0] ss:$16 sps:$4 sm:$0xff]  }
 0x22b   : > { %3830 = vmatpush1.bf16.msra.mxu0 %v6150_v44  ;;  %4158 = vmatpush1.bf16.msra.mxu1 %v6153_v29  ;;  %v6244_v44 = vld [vmem:[%s6665_s15 + $0xfa8] ss:$16 sps:$4 sm:$0xff]   ;;  %v6249_v29 = vld [vmem:[%s6665_s15 + $0xfc4] ss:$16 sps:$4 sm:$0xff]  }
 0x22c   : > { %3831 = vmatprep.subr.bf16.mxu0 %v6158_v46  ;;  %4159 = vmatprep.subr.bf16.mxu1 %v6161_v47  ;;  %v6252_v46 = vld [vmem:[%s6665_s15 + $0xfcc] ss:$16 sps:$4 sm:$0xff]   ;;  %v6247_v47 = vld [vmem:[%s6665_s15 + $0xfc0] ss:$16 sps:$4 sm:$0xff]  }
 0x22f   : > { %3832 = vmatpush1.bf16.msra.mxu0 %v6156_v48  ;;  %4160 = vmatpush1.bf16.msra.mxu1 %v6159_v38  ;;  %v6250_v48 = vld [vmem:[%s6665_s15 + $0xfc8] ss:$16 sps:$4 sm:$0xff]   ;;  %v6255_v38 = vld [vmem:[%s6665_s15 + $0xfe4] ss:$16 sps:$4 sm:$0xff]  }
 0x230   : > { %3842 = vmatprep.subr.bf16.mxu0 %v6165_v49  ;;  %4170 = vmatprep.subr.bf16.mxu1 %v6168_v50  ;;  %v6258_v49 = vld [vmem:[%s6665_s15 + $0xfec] ss:$16 sps:$4 sm:$0xff]   ;;  %v6253_v50 = vld [vmem:[%s6665_s15 + $0xfe0] ss:$16 sps:$4 sm:$0xff]  }
 0x232   : > { %3834 = vmatmul.mubr.bf16.vlgmr.msra.gmra.mrb[0].mxu0 %v7211_v39  ;;  %4162 = vmatmul.mubr.bf16.vlgmr.msra.gmra.mrb[0].mxu1 %v7211_v39 }
 0x233   : > { %3843 = vmatpush1.bf16.msra.mxu0 %v6163_v53  ;;  %4171 = vmatpush1.bf16.msra.mxu1 %v6166_v55  ;;  %v6256_v53 = vld [vmem:[%s6665_s15 + $0xfe8] ss:$16 sps:$4 sm:$0xff]   ;;  %v976_v55 = vcombine.high %v7211_v39, %v7211_v39 }
 0x234   : > { %3844 = vmatprep.subr.bf16.mxu0 %v6171_v56  ;;  %4172 = vmatprep.subr.bf16.mxu1 %v6174_v57  ;;  %v6454_v56 = vmov 1983009808  }
 0x235   : > { %3874 = vmatprep.mubr.bf16.mxu0 %v978_v58  ;;  %4202 = vmatprep.mubr.bf16.mxu1 %v978_v58  ;;  %v4218_v57 = vunpack.c.l.s4 %v6454_v56 }
 0x237   : > { %3845 = vmatpush1.bf16.msra.mxu0 %v6169_v51  ;;  %4173 = vmatpush1.bf16.msra.mxu1 %v6172_v42  ;;  %v4219_v58 = vunpack.c.0.s8 %v4218_v57 }
 0x238   : > { %3846 = vmatprep.subr.bf16.mxu0 %v6177_v59  ;;  %4174 = vmatprep.subr.bf16.mxu1 %v6180_v60 }
 0x239   : > { %v7282_v59 = vsub.s32 %v4219_v58, %v6722_v45 }
 0x23b   : > { %3847 = vmatpush1.bf16.msra.mxu0 %v6175_v52  ;;  %4175 = vmatpush1.bf16.msra.mxu1 %v6178_v61 }
 0x23c   : > { %3848 = vmatprep.subr.bf16.mxu0 %v6183_v62  ;;  %4176 = vmatprep.subr.bf16.mxu1 %v6186_v63 }
 0x23f   : > { %3849 = vmatpush1.bf16.msra.mxu0 %v6181_v0  ;;  %4177 = vmatpush1.bf16.msra.mxu1 %v6184_v1 }
 0x240   : > { %3850 = vmatprep.subr.bf16.mxu0 %v6189_v2  ;;  %4178 = vmatprep.subr.bf16.mxu1 %v6192_v3 }
 0x243   : > { %3851 = vmatpush1.bf16.msra.mxu0 %v6187_v4  ;;  %4179 = vmatpush1.bf16.msra.mxu1 %v6190_v5  ;;  %v364_v4 = vld [vmem:[#allocation2] sm:$0xff] }
 0x244   : > { %3852 = vmatprep.subr.bf16.mxu0 %v6195_v6  ;;  %4180 = vmatprep.subr.bf16.mxu1 %v6198_v7  ;;  %v6259_v7 = vld [vmem:[%s7433_s3 + $0x40] sm:$0xff] (!%p5276_p6)  }
 0x247   : > { %3853 = vmatpush1.bf16.msra.mxu0 %v6193_v8  ;;  %4181 = vmatpush1.bf16.msra.mxu1 %v6196_v9  ;;  %v6260_v8 = vld [vmem:[%s7435_s5 + $0x40] sm:$0xff] (!%p5276_p6)  }
 0x248   : > { %3854 = vmatprep.subr.bf16.mxu0 %v6201_v10  ;;  %4182 = vmatprep.subr.bf16.mxu1 %v6204_v11  ;;  %v6261_v9 = vld [vmem:[%s7433_s3] sm:$0xff] (!%p5276_p6)   ;;  %v6263_v11 = vld [vmem:[%s7433_s3 + $0x48] sm:$0xff] (!%p5276_p6)  }
 0x249   : > { %v6262_v10 = vld [vmem:[%s7435_s5] sm:$0xff] (!%p5276_p6)  }
 0x24b   : > { %3855 = vmatpush1.bf16.msra.mxu0 %v6199_v12  ;;  %4183 = vmatpush1.bf16.msra.mxu1 %v6202_v13  ;;  %v6264_v12 = vld [vmem:[%s7435_s5 + $0x48] sm:$0xff] (!%p5276_p6)  }
 0x24c   : > { %3856 = vmatprep.subr.bf16.mxu0 %v6207_v14  ;;  %4184 = vmatprep.subr.bf16.mxu1 %v6210_v16  ;;  %v6265_v13 = vld [vmem:[%s7433_s3 + $0x8] sm:$0xff] (!%p5276_p6)   ;;  %v6267_v16 = vld [vmem:[%s7433_s3 + $0x50] sm:$0xff] (!%p5276_p6)  }
 0x24d   : > { %v6266_v14 = vld [vmem:[%s7435_s5 + $0x8] sm:$0xff] (!%p5276_p6)  }
 0x24f   : > { %3857 = vmatpush1.bf16.msra.mxu0 %v6205_v18  ;;  %4185 = vmatpush1.bf16.msra.mxu1 %v6208_v54  ;;  %v6268_v18 = vld [vmem:[%s7435_s5 + $0x50] sm:$0xff] (!%p5276_p6)  }
 0x250   : > { %3858 = vmatprep.subr.bf16.mxu0 %v6213_v19  ;;  %4186 = vmatprep.subr.bf16.mxu1 %v6216_v20  ;;  %v6269_v54 = vld [vmem:[%s7433_s3 + $0x10] sm:$0xff] (!%p5276_p6)   ;;  %v6271_v20 = vld [vmem:[%s7433_s3 + $0x58] sm:$0xff] (!%p5276_p6)  }
 0x251   : > { %v6270_v19 = vld [vmem:[%s7435_s5 + $0x10] sm:$0xff] (!%p5276_p6)  }
 0x253   : > { %3859 = vmatpush1.bf16.msra.mxu0 %v6211_v21  ;;  %4187 = vmatpush1.bf16.msra.mxu1 %v6214_v22  ;;  %v6272_v21 = vld [vmem:[%s7435_s5 + $0x58] sm:$0xff] (!%p5276_p6)  }
 0x254   : > { %3860 = vmatprep.subr.bf16.mxu0 %v6219_v24  ;;  %4188 = vmatprep.subr.bf16.mxu1 %v6222_v25  ;;  %v6273_v22 = vld [vmem:[%s7433_s3 + $0x18] sm:$0xff] (!%p5276_p6)   ;;  %v6275_v25 = vld [vmem:[%s7433_s3 + $0x60] sm:$0xff] (!%p5276_p6)  }
 0x255   : > { %v6274_v24 = vld [vmem:[%s7435_s5 + $0x18] sm:$0xff] (!%p5276_p6)  }
 0x257   : > { %3861 = vmatpush1.bf16.msra.mxu0 %v6217_v26  ;;  %4189 = vmatpush1.bf16.msra.mxu1 %v6220_v28  ;;  %v6276_v26 = vld [vmem:[%s7435_s5 + $0x60] sm:$0xff] (!%p5276_p6)  }
 0x258   : > { %3862 = vmatprep.subr.bf16.mxu0 %v6225_v30  ;;  %4190 = vmatprep.subr.bf16.mxu1 %v6228_v31  ;;  %v6277_v28 = vld [vmem:[%s7433_s3 + $0x20] sm:$0xff] (!%p5276_p6)   ;;  %v6279_v31 = vld [vmem:[%s7433_s3 + $0x68] sm:$0xff] (!%p5276_p6)  }
 0x259   : > { %v6278_v30 = vld [vmem:[%s7435_s5 + $0x20] sm:$0xff] (!%p5276_p6)  }
 0x25b   : > { %3863 = vmatpush1.bf16.msra.mxu0 %v6223_v32  ;;  %4191 = vmatpush1.bf16.msra.mxu1 %v6226_v17  ;;  %v6280_v32 = vld [vmem:[%s7435_s5 + $0x68] sm:$0xff] (!%p5276_p6)  }
 0x25c   : > { %3864 = vmatprep.subr.bf16.mxu0 %v6231_v33  ;;  %4192 = vmatprep.subr.bf16.mxu1 %v6234_v34  ;;  %v6281_v17 = vld [vmem:[%s7433_s3 + $0x28] sm:$0xff] (!%p5276_p6)   ;;  %v6283_v34 = vld [vmem:[%s7433_s3 + $0x70] sm:$0xff] (!%p5276_p6)  }
 0x25d   : > { %v6282_v33 = vld [vmem:[%s7435_s5 + $0x28] sm:$0xff] (!%p5276_p6)  }
 0x25f   : > { %3865 = vmatpush1.bf16.msra.mxu0 %v6229_v35  ;;  %4193 = vmatpush1.bf16.msra.mxu1 %v6232_v27  ;;  %v6284_v35 = vld [vmem:[%s7435_s5 + $0x70] sm:$0xff] (!%p5276_p6)  }
 0x260   : > { %3866 = vmatprep.subr.bf16.mxu0 %v6237_v36  ;;  %4194 = vmatprep.subr.bf16.mxu1 %v6240_v37  ;;  %v6285_v27 = vld [vmem:[%s7433_s3 + $0x30] sm:$0xff] (!%p5276_p6)   ;;  %v4244_v36 = vsub.s32 (!%p5276_p6), 0, %v6722_v45 }
 0x261   : > { %v6286_v37 = vld [vmem:[%s7435_s5 + $0x30] sm:$0xff] (!%p5276_p6)  }
 0x263   : > { %3867 = vmatpush1.bf16.msra.mxu0 %v6235_v15  ;;  %4195 = vmatpush1.bf16.msra.mxu1 %v6238_v40  ;;  %v4248_v15 = vsub.s32 (!%p5276_p6), 1, %v6722_v45  ;;  %v6287_v40 = vld [vmem:[%s7433_s3 + $0x78] sm:$0xff] (!%p5276_p6)  }
 0x264   : > { %3868 = vmatprep.subr.bf16.mxu0 %v6243_v41  ;;  %4196 = vmatprep.subr.bf16.mxu1 %v6246_v23  ;;  %v4252_v41 = vsub.s32 (!%p5276_p6), 2, %v6722_v45  ;;  %v6288_v23 = vld [vmem:[%s7435_s5 + $0x78] sm:$0xff] (!%p5276_p6)  }
 0x267   : > { %3869 = vmatpush1.bf16.msra.mxu0 %v6241_v43  ;;  %4197 = vmatpush1.bf16.msra.mxu1 %v6244_v44  ;;  %v4256_v43 = vsub.s32 (!%p5276_p6), 3, %v6722_v45  ;;  %v6289_v44 = vld [vmem:[%s7433_s3 + $0x38] sm:$0xff] (!%p5276_p6)  }
 0x268   : > { %3870 = vmatprep.subr.bf16.mxu0 %v6249_v29  ;;  %4198 = vmatprep.subr.bf16.mxu1 %v6252_v46  ;;  %v6290_v29 = vld [vmem:[%s7435_s5 + $0x38] sm:$0xff] (!%p5276_p6)   ;;  %v4240_v46 = vld [vmem:[#allocation7] sm:$0xf] (!%p5276_p6) }
 0x26b   : > { %3871 = vmatpush1.bf16.msra.mxu0 %v6247_v47  ;;  %4199 = vmatpush1.bf16.msra.mxu1 %v6250_v48  ;;  %v4245_v47 = vrot.slane (!%p5276_p6), %v4240_v46, %v4244_v36  ;;  %v4249_v48 = vrot.slane (!%p5276_p6), %v4240_v46, %v4248_v15 }
 0x26c   : > { %3872 = vmatprep.subr.bf16.mxu0 %v6255_v38  ;;  %4200 = vmatprep.subr.bf16.mxu1 %v6258_v49  ;;  %v4253_v38 = vrot.slane (!%p5276_p6), %v4240_v46, %v4252_v41  ;;  %v4257_v49 = vrot.slane (!%p5276_p6), %v4240_v46, %v4256_v43 }
 0x26f   : > { %3873 = vmatpush1.bf16.msra.mxu0 %v6253_v50  ;;  %4201 = vmatpush1.bf16.msra.mxu1 %v6256_v53  ;;  %v4258_v50 = vcombine.low (!%p5276_p6), %v4245_v47, %v4249_v48  ;;  %v4259_v53 = vcombine.low (!%p5276_p6), %v4253_v38, %v4257_v49 }
 0x270   : > { %5317 = vmatprep.subr.bf16.mxu0 (!%p5276_p6), %v6259_v7  ;;  %5339 = vmatprep.subr.bf16.mxu1 (!%p5276_p6), %v6260_v8  ;;  %v5294_v8 = vld [vmem:[#allocation3] ss:$0 sm:$0xff] (!%p5276_p6) }
 0x271   : > { %v4266_v45 = vrot.slane (!%p5276_p6), %v4258_v50, %v7282_v59 }
 0x272   : > { %3875 = vmatmul.mubr.bf16.vlgmr.msra.gmra.mrb[0].mxu0 %v976_v55  ;;  %4203 = vmatmul.mubr.bf16.vlgmr.msra.gmra.mrb[0].mxu1 %v976_v55  ;;  %v4273_v55 = vrot.slane (!%p5276_p6), %v4259_v53, %v7282_v59 }
 0x273   : > { %5318 = vmatpush3.bf16.msra.mxu0 (!%p5276_p6), %v6261_v9  ;;  %5340 = vmatpush3.bf16.msra.mxu1 (!%p5276_p6), %v6262_v10 }
 0x274   : > { %5319 = vmatprep.subr.bf16.mxu0 (!%p5276_p6), %v6263_v11  ;;  %5341 = vmatprep.subr.bf16.mxu1 (!%p5276_p6), %v6264_v12  ;;  %v4274_v57 = vcombine.low (!%p5276_p6), %v4266_v45, %v4273_v55 }
 0x277   : > { %5320 = vmatpush3.bf16.msra.mxu0 (!%p5276_p6), %v6265_v13  ;;  %5342 = vmatpush3.bf16.msra.mxu1 (!%p5276_p6), %v6266_v14 }
 0x278   : > { %5321 = vmatprep.subr.bf16.mxu0 (!%p5276_p6), %v6267_v16  ;;  %5343 = vmatprep.subr.bf16.mxu1 (!%p5276_p6), %v6268_v18 }
 0x27b   : > { %5322 = vmatpush3.bf16.msra.mxu0 (!%p5276_p6), %v6269_v54  ;;  %5344 = vmatpush3.bf16.msra.mxu1 (!%p5276_p6), %v6270_v19 }
 0x27c   : > { %5323 = vmatprep.subr.bf16.mxu0 (!%p5276_p6), %v6271_v20  ;;  %5345 = vmatprep.subr.bf16.mxu1 (!%p5276_p6), %v6272_v21 }
 0x27f   : > { %5324 = vmatpush3.bf16.msra.mxu0 (!%p5276_p6), %v6273_v22  ;;  %5346 = vmatpush3.bf16.msra.mxu1 (!%p5276_p6), %v6274_v24 }
 0x280   : > { %5325 = vmatprep.subr.bf16.mxu0 (!%p5276_p6), %v6275_v25  ;;  %5347 = vmatprep.subr.bf16.mxu1 (!%p5276_p6), %v6276_v26 }
 0x283   : > { %5326 = vmatpush3.bf16.msra.mxu0 (!%p5276_p6), %v6277_v28  ;;  %5348 = vmatpush3.bf16.msra.mxu1 (!%p5276_p6), %v6278_v30 }
 0x284   : > { %5327 = vmatprep.subr.bf16.mxu0 (!%p5276_p6), %v6279_v31  ;;  %5349 = vmatprep.subr.bf16.mxu1 (!%p5276_p6), %v6280_v32 }
 0x287   : > { %5328 = vmatpush3.bf16.msra.mxu0 (!%p5276_p6), %v6281_v17  ;;  %5350 = vmatpush3.bf16.msra.mxu1 (!%p5276_p6), %v6282_v33 }
 0x288   : > { %5329 = vmatprep.subr.bf16.mxu0 (!%p5276_p6), %v6283_v34  ;;  %5351 = vmatprep.subr.bf16.mxu1 (!%p5276_p6), %v6284_v35 }
 0x28b   : > { %5330 = vmatpush3.bf16.msra.mxu0 (!%p5276_p6), %v6285_v27  ;;  %5352 = vmatpush3.bf16.msra.mxu1 (!%p5276_p6), %v6286_v37 }
 0x28c   : > { %5331 = vmatprep.subr.bf16.mxu0 (!%p5276_p6), %v6287_v40  ;;  %5353 = vmatprep.subr.bf16.mxu1 (!%p5276_p6), %v6288_v23 }
 0x28f   : > { %5332 = vmatpush3.bf16.msra.mxu0 (!%p5276_p6), %v6289_v44  ;;  %5354 = vmatpush3.bf16.msra.mxu1 (!%p5276_p6), %v6290_v29 }
 0x345   : > { %v3876_v51 = vpop.f32.mrb[0].mxu0  ;;  %v4204_v42 = vpop.f32.mrb[0].mxu1 }
 0x346   : > { %v3878_v60 = vpop.f32.mrb[1].mxu0  ;;  %v4206_v52 = vpop.f32.mrb[1].mxu1 }
 0x347   : > { %v4215_v61 = vcombine.low %v3876_v51, %v3878_v60  ;;  %v4216_v62 = vcombine.low %v4204_v42, %v4206_v52  ;;  %v3880_v63 = vpop.f32.mrb[2].mxu0  ;;  %v4208_v0 = vpop.f32.mrb[2].mxu1 }
 0x348   : > { %v3881_v1 = vpop.f32.mrb[3].mxu0  ;;  %v4209_v39 = vpop.f32.mrb[3].mxu1 }
 0x349   : > { %v4223_v2 = vrot.slane %v4215_v61, %v7282_v59  ;;  %v4230_v3 = vrot.slane %v4216_v62, %v7282_v59  ;;  %4238 = sbr.rel (%p5276_p6) target bundleno = 1086 (0x43e), region = 68 }
 0x34b   : > { %v4231_v5 = vcombine.low %v4223_v2, %v4230_v3  ;;  %v5277_v3 = vld [vmem:[#allocation9] ss:$0 sm:$0xff] (!%p5276_p6) }
 0x34d   : > { %v4233_v6 = vadd.f32 %v4231_v5, %v364_v4 }
 0x34f   : > { %4234 = vst [vmem:[#allocation2] sm:$0xff] %v4233_v6 }
 0x356   : > { %v4239_v56 = vld [vmem:[#allocation2] sm:$0xff] }
 0x357   : > { %v4276_v58 = vadd.f32 %v4274_v57, %v4239_v56 }
 0x359   : > { %v4277_v51 = vmax.f32 %v4276_v58, 0.0 }
 0x35b   : > { %v4286_v42 = vrot.slane %v4277_v51, %v7282_v59  ;;  %v4279_v60 = vcombine.high %v4277_v51, %v4277_v51 }
 0x35d   : > { %v4294_v52 = vcombine.high %v4286_v42, %v4286_v42  ;;  %v4293_v61 = vrot.slane %v4279_v60, %v7282_v59  ;;  %v4300_v62 = vpack.c.bf16 %v4286_v42, %v4286_v42 }
 0x35f   : > { %v4301_v63 = vpack.c.bf16 %v4294_v52, %v4294_v52  ;;  %v4295_v0 = vcombine.high %v4293_v61, %v4293_v61  ;;  %v4302_v1 = vpack.c.bf16 %v4293_v61, %v4293_v61 }
 0x361   : > { %4471 = vmatprep.mubr.bf16.mxu0 %v4301_v63  ;;  %v4303_v39 = vpack.c.bf16 %v4295_v0, %v4295_v0 }
 0x362   : > { %4472 = vmatmul.mubr.bf16.vlgmr.msra.gmra.mrb[0].mxu0 %v4300_v62 }
 0x363   : > { %4648 = vmatprep.mubr.bf16.mxu1 %v4303_v39 }
 0x364   : > { %4649 = vmatmul.mubr.bf16.vlgmr.msra.gmra.mrb[0].mxu1 %v4302_v1 }
 0x435   : > { %v5333_v2 = vpop.f32.mrb[0].mxu0 }
 0x436   : > { %v5334_v4 = vpop.f32.mrb[1].mxu0 }
 0x437   : > { %v5355_v5 = vpop.f32.mrb[0].mxu1  ;;  %v5335_v6 = vadd.f32 %v5334_v4, %v5333_v2  ;;  %v5336_v7 = vpop.f32.mrb[2].mxu0 }
 0x438   : > { %v5356_v9 = vpop.f32.mrb[1].mxu1  ;;  %v5337_v10 = vpop.f32.mrb[3].mxu0 }
 0x439   : > { %v4474_v59 = vadd.f32 %v5335_v6, %v5277_v3  ;;  %v5357_v11 = vadd.f32 %v5356_v9, %v5355_v5  ;;  %v5358_v12 = vpop.f32.mrb[2].mxu1 }
 0x43a   : > { %v5359_v13 = vpop.f32.mrb[3].mxu1 }
 0x43b   : > { %4480 = vst.msk [vmem:[#allocation10] sm:$0x3] %vm4479_vm0, %v4474_v59  ;;  %v4651_v14 = vadd.f32 %v5357_v11, %v5294_v8 }
 0x43d   : > { %4657 = vst.msk [vmem:[%s7438_s8] sm:$0x3] %vm4656_vm1, %v4651_v14 }
 0x43e PF: > { %p5447_p7 = scmp.eq.s32.totalorder %s6523_s6, 3  ;;  %s6455_s19 = smov [#allocation10]  }
 0x43f   : > { %s4665_s15 = sshll.u32 %s6455_s19, 4  ;;  %s4666_s15 = int_to_ptr.vmem [resolvable:$true] %s4665_s15 }
 0x440   : > { %s6377_s17 = scalar_lea.vmem %s4666_s15, 32  ;;  %p6384_p5 = scmp.lt.s32.totalorder %s4666_s15, %s4666_s15 }
 0x441   : > { %p6378_p11 = scmp.ne.s32.totalorder %s4666_s15, %s6377_s17  ;;  %p6385_p9 = scmp.lt.s32.totalorder %s6377_s17, %s6377_s17 }
 0x443   : > { %p6379_p12 = pnand %p6378_p11, %p5447_p7  ;;  %p6386_p10 = por %p6385_p9, %p6384_p5 }
 0x445   : > { %p6380_p13 = pneg %p6379_p12 }
 0x447   : > { %p6387_p1 = pnand %p6386_p10, %p6380_p13 }
 0x449   : > { %6390 = shalt.err (!%p6387_p1)
}
 0x44a   : > { %s6391_s12 = scalar_lea.hbm %s7437_s7, 32 }
 0x44b   : > { %p6392_p8 = scmp.ne.s32.totalorder %s7437_s7, %s6391_s12  ;;  %p6397_p3 = scmp.lt.u32.totalorder %s6391_s12, %s7437_s7 }
 0x44d   : > { %p6393_p0 = pnand %p6392_p8, %p5447_p7 }
 0x44f   : > { %p6394_p2 = pneg %p6393_p0 }
 0x451   : > { %p6399_p4 = pnand %p6397_p3, %p6394_p2 }
 0x453   : > { %6402 = shalt.err (!%p6399_p4)
}
 0x454   : > { %5428 = dma.vmem_to_hbm [thread:$0]  (%p5447_p7), %s4666_s15, 32, %s7437_s7, [#allocation6]  }
 0x455   : > { %6428 = dma.done.wait (%p5447_p7), [#allocation6], 32  }
 0x456   : > { %6430 = vsyncadd (%p5447_p7), [#allocation6], 4294967264 }
 0x457 PF: > { %p23_p6 = scmp.ge.s32.totalorder %s6526_s11, 6   ;;  %s7454_s29 = smov %s6437_s30 }
 0x458   : > { %s7455_s30 = smov %s6441_s9  ;;  %s7456_s9 = smov %s6536_s14 }
 0x459   : > { %s7457_s10 = smov %s6526_s11  ;;  %25 = sbr.rel (!%p23_p6) target bundleno = 8 (0x8), region = 112 }
 0x460   :  { %4684 = vsyncpa [#allocation5], 1 }
 0x461   :  { %4686 = vsyncpa [#allocation5 + $0x1], 1 }
 0x462   :  { %4687 = vsyncpa [#allocation8], 1 }
 0x463   :  { %4688 = vsyncpa [#allocation6], 1 }
 0x464   :  { %4690 = vsyncpa [#allocation6 + $0x1], 1 }

// kernel: vgg_alpha_forward.2
= control target key start
LH: loop header
LB: loop body
LE: loop exit
PB: predicated region body
PF: predicated region fallthrough
CT: control target
= control target key end

     0   :  { %15 = vsyncpa [#allocation3], 0  ;;  %s13600_s0 = inlined_call_operand.hbm [shape: bf16[9,32,32], index: 0, kind: input, shape index: {}]   ;;  %s13601_s1 = inlined_call_operand.hbm [shape: f32[32,16], index: 1, kind: input, shape index: {}]   ;;  %s13602_s2 = inlined_call_operand.hbm [shape: bf16[9,16,64], index: 2, kind: input, shape index: {}]   ;;  %s13603_s3 = inlined_call_operand.hbm [shape: f32[1,64], index: 3, kind: input, shape index: {}]   ;;  %s13604_s4 = inlined_call_operand.hbm [shape: bf16[9,64,128], index: 4, kind: input, shape index: {}]   ;;  %s13605_s5 = inlined_call_operand.hbm [shape: f32[1,128], index: 5, kind: input, shape index: {}]   ;;  %s13606_s6 = inlined_call_operand.hbm [shape: bf16[9,128,256], index: 6, kind: input, shape index: {}]   ;;  %s13607_s7 = inlined_call_operand.hbm [shape: f32[1,256], index: 7, kind: input, shape index: {}]   ;;  %s13608_s8 = inlined_call_operand.hbm [shape: bf16[9,256,512], index: 8, kind: input, shape index: {}]   ;;  %s13609_s9 = inlined_call_operand.hbm [shape: f32[1,512], index: 9, kind: input, shape index: {}]   ;;  %s13610_s10 = inlined_call_operand.vmem [shape: bf16[32,512], index: 10, kind: output, shape index: {}]  }
   0x1   :  { %16 = vsyncpa [#allocation5], 0 }
   0x2   :  { %17 = vsyncpa [#allocation8], 0 }
   0x3   :  { %18 = vsyncpa [#allocation11], 0 }
   0x4   :  { %19 = vsyncpa [#allocation14], 0 }
   0x5   :  { %20 = vsyncpa [#allocation17], 0  ;;  %s12671_s13 = smov [#allocation4]   ;;  %s12439_s17 = scalar_lea.hbm %s13601_s1, 512 }
   0x6   :  { %s38_s14 = sshll.u32 %s12671_s13, 4  ;;  %p12440_p0 = scmp.ne.s32.totalorder %s13601_s1, %s12439_s17  ;;  %s39_s14 = int_to_ptr.vmem [resolvable:$true] %s38_s14 }
   0x7   :  { %p12443_p1 = scmp.lt.u32.totalorder %s12439_s17, %s13601_s1 }
   0x9   :  { %p12445_p2 = pnand %p12443_p1, %p12440_p0 }
   0xb   :  { %12448 = shalt.err (!%p12445_p2)
}
   0xc   :  { %s12449_s22 = scalar_lea.vmem %s39_s14, 512  ;;  %p12454_p4 = scmp.lt.s32.totalorder %s39_s14, %s39_s14 }
   0xd   :  { %p12450_p3 = scmp.ne.s32.totalorder %s39_s14, %s12449_s22  ;;  %p12455_p5 = scmp.lt.s32.totalorder %s12449_s22, %s12449_s22 }
   0xf   :  { %p12456_p6 = por %p12455_p5, %p12454_p4 }
  0x11   :  { %p12457_p7 = pnand %p12456_p6, %p12450_p3 }
  0x13   :  { %12460 = shalt.err (!%p12457_p7)
}
  0x14   :  { %s12672_s23 = smov 128   ;;  %s12673_s24 = smov 8  }
  0x15   :  { %44 = dma.hbm_to_vmem [thread:$0]  %s13601_s1, 512, %s39_s14, [#allocation5], %s12672_s23, %s12672_s23, %s12673_s24  }
  0x16   :  { %s12674_s27 = smov [#allocation7]   ;;  %s12675_s29 = smov [#allocation10]  }
  0x17   :  { %s63_s28 = sshll.u32 %s12674_s27, 4  ;;  %s85_s30 = sshll.u32 %s12675_s29, 4  ;;  %s64_s28 = int_to_ptr.vmem [resolvable:$true] %s63_s28  ;;  %s86_s30 = int_to_ptr.vmem [resolvable:$true] %s85_s30 }
  0x18   :  { %s12461_s13 = scalar_lea.hbm %s13603_s3, 16 }
  0x19   :  { %p12462_p8 = scmp.ne.s32.totalorder %s13603_s3, %s12461_s13  ;;  %p12465_p9 = scmp.lt.u32.totalorder %s12461_s13, %s13603_s3 }
  0x1b   :  { %p12467_p10 = pnand %p12465_p9, %p12462_p8 }
  0x1d   :  { %12470 = shalt.err (!%p12467_p10)
}
  0x1e   :  { %s12471_s1 = scalar_lea.vmem %s64_s28, 16  ;;  %s12475_s14 = scalar_lea.vmem %s64_s28, 32 }
  0x1f   :  { %p12472_p11 = scmp.ne.s32.totalorder %s64_s28, %s12471_s1  ;;  %p12476_p12 = scmp.lt.s32.totalorder %s64_s28, %s64_s28 }
  0x20   :  { %p12477_p13 = scmp.lt.s32.totalorder %s12475_s14, %s12471_s1 }
  0x22   :  { %p12478_p0 = por %p12477_p13, %p12476_p12 }
  0x24   :  { %p12479_p1 = pnand %p12478_p0, %p12472_p11 }
  0x26   :  { %12482 = shalt.err (!%p12479_p1)
}
  0x27   :  { %66 = dma.hbm_to_vmem [thread:$0]  %s13603_s3, 16, %s64_s28, [#allocation8]  }
  0x28   :  { %s12483_s25 = scalar_lea.hbm %s13605_s5, 16 }
  0x29   :  { %p12484_p2 = scmp.ne.s32.totalorder %s13605_s5, %s12483_s25  ;;  %p12487_p3 = scmp.lt.u32.totalorder %s12483_s25, %s13605_s5 }
  0x2b   :  { %p12489_p4 = pnand %p12487_p3, %p12484_p2 }
  0x2d   :  { %12492 = shalt.err (!%p12489_p4)
}
  0x2e   :  { %s12493_s12 = scalar_lea.vmem %s86_s30, 16  ;;  %s12497_s13 = scalar_lea.vmem %s86_s30, 32 }
  0x2f   :  { %p12494_p5 = scmp.ne.s32.totalorder %s86_s30, %s12493_s12  ;;  %p12498_p6 = scmp.lt.s32.totalorder %s86_s30, %s86_s30 }
  0x30   :  { %p12499_p7 = scmp.lt.s32.totalorder %s12497_s13, %s12493_s12 }
  0x32   :  { %p12500_p8 = por %p12499_p7, %p12498_p6 }
  0x34   :  { %p12501_p9 = pnand %p12500_p8, %p12494_p5 }
  0x36   :  { %12504 = shalt.err (!%p12501_p9)
}
  0x37   :  { %88 = dma.hbm_to_vmem [thread:$0]  %s13605_s5, 16, %s86_s30, [#allocation11]  }
  0x38   :  { %s12676_s15 = smov [#allocation13]   ;;  %s12677_s17 = smov [#allocation2]  }
  0x39   :  { %s107_s16 = sshll.u32 %s12676_s15, 4  ;;  %s26_s18 = sshll.u32 %s12677_s17, 4  ;;  %s108_s16 = int_to_ptr.vmem [resolvable:$true] %s107_s16  ;;  %s27_s18 = int_to_ptr.vmem [resolvable:$true] %s26_s18 }
  0x3a   :  { %s12505_s19 = scalar_lea.hbm %s13607_s7, 32 }
  0x3b   :  { %p12506_p10 = scmp.ne.s32.totalorder %s13607_s7, %s12505_s19  ;;  %p12509_p11 = scmp.lt.u32.totalorder %s12505_s19, %s13607_s7 }
  0x3d   :  { %p12511_p12 = pnand %p12509_p11, %p12506_p10 }
  0x3f   :  { %12514 = shalt.err (!%p12511_p12)
}
  0x40   :  { %s12515_s5 = scalar_lea.vmem %s108_s16, 32  ;;  %p12520_p0 = scmp.lt.s32.totalorder %s108_s16, %s108_s16 }
  0x41   :  { %p12516_p13 = scmp.ne.s32.totalorder %s108_s16, %s12515_s5  ;;  %p12521_p1 = scmp.lt.s32.totalorder %s12515_s5, %s12515_s5 }
  0x43   :  { %p12522_p2 = por %p12521_p1, %p12520_p0 }
  0x45   :  { %p12523_p3 = pnand %p12522_p2, %p12516_p13 }
  0x47   :  { %12526 = shalt.err (!%p12523_p3)
}
  0x48   :  { %110 = dma.hbm_to_vmem [thread:$0]  %s13607_s7, 32, %s108_s16, [#allocation14]  }
  0x49   :  { %s12527_s11 = scalar_lea.hbm %s13600_s0, 2304 }
  0x4a   :  { %p12528_p4 = scmp.ne.s32.totalorder %s13600_s0, %s12527_s11  ;;  %p12531_p5 = scmp.lt.u32.totalorder %s12527_s11, %s13600_s0 }
  0x4c   :  { %p12533_p6 = pnand %p12531_p5, %p12528_p4 }
  0x4e   :  { %12536 = shalt.err (!%p12533_p6)
}
  0x4f   :  { %s12537_s15 = scalar_lea.vmem %s27_s18, 2304  ;;  %p12542_p8 = scmp.lt.s32.totalorder %s27_s18, %s27_s18 }
  0x50   :  { %p12538_p7 = scmp.ne.s32.totalorder %s27_s18, %s12537_s15  ;;  %p12543_p9 = scmp.lt.s32.totalorder %s12537_s15, %s12537_s15 }
  0x52   :  { %p12544_p10 = por %p12543_p9, %p12542_p8 }
  0x54   :  { %p12545_p11 = pnand %p12544_p10, %p12538_p7 }
  0x56   :  { %12548 = shalt.err (!%p12545_p11)
}
  0x57   :  { %s12678_s7 = smov 64   ;;  %s12679_s16 = smov 4  }
  0x58   :  { %32 = dma.hbm_to_vmem [thread:$0]  %s13600_s0, 2304, %s27_s18, [#allocation3], %s12678_s7, %s12678_s7, %s12679_s16  }
  0x59   :  { %s12680_s14 = smov [#allocation6]   ;;  %s12681_s20 = smov [#allocation9]  }
  0x5a   :  { %s50_s19 = sshll.u32 %s12680_s14, 4  ;;  %s72_s21 = sshll.u32 %s12681_s20, 4  ;;  %s51_s19 = int_to_ptr.vmem [resolvable:$true] %s50_s19  ;;  %s73_s21 = int_to_ptr.vmem [resolvable:$true] %s72_s21 }
  0x5b   :  { %s12549_s5 = scalar_lea.hbm %s13602_s2, 1152 }
  0x5c   :  { %p12550_p12 = scmp.ne.s32.totalorder %s13602_s2, %s12549_s5  ;;  %p12553_p13 = scmp.lt.u32.totalorder %s12549_s5, %s13602_s2 }
  0x5e   :  { %p12555_p0 = pnand %p12553_p13, %p12550_p12 }
  0x60   :  { %12558 = shalt.err (!%p12555_p0)
}
  0x61   :  { %s12559_s0 = scalar_lea.vmem %s51_s19, 1152  ;;  %p12564_p2 = scmp.lt.s32.totalorder %s51_s19, %s51_s19 }
  0x62   :  { %p12560_p1 = scmp.ne.s32.totalorder %s51_s19, %s12559_s0  ;;  %p12565_p3 = scmp.lt.s32.totalorder %s12559_s0, %s12559_s0 }
  0x64   :  { %p12566_p4 = por %p12565_p3, %p12564_p2 }
  0x66   :  { %p12567_p5 = pnand %p12566_p4, %p12560_p1 }
  0x68   :  { %12570 = shalt.err (!%p12567_p5)
}
  0x69   :  { %56 = dma.hbm_to_vmem [thread:$0]  %s13602_s2, 1152, %s51_s19, [#allocation5], %s12678_s7, %s12678_s7, %s12679_s16  }
  0x6a   :  { %s12571_s3 = scalar_lea.hbm %s13604_s4, 4608 }
  0x6b   :  { %p12572_p6 = scmp.ne.s32.totalorder %s13604_s4, %s12571_s3  ;;  %p12575_p7 = scmp.lt.u32.totalorder %s12571_s3, %s13604_s4 }
  0x6d   :  { %p12577_p8 = pnand %p12575_p7, %p12572_p6 }
  0x6f   :  { %12580 = shalt.err (!%p12577_p8)
}
  0x70   :  { %s12581_s14 = scalar_lea.vmem %s73_s21, 4608  ;;  %p12586_p10 = scmp.lt.s32.totalorder %s73_s21, %s73_s21 }
  0x71   :  { %p12582_p9 = scmp.ne.s32.totalorder %s73_s21, %s12581_s14  ;;  %p12587_p11 = scmp.lt.s32.totalorder %s12581_s14, %s12581_s14 }
  0x73   :  { %p12588_p12 = por %p12587_p11, %p12586_p10 }
  0x75   :  { %p12589_p13 = pnand %p12588_p12, %p12582_p9 }
  0x77   :  { %12592 = shalt.err (!%p12589_p13)
}
  0x78   :  { %78 = dma.hbm_to_vmem [thread:$0]  %s13604_s4, 4608, %s73_s21, [#allocation8], %s12678_s7, %s12678_s7, %s12679_s16  }
  0x79   :  { %s12682_s20 = smov [#allocation12]   ;;  %s12683_s25 = smov [#allocation15]  }
  0x7a   :  { %s94_s22 = sshll.u32 %s12682_s20, 4  ;;  %s116_s5 = sshll.u32 %s12683_s25, 4  ;;  %s95_s22 = int_to_ptr.vmem [resolvable:$true] %s94_s22  ;;  %s117_s5 = int_to_ptr.vmem [resolvable:$true] %s116_s5 }
  0x7b   :  { %s12593_s27 = scalar_lea.hbm %s13606_s6, 18432 }
  0x7c   :  { %p12594_p0 = scmp.ne.s32.totalorder %s13606_s6, %s12593_s27  ;;  %p12597_p1 = scmp.lt.u32.totalorder %s12593_s27, %s13606_s6 }
  0x7e   :  { %p12599_p2 = pnand %p12597_p1, %p12594_p0 }
  0x80   :  { %12602 = shalt.err (!%p12599_p2)
}
  0x81   :  { %s12603_s4 = scalar_lea.vmem %s95_s22, 18432  ;;  %p12608_p4 = scmp.lt.s32.totalorder %s95_s22, %s95_s22 }
  0x82   :  { %p12604_p3 = scmp.ne.s32.totalorder %s95_s22, %s12603_s4  ;;  %p12609_p5 = scmp.lt.s32.totalorder %s12603_s4, %s12603_s4 }
  0x84   :  { %p12610_p6 = por %p12609_p5, %p12608_p4 }
  0x86   :  { %p12611_p7 = pnand %p12610_p6, %p12604_p3 }
  0x88   :  { %12614 = shalt.err (!%p12611_p7)
}
  0x89   :  { %100 = dma.hbm_to_vmem [thread:$0]  %s13606_s6, 18432, %s95_s22, [#allocation11], %s12672_s23, %s12672_s23, %s12673_s24  }
  0x8a   :  { %s12615_s13 = scalar_lea.hbm %s13608_s8, 73728 }
  0x8b   :  { %p12616_p8 = scmp.ne.s32.totalorder %s13608_s8, %s12615_s13  ;;  %p12619_p9 = scmp.lt.u32.totalorder %s12615_s13, %s13608_s8 }
  0x8d   :  { %p12621_p10 = pnand %p12619_p9, %p12616_p8 }
  0x8f   :  { %12624 = shalt.err (!%p12621_p10)
}
  0x90   :  { %s12625_s1 = scalar_lea.vmem %s117_s5, 73728  ;;  %p12630_p12 = scmp.lt.s32.totalorder %s117_s5, %s117_s5 }
  0x91   :  { %p12626_p11 = scmp.ne.s32.totalorder %s117_s5, %s12625_s1  ;;  %p12631_p13 = scmp.lt.s32.totalorder %s12625_s1, %s12625_s1 }
  0x93   :  { %p12632_p0 = por %p12631_p13, %p12630_p12 }
  0x95   :  { %p12633_p1 = pnand %p12632_p0, %p12626_p11 }
  0x97   :  { %12636 = shalt.err (!%p12633_p1)
}
  0x98   :  { %s12684_s6 = smov 256   ;;  %s12685_s23 = smov 16  }
  0x99   :  { %122 = dma.hbm_to_vmem [thread:$0]  %s13608_s8, 73728, %s117_s5, [#allocation14], %s12684_s6, %s12684_s6, %s12685_s23  }
  0x9a   :  { %s12686_s2 = smov [#allocation16]   ;;  %s12637_s25 = scalar_lea.hbm %s13609_s9, 64 }
  0x9b   :  { %s129_s19 = sshll.u32 %s12686_s2, 4  ;;  %p12638_p2 = scmp.ne.s32.totalorder %s13609_s9, %s12637_s25  ;;  %s130_s19 = int_to_ptr.vmem [resolvable:$true] %s129_s19 }
  0x9c   :  { %p12641_p3 = scmp.lt.u32.totalorder %s12637_s25, %s13609_s9 }
  0x9e   :  { %p12643_p4 = pnand %p12641_p3, %p12638_p2 }
  0xa0   :  { %12646 = shalt.err (!%p12643_p4)
}
  0xa1   :  { %s12647_s0 = scalar_lea.vmem %s130_s19, 64  ;;  %p12652_p6 = scmp.lt.s32.totalorder %s130_s19, %s130_s19 }
  0xa2   :  { %p12648_p5 = scmp.ne.s32.totalorder %s130_s19, %s12647_s0  ;;  %p12653_p7 = scmp.lt.s32.totalorder %s12647_s0, %s12647_s0 }
  0xa4   :  { %p12654_p8 = por %p12653_p7, %p12652_p6 }
  0xa6   :  { %p12655_p9 = pnand %p12654_p8, %p12648_p5 }
  0xa8   :  { %12658 = shalt.err (!%p12655_p9)
}
  0xa9   :  { %132 = dma.hbm_to_vmem [thread:$0]  %s13609_s9, 64, %s130_s19, [#allocation17]  }
  0xaa   :  { %12659 = dma.done.wait [#allocation3], 2304  }
  0xab   :  { %12660 = vsyncadd [#allocation3], 4294964992 }
  0xac   :  { %12661 = dma.done.wait [#allocation5], 1664  }
  0xad   :  { %12662 = vsyncadd [#allocation5], 4294965632 }
  0xae   :  { %12663 = dma.done.wait [#allocation8], 4624  }
  0xaf   :  { %12664 = vsyncadd [#allocation8], 4294962672 }
  0xb0   :  { %12665 = dma.done.wait [#allocation11], 18448  }
  0xb1   :  { %12666 = vsyncadd [#allocation11], 4294948848 }
  0xb2   :  { %12667 = dma.done.wait [#allocation14], 73760  }
  0xb3   :  { %12668 = vsyncadd [#allocation14], 4294893536 }
  0xb4   :  { %12669 = dma.done.wait [#allocation17], 64  }
  0xb5   :  { %12670 = vsyncadd [#allocation17], 4294967232  ;;  %v164_v0 = vld [vmem:[#allocation4] sm:$0xff]  ;;  %v165_v1 = vld [vmem:[#allocation4 + $0x8] sm:$0xff]  ;;  %vm184_vm0 = vcmask 261120   ;;  %vm325_vm1 = vcmask 130048  }
  0xb6   :  { %v166_v2 = vld [vmem:[#allocation4 + $0x10] sm:$0xff]  ;;  %v12878_v3 = vpack.c.bf16 %v165_v1, %v164_v0  ;;  %v167_v4 = vld [vmem:[#allocation4 + $0x18] sm:$0xff]  ;;  %v11266_v6 = vld [vmem:[#allocation2 + $0x10] sm:$0xff]   ;;  %vm1510_vm2 = vcmask 523264  }
  0xb7   :  { %v12880_v5 = vpack.c.bf16 %v167_v4, %v166_v2  ;;  %10651 = vmatprep.mubr.msk.bf16.mxu1 %vm184_vm0, %v11266_v6  ;;  %v11268_v7 = vld [vmem:[#allocation2] sm:$0xff]   ;;  %v11267_v8 = vld [vmem:[#allocation2 + $0x18] sm:$0xff]   ;;  %v11269_v9 = vld [vmem:[#allocation2 + $0x8] sm:$0xff]  }
  0xb8   :  { %10647 = vmatprep.subr.bf16.mxu1 %v12878_v3  ;;  %10639 = vmatprep.subr.bf16.mxu0 %v12878_v3  ;;  %v11270_v10 = vld [vmem:[#allocation2 + $0x20] sm:$0xff]   ;;  %v11271_v11 = vld [vmem:[#allocation2 + $0x28] sm:$0xff]   ;;  %v11272_v12 = vld [vmem:[#allocation2 + $0x30] sm:$0xff]  }
  0xb9   :  { %10648 = vmatpush3.bf16.msra.mxu1 %v12878_v3  ;;  %10640 = vmatpush3.bf16.msra.mxu0 %v12878_v3  ;;  %v11282_v13 = vld [vmem:[#allocation6 + $0x8] sm:$0xff]   ;;  %v11274_v15 = vld [vmem:[#allocation2 + $0x50] sm:$0xff]   ;;  %v11276_v17 = vld [vmem:[#allocation2 + $0x60] sm:$0xff]  }
  0xba   :  { %10649 = vmatprep.subr.bf16.mxu1 %v12880_v5  ;;  %10641 = vmatprep.subr.bf16.mxu0 %v12880_v5  ;;  %v11273_v14 = vld [vmem:[#allocation2 + $0x38] sm:$0xff]   ;;  %v11277_v18 = vld [vmem:[#allocation2 + $0x68] sm:$0xff]   ;;  %v11278_v19 = vld [vmem:[#allocation2 + $0x70] sm:$0xff]  }
  0xbb   :  { %10643 = vmatprep.mubr.msk.bf16.mxu0 %vm184_vm0, %v11268_v7  ;;  %v11275_v16 = vld [vmem:[#allocation2 + $0x58] sm:$0xff]   ;;  %v11280_v21 = vld [vmem:[#allocation2 + $0x80] sm:$0xff]   ;;  %v11281_v22 = vld [vmem:[#allocation2 + $0x88] sm:$0xff]  }
  0xbc   :  { %v11279_v20 = vld [vmem:[#allocation2 + $0x78] sm:$0xff]   ;;  %v11283_v23 = vld [vmem:[#allocation6] sm:$0xff]   ;;  %v11284_v32 = vld [vmem:[#allocation6 + $0x10] sm:$0xff]  }
  0xbd   :  { %10650 = vmatpush3.bf16.msra.mxu1 %v12880_v5  ;;  %10642 = vmatpush3.bf16.msra.mxu0 %v12880_v5  ;;  %v11285_v43 = vld [vmem:[#allocation6 + $0x18] sm:$0xff]   ;;  %v11286_v53 = vld [vmem:[#allocation6 + $0x20] sm:$0xff]   ;;  %v11287_v63 = vld [vmem:[#allocation6 + $0x28] sm:$0xff]  }
  0xbe   :  { %10667 = vmatprep.subr.bf16.mxu1 %v12878_v3  ;;  %10655 = vmatprep.subr.bf16.mxu0 %v11282_v13 }
  0xc0   :  { %10652 = vmatmul.mubr.msk.bf16.vlgmr.msra.gmra.mrb[0].mxu1 %vm184_vm0, %v11267_v8  ;;  %10644 = vmatmul.mubr.msk.bf16.vlgmr.msra.gmra.mrb[0].mxu0 %vm184_vm0, %v11269_v9 }
  0xc1   :  { %10668 = vmatpush3.bf16.msra.mxu1 %v12878_v3  ;;  %10671 = vmatprep.mubr.msk.bf16.mxu1 %vm184_vm0, %v11270_v10 }
  0xc2   :  { %10669 = vmatprep.subr.bf16.mxu1 %v12880_v5  ;;  %10656 = vmatpush3.bf16.msra.mxu0 %v11282_v13 }
  0xc3   :  { %10661 = vmatprep.subr.bf16.mxu0 %v11283_v23 }
  0xc5   :  { %10670 = vmatpush3.bf16.msra.mxu1 %v12880_v5 }
  0xc6   :  { %10681 = vmatprep.subr.bf16.mxu1 %v12878_v3 }
  0xc8   :  { %10672 = vmatmul.mubr.msk.bf16.vlgmr.msra.gmra.mrb[4].mxu1 %vm184_vm0, %v11271_v11  ;;  %v11288_v11 = vld [vmem:[#allocation6 + $0x30] sm:$0xff]  }
  0xc9   :  { %10682 = vmatpush3.bf16.msra.mxu1 %v12878_v3  ;;  %10685 = vmatprep.mubr.msk.bf16.mxu1 %vm184_vm0, %v11272_v12 }
  0xca   :  { %10683 = vmatprep.subr.bf16.mxu1 %v12880_v5 }
  0xcd   :  { %10684 = vmatpush3.bf16.msra.mxu1 %v12880_v5 }
  0xce   :  { %10701 = vmatprep.subr.bf16.mxu1 %v12878_v3 }
  0xd0   :  { %10686 = vmatmul.mubr.msk.bf16.vlgmr.msra.gmra.mrb[8].mxu1 %vm184_vm0, %v11273_v14 }
  0xd1   :  { %10702 = vmatpush3.bf16.msra.mxu1 %v12878_v3  ;;  %10705 = vmatprep.mubr.msk.bf16.mxu1 %vm184_vm0, %v11274_v15  ;;  %v11289_v15 = vld [vmem:[#allocation6 + $0x38] sm:$0xff]  }
  0xd2   :  { %10703 = vmatprep.subr.bf16.mxu1 %v12880_v5 }
  0xd5   :  { %10704 = vmatpush3.bf16.msra.mxu1 %v12880_v5 }
  0xd6   :  { %10715 = vmatprep.subr.bf16.mxu1 %v12878_v3 }
  0xd8   :  { %10706 = vmatmul.mubr.msk.bf16.vlgmr.msra.gmra.mrb[12].mxu1 %vm184_vm0, %v11275_v16  ;;  %v9622_v16 = vld [vmem:[#allocation7] ss:$0 sm:$0xff] }
  0xd9   :  { %10716 = vmatpush3.bf16.msra.mxu1 %v12878_v3  ;;  %10719 = vmatprep.mubr.msk.bf16.mxu1 %vm184_vm0, %v11276_v17 }
  0xda   :  { %10717 = vmatprep.subr.bf16.mxu1 %v12880_v5 }
  0xdd   :  { %10718 = vmatpush3.bf16.msra.mxu1 %v12880_v5 }
  0xde   :  { %10729 = vmatprep.subr.bf16.mxu1 %v12878_v3 }
  0xe0   :  { %10720 = vmatmul.mubr.msk.bf16.vlgmr.msra.gmra.mrb[16].mxu1 %vm184_vm0, %v11277_v18 }
  0xe1   :  { %10730 = vmatpush3.bf16.msra.mxu1 %v12878_v3  ;;  %10733 = vmatprep.mubr.msk.bf16.mxu1 %vm184_vm0, %v11278_v19 }
  0xe2   :  { %10731 = vmatprep.subr.bf16.mxu1 %v12880_v5 }
  0xe5   :  { %10732 = vmatpush3.bf16.msra.mxu1 %v12880_v5 }
  0xe6   :  { %10743 = vmatprep.subr.bf16.mxu1 %v12878_v3 }
  0xe8   :  { %10734 = vmatmul.mubr.msk.bf16.vlgmr.msra.gmra.mrb[20].mxu1 %vm184_vm0, %v11279_v20 }
  0xe9   :  { %10744 = vmatpush3.bf16.msra.mxu1 %v12878_v3  ;;  %10747 = vmatprep.mubr.msk.bf16.mxu1 %vm184_vm0, %v11280_v21 }
  0xea   :  { %10745 = vmatprep.subr.bf16.mxu1 %v12880_v5 }
  0xed   :  { %10746 = vmatpush3.bf16.msra.mxu1 %v12880_v5 }
  0xf0   :  { %10748 = vmatmul.mubr.msk.bf16.vlgmr.msra.gmra.mrb[24].mxu1 %vm184_vm0, %v11281_v22 }
  0xf1   :  { %10761 = vmatprep.mubr.msk.bf16.mxu1 %vm184_vm0, %v11268_v7 }
 0x193   :  { %v10653_v24 = vpop.f32.mrb[0].mxu1  ;;  %v10645_v26 = vpop.f32.mrb[0].mxu0 }
 0x194   :  { %v299_v25 = vpop.f32.mrb[1].mxu1  ;;  %v225_v28 = vpop.f32.mrb[1].mxu0 }
 0x195   :  { %v10654_v27 = vpop.f32.mrb[2].mxu1  ;;  %v10646_v31 = vpop.f32.mrb[2].mxu0 }
 0x196   :  { %v315_v29 = vpack.c.bf16 %v10654_v27, %v10653_v24  ;;  %v302_v30 = vpop.f32.mrb[3].mxu1  ;;  %v241_v34 = vpack.c.bf16 %v10646_v31, %v10645_v26  ;;  %v228_v35 = vpop.f32.mrb[3].mxu0  ;;  %v12969_v31 = vld [vmem:[#allocation2 + $0x8] sm:$0xff]  }
 0x197   :  { %v314_v33 = vpack.c.bf16 %v302_v30, %v299_v25  ;;  %v240_v36 = vpack.c.bf16 %v228_v35, %v225_v28  ;;  %v12985_v35 = vld [vmem:[#allocation2 + $0x30] sm:$0xff]  }
 0x199   :  { %10657 = vmatprep.mubr.msk.bf16.mxu0 %vm325_vm1, %v314_v33  ;;  %v11291_v33 = vld [vmem:[#allocation9 + $0x20] sm:$0xff]  }
 0x19a   :  { %10658 = vmatmul.mubr.msk.bf16.vlgmr.msra.gmra.mrb[4].mxu0 %vm325_vm1, %v315_v29 }
 0x19b   :  { %10662 = vmatpush3.bf16.msra.mxu0 %v11283_v23  ;;  %10663 = vmatprep.mubr.msk.bf16.mxu0 %vm325_vm1, %v240_v36  ;;  %v10673_v37 = vpop.f32.mrb[4].mxu1  ;;  %v12992_v36 = vld [vmem:[#allocation2 + $0x18] sm:$0xff]  }
 0x19c   :  { %10675 = vmatprep.subr.bf16.mxu0 %v11284_v32  ;;  %v497_v38 = vpop.f32.mrb[5].mxu1 }
 0x19d   :  { %v10674_v39 = vpop.f32.mrb[6].mxu1 }
 0x19e   :  { %v513_v40 = vpack.c.bf16 %v10674_v39, %v10673_v37  ;;  %v500_v41 = vpop.f32.mrb[7].mxu1  ;;  %v12996_v37 = vld [vmem:[#allocation2 + $0x38] sm:$0xff]  }
 0x19f   :  { %v512_v42 = vpack.c.bf16 %v500_v41, %v497_v38  ;;  %v13001_v38 = vld [vmem:[#allocation2 + $0x50] sm:$0xff]   ;;  %v13008_v39 = vld [vmem:[#allocation2 + $0x58] sm:$0xff]   ;;  %v13020_v41 = vld [vmem:[#allocation2 + $0x68] sm:$0xff]  }
 0x1a3   :  { %v10687_v44 = vpop.f32.mrb[8].mxu1 }
 0x1a4   :  { %v637_v45 = vpop.f32.mrb[9].mxu1 }
 0x1a5   :  { %v10688_v46 = vpop.f32.mrb[10].mxu1 }
 0x1a6   :  { %10664 = vmatmul.mubr.msk.bf16.vlgmr.msra.gmra.mrb[4].mxu0 %vm325_vm1, %v241_v34  ;;  %v653_v47 = vpack.c.bf16 %v10688_v46, %v10687_v44  ;;  %v640_v48 = vpop.f32.mrb[11].mxu1  ;;  %v12981_v34 = vld [vmem:[#allocation2 + $0x10] sm:$0xff]   ;;  %v13037_v44 = vld [vmem:[#allocation2 + $0x80] sm:$0xff]  }
 0x1a7   :  { %10676 = vmatpush3.bf16.msra.mxu0 %v11284_v32  ;;  %10677 = vmatprep.mubr.msk.bf16.mxu0 %vm325_vm1, %v512_v42  ;;  %v652_v49 = vpack.c.bf16 %v640_v48, %v637_v45  ;;  %v12973_v32 = vld [vmem:[#allocation2 + $0x28] sm:$0xff]   ;;  %v13025_v42 = vld [vmem:[#allocation2 + $0x70] sm:$0xff]   ;;  %v12422_v46 = vld [vmem:[#allocation2] sm:$0xff]  }
 0x1a8   :  { %10689 = vmatprep.subr.bf16.mxu0 %v11285_v43  ;;  %v13043_v45 = vld [vmem:[#allocation2 + $0x88] sm:$0xff]  }
 0x1a9   :  { %v11293_v48 = vld [vmem:[#allocation9 + $0x30] sm:$0xff]  }
 0x1ab   :  { %v10707_v50 = vpop.f32.mrb[12].mxu1 }
 0x1ac   :  { %v845_v51 = vpop.f32.mrb[13].mxu1 }
 0x1ad   :  { %v10708_v52 = vpop.f32.mrb[14].mxu1 }
 0x1ae   :  { %v861_v54 = vpack.c.bf16 %v10708_v52, %v10707_v50  ;;  %v848_v55 = vpop.f32.mrb[15].mxu1  ;;  %v11295_v50 = vld [vmem:[#allocation9] sm:$0xff]  }
 0x1af   :  { %v860_v56 = vpack.c.bf16 %v848_v55, %v845_v51 }
 0x1b2   :  { %10678 = vmatmul.mubr.msk.bf16.vlgmr.msra.gmra.mrb[4].mxu0 %vm325_vm1, %v513_v40  ;;  %v13013_v40 = vld [vmem:[#allocation2 + $0x60] sm:$0xff]  }
 0x1b3   :  { %10690 = vmatpush3.bf16.msra.mxu0 %v11285_v43  ;;  %10691 = vmatprep.mubr.msk.bf16.mxu0 %vm325_vm1, %v652_v49  ;;  %v10721_v57 = vpop.f32.mrb[16].mxu1  ;;  %v13032_v43 = vld [vmem:[#allocation2 + $0x78] sm:$0xff]  }
 0x1b4   :  { %10695 = vmatprep.subr.bf16.mxu0 %v11286_v53  ;;  %v985_v58 = vpop.f32.mrb[17].mxu1  ;;  %v11294_v49 = vld [vmem:[#allocation9 + $0x38] sm:$0xff]  }
 0x1b5   :  { %v10722_v59 = vpop.f32.mrb[18].mxu1 }
 0x1b6   :  { %v1001_v60 = vpack.c.bf16 %v10722_v59, %v10721_v57  ;;  %v988_v61 = vpop.f32.mrb[19].mxu1 }
 0x1b7   :  { %v1000_v62 = vpack.c.bf16 %v988_v61, %v985_v58 }
 0x1bb   :  { %v10735_v0 = vpop.f32.mrb[20].mxu1 }
 0x1bc   :  { %v1125_v1 = vpop.f32.mrb[21].mxu1 }
 0x1bd   :  { %v10736_v2 = vpop.f32.mrb[22].mxu1 }
 0x1be   :  { %10692 = vmatmul.mubr.msk.bf16.vlgmr.msra.gmra.mrb[4].mxu0 %vm325_vm1, %v653_v47  ;;  %v1141_v4 = vpack.c.bf16 %v10736_v2, %v10735_v0  ;;  %v1128_v6 = vpop.f32.mrb[23].mxu1  ;;  %v11292_v47 = vld [vmem:[#allocation9 + $0x28] sm:$0xff]  }
 0x1bf   :  { %10696 = vmatpush3.bf16.msra.mxu0 %v11286_v53  ;;  %10697 = vmatprep.mubr.msk.bf16.mxu0 %vm325_vm1, %v12878_v3  ;;  %v1140_v7 = vpack.c.bf16 %v1128_v6, %v1125_v1  ;;  %v11290_v3 = vld [vmem:[#allocation6 + $0x40] sm:$0xff]  }
 0x1c0   :  { %10709 = vmatprep.subr.bf16.mxu0 %v11287_v63 }
 0x1c3   :  { %v10749_v8 = vpop.f32.mrb[24].mxu1 }
 0x1c4   :  { %v1265_v9 = vpop.f32.mrb[25].mxu1 }
 0x1c5   :  { %v10750_v10 = vpop.f32.mrb[26].mxu1 }
 0x1c6   :  { %v1281_v12 = vpack.c.bf16 %v10750_v10, %v10749_v8  ;;  %v1268_v13 = vpop.f32.mrb[27].mxu1 }
 0x1c7   :  { %v1280_v14 = vpack.c.bf16 %v1268_v13, %v1265_v9  ;;  %v11296_v13 = vld [vmem:[#allocation9 + $0x8] sm:$0xff]  }
 0x1ca   :  { %10698 = vmatmul.mubr.msk.bf16.vlgmr.msra.gmra.mrb[4].mxu0 %vm325_vm1, %v12880_v5  ;;  %v12951_v5 = vld [vmem:[#allocation2 + $0x20] sm:$0xff]  }
 0x1cb   :  { %10710 = vmatpush3.bf16.msra.mxu0 %v11287_v63  ;;  %10711 = vmatprep.mubr.msk.bf16.mxu0 %vm325_vm1, %v860_v56 }
 0x1cc   :  { %10723 = vmatprep.subr.bf16.mxu0 %v11288_v11 }
 0x1d6   :  { %10712 = vmatmul.mubr.msk.bf16.vlgmr.msra.gmra.mrb[4].mxu0 %vm325_vm1, %v861_v54 }
 0x1d7   :  { %10724 = vmatpush3.bf16.msra.mxu0 %v11288_v11  ;;  %10725 = vmatprep.mubr.msk.bf16.mxu0 %vm325_vm1, %v1000_v62 }
 0x1d8   :  { %10737 = vmatprep.subr.bf16.mxu0 %v11289_v15 }
 0x1e2   :  { %10726 = vmatmul.mubr.msk.bf16.vlgmr.msra.gmra.mrb[4].mxu0 %vm325_vm1, %v1001_v60 }
 0x1e3   :  { %10738 = vmatpush3.bf16.msra.mxu0 %v11289_v15  ;;  %10739 = vmatprep.mubr.msk.bf16.mxu0 %vm325_vm1, %v1140_v7  ;;  %v11297_v15 = vld [vmem:[#allocation9 + $0x10] sm:$0xff]  }
 0x1e4   :  { %10751 = vmatprep.subr.bf16.mxu0 %v11290_v3 }
 0x1ee   :  { %10740 = vmatmul.mubr.msk.bf16.vlgmr.msra.gmra.mrb[4].mxu0 %vm325_vm1, %v1141_v4 }
 0x1ef   :  { %10752 = vmatpush3.bf16.msra.mxu0 %v11290_v3  ;;  %10753 = vmatprep.mubr.msk.bf16.mxu0 %vm325_vm1, %v1280_v14 }
 0x1fa   :  { %10754 = vmatmul.mubr.msk.bf16.vlgmr.msra.gmra.mrb[4].mxu0 %vm325_vm1, %v1281_v12 }
 0x1fb   :  { %10801 = vmatprep.mubr.msk.bf16.mxu0 %vm184_vm0, %v12951_v5 }
 0x2cd   :  { %v10755_v17 = vpop.f32.mrb[4].mxu0 }
 0x2ce   :  { %v1359_v18 = vadd.f32 %v10755_v17, %v9622_v16  ;;  %v1331_v19 = vpop.f32.mrb[5].mxu0 }
 0x2cf   :  { %v1357_v20 = vadd.f32 %v9622_v16, %v1331_v19  ;;  %v10756_v21 = vpop.f32.mrb[6].mxu0 }
 0x2d0   :  { %v1360_v22 = vadd.f32 %v10756_v21, %v9622_v16  ;;  %v1334_v23 = vpop.f32.mrb[7].mxu0  ;;  %v1363_v25 = vmax.f32 %v1359_v18, 0.0 }
 0x2d1   :  { %v1358_v24 = vadd.f32 %v9622_v16, %v1334_v23  ;;  %v1361_v27 = vmax.f32 %v1357_v20, 0.0  ;;  %v11298_v20 = vld [vmem:[#allocation9 + $0x18] sm:$0xff]  }
 0x2d2   :  { %v1364_v26 = vmax.f32 %v1360_v22, 0.0  ;;  %v11299_v22 = vld [vmem:[#allocation9 + $0x40] sm:$0xff]  }
 0x2d3   :  { %v1362_v28 = vmax.f32 %v1358_v24, 0.0 }
 0x2d4   :  { %v12955_v29 = vpack.c.bf16 %v1364_v26, %v1363_v25 }
 0x2d5   :  { %v12957_v30 = vpack.c.bf16 %v1362_v28, %v1361_v27  ;;  %v11300_v28 = vld [vmem:[#allocation9 + $0x48] sm:$0xff]  }
 0x2d7   :  { %10757 = vmatprep.subr.bf16.mxu1 %v12957_v30  ;;  %10797 = vmatprep.subr.bf16.mxu0 %v12957_v30 }
 0x2d8   :  { %10758 = vmatpush3.bf16.msra.mxu1 %v12957_v30  ;;  %10798 = vmatpush3.bf16.msra.mxu0 %v12957_v30 }
 0x2d9   :  { %10759 = vmatprep.subr.bf16.mxu1 %v12955_v29  ;;  %10799 = vmatprep.subr.bf16.mxu0 %v12955_v29 }
 0x2dc   :  { %10760 = vmatpush3.bf16.msra.mxu1 %v12955_v29  ;;  %10800 = vmatpush3.bf16.msra.mxu0 %v12955_v29 }
 0x2dd   :  { %10765 = vmatprep.subr.bf16.mxu1 %v12957_v30  ;;  %10817 = vmatprep.subr.bf16.mxu0 %v12957_v30 }
 0x2df   :  { %10762 = vmatmul.mubr.msk.bf16.vlgmr.msra.gmra.mrb[28].mxu1 %vm184_vm0, %v12969_v31  ;;  %10802 = vmatmul.mubr.msk.bf16.vlgmr.msra.gmra.mrb[8].mxu0 %vm184_vm0, %v12973_v32 }
 0x2e0   :  { %10766 = vmatpush3.bf16.msra.mxu1 %v12957_v30  ;;  %10818 = vmatpush3.bf16.msra.mxu0 %v12957_v30 }
 0x2e1   :  { %10767 = vmatprep.subr.bf16.mxu1 %v12955_v29  ;;  %10819 = vmatprep.subr.bf16.mxu0 %v12955_v29 }
 0x2e2   :  { %10769 = vmatprep.mubr.msk.bf16.mxu1 %vm184_vm0, %v12981_v34  ;;  %10821 = vmatprep.mubr.msk.bf16.mxu0 %vm184_vm0, %v12985_v35 }
 0x2e4   :  { %10768 = vmatpush3.bf16.msra.mxu1 %v12955_v29  ;;  %10820 = vmatpush3.bf16.msra.mxu0 %v12955_v29 }
 0x2e5   :  { %10849 = vmatprep.subr.bf16.mxu0 %v12957_v30  ;;  %10773 = vmatprep.subr.bf16.mxu1 %v11291_v33 }
 0x2e7   :  { %10770 = vmatmul.mubr.msk.bf16.vlgmr.msra.gmra.mrb[32].mxu1 %vm184_vm0, %v12992_v36  ;;  %10822 = vmatmul.mubr.msk.bf16.vlgmr.msra.gmra.mrb[12].mxu0 %vm184_vm0, %v12996_v37 }
 0x2e8   :  { %10850 = vmatpush3.bf16.msra.mxu0 %v12957_v30  ;;  %10853 = vmatprep.mubr.msk.bf16.mxu0 %vm184_vm0, %v13001_v38 }
 0x2e9   :  { %10851 = vmatprep.subr.bf16.mxu0 %v12955_v29  ;;  %10774 = vmatpush3.bf16.msra.mxu1 %v11291_v33 }
 0x2ea   :  { %10775 = vmatprep.subr.bf16.mxu1 %v11292_v47 }
 0x2ec   :  { %10852 = vmatpush3.bf16.msra.mxu0 %v12955_v29 }
 0x2ed   :  { %10869 = vmatprep.subr.bf16.mxu0 %v12957_v30  ;;  %10776 = vmatpush3.bf16.msra.mxu1 %v11292_v47 }
 0x2ee   :  { %10777 = vmatprep.subr.bf16.mxu1 %v11293_v48 }
 0x2ef   :  { %10854 = vmatmul.mubr.msk.bf16.vlgmr.msra.gmra.mrb[16].mxu0 %vm184_vm0, %v13008_v39 }
 0x2f0   :  { %10870 = vmatpush3.bf16.msra.mxu0 %v12957_v30  ;;  %10873 = vmatprep.mubr.msk.bf16.mxu0 %vm184_vm0, %v13013_v40 }
 0x2f1   :  { %10871 = vmatprep.subr.bf16.mxu0 %v12955_v29  ;;  %10778 = vmatpush3.bf16.msra.mxu1 %v11293_v48 }
 0x2f2   :  { %10779 = vmatprep.subr.bf16.mxu1 %v11294_v49 }
 0x2f4   :  { %10872 = vmatpush3.bf16.msra.mxu0 %v12955_v29 }
 0x2f5   :  { %10889 = vmatprep.subr.bf16.mxu0 %v12957_v30  ;;  %10780 = vmatpush3.bf16.msra.mxu1 %v11294_v49 }
 0x2f6   :  { %10785 = vmatprep.subr.bf16.mxu1 %v11295_v50 }
 0x2f7   :  { %10874 = vmatmul.mubr.msk.bf16.vlgmr.msra.gmra.mrb[20].mxu0 %vm184_vm0, %v13020_v41 }
 0x2f8   :  { %10890 = vmatpush3.bf16.msra.mxu0 %v12957_v30  ;;  %10893 = vmatprep.mubr.msk.bf16.mxu0 %vm184_vm0, %v13025_v42 }
 0x2f9   :  { %10891 = vmatprep.subr.bf16.mxu0 %v12955_v29 }
 0x2fc   :  { %10892 = vmatpush3.bf16.msra.mxu0 %v12955_v29 }
 0x2fd   :  { %10909 = vmatprep.subr.bf16.mxu0 %v12957_v30 }
 0x2ff   :  { %10894 = vmatmul.mubr.msk.bf16.vlgmr.msra.gmra.mrb[24].mxu0 %vm184_vm0, %v13032_v43 }
 0x300   :  { %10910 = vmatpush3.bf16.msra.mxu0 %v12957_v30  ;;  %10913 = vmatprep.mubr.msk.bf16.mxu0 %vm184_vm0, %v13037_v44 }
 0x301   :  { %10911 = vmatprep.subr.bf16.mxu0 %v12955_v29 }
 0x304   :  { %10912 = vmatpush3.bf16.msra.mxu0 %v12955_v29 }
 0x307   :  { %10914 = vmatmul.mubr.msk.bf16.vlgmr.msra.gmra.mrb[28].mxu0 %vm184_vm0, %v13043_v45 }
 0x308   :  { %10933 = vmatprep.mubr.msk.bf16.mxu0 %vm184_vm0, %v12422_v46  ;;  %v11301_v46 = vld [vmem:[#allocation9 + $0x50] sm:$0xff]  }
 0x3b2   :  { %v10763_v51 = vpop.f32.mrb[28].mxu1  ;;  %v13048_v52 = vpop.f32.mrb[8].mxu0 }
 0x3b3   :  { %v1401_v53 = vpop.f32.mrb[29].mxu1  ;;  %v1679_v54 = vpop.f32.mrb[9].mxu0 }
 0x3b4   :  { %v10764_v55 = vpop.f32.mrb[30].mxu1  ;;  %v13050_v56 = vpop.f32.mrb[10].mxu0 }
 0x3b5   :  { %v1417_v57 = vpack.c.bf16 %v10764_v55, %v10763_v51  ;;  %v1404_v58 = vpop.f32.mrb[31].mxu1  ;;  %v1695_v59 = vpack.c.bf16 %v13050_v56, %v13048_v52  ;;  %v1682_v60 = vpop.f32.mrb[11].mxu0  ;;  %v11303_v55 = vld [vmem:[#allocation9 + $0x60] sm:$0xff]   ;;  %v11309_v52 = vld [vmem:[#allocation9 + $0x90] sm:$0xff]   ;;  %v11310_v56 = vld [vmem:[#allocation9 + $0x98] sm:$0xff]  }
 0x3b6   :  { %v1416_v61 = vpack.c.bf16 %v1404_v58, %v1401_v53  ;;  %v1694_v62 = vpack.c.bf16 %v1682_v60, %v1679_v54  ;;  %v11302_v53 = vld [vmem:[#allocation9 + $0x58] sm:$0xff]  }
 0x3ba   :  { %v10771_v63 = vpop.f32.mrb[32].mxu1  ;;  %v13054_v0 = vpop.f32.mrb[12].mxu0 }
 0x3bb   :  { %v1460_v1 = vpop.f32.mrb[33].mxu1  ;;  %v13056_v2 = vpop.f32.mrb[13].mxu0 }
 0x3bc   :  { %v10772_v4 = vpop.f32.mrb[34].mxu1  ;;  %v13058_v6 = vpop.f32.mrb[14].mxu0 }
 0x3bd   :  { %v1476_v7 = vpack.c.bf16 %v10772_v4, %v10771_v63  ;;  %v1463_v8 = vpop.f32.mrb[35].mxu1  ;;  %v1838_v9 = vpack.c.bf16 %v13058_v6, %v13054_v0  ;;  %v1825_v10 = vpop.f32.mrb[15].mxu0  ;;  %v11304_v63 = vld [vmem:[#allocation9 + $0x68] sm:$0xff]   ;;  %v11307_v4 = vld [vmem:[#allocation9 + $0x80] sm:$0xff]   ;;  %v11314_v0 = vld [vmem:[#allocation9 + $0xb8] sm:$0xff]  }
 0x3be   :  { %v1475_v11 = vpack.c.bf16 %v1463_v8, %v1460_v1  ;;  %v1837_v12 = vpack.c.bf16 %v1825_v10, %v13056_v2  ;;  %v11305_v1 = vld [vmem:[#allocation9 + $0x70] sm:$0xff]   ;;  %v11306_v2 = vld [vmem:[#allocation9 + $0x78] sm:$0xff]   ;;  %v11312_v8 = vld [vmem:[#allocation9 + $0xa8] sm:$0xff]  }
 0x3bf   :  { %v11315_v6 = vld [vmem:[#allocation9 + $0xc0] sm:$0xff]   ;;  %v11318_v10 = vld [vmem:[#allocation9 + $0xd8] sm:$0xff]  }
 0x3c0   :  { %10781 = vmatprep.mubr.msk.bf16.mxu1 %vm1510_vm2, %v1475_v11  ;;  %v11319_v11 = vld [vmem:[#allocation9 + $0xe0] sm:$0xff]  }
 0x3c1   :  { %10782 = vmatmul.mubr.msk.bf16.vlgmr.msra.gmra.mrb[36].mxu1 %vm1510_vm2, %v1476_v7  ;;  %v11308_v7 = vld [vmem:[#allocation9 + $0x88] sm:$0xff]  }
 0x3c2   :  { %10786 = vmatpush3.bf16.msra.mxu1 %v11295_v50  ;;  %10793 = vmatprep.mubr.msk.bf16.mxu1 %vm1510_vm2, %v1416_v61  ;;  %v13066_v14 = vpop.f32.mrb[16].mxu0 }
 0x3c3   :  { %10787 = vmatprep.subr.bf16.mxu1 %v11296_v13  ;;  %v13068_v3 = vpop.f32.mrb[17].mxu0 }
 0x3c4   :  { %v13070_v16 = vpop.f32.mrb[18].mxu0 }
 0x3c5   :  { %v2073_v17 = vpack.c.bf16 %v13070_v16, %v13066_v14  ;;  %v13074_v18 = vpop.f32.mrb[19].mxu0  ;;  %v11322_v14 = vld [vmem:[#allocation9 + $0xf8] sm:$0xff]   ;;  %v11325_v16 = vld [vmem:[#allocation9 + $0x110] sm:$0xff]  }
 0x3c6   :  { %10788 = vmatpush3.bf16.msra.mxu1 %v11296_v13  ;;  %v2072_v19 = vpack.c.bf16 %v13074_v18, %v13068_v3  ;;  %v11321_v13 = vld [vmem:[#allocation9 + $0xf0] sm:$0xff]   ;;  %v11324_v3 = vld [vmem:[#allocation9 + $0x108] sm:$0xff]   ;;  %v9693_v18 = vld [vmem:[#allocation10] ss:$0 sm:$0xff] }
 0x3c7   :  { %10789 = vmatprep.subr.bf16.mxu1 %v11297_v15 }
 0x3ca   :  { %10790 = vmatpush3.bf16.msra.mxu1 %v11297_v15  ;;  %v13078_v21 = vpop.f32.mrb[20].mxu0  ;;  %v11323_v15 = vld [vmem:[#allocation9 + $0x100] sm:$0xff]  }
 0x3cb   :  { %10791 = vmatprep.subr.bf16.mxu1 %v11298_v20  ;;  %v13080_v23 = vpop.f32.mrb[21].mxu0 }
 0x3cc   :  { %v13082_v24 = vpop.f32.mrb[22].mxu0 }
 0x3cd   :  { %v2216_v25 = vpack.c.bf16 %v13082_v24, %v13078_v21  ;;  %v13086_v26 = vpop.f32.mrb[23].mxu0 }
 0x3ce   :  { %10792 = vmatpush3.bf16.msra.mxu1 %v11298_v20  ;;  %v2215_v27 = vpack.c.bf16 %v13086_v26, %v13080_v23 }
 0x3cf   :  { %10805 = vmatprep.subr.bf16.mxu1 %v11299_v22 }
 0x3d1   :  { %10794 = vmatmul.mubr.msk.bf16.vlgmr.msra.gmra.mrb[36].mxu1 %vm1510_vm2, %v1417_v57 }
 0x3d2   :  { %10806 = vmatpush3.bf16.msra.mxu1 %v11299_v22  ;;  %10813 = vmatprep.mubr.msk.bf16.mxu1 %vm1510_vm2, %v1694_v62  ;;  %v13092_v33 = vpop.f32.mrb[24].mxu0 }
 0x3d3   :  { %10807 = vmatprep.subr.bf16.mxu1 %v11300_v28  ;;  %v13094_v47 = vpop.f32.mrb[25].mxu0 }
 0x3d4   :  { %v13096_v48 = vpop.f32.mrb[26].mxu0 }
 0x3d5   :  { %v2359_v49 = vpack.c.bf16 %v13096_v48, %v13092_v33  ;;  %v13100_v50 = vpop.f32.mrb[27].mxu0 }
 0x3d6   :  { %10808 = vmatpush3.bf16.msra.mxu1 %v11300_v28  ;;  %v2358_v51 = vpack.c.bf16 %v13100_v50, %v13094_v47  ;;  %v11339_v50 = vld [vmem:[#allocation12 + $0xc0] ss:$8 sps:$4 sm:$0xff]  }
 0x3d7   :  { %10809 = vmatprep.subr.bf16.mxu1 %v11301_v46 }
 0x3da   :  { %10810 = vmatpush3.bf16.msra.mxu1 %v11301_v46  ;;  %v13104_v54 = vpop.f32.mrb[28].mxu0 }
 0x3db   :  { %10811 = vmatprep.subr.bf16.mxu1 %v11302_v53  ;;  %v13106_v57 = vpop.f32.mrb[29].mxu0 }
 0x3dc   :  { %v13108_v58 = vpop.f32.mrb[30].mxu0 }
 0x3dd   :  { %v2502_v60 = vpack.c.bf16 %v13108_v58, %v13104_v54  ;;  %v13112_v61 = vpop.f32.mrb[31].mxu0  ;;  %v11348_v54 = vld [vmem:[#allocation12 + $0xf0] ss:$8 sps:$4 sm:$0xff]  }
 0x3de   :  { %10812 = vmatpush3.bf16.msra.mxu1 %v11302_v53  ;;  %v2501_v62 = vpack.c.bf16 %v13112_v61, %v13106_v57  ;;  %v11345_v53 = vld [vmem:[#allocation12 + $0xe0] ss:$8 sps:$4 sm:$0xff]  }
 0x3df   :  { %10825 = vmatprep.subr.bf16.mxu1 %v11303_v55 }
 0x3e1   :  { %10814 = vmatmul.mubr.msk.bf16.vlgmr.msra.gmra.mrb[36].mxu1 %vm1510_vm2, %v1695_v59  ;;  %v11311_v59 = vld [vmem:[#allocation9 + $0xa0] sm:$0xff]  }
 0x3e2   :  { %10826 = vmatpush3.bf16.msra.mxu1 %v11303_v55  ;;  %10833 = vmatprep.mubr.msk.bf16.mxu1 %vm1510_vm2, %v1837_v12  ;;  %v11320_v12 = vld [vmem:[#allocation9 + $0xe8] sm:$0xff]   ;;  %v12687_v55 = vmov 0  }
 0x3e3   :  { %10827 = vmatprep.subr.bf16.mxu1 %v11304_v63 }
 0x3e6   :  { %10828 = vmatpush3.bf16.msra.mxu1 %v11304_v63 }
 0x3e7   :  { %10829 = vmatprep.subr.bf16.mxu1 %v11305_v1 }
 0x3ea   :  { %10830 = vmatpush3.bf16.msra.mxu1 %v11305_v1 }
 0x3eb   :  { %10831 = vmatprep.subr.bf16.mxu1 %v11306_v2 }
 0x3ee   :  { %10832 = vmatpush3.bf16.msra.mxu1 %v11306_v2 }
 0x3ef   :  { %10837 = vmatprep.subr.bf16.mxu1 %v11307_v4 }
 0x3f1   :  { %10834 = vmatmul.mubr.msk.bf16.vlgmr.msra.gmra.mrb[36].mxu1 %vm1510_vm2, %v1838_v9  ;;  %v11316_v9 = vld [vmem:[#allocation9 + $0xc8] sm:$0xff]  }
 0x3f2   :  { %10838 = vmatpush3.bf16.msra.mxu1 %v11307_v4  ;;  %10845 = vmatprep.mubr.msk.bf16.mxu1 %vm1510_vm2, %v12957_v30  ;;  %v11313_v30 = vld [vmem:[#allocation9 + $0xb0] sm:$0xff]  }
 0x3f3   :  { %10839 = vmatprep.subr.bf16.mxu1 %v11308_v7 }
 0x3f6   :  { %10840 = vmatpush3.bf16.msra.mxu1 %v11308_v7 }
 0x3f7   :  { %10841 = vmatprep.subr.bf16.mxu1 %v11309_v52 }
 0x3fa   :  { %10842 = vmatpush3.bf16.msra.mxu1 %v11309_v52  ;;  %v11351_v52 = vld [vmem:[#allocation12] ss:$8 sps:$4 sm:$0xff]  }
 0x3fb   :  { %10843 = vmatprep.subr.bf16.mxu1 %v11310_v56 }
 0x3fe   :  { %10844 = vmatpush3.bf16.msra.mxu1 %v11310_v56 }
 0x3ff   :  { %10857 = vmatprep.subr.bf16.mxu1 %v11311_v59 }
 0x401   :  { %10846 = vmatmul.mubr.msk.bf16.vlgmr.msra.gmra.mrb[36].mxu1 %vm1510_vm2, %v12955_v29  ;;  %v11317_v29 = vld [vmem:[#allocation9 + $0xd0] sm:$0xff]  }
 0x402   :  { %10858 = vmatpush3.bf16.msra.mxu1 %v11311_v59  ;;  %10865 = vmatprep.mubr.msk.bf16.mxu1 %vm1510_vm2, %v2072_v19  ;;  %v11356_v59 = vld [vmem:[#allocation12 + $0x14] ss:$8 sps:$4 sm:$0xff]  }
 0x403   :  { %10859 = vmatprep.subr.bf16.mxu1 %v11312_v8 }
 0x406   :  { %10860 = vmatpush3.bf16.msra.mxu1 %v11312_v8  ;;  %v11354_v8 = vld [vmem:[#allocation12 + $0x10] ss:$8 sps:$4 sm:$0xff]  }
 0x407   :  { %10861 = vmatprep.subr.bf16.mxu1 %v11313_v30 }
 0x40a   :  { %10862 = vmatpush3.bf16.msra.mxu1 %v11313_v30  ;;  %v11359_v30 = vld [vmem:[#allocation12 + $0x24] ss:$8 sps:$4 sm:$0xff]  }
 0x40b   :  { %10863 = vmatprep.subr.bf16.mxu1 %v11314_v0 }
 0x40e   :  { %10864 = vmatpush3.bf16.msra.mxu1 %v11314_v0  ;;  %v11357_v0 = vld [vmem:[#allocation12 + $0x20] ss:$8 sps:$4 sm:$0xff]  }
 0x40f   :  { %10877 = vmatprep.subr.bf16.mxu1 %v11315_v6 }
 0x411   :  { %10866 = vmatmul.mubr.msk.bf16.vlgmr.msra.gmra.mrb[36].mxu1 %vm1510_vm2, %v2073_v17  ;;  %v11326_v17 = vld [vmem:[#allocation9 + $0x118] sm:$0xff]  }
 0x412   :  { %10878 = vmatpush3.bf16.msra.mxu1 %v11315_v6  ;;  %10885 = vmatprep.mubr.msk.bf16.mxu1 %vm1510_vm2, %v2215_v27  ;;  %v11362_v6 = vld [vmem:[#allocation12 + $0x34] ss:$8 sps:$4 sm:$0xff]  }
 0x413   :  { %10879 = vmatprep.subr.bf16.mxu1 %v11316_v9 }
 0x416   :  { %10880 = vmatpush3.bf16.msra.mxu1 %v11316_v9  ;;  %v11360_v9 = vld [vmem:[#allocation12 + $0x30] ss:$8 sps:$4 sm:$0xff]  }
 0x417   :  { %10881 = vmatprep.subr.bf16.mxu1 %v11317_v29 }
 0x41a   :  { %10882 = vmatpush3.bf16.msra.mxu1 %v11317_v29  ;;  %v11365_v29 = vld [vmem:[#allocation12 + $0x44] ss:$8 sps:$4 sm:$0xff]  }
 0x41b   :  { %10883 = vmatprep.subr.bf16.mxu1 %v11318_v10 }
 0x41e   :  { %10884 = vmatpush3.bf16.msra.mxu1 %v11318_v10  ;;  %v11363_v10 = vld [vmem:[#allocation12 + $0x40] ss:$8 sps:$4 sm:$0xff]  }
 0x41f   :  { %10897 = vmatprep.subr.bf16.mxu1 %v11319_v11 }
 0x421   :  { %10886 = vmatmul.mubr.msk.bf16.vlgmr.msra.gmra.mrb[36].mxu1 %vm1510_vm2, %v2216_v25 }
 0x422   :  { %10898 = vmatpush3.bf16.msra.mxu1 %v11319_v11  ;;  %10905 = vmatprep.mubr.msk.bf16.mxu1 %vm1510_vm2, %v2358_v51  ;;  %v11347_v51 = vld [vmem:[#allocation12 + $0xe4] ss:$8 sps:$4 sm:$0xff]   ;;  %v11368_v11 = vld [vmem:[#allocation12 + $0x54] ss:$8 sps:$4 sm:$0xff]  }
 0x423   :  { %10899 = vmatprep.subr.bf16.mxu1 %v11320_v12 }
 0x426   :  { %10900 = vmatpush3.bf16.msra.mxu1 %v11320_v12  ;;  %v11366_v12 = vld [vmem:[#allocation12 + $0x50] ss:$8 sps:$4 sm:$0xff]  }
 0x427   :  { %10901 = vmatprep.subr.bf16.mxu1 %v11321_v13 }
 0x42a   :  { %10902 = vmatpush3.bf16.msra.mxu1 %v11321_v13  ;;  %v11371_v13 = vld [vmem:[#allocation12 + $0x64] ss:$8 sps:$4 sm:$0xff]  }
 0x42b   :  { %10903 = vmatprep.subr.bf16.mxu1 %v11322_v14 }
 0x42e   :  { %10904 = vmatpush3.bf16.msra.mxu1 %v11322_v14  ;;  %v11369_v14 = vld [vmem:[#allocation12 + $0x60] ss:$8 sps:$4 sm:$0xff]  }
 0x42f   :  { %10917 = vmatprep.subr.bf16.mxu1 %v11323_v15 }
 0x431   :  { %10906 = vmatmul.mubr.msk.bf16.vlgmr.msra.gmra.mrb[36].mxu1 %vm1510_vm2, %v2359_v49  ;;  %v11338_v49 = vld [vmem:[#allocation12 + $0xb4] ss:$8 sps:$4 sm:$0xff]  }
 0x432   :  { %10918 = vmatpush3.bf16.msra.mxu1 %v11323_v15  ;;  %10925 = vmatprep.mubr.msk.bf16.mxu1 %vm1510_vm2, %v2501_v62  ;;  %v11374_v15 = vld [vmem:[#allocation12 + $0x74] ss:$8 sps:$4 sm:$0xff]  }
 0x433   :  { %10919 = vmatprep.subr.bf16.mxu1 %v11324_v3 }
 0x436   :  { %10920 = vmatpush3.bf16.msra.mxu1 %v11324_v3  ;;  %v11372_v3 = vld [vmem:[#allocation12 + $0x70] ss:$8 sps:$4 sm:$0xff]  }
 0x437   :  { %10921 = vmatprep.subr.bf16.mxu1 %v11325_v16 }
 0x43a   :  { %10922 = vmatpush3.bf16.msra.mxu1 %v11325_v16  ;;  %v11377_v16 = vld [vmem:[#allocation12 + $0x104] ss:$8 sps:$4 sm:$0xff]  }
 0x43b   :  { %10923 = vmatprep.subr.bf16.mxu1 %v11326_v17 }
 0x43e   :  { %10924 = vmatpush3.bf16.msra.mxu1 %v11326_v17  ;;  %v11375_v17 = vld [vmem:[#allocation12 + $0x100] ss:$8 sps:$4 sm:$0xff]  }
 0x441   :  { %10926 = vmatmul.mubr.msk.bf16.vlgmr.msra.gmra.mrb[36].mxu1 %vm1510_vm2, %v2502_v60 }
 0x442   :  { %10957 = vmatprep.mubr.msk.bf16.mxu1 %vm184_vm0, %v12985_v35  ;;  %v11329_v35 = vld [vmem:[#allocation12 + $0x84] ss:$8 sps:$4 sm:$0xff]  }
 0x514   :  { %v10927_v19 = vpop.f32.mrb[36].mxu1 }
 0x515   :  { %v2604_v20 = vadd.f32 %v10927_v19, %v9693_v18  ;;  %v2576_v21 = vpop.f32.mrb[37].mxu1  ;;  %v11378_v19 = vld [vmem:[#allocation12 + $0x110] ss:$8 sps:$4 sm:$0xff]  }
 0x516   :  { %v2602_v22 = vadd.f32 %v9693_v18, %v2576_v21  ;;  %v10928_v23 = vpop.f32.mrb[38].mxu1  ;;  %v11381_v21 = vld [vmem:[#allocation12 + $0x120] ss:$8 sps:$4 sm:$0xff]  }
 0x517   :  { %v2605_v24 = vadd.f32 %v10928_v23, %v9693_v18  ;;  %v2579_v25 = vpop.f32.mrb[39].mxu1  ;;  %v2608_v27 = vmax.f32 %v2604_v20, 0.0  ;;  %v11383_v20 = vld [vmem:[#allocation12 + $0x124] ss:$8 sps:$4 sm:$0xff]   ;;  %v11384_v23 = vld [vmem:[#allocation12 + $0x130] ss:$8 sps:$4 sm:$0xff]  }
 0x518   :  { %v2603_v26 = vadd.f32 %v9693_v18, %v2579_v25  ;;  %v2606_v33 = vmax.f32 %v2602_v22, 0.0  ;;  %v11380_v18 = vld [vmem:[#allocation12 + $0x114] ss:$8 sps:$4 sm:$0xff]  }
 0x519   :  { %v2609_v28 = vmax.f32 %v2605_v24, 0.0  ;;  %v11386_v22 = vld [vmem:[#allocation12 + $0x134] ss:$8 sps:$4 sm:$0xff]   ;;  %v11389_v24 = vld [vmem:[#allocation12 + $0x144] ss:$8 sps:$4 sm:$0xff]  }
 0x51a   :  { %v2607_v46 = vmax.f32 %v2603_v26, 0.0  ;;  %v11392_v25 = vld [vmem:[#allocation12 + $0x154] ss:$8 sps:$4 sm:$0xff]   ;;  %v11395_v26 = vld [vmem:[#allocation12 + $0x164] ss:$8 sps:$4 sm:$0xff]  }
 0x51b   :  { %v13163_v47 = vpack.c.bf16 %v2609_v28, %v2608_v27  ;;  %v11393_v27 = vld [vmem:[#allocation12 + $0x160] ss:$8 sps:$4 sm:$0xff]   ;;  %v11398_v28 = vld [vmem:[#allocation12 + $0x174] ss:$8 sps:$4 sm:$0xff]  }
 0x51c   :  { %v13165_v48 = vpack.c.bf16 %v2607_v46, %v2606_v33  ;;  %v11396_v33 = vld [vmem:[#allocation12 + $0x170] ss:$8 sps:$4 sm:$0xff]   ;;  %v11401_v46 = vld [vmem:[#allocation12 + $0x184] ss:$8 sps:$4 sm:$0xff]  }
 0x51e   :  { %10929 = vmatprep.subr.bf16.mxu0 %v13165_v48  ;;  %10953 = vmatprep.subr.bf16.mxu1 %v13165_v48 }
 0x51f   :  { %10930 = vmatpush3.bf16.msra.mxu0 %v13165_v48  ;;  %10954 = vmatpush3.bf16.msra.mxu1 %v13165_v48 }
 0x520   :  { %10931 = vmatprep.subr.bf16.mxu0 %v13163_v47  ;;  %10955 = vmatprep.subr.bf16.mxu1 %v13163_v47 }
 0x523   :  { %10932 = vmatpush3.bf16.msra.mxu0 %v13163_v47  ;;  %10956 = vmatpush3.bf16.msra.mxu1 %v13163_v47 }
 0x524   :  { %10937 = vmatprep.subr.bf16.mxu0 %v13165_v48  ;;  %10961 = vmatprep.subr.bf16.mxu1 %v13165_v48 }
 0x526   :  { %10934 = vmatmul.mubr.msk.bf16.vlgmr.msra.gmra.mrb[32].mxu0 %vm184_vm0, %v12969_v31  ;;  %10958 = vmatmul.mubr.msk.bf16.vlgmr.msra.gmra.mrb[40].mxu1 %vm184_vm0, %v12996_v37  ;;  %v11327_v31 = vld [vmem:[#allocation12 + $0x80] ss:$8 sps:$4 sm:$0xff]   ;;  %v11332_v37 = vld [vmem:[#allocation12 + $0x94] ss:$8 sps:$4 sm:$0xff]  }
 0x527   :  { %10938 = vmatpush3.bf16.msra.mxu0 %v13165_v48  ;;  %10962 = vmatpush3.bf16.msra.mxu1 %v13165_v48 }
 0x528   :  { %10939 = vmatprep.subr.bf16.mxu0 %v13163_v47  ;;  %10963 = vmatprep.subr.bf16.mxu1 %v13163_v47 }
 0x529   :  { %10941 = vmatprep.mubr.msk.bf16.mxu0 %vm184_vm0, %v12981_v34  ;;  %10965 = vmatprep.mubr.msk.bf16.mxu1 %vm184_vm0, %v13001_v38  ;;  %v11330_v34 = vld [vmem:[#allocation12 + $0x90] ss:$8 sps:$4 sm:$0xff]   ;;  %v11335_v38 = vld [vmem:[#allocation12 + $0xa4] ss:$8 sps:$4 sm:$0xff]  }
 0x52b   :  { %10940 = vmatpush3.bf16.msra.mxu0 %v13163_v47  ;;  %10964 = vmatpush3.bf16.msra.mxu1 %v13163_v47 }
 0x52c   :  { %10969 = vmatprep.subr.bf16.mxu1 %v13165_v48  ;;  %2827 = vmatprep.subr.bf16.mxu0 %v11329_v35 }
 0x52e   :  { %10942 = vmatmul.mubr.msk.bf16.vlgmr.msra.gmra.mrb[36].mxu0 %vm184_vm0, %v12992_v36  ;;  %10966 = vmatmul.mubr.msk.bf16.vlgmr.msra.gmra.mrb[44].mxu1 %vm184_vm0, %v13008_v39  ;;  %v11333_v36 = vld [vmem:[#allocation12 + $0xa0] ss:$8 sps:$4 sm:$0xff]   ;;  %v11336_v39 = vld [vmem:[#allocation12 + $0xb0] ss:$8 sps:$4 sm:$0xff]  }
 0x52f   :  { %10970 = vmatpush3.bf16.msra.mxu1 %v13165_v48  ;;  %10973 = vmatprep.mubr.msk.bf16.mxu1 %vm184_vm0, %v13013_v40  ;;  %v11341_v40 = vld [vmem:[#allocation12 + $0xc4] ss:$8 sps:$4 sm:$0xff]  }
 0x530   :  { %10971 = vmatprep.subr.bf16.mxu1 %v13163_v47  ;;  %2828 = vmatpush1.bf16.msra.mxu0 %v11327_v31 }
 0x531   :  { %2829 = vmatprep.subr.bf16.mxu0 %v11332_v37  ;;  %2859 = vmatprep.mubr.bf16.mxu0 %v12687_v55 }
 0x533   :  { %10972 = vmatpush3.bf16.msra.mxu1 %v13163_v47 }
 0x534   :  { %10977 = vmatprep.subr.bf16.mxu1 %v13165_v48  ;;  %2830 = vmatpush1.bf16.msra.mxu0 %v11330_v34 }
 0x535   :  { %2831 = vmatprep.subr.bf16.mxu0 %v11335_v38 }
 0x536   :  { %10974 = vmatmul.mubr.msk.bf16.vlgmr.msra.gmra.mrb[48].mxu1 %vm184_vm0, %v13020_v41  ;;  %v11344_v41 = vld [vmem:[#allocation12 + $0xd4] ss:$8 sps:$4 sm:$0xff]  }
 0x537   :  { %10978 = vmatpush3.bf16.msra.mxu1 %v13165_v48  ;;  %10981 = vmatprep.mubr.msk.bf16.mxu1 %vm184_vm0, %v13025_v42  ;;  %v11342_v42 = vld [vmem:[#allocation12 + $0xd0] ss:$8 sps:$4 sm:$0xff]  }
 0x538   :  { %10979 = vmatprep.subr.bf16.mxu1 %v13163_v47  ;;  %2832 = vmatpush1.bf16.msra.mxu0 %v11333_v36 }
 0x539   :  { %2833 = vmatprep.subr.bf16.mxu0 %v11338_v49 }
 0x53b   :  { %10980 = vmatpush3.bf16.msra.mxu1 %v13163_v47 }
 0x53c   :  { %10985 = vmatprep.subr.bf16.mxu1 %v13165_v48  ;;  %2834 = vmatpush1.bf16.msra.mxu0 %v11336_v39 }
 0x53d   :  { %2835 = vmatprep.subr.bf16.mxu0 %v11341_v40 }
 0x53e   :  { %10982 = vmatmul.mubr.msk.bf16.vlgmr.msra.gmra.mrb[52].mxu1 %vm184_vm0, %v13032_v43  ;;  %v11350_v43 = vld [vmem:[#allocation12 + $0xf4] ss:$8 sps:$4 sm:$0xff]  }
 0x53f   :  { %10986 = vmatpush3.bf16.msra.mxu1 %v13165_v48  ;;  %10989 = vmatprep.mubr.msk.bf16.mxu1 %vm184_vm0, %v13037_v44  ;;  %v11353_v44 = vld [vmem:[#allocation12 + $0x4] ss:$8 sps:$4 sm:$0xff]  }
 0x540   :  { %10987 = vmatprep.subr.bf16.mxu1 %v13163_v47  ;;  %2836 = vmatpush1.bf16.msra.mxu0 %v11339_v50 }
 0x541   :  { %2837 = vmatprep.subr.bf16.mxu0 %v11344_v41 }
 0x543   :  { %10988 = vmatpush3.bf16.msra.mxu1 %v13163_v47 }
 0x544   :  { %2838 = vmatpush1.bf16.msra.mxu0 %v11342_v42 }
 0x545   :  { %2839 = vmatprep.subr.bf16.mxu0 %v11347_v51 }
 0x546   :  { %10990 = vmatmul.mubr.msk.bf16.vlgmr.msra.gmra.mrb[56].mxu1 %vm184_vm0, %v13043_v45 }
 0x547   :  { %4489 = vmatprep.mubr.bf16.mxu1 %v12687_v55 }
 0x548   :  { %2840 = vmatpush1.bf16.msra.mxu0 %v11345_v53 }
 0x549   :  { %2841 = vmatprep.subr.bf16.mxu0 %v11350_v43 }
 0x54c   :  { %2842 = vmatpush1.bf16.msra.mxu0 %v11348_v54 }
 0x54d   :  { %2960 = vmatprep.subr.bf16.mxu0 %v11353_v44 }
 0x5f9   :  { %v10935_v45 = vpop.f32.mrb[32].mxu0  ;;  %v13233_v35 = vpop.f32.mrb[40].mxu1 }
 0x5fa   :  { %v2646_v57 = vpop.f32.mrb[33].mxu0  ;;  %v13235_v31 = vpop.f32.mrb[41].mxu1 }
 0x5fb   :  { %v10936_v58 = vpop.f32.mrb[34].mxu0  ;;  %v13237_v37 = vpop.f32.mrb[42].mxu1 }
 0x5fc   :  { %v2662_v60 = vpack.c.bf16 %v10936_v58, %v10935_v45  ;;  %v2649_v61 = vpop.f32.mrb[35].mxu0  ;;  %v3272_v34 = vpack.c.bf16 %v13237_v37, %v13233_v35  ;;  %v13241_v38 = vpop.f32.mrb[43].mxu1 }
 0x5fd   :  { %v2661_v62 = vpack.c.bf16 %v2649_v61, %v2646_v57  ;;  %v3271_v36 = vpack.c.bf16 %v13241_v38, %v13235_v31 }
 0x601   :  { %v10943_v63 = vpop.f32.mrb[36].mxu0  ;;  %v13245_v49 = vpop.f32.mrb[44].mxu1 }
 0x602   :  { %v2713_v1 = vpop.f32.mrb[37].mxu0  ;;  %v13247_v39 = vpop.f32.mrb[45].mxu1 }
 0x603   :  { %v10944_v2 = vpop.f32.mrb[38].mxu0  ;;  %v13249_v40 = vpop.f32.mrb[46].mxu1 }
 0x604   :  { %v2729_v4 = vpack.c.bf16 %v10944_v2, %v10943_v63  ;;  %v2716_v7 = vpop.f32.mrb[39].mxu0  ;;  %v3639_v50 = vpack.c.bf16 %v13249_v40, %v13245_v49  ;;  %v13253_v41 = vpop.f32.mrb[47].mxu1  ;;  %v11399_v63 = vld [vmem:[#allocation12 + $0x180] ss:$8 sps:$4 sm:$0xff]   ;;  %v11404_v2 = vld [vmem:[#allocation12 + $0x194] ss:$8 sps:$4 sm:$0xff]  }
 0x605   :  { %v2728_v56 = vpack.c.bf16 %v2716_v7, %v2713_v1  ;;  %v3638_v42 = vpack.c.bf16 %v13253_v41, %v13247_v39  ;;  %v11407_v7 = vld [vmem:[#allocation12 + $0x1a4] ss:$8 sps:$4 sm:$0xff]   ;;  %v11483_v41 = vld [vmem:[#allocation12 + $0x340] ss:$8 sps:$4 sm:$0xff]   ;;  %v11492_v49 = vld [vmem:[#allocation12 + $0x370] ss:$8 sps:$4 sm:$0xff]  }
 0x606   :  { %v11485_v39 = vld [vmem:[#allocation12 + $0x344] ss:$8 sps:$4 sm:$0xff]  }
 0x607   :  { %2860 = vmatmul.mubr.bf16.vlgmr.msra.gmra.mrb[40].mxu0 %v2728_v56  ;;  %v11410_v56 = vld [vmem:[#allocation12 + $0x1b4] ss:$8 sps:$4 sm:$0xff]   ;;  %v11497_v40 = vld [vmem:[#allocation12 + $0x384] ss:$8 sps:$4 sm:$0xff]  }
 0x608   :  { %2961 = vmatpush1.bf16.msra.mxu0 %v11351_v52  ;;  %2869 = vmatprep.mubr.bf16.mxu0 %v12687_v55  ;;  %v11405_v52 = vld [vmem:[#allocation12 + $0x1a0] ss:$8 sps:$4 sm:$0xff]  }
 0x609   :  { %2962 = vmatprep.subr.bf16.mxu0 %v11356_v59  ;;  %v13257_v51 = vpop.f32.mrb[48].mxu1  ;;  %v11408_v59 = vld [vmem:[#allocation12 + $0x1b0] ss:$8 sps:$4 sm:$0xff]  }
 0x60a   :  { %v13259_v53 = vpop.f32.mrb[49].mxu1 }
 0x60b   :  { %v13261_v43 = vpop.f32.mrb[50].mxu1 }
 0x60c   :  { %2963 = vmatpush1.bf16.msra.mxu0 %v11354_v8  ;;  %v3848_v44 = vpack.c.bf16 %v13261_v43, %v13257_v51  ;;  %v13265_v45 = vpop.f32.mrb[51].mxu1  ;;  %v11413_v8 = vld [vmem:[#allocation12 + $0x1c4] ss:$8 sps:$4 sm:$0xff]   ;;  %v11516_v51 = vld [vmem:[#allocation12 + $0x3f0] ss:$8 sps:$4 sm:$0xff]  }
 0x60d   :  { %2964 = vmatprep.subr.bf16.mxu0 %v11359_v30  ;;  %v3847_v58 = vpack.c.bf16 %v13265_v45, %v13259_v53  ;;  %v11411_v30 = vld [vmem:[#allocation12 + $0x1c0] ss:$8 sps:$4 sm:$0xff]   ;;  %v11509_v53 = vld [vmem:[#allocation12 + $0x3c4] ss:$8 sps:$4 sm:$0xff]  }
 0x60e   :  { %v11507_v45 = vld [vmem:[#allocation12 + $0x3c0] ss:$8 sps:$4 sm:$0xff]   ;;  %v11521_v43 = vld [vmem:[#allocation12 + $0x404] ss:$8 sps:$4 sm:$0xff]  }
 0x60f   :  { %2870 = vmatmul.mubr.bf16.gmra.mrb[44].mxu0 %v2729_v4  ;;  %v11402_v4 = vld [vmem:[#allocation12 + $0x190] ss:$8 sps:$4 sm:$0xff]  }
 0x610   :  { %2965 = vmatpush1.bf16.msra.mxu0 %v11357_v0  ;;  %2992 = vmatprep.mubr.bf16.mxu0 %v12687_v55  ;;  %v11416_v0 = vld [vmem:[#allocation12 + $0x1d4] ss:$8 sps:$4 sm:$0xff]  }
 0x611   :  { %2966 = vmatprep.subr.bf16.mxu0 %v11362_v6  ;;  %v11414_v6 = vld [vmem:[#allocation12 + $0x1d0] ss:$8 sps:$4 sm:$0xff]  }
 0x614   :  { %2967 = vmatpush1.bf16.msra.mxu0 %v11360_v9  ;;  %v11419_v9 = vld [vmem:[#allocation12 + $0x1e4] ss:$8 sps:$4 sm:$0xff]  }
 0x615   :  { %2968 = vmatprep.subr.bf16.mxu0 %v11365_v29  ;;  %v11417_v29 = vld [vmem:[#allocation12 + $0x1e0] ss:$8 sps:$4 sm:$0xff]  }
 0x618   :  { %2969 = vmatpush1.bf16.msra.mxu0 %v11363_v10  ;;  %v13271_v10 = vpop.f32.mrb[52].mxu1 }
 0x619   :  { %2970 = vmatprep.subr.bf16.mxu0 %v11368_v11  ;;  %v11422_v11 = vld [vmem:[#allocation12 + $0x1f4] ss:$8 sps:$4 sm:$0xff]  }
 0x61c   :  { %2971 = vmatpush1.bf16.msra.mxu0 %v11366_v12  ;;  %v13273_v12 = vpop.f32.mrb[53].mxu1 }
 0x61d   :  { %2972 = vmatprep.subr.bf16.mxu0 %v11371_v13  ;;  %v11420_v13 = vld [vmem:[#allocation12 + $0x1f0] ss:$8 sps:$4 sm:$0xff]  }
 0x620   :  { %2973 = vmatpush1.bf16.msra.mxu0 %v11369_v14  ;;  %v13275_v14 = vpop.f32.mrb[54].mxu1 }
 0x621   :  { %2974 = vmatprep.subr.bf16.mxu0 %v11374_v15  ;;  %v11425_v15 = vld [vmem:[#allocation12 + $0x204] ss:$8 sps:$4 sm:$0xff]  }
 0x624   :  { %2975 = vmatpush1.bf16.msra.mxu0 %v11372_v3  ;;  %v4057_v3 = vpack.c.bf16 %v13275_v14, %v13271_v10  ;;  %v11540_v10 = vld [vmem:[#allocation12 + $0x470] ss:$8 sps:$4 sm:$0xff]  }
 0x625   :  { %10945 = vmatprep.subr.bf16.mxu0 %v13165_v48  ;;  %v11543_v14 = vld [vmem:[#allocation15 + $0x200] ss:$16 sps:$4 sm:$0xff]  }
 0x627   :  { %2993 = vmatmul.mubr.bf16.vlgmr.msra.gmra.mrb[40].mxu0 %v2661_v62 }
 0x628   :  { %10946 = vmatpush3.bf16.msra.mxu0 %v13165_v48  ;;  %3002 = vmatprep.mubr.bf16.mxu0 %v12687_v55 }
 0x629   :  { %10947 = vmatprep.subr.bf16.mxu0 %v13163_v47 }
 0x62c   :  { %10948 = vmatpush3.bf16.msra.mxu0 %v13163_v47 }
 0x62d   :  { %3161 = vmatprep.subr.bf16.mxu0 %v11377_v16  ;;  %v13279_v16 = vpop.f32.mrb[55].mxu1 }
 0x62f   :  { %3003 = vmatmul.mubr.bf16.gmra.mrb[44].mxu0 %v2662_v60 }
 0x630   :  { %10949 = vmatprep.mubr.msk.bf16.mxu0 %vm184_vm0, %v12951_v5  ;;  %v11387_v5 = vld [vmem:[#allocation12 + $0x140] ss:$8 sps:$4 sm:$0xff]  }
 0x637   :  { %10950 = vmatmul.mubr.msk.bf16.vlgmr.msra.gmra.mrb[48].mxu0 %vm184_vm0, %v12973_v32  ;;  %v11390_v32 = vld [vmem:[#allocation12 + $0x150] ss:$8 sps:$4 sm:$0xff]  }
 0x638   :  { %3162 = vmatpush1.bf16.msra.mxu0 %v11375_v17  ;;  %3193 = vmatprep.mubr.bf16.mxu0 %v12687_v55  ;;  %v4056_v17 = vpack.c.bf16 %v13279_v16, %v13273_v12  ;;  %v11533_v12 = vld [vmem:[#allocation12 + $0x444] ss:$8 sps:$4 sm:$0xff]   ;;  %v11531_v16 = vld [vmem:[#allocation12 + $0x440] ss:$8 sps:$4 sm:$0xff]  }
 0x639   :  { %3163 = vmatprep.subr.bf16.mxu0 %v11380_v18  ;;  %v11423_v18 = vld [vmem:[#allocation12 + $0x200] ss:$8 sps:$4 sm:$0xff]  }
 0x63c   :  { %3164 = vmatpush1.bf16.msra.mxu0 %v11378_v19  ;;  %v11428_v19 = vld [vmem:[#allocation12 + $0x214] ss:$8 sps:$4 sm:$0xff]  }
 0x63d   :  { %3165 = vmatprep.subr.bf16.mxu0 %v11383_v20  ;;  %v11426_v20 = vld [vmem:[#allocation12 + $0x210] ss:$8 sps:$4 sm:$0xff]  }
 0x640   :  { %3166 = vmatpush1.bf16.msra.mxu0 %v11381_v21  ;;  %v11431_v21 = vld [vmem:[#allocation12 + $0x224] ss:$8 sps:$4 sm:$0xff]  }
 0x641   :  { %3167 = vmatprep.subr.bf16.mxu0 %v11386_v22  ;;  %v11429_v22 = vld [vmem:[#allocation12 + $0x220] ss:$8 sps:$4 sm:$0xff]  }
 0x644   :  { %3168 = vmatpush1.bf16.msra.mxu0 %v11384_v23  ;;  %v11434_v23 = vld [vmem:[#allocation12 + $0x234] ss:$8 sps:$4 sm:$0xff]  }
 0x645   :  { %3169 = vmatprep.subr.bf16.mxu0 %v11389_v24  ;;  %v11432_v24 = vld [vmem:[#allocation12 + $0x230] ss:$8 sps:$4 sm:$0xff]  }
 0x648   :  { %3170 = vmatpush1.bf16.msra.mxu0 %v11387_v5  ;;  %v11437_v5 = vld [vmem:[#allocation12 + $0x244] ss:$8 sps:$4 sm:$0xff]  }
 0x649   :  { %3171 = vmatprep.subr.bf16.mxu0 %v11392_v25  ;;  %v11435_v25 = vld [vmem:[#allocation12 + $0x240] ss:$8 sps:$4 sm:$0xff]  }
 0x64c   :  { %3172 = vmatpush1.bf16.msra.mxu0 %v11390_v32  ;;  %v11440_v32 = vld [vmem:[#allocation12 + $0x254] ss:$8 sps:$4 sm:$0xff]  }
 0x64d   :  { %3173 = vmatprep.subr.bf16.mxu0 %v11395_v26  ;;  %v11438_v26 = vld [vmem:[#allocation12 + $0x250] ss:$8 sps:$4 sm:$0xff]  }
 0x650   :  { %3174 = vmatpush1.bf16.msra.mxu0 %v11393_v27  ;;  %v11443_v27 = vld [vmem:[#allocation12 + $0x264] ss:$8 sps:$4 sm:$0xff]  }
 0x651   :  { %3175 = vmatprep.subr.bf16.mxu0 %v11398_v28  ;;  %v11441_v28 = vld [vmem:[#allocation12 + $0x260] ss:$8 sps:$4 sm:$0xff]  }
 0x654   :  { %3176 = vmatpush1.bf16.msra.mxu0 %v11396_v33  ;;  %v13288_v33 = vpop.f32.mrb[56].mxu1 }
 0x655   :  { %3370 = vmatprep.subr.bf16.mxu0 %v11401_v46  ;;  %v11446_v46 = vld [vmem:[#allocation12 + $0x274] ss:$8 sps:$4 sm:$0xff]   ;;  %v13290_v35 = vpop.f32.mrb[57].mxu1 }
 0x656   :  { %v13292_v31 = vpop.f32.mrb[58].mxu1 }
 0x657   :  { %v4266_v37 = vpack.c.bf16 %v13292_v31, %v13288_v33  ;;  %v13296_v38 = vpop.f32.mrb[59].mxu1  ;;  %v11560_v33 = vld [vmem:[#allocation15 + $0x2a4] ss:$16 sps:$4 sm:$0xff]   ;;  %v11558_v31 = vld [vmem:[#allocation15 + $0x2a0] ss:$16 sps:$4 sm:$0xff]  }
 0x70a   :  { %v10951_v54 = vpop.f32.mrb[48].mxu0 }
 0x70b   :  { %v3047_v57 = vpop.f32.mrb[49].mxu0 }
 0x70c   :  { %v10952_v60 = vpop.f32.mrb[50].mxu0 }
 0x70d   :  { %v3063_v61 = vpack.c.bf16 %v10952_v60, %v10951_v54  ;;  %v3050_v62 = vpop.f32.mrb[51].mxu0  ;;  %v4265_v54 = vpack.c.bf16 %v13296_v38, %v13290_v35  ;;  %v11452_v60 = vld [vmem:[#allocation12 + $0x294] ss:$8 sps:$4 sm:$0xff]  }
 0x70e   :  { %v3062_v1 = vpack.c.bf16 %v3050_v62, %v3047_v57  ;;  %v11447_v57 = vld [vmem:[#allocation12 + $0x280] ss:$8 sps:$4 sm:$0xff]   ;;  %v11455_v62 = vld [vmem:[#allocation12 + $0x2a4] ss:$8 sps:$4 sm:$0xff]  }
 0x70f   :  { %v11552_v35 = vld [vmem:[#allocation15 + $0x260] ss:$16 sps:$4 sm:$0xff]   ;;  %v11557_v38 = vld [vmem:[#allocation15 + $0x284] ss:$16 sps:$4 sm:$0xff]  }
 0x710   :  { %3194 = vmatmul.mubr.bf16.vlgmr.msra.gmra.mrb[40].mxu0 %v3062_v1  ;;  %v11458_v1 = vld [vmem:[#allocation12 + $0x2b4] ss:$8 sps:$4 sm:$0xff]  }
 0x711   :  { %3371 = vmatpush1.bf16.msra.mxu0 %v11399_v63  ;;  %3203 = vmatprep.mubr.bf16.mxu0 %v12687_v55  ;;  %v11453_v63 = vld [vmem:[#allocation12 + $0x2a0] ss:$8 sps:$4 sm:$0xff]  }
 0x712   :  { %3372 = vmatprep.subr.bf16.mxu0 %v11404_v2  ;;  %v11456_v2 = vld [vmem:[#allocation12 + $0x2b0] ss:$8 sps:$4 sm:$0xff]  }
 0x715   :  { %3373 = vmatpush1.bf16.msra.mxu0 %v11402_v4  ;;  %v11461_v4 = vld [vmem:[#allocation12 + $0x2c4] ss:$8 sps:$4 sm:$0xff]  }
 0x716   :  { %3374 = vmatprep.subr.bf16.mxu0 %v11407_v7  ;;  %v11464_v7 = vld [vmem:[#allocation12 + $0x2d4] ss:$8 sps:$4 sm:$0xff]  }
 0x718   :  { %3204 = vmatmul.mubr.bf16.gmra.mrb[44].mxu0 %v3063_v61  ;;  %v11450_v61 = vld [vmem:[#allocation12 + $0x290] ss:$8 sps:$4 sm:$0xff]  }
 0x719   :  { %3375 = vmatpush1.bf16.msra.mxu0 %v11405_v52  ;;  %3402 = vmatprep.mubr.bf16.mxu0 %v12687_v55  ;;  %v11462_v52 = vld [vmem:[#allocation12 + $0x2d0] ss:$8 sps:$4 sm:$0xff]  }
 0x71a   :  { %3376 = vmatprep.subr.bf16.mxu0 %v11410_v56  ;;  %v11467_v56 = vld [vmem:[#allocation12 + $0x2e4] ss:$8 sps:$4 sm:$0xff]  }
 0x71d   :  { %3377 = vmatpush1.bf16.msra.mxu0 %v11408_v59  ;;  %v11465_v59 = vld [vmem:[#allocation12 + $0x2e0] ss:$8 sps:$4 sm:$0xff]  }
 0x71e   :  { %3378 = vmatprep.subr.bf16.mxu0 %v11413_v8  ;;  %v11470_v8 = vld [vmem:[#allocation12 + $0x2f4] ss:$8 sps:$4 sm:$0xff]  }
 0x721   :  { %3379 = vmatpush1.bf16.msra.mxu0 %v11411_v30  ;;  %v11473_v30 = vld [vmem:[#allocation12 + $0x304] ss:$8 sps:$4 sm:$0xff]  }
 0x722   :  { %3380 = vmatprep.subr.bf16.mxu0 %v11416_v0  ;;  %v11471_v0 = vld [vmem:[#allocation12 + $0x300] ss:$8 sps:$4 sm:$0xff]  }
 0x725   :  { %3381 = vmatpush1.bf16.msra.mxu0 %v11414_v6  ;;  %v11476_v6 = vld [vmem:[#allocation12 + $0x314] ss:$8 sps:$4 sm:$0xff]  }
 0x726   :  { %3382 = vmatprep.subr.bf16.mxu0 %v11419_v9  ;;  %v11474_v9 = vld [vmem:[#allocation12 + $0x310] ss:$8 sps:$4 sm:$0xff]  }
 0x729   :  { %3383 = vmatpush1.bf16.msra.mxu0 %v11417_v29  ;;  %v11479_v29 = vld [vmem:[#allocation12 + $0x324] ss:$8 sps:$4 sm:$0xff]  }
 0x72a   :  { %3384 = vmatprep.subr.bf16.mxu0 %v11422_v11  ;;  %v11477_v11 = vld [vmem:[#allocation12 + $0x320] ss:$8 sps:$4 sm:$0xff]  }
 0x72d   :  { %3385 = vmatpush1.bf16.msra.mxu0 %v11420_v13  ;;  %v11482_v13 = vld [vmem:[#allocation12 + $0x334] ss:$8 sps:$4 sm:$0xff]  }
 0x72e   :  { %3528 = vmatprep.subr.bf16.mxu0 %v11425_v15  ;;  %v11480_v15 = vld [vmem:[#allocation12 + $0x330] ss:$8 sps:$4 sm:$0xff]  }
 0x730   :  { %3403 = vmatmul.mubr.bf16.vlgmr.msra.gmra.mrb[40].mxu0 %v3271_v36  ;;  %v11449_v36 = vld [vmem:[#allocation12 + $0x284] ss:$8 sps:$4 sm:$0xff]  }
 0x731   :  { %3529 = vmatpush1.bf16.msra.mxu0 %v11423_v18  ;;  %3412 = vmatprep.mubr.bf16.mxu0 %v12687_v55  ;;  %v11486_v18 = vld [vmem:[#allocation12 + $0x350] ss:$8 sps:$4 sm:$0xff]  }
 0x732   :  { %3530 = vmatprep.subr.bf16.mxu0 %v11428_v19  ;;  %v11491_v19 = vld [vmem:[#allocation12 + $0x364] ss:$8 sps:$4 sm:$0xff]  }
 0x735   :  { %3531 = vmatpush1.bf16.msra.mxu0 %v11426_v20  ;;  %v11489_v20 = vld [vmem:[#allocation12 + $0x360] ss:$8 sps:$4 sm:$0xff]  }
 0x736   :  { %3532 = vmatprep.subr.bf16.mxu0 %v11431_v21  ;;  %v11494_v21 = vld [vmem:[#allocation12 + $0x374] ss:$8 sps:$4 sm:$0xff]  }
 0x738   :  { %3413 = vmatmul.mubr.bf16.gmra.mrb[44].mxu0 %v3272_v34  ;;  %v11444_v34 = vld [vmem:[#allocation12 + $0x270] ss:$8 sps:$4 sm:$0xff]  }
 0x739   :  { %3533 = vmatpush1.bf16.msra.mxu0 %v11429_v22  ;;  %3560 = vmatprep.mubr.bf16.mxu0 %v12687_v55  ;;  %v11500_v22 = vld [vmem:[#allocation12 + $0x394] ss:$8 sps:$4 sm:$0xff]  }
 0x73a   :  { %3534 = vmatprep.subr.bf16.mxu0 %v11434_v23  ;;  %v11498_v23 = vld [vmem:[#allocation12 + $0x390] ss:$8 sps:$4 sm:$0xff]  }
 0x73d   :  { %3535 = vmatpush1.bf16.msra.mxu0 %v11432_v24  ;;  %v11503_v24 = vld [vmem:[#allocation12 + $0x3a4] ss:$8 sps:$4 sm:$0xff]  }
 0x73e   :  { %3536 = vmatprep.subr.bf16.mxu0 %v11437_v5  ;;  %v11501_v5 = vld [vmem:[#allocation12 + $0x3a0] ss:$8 sps:$4 sm:$0xff]  }
 0x741   :  { %3537 = vmatpush1.bf16.msra.mxu0 %v11435_v25  ;;  %v11506_v25 = vld [vmem:[#allocation12 + $0x3b4] ss:$8 sps:$4 sm:$0xff]  }
 0x742   :  { %3538 = vmatprep.subr.bf16.mxu0 %v11440_v32  ;;  %v11504_v32 = vld [vmem:[#allocation12 + $0x3b0] ss:$8 sps:$4 sm:$0xff]  }
 0x745   :  { %3539 = vmatpush1.bf16.msra.mxu0 %v11438_v26  ;;  %v11510_v26 = vld [vmem:[#allocation12 + $0x3d0] ss:$8 sps:$4 sm:$0xff]  }
 0x746   :  { %3540 = vmatprep.subr.bf16.mxu0 %v11443_v27  ;;  %v11515_v27 = vld [vmem:[#allocation12 + $0x3e4] ss:$8 sps:$4 sm:$0xff]  }
 0x749   :  { %3541 = vmatpush1.bf16.msra.mxu0 %v11441_v28  ;;  %v11513_v28 = vld [vmem:[#allocation12 + $0x3e0] ss:$8 sps:$4 sm:$0xff]  }
 0x74a   :  { %3542 = vmatprep.subr.bf16.mxu0 %v11446_v46  ;;  %v11518_v46 = vld [vmem:[#allocation12 + $0x3f4] ss:$8 sps:$4 sm:$0xff]  }
 0x74d   :  { %3543 = vmatpush1.bf16.msra.mxu0 %v11444_v34  ;;  %v11524_v34 = vld [vmem:[#allocation12 + $0x414] ss:$8 sps:$4 sm:$0xff]  }
 0x74e   :  { %3737 = vmatprep.subr.bf16.mxu0 %v11449_v36  ;;  %v11522_v36 = vld [vmem:[#allocation12 + $0x410] ss:$8 sps:$4 sm:$0xff]  }
 0x750   :  { %3561 = vmatmul.mubr.bf16.vlgmr.msra.gmra.mrb[40].mxu0 %v13165_v48  ;;  %v11459_v48 = vld [vmem:[#allocation12 + $0x2c0] ss:$8 sps:$4 sm:$0xff]  }
 0x751   :  { %3738 = vmatpush1.bf16.msra.mxu0 %v11447_v57  ;;  %3570 = vmatprep.mubr.bf16.mxu0 %v12687_v55  ;;  %v11527_v57 = vld [vmem:[#allocation12 + $0x424] ss:$8 sps:$4 sm:$0xff]  }
 0x752   :  { %3739 = vmatprep.subr.bf16.mxu0 %v11452_v60  ;;  %v11525_v60 = vld [vmem:[#allocation12 + $0x420] ss:$8 sps:$4 sm:$0xff]  }
 0x755   :  { %3740 = vmatpush1.bf16.msra.mxu0 %v11450_v61  ;;  %v11530_v61 = vld [vmem:[#allocation12 + $0x434] ss:$8 sps:$4 sm:$0xff]  }
 0x756   :  { %3741 = vmatprep.subr.bf16.mxu0 %v11455_v62  ;;  %v11528_v62 = vld [vmem:[#allocation12 + $0x430] ss:$8 sps:$4 sm:$0xff]  }
 0x758   :  { %3571 = vmatmul.mubr.bf16.gmra.mrb[44].mxu0 %v13163_v47  ;;  %v11468_v47 = vld [vmem:[#allocation12 + $0x2f0] ss:$8 sps:$4 sm:$0xff]  }
 0x759   :  { %3742 = vmatpush1.bf16.msra.mxu0 %v11453_v63  ;;  %3769 = vmatprep.mubr.bf16.mxu0 %v12687_v55  ;;  %v11534_v63 = vld [vmem:[#allocation12 + $0x450] ss:$8 sps:$4 sm:$0xff]  }
 0x75a   :  { %3743 = vmatprep.subr.bf16.mxu0 %v11458_v1  ;;  %v11539_v1 = vld [vmem:[#allocation12 + $0x464] ss:$8 sps:$4 sm:$0xff]  }
 0x75d   :  { %3744 = vmatpush1.bf16.msra.mxu0 %v11456_v2  ;;  %v11537_v2 = vld [vmem:[#allocation12 + $0x460] ss:$8 sps:$4 sm:$0xff]  }
 0x75e   :  { %3745 = vmatprep.subr.bf16.mxu0 %v11461_v4  ;;  %v11542_v4 = vld [vmem:[#allocation12 + $0x474] ss:$8 sps:$4 sm:$0xff]  }
 0x761   :  { %3746 = vmatpush1.bf16.msra.mxu0 %v11459_v48  ;;  %v11548_v48 = vld [vmem:[#allocation15 + $0x224] ss:$16 sps:$4 sm:$0xff]  }
 0x762   :  { %3747 = vmatprep.subr.bf16.mxu0 %v11464_v7  ;;  %v11546_v7 = vld [vmem:[#allocation15 + $0x220] ss:$16 sps:$4 sm:$0xff]  }
 0x765   :  { %3748 = vmatpush1.bf16.msra.mxu0 %v11462_v52  ;;  %v11551_v52 = vld [vmem:[#allocation15 + $0x244] ss:$16 sps:$4 sm:$0xff]  }
 0x766   :  { %3749 = vmatprep.subr.bf16.mxu0 %v11467_v56  ;;  %v11549_v56 = vld [vmem:[#allocation15 + $0x240] ss:$16 sps:$4 sm:$0xff]  }
 0x769   :  { %3750 = vmatpush1.bf16.msra.mxu0 %v11465_v59  ;;  %v11554_v59 = vld [vmem:[#allocation15 + $0x264] ss:$16 sps:$4 sm:$0xff]  }
 0x76a   :  { %3751 = vmatprep.subr.bf16.mxu0 %v11470_v8  ;;  %v11561_v8 = vld [vmem:[#allocation15 + $0x2c0] ss:$16 sps:$4 sm:$0xff]  }
 0x76d   :  { %3752 = vmatpush1.bf16.msra.mxu0 %v11468_v47  ;;  %v11566_v47 = vld [vmem:[#allocation15 + $0x2e4] ss:$16 sps:$4 sm:$0xff]  }
 0x76e   :  { %3946 = vmatprep.subr.bf16.mxu0 %v11473_v30  ;;  %v11564_v30 = vld [vmem:[#allocation15 + $0x2e0] ss:$16 sps:$4 sm:$0xff]  }
 0x770   :  { %3770 = vmatmul.mubr.bf16.vlgmr.msra.gmra.mrb[40].mxu0 %v3638_v42  ;;  %v11488_v42 = vld [vmem:[#allocation12 + $0x354] ss:$8 sps:$4 sm:$0xff]  }
 0x771   :  { %3947 = vmatpush1.bf16.msra.mxu0 %v11471_v0  ;;  %3779 = vmatprep.mubr.bf16.mxu0 %v12687_v55  ;;  %v11569_v0 = vld [vmem:[#allocation15 + $0x304] ss:$16 sps:$4 sm:$0xff]  }
 0x772   :  { %3948 = vmatprep.subr.bf16.mxu0 %v11476_v6  ;;  %v11567_v6 = vld [vmem:[#allocation15 + $0x300] ss:$16 sps:$4 sm:$0xff]  }
 0x775   :  { %3949 = vmatpush1.bf16.msra.mxu0 %v11474_v9  ;;  %v11572_v9 = vld [vmem:[#allocation15 + $0x324] ss:$16 sps:$4 sm:$0xff]  }
 0x776   :  { %3950 = vmatprep.subr.bf16.mxu0 %v11479_v29  ;;  %v11570_v29 = vld [vmem:[#allocation15 + $0x320] ss:$16 sps:$4 sm:$0xff]  }
 0x778   :  { %3780 = vmatmul.mubr.bf16.gmra.mrb[44].mxu0 %v3639_v50  ;;  %v11495_v50 = vld [vmem:[#allocation12 + $0x380] ss:$8 sps:$4 sm:$0xff]  }
 0x779   :  { %3951 = vmatpush1.bf16.msra.mxu0 %v11477_v11  ;;  %3978 = vmatprep.mubr.bf16.mxu0 %v12687_v55  ;;  %v11575_v11 = vld [vmem:[#allocation15 + $0x344] ss:$16 sps:$4 sm:$0xff]  }
 0x77a   :  { %3952 = vmatprep.subr.bf16.mxu0 %v11482_v13  ;;  %v11573_v13 = vld [vmem:[#allocation15 + $0x340] ss:$16 sps:$4 sm:$0xff]  }
 0x77d   :  { %3953 = vmatpush1.bf16.msra.mxu0 %v11480_v15  ;;  %v4427_v15 = vlaneseq }
 0x77e   :  { %3954 = vmatprep.subr.bf16.mxu0 %v11485_v39 }
 0x77f   :  { %v13335_v39 = vshrl.u32 %v4427_v15, 7 }
 0x781   :  { %3955 = vmatpush1.bf16.msra.mxu0 %v11483_v41  ;;  %v4429_v41 = vsub.s32 0, %v13335_v39 }
 0x782   :  { %3956 = vmatprep.subr.bf16.mxu0 %v11488_v42  ;;  %v4425_v42 = vld [vmem:[#allocation13] sm:$0x3] }
 0x785   :  { %3957 = vmatpush1.bf16.msra.mxu0 %v11486_v18  ;;  %v4433_v18 = vsub.s32 1, %v13335_v39 }
 0x786   :  { %3958 = vmatprep.subr.bf16.mxu0 %v11491_v19  ;;  %v4430_v19 = vrot.slane %v4425_v42, %v4429_v41 }
 0x789   :  { %3959 = vmatpush1.bf16.msra.mxu0 %v11489_v20  ;;  %v4434_v20 = vrot.slane %v4425_v42, %v4433_v18 }
 0x78a   :  { %3960 = vmatprep.subr.bf16.mxu0 %v11494_v21 }
 0x78d   :  { %3961 = vmatpush1.bf16.msra.mxu0 %v11492_v49 }
 0x78e   :  { %4155 = vmatprep.subr.bf16.mxu0 %v11497_v40 }
 0x790   :  { %3979 = vmatmul.mubr.bf16.vlgmr.msra.gmra.mrb[40].mxu0 %v3847_v58  ;;  %v11512_v58 = vld [vmem:[#allocation12 + $0x3d4] ss:$8 sps:$4 sm:$0xff]  }
 0x791   :  { %4156 = vmatpush1.bf16.msra.mxu0 %v11495_v50  ;;  %3988 = vmatprep.mubr.bf16.mxu0 %v12687_v55 }
 0x792   :  { %4157 = vmatprep.subr.bf16.mxu0 %v11500_v22 }
 0x795   :  { %4158 = vmatpush1.bf16.msra.mxu0 %v11498_v23 }
 0x796   :  { %4159 = vmatprep.subr.bf16.mxu0 %v11503_v24 }
 0x798   :  { %3989 = vmatmul.mubr.bf16.gmra.mrb[44].mxu0 %v3848_v44  ;;  %v11519_v44 = vld [vmem:[#allocation12 + $0x400] ss:$8 sps:$4 sm:$0xff]  }
 0x799   :  { %4160 = vmatpush1.bf16.msra.mxu0 %v11501_v5  ;;  %4187 = vmatprep.mubr.bf16.mxu0 %v12687_v55 }
 0x79a   :  { %4161 = vmatprep.subr.bf16.mxu0 %v11506_v25 }
 0x79d   :  { %4162 = vmatpush1.bf16.msra.mxu0 %v11504_v32 }
 0x79e   :  { %4163 = vmatprep.subr.bf16.mxu0 %v11509_v53 }
 0x7a1   :  { %4164 = vmatpush1.bf16.msra.mxu0 %v11507_v45 }
 0x7a2   :  { %4165 = vmatprep.subr.bf16.mxu0 %v11512_v58 }
 0x7a5   :  { %4166 = vmatpush1.bf16.msra.mxu0 %v11510_v26 }
 0x7a6   :  { %4167 = vmatprep.subr.bf16.mxu0 %v11515_v27 }
 0x7a9   :  { %4168 = vmatpush1.bf16.msra.mxu0 %v11513_v28 }
 0x7aa   :  { %4169 = vmatprep.subr.bf16.mxu0 %v11518_v46 }
 0x7ad   :  { %4170 = vmatpush1.bf16.msra.mxu0 %v11516_v51 }
 0x7ae   :  { %4364 = vmatprep.subr.bf16.mxu0 %v11521_v43 }
 0x7b0   :  { %4188 = vmatmul.mubr.bf16.vlgmr.msra.gmra.mrb[40].mxu0 %v4056_v17  ;;  %v11536_v17 = vld [vmem:[#allocation12 + $0x454] ss:$8 sps:$4 sm:$0xff]  }
 0x7b1   :  { %4365 = vmatpush1.bf16.msra.mxu0 %v11519_v44  ;;  %4197 = vmatprep.mubr.bf16.mxu0 %v12687_v55 }
 0x7b2   :  { %4366 = vmatprep.subr.bf16.mxu0 %v11524_v34 }
 0x7b5   :  { %4367 = vmatpush1.bf16.msra.mxu0 %v11522_v36 }
 0x7b6   :  { %4368 = vmatprep.subr.bf16.mxu0 %v11527_v57 }
 0x7b8   :  { %4198 = vmatmul.mubr.bf16.gmra.mrb[44].mxu0 %v4057_v3  ;;  %v11545_v3 = vld [vmem:[#allocation15 + $0x204] ss:$16 sps:$4 sm:$0xff]  }
 0x7b9   :  { %4369 = vmatpush1.bf16.msra.mxu0 %v11525_v60  ;;  %4396 = vmatprep.mubr.bf16.mxu0 %v12687_v55 }
 0x7ba   :  { %4370 = vmatprep.subr.bf16.mxu0 %v11530_v61 }
 0x7bd   :  { %4371 = vmatpush1.bf16.msra.mxu0 %v11528_v62 }
 0x7be   :  { %4372 = vmatprep.subr.bf16.mxu0 %v11533_v12 }
 0x7c1   :  { %4373 = vmatpush1.bf16.msra.mxu0 %v11531_v16 }
 0x7c2   :  { %4374 = vmatprep.subr.bf16.mxu0 %v11536_v17  ;;  %v12423_v17 = vld [vmem:[#allocation2] sm:$0xff]  }
 0x7c5   :  { %4375 = vmatpush1.bf16.msra.mxu0 %v11534_v63  ;;  %v12424_v63 = vld [vmem:[#allocation2 + $0x8] sm:$0xff]  }
 0x7c6   :  { %4376 = vmatprep.subr.bf16.mxu0 %v11539_v1  ;;  %v12425_v1 = vld [vmem:[#allocation2 + $0x10] sm:$0xff]  }
 0x7c9   :  { %4377 = vmatpush1.bf16.msra.mxu0 %v11537_v2  ;;  %v12426_v2 = vld [vmem:[#allocation2 + $0x18] sm:$0xff]  }
 0x7ca   :  { %4378 = vmatprep.subr.bf16.mxu0 %v11542_v4  ;;  %v11578_v4 = vld [vmem:[#allocation15 + $0x364] ss:$16 sps:$4 sm:$0xff]  }
 0x7cd   :  { %4379 = vmatpush1.bf16.msra.mxu0 %v11540_v10  ;;  %v11576_v10 = vld [vmem:[#allocation15 + $0x360] ss:$16 sps:$4 sm:$0xff]  }
 0x7ce   :  { %5020 = vmatprep.subr.bf16.mxu0 %v11545_v3  ;;  %v11581_v3 = vld [vmem:[#allocation15 + $0x384] ss:$16 sps:$4 sm:$0xff]  }
 0x7d0   :  { %4397 = vmatmul.mubr.bf16.vlgmr.msra.gmra.mrb[40].mxu0 %v4265_v54  ;;  %v11555_v54 = vld [vmem:[#allocation15 + $0x280] ss:$16 sps:$4 sm:$0xff]  }
 0x7d1   :  { %4406 = vmatprep.mubr.bf16.mxu0 %v12687_v55  ;;  %5021 = vmatpush1.bf16.msra.mxu0 %v11543_v14  ;;  %v11579_v14 = vld [vmem:[#allocation15 + $0x380] ss:$16 sps:$4 sm:$0xff]  }
 0x7d2   :  { %5022 = vmatprep.subr.bf16.mxu0 %v11548_v48  ;;  %v11584_v48 = vld [vmem:[#allocation15 + $0x3a4] ss:$16 sps:$4 sm:$0xff]  }
 0x7d5   :  { %5023 = vmatpush1.bf16.msra.mxu0 %v11546_v7  ;;  %v11582_v7 = vld [vmem:[#allocation15 + $0x3a0] ss:$16 sps:$4 sm:$0xff]  }
 0x7d6   :  { %5024 = vmatprep.subr.bf16.mxu0 %v11551_v52  ;;  %v11585_v52 = vld [vmem:[#allocation15 + $0x3c0] ss:$16 sps:$4 sm:$0xff]  }
 0x7d8   :  { %4407 = vmatmul.mubr.bf16.gmra.mrb[44].mxu0 %v4266_v37  ;;  %v11563_v37 = vld [vmem:[#allocation15 + $0x2c4] ss:$16 sps:$4 sm:$0xff]  }
 0x7d9   :  { %5025 = vmatpush1.bf16.msra.mxu0 %v11549_v56  ;;  %v11587_v56 = vld [vmem:[#allocation15 + $0x3c4] ss:$16 sps:$4 sm:$0xff]  }
 0x7da   :  { %5026 = vmatprep.subr.bf16.mxu0 %v11554_v59  ;;  %v11590_v59 = vld [vmem:[#allocation15 + $0x3e4] ss:$16 sps:$4 sm:$0xff]  }
 0x7dd   :  { %5027 = vmatpush1.bf16.msra.mxu0 %v11552_v35  ;;  %v11588_v35 = vld [vmem:[#allocation15 + $0x3e0] ss:$16 sps:$4 sm:$0xff]  }
 0x7de   :  { %5028 = vmatprep.subr.bf16.mxu0 %v11557_v38  ;;  %v11593_v38 = vld [vmem:[#allocation15 + $0x20c] ss:$16 sps:$4 sm:$0xff]  }
 0x7e1   :  { %5029 = vmatpush1.bf16.msra.mxu0 %v11555_v54 }
 0x7e2   :  { %5030 = vmatprep.subr.bf16.mxu0 %v11560_v33 }
 0x7e5   :  { %5031 = vmatpush1.bf16.msra.mxu0 %v11558_v31 }
 0x7e6   :  { %5032 = vmatprep.subr.bf16.mxu0 %v11563_v37 }
 0x7e9   :  { %5033 = vmatpush1.bf16.msra.mxu0 %v11561_v8 }
 0x7ea   :  { %5034 = vmatprep.subr.bf16.mxu0 %v11566_v47 }
 0x7ed   :  { %5035 = vmatpush1.bf16.msra.mxu0 %v11564_v30 }
 0x7ee   :  { %5036 = vmatprep.subr.bf16.mxu0 %v11569_v0 }
 0x7f1   :  { %5037 = vmatpush1.bf16.msra.mxu0 %v11567_v6 }
 0x7f2   :  { %5038 = vmatprep.subr.bf16.mxu0 %v11572_v9 }
 0x7f5   :  { %5039 = vmatpush1.bf16.msra.mxu0 %v11570_v29 }
 0x7f6   :  { %5040 = vmatprep.subr.bf16.mxu0 %v11575_v11 }
 0x7f9   :  { %5041 = vmatpush1.bf16.msra.mxu0 %v11573_v13 }
 0x7fa   :  { %5042 = vmatprep.subr.bf16.mxu0 %v11578_v4  ;;  %v11626_v4 = vld [vmem:[#allocation15 + $0x36c] ss:$16 sps:$4 sm:$0xff]  }
 0x7fd   :  { %5043 = vmatpush1.bf16.msra.mxu0 %v11576_v10  ;;  %v11624_v10 = vld [vmem:[#allocation15 + $0x368] ss:$16 sps:$4 sm:$0xff]  }
 0x7fe   :  { %5044 = vmatprep.subr.bf16.mxu0 %v11581_v3  ;;  %v11627_v3 = vld [vmem:[#allocation15 + $0x388] ss:$16 sps:$4 sm:$0xff]  }
 0x801   :  { %5045 = vmatpush1.bf16.msra.mxu0 %v11579_v14  ;;  %v11629_v14 = vld [vmem:[#allocation15 + $0x38c] ss:$16 sps:$4 sm:$0xff]  }
 0x802   :  { %5046 = vmatprep.subr.bf16.mxu0 %v11584_v48  ;;  %v11632_v48 = vld [vmem:[#allocation15 + $0x3ac] ss:$16 sps:$4 sm:$0xff]  }
 0x805   :  { %5047 = vmatpush1.bf16.msra.mxu0 %v11582_v7  ;;  %v11630_v7 = vld [vmem:[#allocation15 + $0x3a8] ss:$16 sps:$4 sm:$0xff]  }
 0x806   :  { %5048 = vmatprep.subr.bf16.mxu0 %v11587_v56  ;;  %v11633_v56 = vld [vmem:[#allocation15 + $0x3c8] ss:$16 sps:$4 sm:$0xff]  }
 0x809   :  { %5049 = vmatpush1.bf16.msra.mxu0 %v11585_v52  ;;  %v11635_v52 = vld [vmem:[#allocation15 + $0x3cc] ss:$16 sps:$4 sm:$0xff]  }
 0x80a   :  { %5050 = vmatprep.subr.bf16.mxu0 %v11590_v59  ;;  %v11638_v59 = vld [vmem:[#allocation15 + $0x3ec] ss:$16 sps:$4 sm:$0xff]  }
 0x80d   :  { %5051 = vmatpush1.bf16.msra.mxu0 %v11588_v35  ;;  %v11636_v35 = vld [vmem:[#allocation15 + $0x3e8] ss:$16 sps:$4 sm:$0xff]  }
 0x80e   :  { %5073 = vmatprep.subr.bf16.mxu0 %v11593_v38  ;;  %v11641_v38 = vld [vmem:[#allocation15 + $0x4] ss:$16 sps:$4 sm:$0xff]  }
 0x8a3   :  { %v4398_v21 = vpop.f32.mrb[40].mxu0 }
 0x8a4   :  { %v4437_v49 = vadd.f32 %v4430_v19, %v4398_v21  ;;  %v4400_v40 = vpop.f32.mrb[41].mxu0 }
 0x8a5   :  { %v4438_v50 = vadd.f32 %v4434_v20, %v4400_v40  ;;  %v4402_v22 = vpop.f32.mrb[42].mxu0  ;;  %v11596_v40 = vld [vmem:[#allocation15 + $0x22c] ss:$16 sps:$4 sm:$0xff]  }
 0x8a6   :  { %v4439_v23 = vadd.f32 %v4430_v19, %v4402_v22  ;;  %v4404_v24 = vpop.f32.mrb[43].mxu0  ;;  %v4445_v25 = vmax.f32 %v4437_v49, 0.0  ;;  %v11591_v49 = vld [vmem:[#allocation15 + $0x208] ss:$16 sps:$4 sm:$0xff]  }
 0x8a7   :  { %v4440_v5 = vadd.f32 %v4434_v20, %v4404_v24  ;;  %v4446_v53 = vmax.f32 %v4438_v50, 0.0  ;;  %v11594_v22 = vld [vmem:[#allocation15 + $0x228] ss:$16 sps:$4 sm:$0xff]   ;;  %v11599_v24 = vld [vmem:[#allocation15 + $0x24c] ss:$16 sps:$4 sm:$0xff]  }
 0x8a8   :  { %v4447_v32 = vmax.f32 %v4439_v23, 0.0 }
 0x8a9   :  { %v4448_v45 = vmax.f32 %v4440_v5, 0.0 }
 0x8aa   :  { %v13343_v58 = vpack.c.bf16 %v4447_v32, %v4445_v25 }
 0x8ab   :  { %v13345_v26 = vpack.c.bf16 %v4448_v45, %v4446_v53  ;;  %v4408_v27 = vpop.f32.mrb[44].mxu0  ;;  %v11597_v45 = vld [vmem:[#allocation15 + $0x248] ss:$16 sps:$4 sm:$0xff]  }
 0x8ac   :  { %v4441_v28 = vadd.f32 %v4430_v19, %v4408_v27  ;;  %v4410_v46 = vpop.f32.mrb[45].mxu0  ;;  %v11602_v27 = vld [vmem:[#allocation15 + $0x26c] ss:$16 sps:$4 sm:$0xff]  }
 0x8ad   :  { %v4442_v51 = vadd.f32 %v4434_v20, %v4410_v46  ;;  %v4412_v43 = vpop.f32.mrb[46].mxu0  ;;  %4457 = vmatprep.subr.bf16.mxu1 %v13345_v26  ;;  %v11605_v46 = vld [vmem:[#allocation15 + $0x28c] ss:$16 sps:$4 sm:$0xff]  }
 0x8ae   :  { %v4443_v44 = vadd.f32 %v4430_v19, %v4412_v43  ;;  %v4414_v34 = vpop.f32.mrb[47].mxu0  ;;  %4458 = vmatpush1.bf16.msra.mxu1 %v13343_v58  ;;  %v4449_v57 = vmax.f32 %v4441_v28, 0.0  ;;  %v11600_v28 = vld [vmem:[#allocation15 + $0x268] ss:$16 sps:$4 sm:$0xff]   ;;  %v11608_v43 = vld [vmem:[#allocation15 + $0x2ac] ss:$16 sps:$4 sm:$0xff]  }
 0x8af   :  { %v4444_v36 = vadd.f32 %v4434_v20, %v4414_v34  ;;  %v4450_v61 = vmax.f32 %v4442_v51, 0.0  ;;  %v11603_v51 = vld [vmem:[#allocation15 + $0x288] ss:$16 sps:$4 sm:$0xff]   ;;  %v11611_v34 = vld [vmem:[#allocation15 + $0x2cc] ss:$16 sps:$4 sm:$0xff]  }
 0x8b0   :  { %v4451_v60 = vmax.f32 %v4443_v44, 0.0  ;;  %v11606_v44 = vld [vmem:[#allocation15 + $0x2a8] ss:$16 sps:$4 sm:$0xff]  }
 0x8b1   :  { %v4452_v62 = vmax.f32 %v4444_v36, 0.0  ;;  %v11609_v36 = vld [vmem:[#allocation15 + $0x2c8] ss:$16 sps:$4 sm:$0xff]  }
 0x8b2   :  { %v13349_v12 = vpack.c.bf16 %v4451_v60, %v4449_v57  ;;  %v11614_v57 = vld [vmem:[#allocation15 + $0x2ec] ss:$16 sps:$4 sm:$0xff]   ;;  %v11612_v60 = vld [vmem:[#allocation15 + $0x2e8] ss:$16 sps:$4 sm:$0xff]  }
 0x8b3   :  { %v13351_v16 = vpack.c.bf16 %v4452_v62, %v4450_v61  ;;  %v11617_v61 = vld [vmem:[#allocation15 + $0x30c] ss:$16 sps:$4 sm:$0xff]   ;;  %v11615_v62 = vld [vmem:[#allocation15 + $0x308] ss:$16 sps:$4 sm:$0xff]  }
 0x8b5   :  { %4459 = vmatprep.subr.bf16.mxu1 %v13351_v16 }
 0x8b6   :  { %4460 = vmatpush1.bf16.msra.mxu1 %v13349_v12 }
 0x8b7   :  { %4578 = vmatprep.subr.bf16.mxu1 %v13345_v26 }
 0x8b9   :  { %9854 = vmatmul.mubr.msk.bf16.vlgmr.msra.gmra.mrb[60].mxu1 %vm184_vm0, %v12423_v17  ;;  %v11620_v17 = vld [vmem:[#allocation15 + $0x32c] ss:$16 sps:$4 sm:$0xff]  }
 0x8ba   :  { %4579 = vmatpush1.bf16.msra.mxu1 %v13343_v58  ;;  %4499 = vmatprep.mubr.bf16.mxu1 %v12687_v55 }
 0x8bb   :  { %4580 = vmatprep.subr.bf16.mxu1 %v13351_v16 }
 0x8be   :  { %4581 = vmatpush1.bf16.msra.mxu1 %v13349_v12 }
 0x8c1   :  { %9855 = vmatmul.mubr.msk.bf16.gmra.mrb[64].mxu1 %vm184_vm0, %v12424_v63  ;;  %v11618_v63 = vld [vmem:[#allocation15 + $0x328] ss:$16 sps:$4 sm:$0xff]  }
 0x8c2   :  { %4610 = vmatprep.mubr.bf16.mxu1 %v12687_v55 }
 0x8c9   :  { %9856 = vmatmul.mubr.msk.bf16.vlgmr.msra.gmra.mrb[68].mxu1 %vm184_vm0, %v12425_v1  ;;  %v11623_v1 = vld [vmem:[#allocation15 + $0x34c] ss:$16 sps:$4 sm:$0xff]  }
 0x8ca   :  { %4620 = vmatprep.mubr.bf16.mxu1 %v12687_v55 }
 0x8d1   :  { %9857 = vmatmul.mubr.msk.bf16.gmra.mrb[72].mxu1 %vm184_vm0, %v12426_v2  ;;  %v11621_v2 = vld [vmem:[#allocation15 + $0x348] ss:$16 sps:$4 sm:$0xff]  }
 0x98c   :  { %v4491_v54 = vpop.f32.mrb[60].mxu1 }
 0x98d   :  { %v4493_v33 = vpop.f32.mrb[61].mxu1 }
 0x98e   :  { %v4495_v31 = vpop.f32.mrb[62].mxu1 }
 0x98f   :  { %v13366_v37 = vpack.c.bf16 %v4495_v31, %v4491_v54  ;;  %v4497_v8 = vpop.f32.mrb[63].mxu1  ;;  %v11639_v54 = vld [vmem:[#allocation15] ss:$16 sps:$4 sm:$0xff]  }
 0x990   :  { %v13368_v47 = vpack.c.bf16 %v4497_v8, %v4493_v33  ;;  %v11644_v33 = vld [vmem:[#allocation15 + $0x24] ss:$16 sps:$4 sm:$0xff]   ;;  %v11642_v31 = vld [vmem:[#allocation15 + $0x20] ss:$16 sps:$4 sm:$0xff]  }
 0x991   :  { %v11647_v8 = vld [vmem:[#allocation15 + $0x44] ss:$16 sps:$4 sm:$0xff]  }
 0x994   :  { %v4501_v30 = vpop.f32.mrb[64].mxu1 }
 0x995   :  { %v4503_v0 = vpop.f32.mrb[65].mxu1 }
 0x996   :  { %v4505_v6 = vpop.f32.mrb[66].mxu1 }
 0x997   :  { %v13370_v9 = vpack.c.bf16 %v4505_v6, %v4501_v30  ;;  %v4507_v29 = vpop.f32.mrb[67].mxu1  ;;  %v11645_v30 = vld [vmem:[#allocation15 + $0x40] ss:$16 sps:$4 sm:$0xff]  }
 0x998   :  { %v13372_v11 = vpack.c.bf16 %v4507_v29, %v4503_v0  ;;  %v11650_v0 = vld [vmem:[#allocation15 + $0x64] ss:$16 sps:$4 sm:$0xff]   ;;  %v11648_v6 = vld [vmem:[#allocation15 + $0x60] ss:$16 sps:$4 sm:$0xff]  }
 0x999   :  { %v11653_v29 = vld [vmem:[#allocation15 + $0x84] ss:$16 sps:$4 sm:$0xff]  }
 0x99c   :  { %v4612_v13 = vpop.f32.mrb[68].mxu1 }
 0x99d   :  { %v4614_v15 = vpop.f32.mrb[69].mxu1 }
 0x99e   :  { %v4616_v42 = vpop.f32.mrb[70].mxu1 }
 0x99f   :  { %v13374_v19 = vpack.c.bf16 %v4616_v42, %v4612_v13  ;;  %v4618_v20 = vpop.f32.mrb[71].mxu1  ;;  %v11651_v13 = vld [vmem:[#allocation15 + $0x80] ss:$16 sps:$4 sm:$0xff]  }
 0x9a0   :  { %v4632_v21 = vpack.c.bf16 %v4618_v20, %v4614_v15  ;;  %v11656_v15 = vld [vmem:[#allocation15 + $0xa4] ss:$16 sps:$4 sm:$0xff]   ;;  %v11654_v42 = vld [vmem:[#allocation15 + $0xa0] ss:$16 sps:$4 sm:$0xff]  }
 0x9a1   :  { %v11657_v20 = vld [vmem:[#allocation15 + $0xc0] ss:$16 sps:$4 sm:$0xff]  }
 0x9a2   :  { %5052 = vmatprep.mubr.bf16.mxu0 %v4632_v21 }
 0x9a3   :  { %5053 = vmatmul.mubr.bf16.vlgmr.msra.gmra.mrb[52].mxu0 %v13374_v19 }
 0x9a4   :  { %5074 = vmatpush1.bf16.msra.mxu0 %v11591_v49  ;;  %v4622_v50 = vpop.f32.mrb[72].mxu1  ;;  %v11660_v49 = vld [vmem:[#allocation15 + $0xe0] ss:$16 sps:$4 sm:$0xff]  }
 0x9a5   :  { %v4624_v23 = vpop.f32.mrb[73].mxu1  ;;  %5075 = vmatprep.subr.bf16.mxu0 %v11596_v40  ;;  %v11665_v40 = vld [vmem:[#allocation15 + $0x104] ss:$16 sps:$4 sm:$0xff]  }
 0x9a6   :  { %v4626_v5 = vpop.f32.mrb[74].mxu1 }
 0x9a7   :  { %v13377_v25 = vpack.c.bf16 %v4626_v5, %v4622_v50  ;;  %v4628_v32 = vpop.f32.mrb[75].mxu1  ;;  %v11663_v50 = vld [vmem:[#allocation15 + $0x100] ss:$16 sps:$4 sm:$0xff]  }
 0x9a8   :  { %v13379_v53 = vpack.c.bf16 %v4628_v32, %v4624_v23  ;;  %5076 = vmatpush1.bf16.msra.mxu0 %v11594_v22  ;;  %v11668_v22 = vld [vmem:[#allocation15 + $0x124] ss:$16 sps:$4 sm:$0xff]   ;;  %v11666_v23 = vld [vmem:[#allocation15 + $0x120] ss:$16 sps:$4 sm:$0xff]  }
 0x9a9   :  { %5077 = vmatprep.subr.bf16.mxu0 %v11599_v24  ;;  %v11671_v24 = vld [vmem:[#allocation15 + $0x144] ss:$16 sps:$4 sm:$0xff]   ;;  %v11669_v5 = vld [vmem:[#allocation15 + $0x140] ss:$16 sps:$4 sm:$0xff]  }
 0x9aa   :  { %5062 = vmatprep.mubr.bf16.mxu0 %v13379_v53  ;;  %v11672_v32 = vld [vmem:[#allocation15 + $0x160] ss:$16 sps:$4 sm:$0xff]  }
 0x9ab   :  { %5063 = vmatmul.mubr.bf16.gmra.mrb[56].mxu0 %v13377_v25 }
 0x9ac   :  { %5078 = vmatpush1.bf16.msra.mxu0 %v11597_v45  ;;  %5105 = vmatprep.mubr.bf16.mxu0 %v4632_v21  ;;  %v11662_v21 = vld [vmem:[#allocation15 + $0xe4] ss:$16 sps:$4 sm:$0xff]   ;;  %v11675_v45 = vld [vmem:[#allocation15 + $0x180] ss:$16 sps:$4 sm:$0xff]  }
 0x9ad   :  { %5079 = vmatprep.subr.bf16.mxu0 %v11602_v27  ;;  %v11680_v27 = vld [vmem:[#allocation15 + $0x1a4] ss:$16 sps:$4 sm:$0xff]  }
 0x9b0   :  { %5080 = vmatpush1.bf16.msra.mxu0 %v11600_v28  ;;  %v11678_v28 = vld [vmem:[#allocation15 + $0x1a0] ss:$16 sps:$4 sm:$0xff]  }
 0x9b1   :  { %5081 = vmatprep.subr.bf16.mxu0 %v11605_v46  ;;  %v11683_v46 = vld [vmem:[#allocation15 + $0x1c4] ss:$16 sps:$4 sm:$0xff]  }
 0x9b4   :  { %5082 = vmatpush1.bf16.msra.mxu0 %v11603_v51  ;;  %v11681_v51 = vld [vmem:[#allocation15 + $0x1c0] ss:$16 sps:$4 sm:$0xff]  }
 0x9b5   :  { %5083 = vmatprep.subr.bf16.mxu0 %v11608_v43  ;;  %v11686_v43 = vld [vmem:[#allocation15 + $0x1e4] ss:$16 sps:$4 sm:$0xff]  }
 0x9b8   :  { %5084 = vmatpush1.bf16.msra.mxu0 %v11606_v44  ;;  %v11684_v44 = vld [vmem:[#allocation15 + $0x1e0] ss:$16 sps:$4 sm:$0xff]  }
 0x9b9   :  { %5085 = vmatprep.subr.bf16.mxu0 %v11611_v34  ;;  %v11689_v34 = vld [vmem:[#allocation15 + $0xc] ss:$16 sps:$4 sm:$0xff]  }
 0x9bc   :  { %5086 = vmatpush1.bf16.msra.mxu0 %v11609_v36  ;;  %v11687_v36 = vld [vmem:[#allocation15 + $0x8] ss:$16 sps:$4 sm:$0xff]  }
 0x9bd   :  { %5087 = vmatprep.subr.bf16.mxu0 %v11614_v57  ;;  %v11692_v57 = vld [vmem:[#allocation15 + $0x2c] ss:$16 sps:$4 sm:$0xff]  }
 0x9c0   :  { %5088 = vmatpush1.bf16.msra.mxu0 %v11612_v60  ;;  %v11690_v60 = vld [vmem:[#allocation15 + $0x28] ss:$16 sps:$4 sm:$0xff]  }
 0x9c1   :  { %5089 = vmatprep.subr.bf16.mxu0 %v11617_v61  ;;  %v11695_v61 = vld [vmem:[#allocation15 + $0x4c] ss:$16 sps:$4 sm:$0xff]  }
 0x9c4   :  { %5090 = vmatpush1.bf16.msra.mxu0 %v11615_v62  ;;  %v11693_v62 = vld [vmem:[#allocation15 + $0x48] ss:$16 sps:$4 sm:$0xff]  }
 0x9c5   :  { %5091 = vmatprep.subr.bf16.mxu0 %v11620_v17  ;;  %v11698_v17 = vld [vmem:[#allocation15 + $0x6c] ss:$16 sps:$4 sm:$0xff]  }
 0x9c8   :  { %5092 = vmatpush1.bf16.msra.mxu0 %v11618_v63  ;;  %v11696_v63 = vld [vmem:[#allocation15 + $0x68] ss:$16 sps:$4 sm:$0xff]  }
 0x9c9   :  { %5093 = vmatprep.subr.bf16.mxu0 %v11623_v1  ;;  %v11701_v1 = vld [vmem:[#allocation15 + $0x8c] ss:$16 sps:$4 sm:$0xff]  }
 0x9cc   :  { %5094 = vmatpush1.bf16.msra.mxu0 %v11621_v2  ;;  %v11699_v2 = vld [vmem:[#allocation15 + $0x88] ss:$16 sps:$4 sm:$0xff]  }
 0x9cd   :  { %5095 = vmatprep.subr.bf16.mxu0 %v11626_v4  ;;  %v11704_v4 = vld [vmem:[#allocation15 + $0xac] ss:$16 sps:$4 sm:$0xff]  }
 0x9d0   :  { %5096 = vmatpush1.bf16.msra.mxu0 %v11624_v10  ;;  %v11702_v10 = vld [vmem:[#allocation15 + $0xa8] ss:$16 sps:$4 sm:$0xff]  }
 0x9d1   :  { %5097 = vmatprep.subr.bf16.mxu0 %v11629_v14  ;;  %v11707_v14 = vld [vmem:[#allocation15 + $0xcc] ss:$16 sps:$4 sm:$0xff]  }
 0x9d4   :  { %5098 = vmatpush1.bf16.msra.mxu0 %v11627_v3  ;;  %v11705_v3 = vld [vmem:[#allocation15 + $0xc8] ss:$16 sps:$4 sm:$0xff]  }
 0x9d5   :  { %5099 = vmatprep.subr.bf16.mxu0 %v11632_v48  ;;  %v11710_v48 = vld [vmem:[#allocation15 + $0xec] ss:$16 sps:$4 sm:$0xff]  }
 0x9d8   :  { %5100 = vmatpush1.bf16.msra.mxu0 %v11630_v7  ;;  %v11708_v7 = vld [vmem:[#allocation15 + $0xe8] ss:$16 sps:$4 sm:$0xff]  }
 0x9d9   :  { %5101 = vmatprep.subr.bf16.mxu0 %v11635_v52  ;;  %v11713_v52 = vld [vmem:[#allocation15 + $0x10c] ss:$16 sps:$4 sm:$0xff]  }
 0x9dc   :  { %5102 = vmatpush1.bf16.msra.mxu0 %v11633_v56  ;;  %v11716_v56 = vld [vmem:[#allocation15 + $0x12c] ss:$16 sps:$4 sm:$0xff]  }
 0x9dd   :  { %5103 = vmatprep.subr.bf16.mxu0 %v11638_v59  ;;  %v11714_v59 = vld [vmem:[#allocation15 + $0x128] ss:$16 sps:$4 sm:$0xff]  }
 0x9e0   :  { %5104 = vmatpush1.bf16.msra.mxu0 %v11636_v35  ;;  %v11719_v35 = vld [vmem:[#allocation15 + $0x14c] ss:$16 sps:$4 sm:$0xff]  }
 0x9e1   :  { %5446 = vmatprep.subr.bf16.mxu0 %v11641_v38  ;;  %v11717_v38 = vld [vmem:[#allocation15 + $0x148] ss:$16 sps:$4 sm:$0xff]  }
 0x9e3   :  { %5106 = vmatmul.mubr.bf16.vlgmr.msra.gmra.mrb[60].mxu0 %v13374_v19  ;;  %v11659_v19 = vld [vmem:[#allocation15 + $0xc4] ss:$16 sps:$4 sm:$0xff]  }
 0x9e4   :  { %5115 = vmatprep.mubr.bf16.mxu0 %v13379_v53  ;;  %5447 = vmatpush1.bf16.msra.mxu0 %v11639_v54  ;;  %v11677_v53 = vld [vmem:[#allocation15 + $0x184] ss:$16 sps:$4 sm:$0xff]   ;;  %v11722_v54 = vld [vmem:[#allocation15 + $0x16c] ss:$16 sps:$4 sm:$0xff]  }
 0x9e5   :  { %5448 = vmatprep.subr.bf16.mxu0 %v11644_v33  ;;  %v11720_v33 = vld [vmem:[#allocation15 + $0x168] ss:$16 sps:$4 sm:$0xff]  }
 0x9e8   :  { %5449 = vmatpush1.bf16.msra.mxu0 %v11642_v31  ;;  %v11725_v31 = vld [vmem:[#allocation15 + $0x18c] ss:$16 sps:$4 sm:$0xff]  }
 0x9e9   :  { %5450 = vmatprep.subr.bf16.mxu0 %v11647_v8  ;;  %v11723_v8 = vld [vmem:[#allocation15 + $0x188] ss:$16 sps:$4 sm:$0xff]  }
 0x9eb   :  { %5116 = vmatmul.mubr.bf16.gmra.mrb[64].mxu0 %v13377_v25  ;;  %v11674_v25 = vld [vmem:[#allocation15 + $0x164] ss:$16 sps:$4 sm:$0xff]  }
 0x9ec   :  { %5451 = vmatpush1.bf16.msra.mxu0 %v11645_v30  ;;  %5478 = vmatprep.mubr.bf16.mxu0 %v13368_v47  ;;  %v11728_v30 = vld [vmem:[#allocation15 + $0x1ac] ss:$16 sps:$4 sm:$0xff]  }
 0x9ed   :  { %5452 = vmatprep.subr.bf16.mxu0 %v11650_v0  ;;  %v11726_v0 = vld [vmem:[#allocation15 + $0x1a8] ss:$16 sps:$4 sm:$0xff]  }
 0x9f0   :  { %5453 = vmatpush1.bf16.msra.mxu0 %v11648_v6  ;;  %v11731_v6 = vld [vmem:[#allocation15 + $0x1cc] ss:$16 sps:$4 sm:$0xff]  }
 0x9f1   :  { %5454 = vmatprep.subr.bf16.mxu0 %v11653_v29  ;;  %v11729_v29 = vld [vmem:[#allocation15 + $0x1c8] ss:$16 sps:$4 sm:$0xff]  }
 0x9f4   :  { %5455 = vmatpush1.bf16.msra.mxu0 %v11651_v13  ;;  %v11734_v13 = vld [vmem:[#allocation15 + $0x1ec] ss:$16 sps:$4 sm:$0xff]  }
 0x9f5   :  { %5456 = vmatprep.subr.bf16.mxu0 %v11656_v15  ;;  %v11732_v15 = vld [vmem:[#allocation15 + $0x1e8] ss:$16 sps:$4 sm:$0xff]  }
 0x9f8   :  { %5457 = vmatpush1.bf16.msra.mxu0 %v11654_v42  ;;  %v11737_v42 = vld [vmem:[#allocation15 + $0x404] ss:$16 sps:$4 sm:$0xff]  }
 0x9f9   :  { %5458 = vmatprep.subr.bf16.mxu0 %v11659_v19  ;;  %v11735_v19 = vld [vmem:[#allocation15 + $0x400] ss:$16 sps:$4 sm:$0xff]  }
 0x9fc   :  { %5459 = vmatpush1.bf16.msra.mxu0 %v11657_v20  ;;  %v11740_v20 = vld [vmem:[#allocation15 + $0x424] ss:$16 sps:$4 sm:$0xff]  }
 0x9fd   :  { %5460 = vmatprep.subr.bf16.mxu0 %v11662_v21  ;;  %v12427_v21 = vld [vmem:[#allocation2 + $0x20] sm:$0xff]  }
 0xa00   :  { %5461 = vmatpush1.bf16.msra.mxu0 %v11660_v49  ;;  %v11741_v49 = vld [vmem:[#allocation15 + $0x440] ss:$16 sps:$4 sm:$0xff]  }
 0xa01   :  { %5462 = vmatprep.subr.bf16.mxu0 %v11665_v40  ;;  %v11746_v40 = vld [vmem:[#allocation15 + $0x464] ss:$16 sps:$4 sm:$0xff]  }
 0xa04   :  { %5463 = vmatpush1.bf16.msra.mxu0 %v11663_v50  ;;  %v12428_v50 = vld [vmem:[#allocation2 + $0x28] sm:$0xff]  }
 0xa05   :  { %5464 = vmatprep.subr.bf16.mxu0 %v11668_v22  ;;  %v11749_v22 = vld [vmem:[#allocation15 + $0x484] ss:$16 sps:$4 sm:$0xff]  }
 0xa08   :  { %5465 = vmatpush1.bf16.msra.mxu0 %v11666_v23  ;;  %v11747_v23 = vld [vmem:[#allocation15 + $0x480] ss:$16 sps:$4 sm:$0xff]  }
 0xa09   :  { %5466 = vmatprep.subr.bf16.mxu0 %v11671_v24  ;;  %v11752_v24 = vld [vmem:[#allocation15 + $0x4a4] ss:$16 sps:$4 sm:$0xff]  }
 0xa0c   :  { %5467 = vmatpush1.bf16.msra.mxu0 %v11669_v5  ;;  %v11750_v5 = vld [vmem:[#allocation15 + $0x4a0] ss:$16 sps:$4 sm:$0xff]  }
 0xa0d   :  { %5468 = vmatprep.subr.bf16.mxu0 %v11674_v25  ;;  %v11755_v25 = vld [vmem:[#allocation15 + $0x4c4] ss:$16 sps:$4 sm:$0xff]  }
 0xa10   :  { %5469 = vmatpush1.bf16.msra.mxu0 %v11672_v32  ;;  %v11753_v32 = vld [vmem:[#allocation15 + $0x4c0] ss:$16 sps:$4 sm:$0xff]  }
 0xa11   :  { %5470 = vmatprep.subr.bf16.mxu0 %v11677_v53  ;;  %v11758_v53 = vld [vmem:[#allocation15 + $0x4e4] ss:$16 sps:$4 sm:$0xff]  }
 0xa14   :  { %5471 = vmatpush1.bf16.msra.mxu0 %v11675_v45  ;;  %v11756_v45 = vld [vmem:[#allocation15 + $0x4e0] ss:$16 sps:$4 sm:$0xff]  }
 0xa15   :  { %5472 = vmatprep.subr.bf16.mxu0 %v11680_v27  ;;  %v11761_v27 = vld [vmem:[#allocation15 + $0x504] ss:$16 sps:$4 sm:$0xff]  }
 0xa18   :  { %5473 = vmatpush1.bf16.msra.mxu0 %v11678_v28  ;;  %v11759_v28 = vld [vmem:[#allocation15 + $0x500] ss:$16 sps:$4 sm:$0xff]  }
 0xa19   :  { %5474 = vmatprep.subr.bf16.mxu0 %v11683_v46  ;;  %v11764_v46 = vld [vmem:[#allocation15 + $0x524] ss:$16 sps:$4 sm:$0xff]  }
 0xa1c   :  { %5475 = vmatpush1.bf16.msra.mxu0 %v11681_v51  ;;  %v11762_v51 = vld [vmem:[#allocation15 + $0x520] ss:$16 sps:$4 sm:$0xff]  }
 0xa1d   :  { %5476 = vmatprep.subr.bf16.mxu0 %v11686_v43  ;;  %v11767_v43 = vld [vmem:[#allocation15 + $0x544] ss:$16 sps:$4 sm:$0xff]  }
 0xa20   :  { %5477 = vmatpush1.bf16.msra.mxu0 %v11684_v44  ;;  %v11765_v44 = vld [vmem:[#allocation15 + $0x540] ss:$16 sps:$4 sm:$0xff]  }
 0xa21   :  { %5499 = vmatprep.subr.bf16.mxu0 %v11689_v34  ;;  %v11770_v34 = vld [vmem:[#allocation15 + $0x564] ss:$16 sps:$4 sm:$0xff]  }
 0xa23   :  { %5479 = vmatmul.mubr.bf16.vlgmr.msra.gmra.mrb[52].mxu0 %v13366_v37 }
 0xa24   :  { %5488 = vmatprep.mubr.bf16.mxu0 %v13372_v11  ;;  %5500 = vmatpush1.bf16.msra.mxu0 %v11687_v36  ;;  %v11768_v36 = vld [vmem:[#allocation15 + $0x560] ss:$16 sps:$4 sm:$0xff]  }
 0xa25   :  { %5501 = vmatprep.subr.bf16.mxu0 %v11692_v57  ;;  %v11773_v57 = vld [vmem:[#allocation15 + $0x584] ss:$16 sps:$4 sm:$0xff]  }
 0xa28   :  { %5502 = vmatpush1.bf16.msra.mxu0 %v11690_v60  ;;  %v11771_v60 = vld [vmem:[#allocation15 + $0x580] ss:$16 sps:$4 sm:$0xff]  }
 0xa29   :  { %5503 = vmatprep.subr.bf16.mxu0 %v11695_v61  ;;  %v11776_v61 = vld [vmem:[#allocation15 + $0x5a4] ss:$16 sps:$4 sm:$0xff]  }
 0xa2b   :  { %5489 = vmatmul.mubr.bf16.gmra.mrb[56].mxu0 %v13370_v9 }
 0xa2c   :  { %5504 = vmatpush1.bf16.msra.mxu0 %v11693_v62  ;;  %5531 = vmatprep.mubr.bf16.mxu0 %v13368_v47  ;;  %v11711_v47 = vld [vmem:[#allocation15 + $0x108] ss:$16 sps:$4 sm:$0xff]   ;;  %v11774_v62 = vld [vmem:[#allocation15 + $0x5a0] ss:$16 sps:$4 sm:$0xff]  }
 0xa2d   :  { %5505 = vmatprep.subr.bf16.mxu0 %v11698_v17  ;;  %v11779_v17 = vld [vmem:[#allocation15 + $0x5c4] ss:$16 sps:$4 sm:$0xff]  }
 0xa30   :  { %5506 = vmatpush1.bf16.msra.mxu0 %v11696_v63  ;;  %v11777_v63 = vld [vmem:[#allocation15 + $0x5c0] ss:$16 sps:$4 sm:$0xff]  }
 0xa31   :  { %5507 = vmatprep.subr.bf16.mxu0 %v11701_v1  ;;  %v11782_v1 = vld [vmem:[#allocation15 + $0x5e4] ss:$16 sps:$4 sm:$0xff]  }
 0xa34   :  { %5508 = vmatpush1.bf16.msra.mxu0 %v11699_v2  ;;  %v11780_v2 = vld [vmem:[#allocation15 + $0x5e0] ss:$16 sps:$4 sm:$0xff]  }
 0xa35   :  { %5509 = vmatprep.subr.bf16.mxu0 %v11704_v4  ;;  %v11785_v4 = vld [vmem:[#allocation15 + $0x40c] ss:$16 sps:$4 sm:$0xff]  }
 0xa38   :  { %5510 = vmatpush1.bf16.msra.mxu0 %v11702_v10 }
 0xa39   :  { %5511 = vmatprep.subr.bf16.mxu0 %v11707_v14 }
 0xa3c   :  { %5512 = vmatpush1.bf16.msra.mxu0 %v11705_v3 }
 0xa3d   :  { %5513 = vmatprep.subr.bf16.mxu0 %v11710_v48 }
 0xa40   :  { %5514 = vmatpush1.bf16.msra.mxu0 %v11708_v7 }
 0xa41   :  { %5515 = vmatprep.subr.bf16.mxu0 %v11713_v52 }
 0xa44   :  { %5516 = vmatpush1.bf16.msra.mxu0 %v11711_v47  ;;  %v11783_v47 = vld [vmem:[#allocation15 + $0x408] ss:$16 sps:$4 sm:$0xff]  }
 0xa45   :  { %5517 = vmatprep.subr.bf16.mxu0 %v11716_v56  ;;  %v11788_v56 = vld [vmem:[#allocation15 + $0x42c] ss:$16 sps:$4 sm:$0xff]  }
 0xa48   :  { %5518 = vmatpush1.bf16.msra.mxu0 %v11714_v59 }
 0xa49   :  { %5519 = vmatprep.subr.bf16.mxu0 %v11719_v35  ;;  %v11786_v35 = vld [vmem:[#allocation15 + $0x428] ss:$16 sps:$4 sm:$0xff]  }
 0xa4c   :  { %5520 = vmatpush1.bf16.msra.mxu0 %v11717_v38 }
 0xa4d   :  { %5521 = vmatprep.subr.bf16.mxu0 %v11722_v54  ;;  %v11791_v54 = vld [vmem:[#allocation15 + $0x44c] ss:$16 sps:$4 sm:$0xff]  }
 0xa50   :  { %5522 = vmatpush1.bf16.msra.mxu0 %v11720_v33 }
 0xa51   :  { %5523 = vmatprep.subr.bf16.mxu0 %v11725_v31 }
 0xa54   :  { %5524 = vmatpush1.bf16.msra.mxu0 %v11723_v8 }
 0xa55   :  { %5525 = vmatprep.subr.bf16.mxu0 %v11728_v30 }
 0xa58   :  { %5526 = vmatpush1.bf16.msra.mxu0 %v11726_v0  ;;  %v11789_v0 = vld [vmem:[#allocation15 + $0x448] ss:$16 sps:$4 sm:$0xff]  }
 0xa59   :  { %5527 = vmatprep.subr.bf16.mxu0 %v11731_v6  ;;  %v11794_v6 = vld [vmem:[#allocation15 + $0x46c] ss:$16 sps:$4 sm:$0xff]  }
 0xa5c   :  { %5528 = vmatpush1.bf16.msra.mxu0 %v11729_v29  ;;  %v11792_v29 = vld [vmem:[#allocation15 + $0x468] ss:$16 sps:$4 sm:$0xff]  }
 0xa5d   :  { %5529 = vmatprep.subr.bf16.mxu0 %v11734_v13  ;;  %v11797_v13 = vld [vmem:[#allocation15 + $0x48c] ss:$16 sps:$4 sm:$0xff]  }
 0xa60   :  { %5530 = vmatpush1.bf16.msra.mxu0 %v11732_v15  ;;  %v11795_v15 = vld [vmem:[#allocation15 + $0x488] ss:$16 sps:$4 sm:$0xff]  }
 0xa61   :  { %5552 = vmatprep.subr.bf16.mxu0 %v13345_v26 }
 0xa63   :  { %5532 = vmatmul.mubr.bf16.vlgmr.msra.gmra.mrb[60].mxu0 %v13366_v37  ;;  %v11738_v37 = vld [vmem:[#allocation15 + $0x420] ss:$16 sps:$4 sm:$0xff]  }
 0xa64   :  { %5541 = vmatprep.mubr.bf16.mxu0 %v13372_v11  ;;  %5553 = vmatpush1.bf16.msra.mxu0 %v13343_v58  ;;  %v11743_v11 = vld [vmem:[#allocation15 + $0x444] ss:$16 sps:$4 sm:$0xff]  }
 0xa65   :  { %5554 = vmatprep.subr.bf16.mxu0 %v13351_v16 }
 0xa68   :  { %5555 = vmatpush1.bf16.msra.mxu0 %v13349_v12 }
 0xa69   :  { %5994 = vmatprep.subr.bf16.mxu0 %v11737_v42  ;;  %v11800_v42 = vld [vmem:[#allocation15 + $0x4ac] ss:$16 sps:$4 sm:$0xff]  }
 0xa6b   :  { %5542 = vmatmul.mubr.bf16.gmra.mrb[64].mxu0 %v13370_v9  ;;  %v11744_v9 = vld [vmem:[#allocation15 + $0x460] ss:$16 sps:$4 sm:$0xff]  }
 0xa6c   :  { %5584 = vmatprep.mubr.bf16.mxu0 %v12687_v55 }
 0xa73   :  { %9986 = vmatmul.mubr.msk.bf16.vlgmr.msra.gmra.mrb[68].mxu0 %vm184_vm0, %v12427_v21  ;;  %v11884_v21 = vld [vmem:[#allocation15 + $0x62c] ss:$16 sps:$4 sm:$0xff]  }
 0xa74   :  { %5594 = vmatprep.mubr.bf16.mxu0 %v12687_v55  ;;  %5995 = vmatpush1.bf16.msra.mxu0 %v11735_v19  ;;  %v11879_v19 = vld [vmem:[#allocation15 + $0x608] ss:$16 sps:$4 sm:$0xff]  }
 0xa75   :  { %5996 = vmatprep.subr.bf16.mxu0 %v11740_v20  ;;  %v11881_v20 = vld [vmem:[#allocation15 + $0x60c] ss:$16 sps:$4 sm:$0xff]  }
 0xa76   :  { %6611 = vmatprep.subr.bf16.mxu1 %v11881_v20  ;;  %v11851_v20 = vld [vmem:[#allocation15 + $0x6c4] ss:$16 sps:$4 sm:$0xff]  }
 0xa77   :  { %6612 = vmatpush1.bf16.msra.mxu1 %v11879_v19  ;;  %v11846_v19 = vld [vmem:[#allocation15 + $0x6a0] ss:$16 sps:$4 sm:$0xff]  }
 0xa78   :  { %5997 = vmatpush1.bf16.msra.mxu0 %v11738_v37  ;;  %v11798_v37 = vld [vmem:[#allocation15 + $0x4a8] ss:$16 sps:$4 sm:$0xff]   ;;  %6613 = vmatprep.subr.bf16.mxu1 %v11884_v21  ;;  %v11849_v21 = vld [vmem:[#allocation15 + $0x6c0] ss:$16 sps:$4 sm:$0xff]  }
 0xa79   :  { %5998 = vmatprep.subr.bf16.mxu0 %v11743_v11  ;;  %v11882_v11 = vld [vmem:[#allocation15 + $0x628] ss:$16 sps:$4 sm:$0xff]  }
 0xa7b   :  { %9987 = vmatmul.mubr.msk.bf16.gmra.mrb[72].mxu0 %vm184_vm0, %v12428_v50  ;;  %v11801_v50 = vld [vmem:[#allocation15 + $0x4c8] ss:$16 sps:$4 sm:$0xff]   ;;  %6614 = vmatpush1.bf16.msra.mxu1 %v11882_v11  ;;  %v11852_v11 = vld [vmem:[#allocation15 + $0x6e0] ss:$16 sps:$4 sm:$0xff]  }
 0xa7c   :  { %5999 = vmatpush1.bf16.msra.mxu0 %v11741_v49  ;;  %v11803_v49 = vld [vmem:[#allocation15 + $0x4cc] ss:$16 sps:$4 sm:$0xff]  }
 0xa7d   :  { %6000 = vmatprep.subr.bf16.mxu0 %v11746_v40  ;;  %v11887_v40 = vld [vmem:[#allocation15 + $0x64c] ss:$16 sps:$4 sm:$0xff]  }
 0xa7e   :  { %6615 = vmatprep.subr.bf16.mxu1 %v11887_v40  ;;  %v11855_v40 = vld [vmem:[#allocation15 + $0x700] ss:$16 sps:$4 sm:$0xff]  }
 0xa80   :  { %6001 = vmatpush1.bf16.msra.mxu0 %v11744_v9  ;;  %v11885_v9 = vld [vmem:[#allocation15 + $0x648] ss:$16 sps:$4 sm:$0xff]  }
 0xa81   :  { %6002 = vmatprep.subr.bf16.mxu0 %v11749_v22  ;;  %v11806_v22 = vld [vmem:[#allocation15 + $0x4ec] ss:$16 sps:$4 sm:$0xff]   ;;  %6616 = vmatpush1.bf16.msra.mxu1 %v11885_v9  ;;  %v11858_v9 = vld [vmem:[#allocation15 + $0x720] ss:$16 sps:$4 sm:$0xff]  }
 0xa84   :  { %6003 = vmatpush1.bf16.msra.mxu0 %v11747_v23  ;;  %v11890_v23 = vld [vmem:[#allocation15 + $0x66c] ss:$16 sps:$4 sm:$0xff]  }
 0xa85   :  { %6004 = vmatprep.subr.bf16.mxu0 %v11752_v24  ;;  %v11804_v24 = vld [vmem:[#allocation15 + $0x4e8] ss:$16 sps:$4 sm:$0xff]   ;;  %6617 = vmatprep.subr.bf16.mxu1 %v11890_v23  ;;  %v11861_v23 = vld [vmem:[#allocation15 + $0x740] ss:$16 sps:$4 sm:$0xff]  }
 0xa88   :  { %6005 = vmatpush1.bf16.msra.mxu0 %v11750_v5  ;;  %v11888_v5 = vld [vmem:[#allocation15 + $0x668] ss:$16 sps:$4 sm:$0xff]  }
 0xa89   :  { %6006 = vmatprep.subr.bf16.mxu0 %v11755_v25  ;;  %v11809_v25 = vld [vmem:[#allocation15 + $0x50c] ss:$16 sps:$4 sm:$0xff]   ;;  %6618 = vmatpush1.bf16.msra.mxu1 %v11888_v5  ;;  %v11864_v5 = vld [vmem:[#allocation15 + $0x760] ss:$16 sps:$4 sm:$0xff]  }
 0xa8c   :  { %6007 = vmatpush1.bf16.msra.mxu0 %v11753_v32  ;;  %v11893_v32 = vld [vmem:[#allocation15 + $0x68c] ss:$16 sps:$4 sm:$0xff]  }
 0xa8d   :  { %6008 = vmatprep.subr.bf16.mxu0 %v11758_v53  ;;  %v11807_v53 = vld [vmem:[#allocation15 + $0x508] ss:$16 sps:$4 sm:$0xff]   ;;  %6619 = vmatprep.subr.bf16.mxu1 %v11893_v32  ;;  %v11867_v32 = vld [vmem:[#allocation15 + $0x780] ss:$16 sps:$4 sm:$0xff]  }
 0xa90   :  { %6009 = vmatpush1.bf16.msra.mxu0 %v11756_v45  ;;  %v11891_v45 = vld [vmem:[#allocation15 + $0x688] ss:$16 sps:$4 sm:$0xff]  }
 0xa91   :  { %6010 = vmatprep.subr.bf16.mxu0 %v11761_v27  ;;  %v11812_v27 = vld [vmem:[#allocation15 + $0x52c] ss:$16 sps:$4 sm:$0xff]   ;;  %6620 = vmatpush1.bf16.msra.mxu1 %v11891_v45  ;;  %v11870_v45 = vld [vmem:[#allocation15 + $0x7a0] ss:$16 sps:$4 sm:$0xff]  }
 0xa94   :  { %6011 = vmatpush1.bf16.msra.mxu0 %v11759_v28  ;;  %v11896_v28 = vld [vmem:[#allocation15 + $0x6ac] ss:$16 sps:$4 sm:$0xff]  }
 0xa95   :  { %6012 = vmatprep.subr.bf16.mxu0 %v11764_v46  ;;  %v11810_v46 = vld [vmem:[#allocation15 + $0x528] ss:$16 sps:$4 sm:$0xff]   ;;  %6621 = vmatprep.subr.bf16.mxu1 %v11896_v28  ;;  %v11873_v28 = vld [vmem:[#allocation15 + $0x7c0] ss:$16 sps:$4 sm:$0xff]  }
 0xa98   :  { %6013 = vmatpush1.bf16.msra.mxu0 %v11762_v51  ;;  %v11894_v51 = vld [vmem:[#allocation15 + $0x6a8] ss:$16 sps:$4 sm:$0xff]  }
 0xa99   :  { %6014 = vmatprep.subr.bf16.mxu0 %v11767_v43  ;;  %v11815_v43 = vld [vmem:[#allocation15 + $0x54c] ss:$16 sps:$4 sm:$0xff]   ;;  %6622 = vmatpush1.bf16.msra.mxu1 %v11894_v51  ;;  %v11876_v51 = vld [vmem:[#allocation15 + $0x7e0] ss:$16 sps:$4 sm:$0xff]  }
 0xa9c   :  { %6015 = vmatpush1.bf16.msra.mxu0 %v11765_v44  ;;  %v11899_v44 = vld [vmem:[#allocation15 + $0x6cc] ss:$16 sps:$4 sm:$0xff]  }
 0xa9d   :  { %6016 = vmatprep.subr.bf16.mxu0 %v11770_v34  ;;  %v11813_v34 = vld [vmem:[#allocation15 + $0x548] ss:$16 sps:$4 sm:$0xff]   ;;  %6623 = vmatprep.subr.bf16.mxu1 %v11899_v44 }
 0xa9e   :  { %v11912_v44 = vld [vmem:[#allocation15 + $0x768] ss:$16 sps:$4 sm:$0xff]  }
 0xaa0   :  { %6017 = vmatpush1.bf16.msra.mxu0 %v11768_v36  ;;  %v11897_v36 = vld [vmem:[#allocation15 + $0x6c8] ss:$16 sps:$4 sm:$0xff]  }
 0xaa1   :  { %6018 = vmatprep.subr.bf16.mxu0 %v11773_v57  ;;  %v11818_v57 = vld [vmem:[#allocation15 + $0x56c] ss:$16 sps:$4 sm:$0xff]   ;;  %6624 = vmatpush1.bf16.msra.mxu1 %v11897_v36  ;;  %v11915_v36 = vld [vmem:[#allocation15 + $0x788] ss:$16 sps:$4 sm:$0xff]  }
 0xaa4   :  { %6019 = vmatpush1.bf16.msra.mxu0 %v11771_v60  ;;  %v11902_v60 = vld [vmem:[#allocation15 + $0x6ec] ss:$16 sps:$4 sm:$0xff]  }
 0xaa5   :  { %6020 = vmatprep.subr.bf16.mxu0 %v11776_v61  ;;  %v11816_v61 = vld [vmem:[#allocation15 + $0x568] ss:$16 sps:$4 sm:$0xff]   ;;  %6625 = vmatprep.subr.bf16.mxu1 %v11902_v60 }
 0xaa6   :  { %v11918_v60 = vld [vmem:[#allocation15 + $0x7a8] ss:$16 sps:$4 sm:$0xff]  }
 0xaa8   :  { %6021 = vmatpush1.bf16.msra.mxu0 %v11774_v62  ;;  %v11900_v62 = vld [vmem:[#allocation15 + $0x6e8] ss:$16 sps:$4 sm:$0xff]  }
 0xaa9   :  { %6022 = vmatprep.subr.bf16.mxu0 %v11779_v17  ;;  %v11821_v17 = vld [vmem:[#allocation15 + $0x58c] ss:$16 sps:$4 sm:$0xff]   ;;  %6626 = vmatpush1.bf16.msra.mxu1 %v11900_v62  ;;  %v11921_v62 = vld [vmem:[#allocation15 + $0x7c8] ss:$16 sps:$4 sm:$0xff]  }
 0xaac   :  { %6023 = vmatpush1.bf16.msra.mxu0 %v11777_v63  ;;  %v11905_v63 = vld [vmem:[#allocation15 + $0x70c] ss:$16 sps:$4 sm:$0xff]  }
 0xaad   :  { %6024 = vmatprep.subr.bf16.mxu0 %v11782_v1  ;;  %v11819_v1 = vld [vmem:[#allocation15 + $0x588] ss:$16 sps:$4 sm:$0xff]   ;;  %6627 = vmatprep.subr.bf16.mxu1 %v11905_v63 }
 0xaae   :  { %v11924_v63 = vld [vmem:[#allocation15 + $0x7e8] ss:$16 sps:$4 sm:$0xff]  }
 0xab0   :  { %6025 = vmatpush1.bf16.msra.mxu0 %v11780_v2  ;;  %v11903_v2 = vld [vmem:[#allocation15 + $0x708] ss:$16 sps:$4 sm:$0xff]  }
 0xab1   :  { %6047 = vmatprep.subr.bf16.mxu0 %v11785_v4  ;;  %v11824_v4 = vld [vmem:[#allocation15 + $0x5ac] ss:$16 sps:$4 sm:$0xff]   ;;  %6628 = vmatpush1.bf16.msra.mxu1 %v11903_v2 }
 0xb46   :  { %v5586_v10 = vpop.f32.mrb[68].mxu0 }
 0xb47   :  { %v5588_v14 = vpop.f32.mrb[69].mxu0 }
 0xb48   :  { %v5590_v3 = vpop.f32.mrb[70].mxu0 }
 0xb49   :  { %v13402_v48 = vpack.c.bf16 %v5590_v3, %v5586_v10  ;;  %v5592_v7 = vpop.f32.mrb[71].mxu0  ;;  %v11908_v10 = vld [vmem:[#allocation15 + $0x72c] ss:$16 sps:$4 sm:$0xff]   ;;  %v11906_v3 = vld [vmem:[#allocation15 + $0x728] ss:$16 sps:$4 sm:$0xff]  }
 0xb4a   :  { %v5606_v52 = vpack.c.bf16 %v5592_v7, %v5588_v14  ;;  %v11822_v14 = vld [vmem:[#allocation15 + $0x5a8] ss:$16 sps:$4 sm:$0xff]   ;;  %v11827_v7 = vld [vmem:[#allocation15 + $0x5cc] ss:$16 sps:$4 sm:$0xff]   ;;  %6629 = vmatprep.subr.bf16.mxu1 %v11908_v10 }
 0xb4b   :  { %6630 = vmatpush1.bf16.msra.mxu1 %v11906_v3 }
 0xb4c   :  { %6026 = vmatprep.mubr.bf16.mxu0 %v5606_v52 }
 0xb4d   :  { %6027 = vmatmul.mubr.bf16.vlgmr.msra.gmra.mrb[52].mxu0 %v13402_v48 }
 0xb4e   :  { %6048 = vmatpush1.bf16.msra.mxu0 %v11783_v47  ;;  %v5596_v59 = vpop.f32.mrb[72].mxu0  ;;  %v11825_v47 = vld [vmem:[#allocation15 + $0x5c8] ss:$16 sps:$4 sm:$0xff]  }
 0xb4f   :  { %v5598_v38 = vpop.f32.mrb[73].mxu0  ;;  %6049 = vmatprep.subr.bf16.mxu0 %v11788_v56  ;;  %v11909_v56 = vld [vmem:[#allocation15 + $0x748] ss:$16 sps:$4 sm:$0xff]  }
 0xb50   :  { %v5600_v33 = vpop.f32.mrb[74].mxu0 }
 0xb51   :  { %v13405_v31 = vpack.c.bf16 %v5600_v33, %v5596_v59  ;;  %v5602_v8 = vpop.f32.mrb[75].mxu0  ;;  %v11830_v59 = vld [vmem:[#allocation15 + $0x5ec] ss:$16 sps:$4 sm:$0xff]   ;;  %v11836_v33 = vld [vmem:[#allocation15 + $0x624] ss:$16 sps:$4 sm:$0xff]  }
 0xb52   :  { %v13407_v30 = vpack.c.bf16 %v5602_v8, %v5598_v38  ;;  %6050 = vmatpush1.bf16.msra.mxu0 %v11786_v35  ;;  %v11828_v35 = vld [vmem:[#allocation15 + $0x5e8] ss:$16 sps:$4 sm:$0xff]   ;;  %v11833_v38 = vld [vmem:[#allocation15 + $0x604] ss:$16 sps:$4 sm:$0xff]  }
 0xb53   :  { %6051 = vmatprep.subr.bf16.mxu0 %v11791_v54  ;;  %v11831_v54 = vld [vmem:[#allocation15 + $0x600] ss:$16 sps:$4 sm:$0xff]  }
 0xb54   :  { %6036 = vmatprep.mubr.bf16.mxu0 %v13407_v30  ;;  %v12429_v8 = vld [vmem:[#allocation2 + $0x30] sm:$0xff]  }
 0xb55   :  { %6037 = vmatmul.mubr.bf16.gmra.mrb[56].mxu0 %v13405_v31 }
 0xb56   :  { %6052 = vmatpush1.bf16.msra.mxu0 %v11789_v0  ;;  %6079 = vmatprep.mubr.bf16.mxu0 %v5606_v52  ;;  %v11911_v52 = vld [vmem:[#allocation15 + $0x74c] ss:$16 sps:$4 sm:$0xff]   ;;  %v11837_v0 = vld [vmem:[#allocation15 + $0x640] ss:$16 sps:$4 sm:$0xff]  }
 0xb57   :  { %6053 = vmatprep.subr.bf16.mxu0 %v11794_v6  ;;  %6631 = vmatprep.subr.bf16.mxu1 %v11911_v52  ;;  %v11842_v6 = vld [vmem:[#allocation15 + $0x664] ss:$16 sps:$4 sm:$0xff]  }
 0xb58   :  { %6632 = vmatpush1.bf16.msra.mxu1 %v11909_v56 }
 0xb5a   :  { %6054 = vmatpush1.bf16.msra.mxu0 %v11792_v29  ;;  %v12430_v29 = vld [vmem:[#allocation2 + $0x38] sm:$0xff]  }
 0xb5b   :  { %6055 = vmatprep.subr.bf16.mxu0 %v11797_v13  ;;  %v11845_v13 = vld [vmem:[#allocation15 + $0x684] ss:$16 sps:$4 sm:$0xff]  }
 0xb5e   :  { %6056 = vmatpush1.bf16.msra.mxu0 %v11795_v15  ;;  %v11843_v15 = vld [vmem:[#allocation15 + $0x680] ss:$16 sps:$4 sm:$0xff]  }
 0xb5f   :  { %6057 = vmatprep.subr.bf16.mxu0 %v11800_v42  ;;  %v11848_v42 = vld [vmem:[#allocation15 + $0x6a4] ss:$16 sps:$4 sm:$0xff]  }
 0xb62   :  { %6058 = vmatpush1.bf16.msra.mxu0 %v11798_v37  ;;  %v11854_v37 = vld [vmem:[#allocation15 + $0x6e4] ss:$16 sps:$4 sm:$0xff]  }
 0xb63   :  { %6059 = vmatprep.subr.bf16.mxu0 %v11803_v49  ;;  %v11857_v49 = vld [vmem:[#allocation15 + $0x704] ss:$16 sps:$4 sm:$0xff]  }
 0xb66   :  { %6060 = vmatpush1.bf16.msra.mxu0 %v11801_v50  ;;  %v11860_v50 = vld [vmem:[#allocation15 + $0x724] ss:$16 sps:$4 sm:$0xff]  }
 0xb67   :  { %6061 = vmatprep.subr.bf16.mxu0 %v11806_v22  ;;  %v11863_v22 = vld [vmem:[#allocation15 + $0x744] ss:$16 sps:$4 sm:$0xff]  }
 0xb6a   :  { %6062 = vmatpush1.bf16.msra.mxu0 %v11804_v24  ;;  %v11866_v24 = vld [vmem:[#allocation15 + $0x764] ss:$16 sps:$4 sm:$0xff]  }
 0xb6b   :  { %6063 = vmatprep.subr.bf16.mxu0 %v11809_v25  ;;  %v11869_v25 = vld [vmem:[#allocation15 + $0x784] ss:$16 sps:$4 sm:$0xff]  }
 0xb6e   :  { %6064 = vmatpush1.bf16.msra.mxu0 %v11807_v53  ;;  %v11872_v53 = vld [vmem:[#allocation15 + $0x7a4] ss:$16 sps:$4 sm:$0xff]  }
 0xb6f   :  { %6065 = vmatprep.subr.bf16.mxu0 %v11812_v27  ;;  %v11875_v27 = vld [vmem:[#allocation15 + $0x7c4] ss:$16 sps:$4 sm:$0xff]  }
 0xb72   :  { %6066 = vmatpush1.bf16.msra.mxu0 %v11810_v46  ;;  %v11878_v46 = vld [vmem:[#allocation15 + $0x7e4] ss:$16 sps:$4 sm:$0xff]  }
 0xb73   :  { %6067 = vmatprep.subr.bf16.mxu0 %v11815_v43  ;;  %v11914_v43 = vld [vmem:[#allocation15 + $0x76c] ss:$16 sps:$4 sm:$0xff]  }
 0xb74   :  { %6633 = vmatprep.subr.bf16.mxu1 %v11914_v43  ;;  %v12434_v43 = vld [vmem:[#allocation2 + $0x68] sm:$0xff]  }
 0xb75   :  { %6634 = vmatpush1.bf16.msra.mxu1 %v11912_v44  ;;  %v11960_v44 = vld [vmem:[#allocation15 + $0x960] ss:$16 sps:$4 sm:$0xff]  }
 0xb76   :  { %6068 = vmatpush1.bf16.msra.mxu0 %v11813_v34  ;;  %v11917_v34 = vld [vmem:[#allocation15 + $0x78c] ss:$16 sps:$4 sm:$0xff]  }
 0xb77   :  { %6069 = vmatprep.subr.bf16.mxu0 %v11818_v57  ;;  %6635 = vmatprep.subr.bf16.mxu1 %v11917_v34  ;;  %v11920_v57 = vld [vmem:[#allocation15 + $0x7ac] ss:$16 sps:$4 sm:$0xff]   ;;  %v11965_v34 = vld [vmem:[#allocation15 + $0x984] ss:$16 sps:$4 sm:$0xff]  }
 0xb79   :  { %6636 = vmatpush1.bf16.msra.mxu1 %v11915_v36  ;;  %v11963_v36 = vld [vmem:[#allocation15 + $0x980] ss:$16 sps:$4 sm:$0xff]  }
 0xb7a   :  { %6070 = vmatpush1.bf16.msra.mxu0 %v11816_v61  ;;  %6637 = vmatprep.subr.bf16.mxu1 %v11920_v57  ;;  %v11923_v61 = vld [vmem:[#allocation15 + $0x7cc] ss:$16 sps:$4 sm:$0xff]   ;;  %v11968_v57 = vld [vmem:[#allocation15 + $0x9a4] ss:$16 sps:$4 sm:$0xff]  }
 0xb7b   :  { %6071 = vmatprep.subr.bf16.mxu0 %v11821_v17  ;;  %v11926_v17 = vld [vmem:[#allocation15 + $0x7ec] ss:$16 sps:$4 sm:$0xff]  }
 0xb7d   :  { %6638 = vmatpush1.bf16.msra.mxu1 %v11918_v60  ;;  %v12435_v60 = vld [vmem:[#allocation2 + $0x70] sm:$0xff]  }
 0xb7e   :  { %6072 = vmatpush1.bf16.msra.mxu0 %v11819_v1  ;;  %6639 = vmatprep.subr.bf16.mxu1 %v11923_v61  ;;  %v11929_v1 = vld [vmem:[#allocation15 + $0x804] ss:$16 sps:$4 sm:$0xff]   ;;  %v11966_v61 = vld [vmem:[#allocation15 + $0x9a0] ss:$16 sps:$4 sm:$0xff]  }
 0xb7f   :  { %6073 = vmatprep.subr.bf16.mxu0 %v11824_v4 }
 0xb81   :  { %6640 = vmatpush1.bf16.msra.mxu1 %v11921_v62  ;;  %v11971_v62 = vld [vmem:[#allocation15 + $0x9c4] ss:$16 sps:$4 sm:$0xff]  }
 0xb82   :  { %6074 = vmatpush1.bf16.msra.mxu0 %v11822_v14  ;;  %6641 = vmatprep.subr.bf16.mxu1 %v11926_v17  ;;  %v11969_v17 = vld [vmem:[#allocation15 + $0x9c0] ss:$16 sps:$4 sm:$0xff]  }
 0xb83   :  { %6075 = vmatprep.subr.bf16.mxu0 %v11827_v7 }
 0xb85   :  { %6642 = vmatpush1.bf16.msra.mxu1 %v11924_v63  ;;  %v11974_v63 = vld [vmem:[#allocation15 + $0x9e4] ss:$16 sps:$4 sm:$0xff]  }
 0xb86   :  { %6076 = vmatpush1.bf16.msra.mxu0 %v11825_v47  ;;  %7065 = vmatprep.subr.bf16.mxu1 %v11929_v1  ;;  %v12436_v1 = vld [vmem:[#allocation2 + $0x78] sm:$0xff]  }
 0xb87   :  { %6077 = vmatprep.subr.bf16.mxu0 %v11830_v59 }
 0xb8a   :  { %6078 = vmatpush1.bf16.msra.mxu0 %v11828_v35 }
 0xb8b   :  { %6116 = vmatprep.subr.bf16.mxu0 %v13345_v26 }
 0xb8d   :  { %6080 = vmatmul.mubr.bf16.vlgmr.msra.gmra.mrb[60].mxu0 %v13402_v48  ;;  %v11834_v48 = vld [vmem:[#allocation15 + $0x620] ss:$16 sps:$4 sm:$0xff]  }
 0xb8e   :  { %6089 = vmatprep.mubr.bf16.mxu0 %v13407_v30  ;;  %6117 = vmatpush1.bf16.msra.mxu0 %v13343_v58  ;;  %v11839_v30 = vld [vmem:[#allocation15 + $0x644] ss:$16 sps:$4 sm:$0xff]  }
 0xb8f   :  { %6118 = vmatprep.subr.bf16.mxu0 %v13351_v16 }
 0xb92   :  { %6119 = vmatpush1.bf16.msra.mxu0 %v13349_v12 }
 0xb93   :  { %6558 = vmatprep.subr.bf16.mxu0 %v11833_v38 }
 0xb95   :  { %6090 = vmatmul.mubr.bf16.gmra.mrb[64].mxu0 %v13405_v31  ;;  %v11840_v31 = vld [vmem:[#allocation15 + $0x660] ss:$16 sps:$4 sm:$0xff]  }
 0xb96   :  { %6148 = vmatprep.mubr.bf16.mxu0 %v12687_v55 }
 0xb9d   :  { %10052 = vmatmul.mubr.msk.bf16.vlgmr.msra.gmra.mrb[76].mxu0 %vm184_vm0, %v12429_v8  ;;  %v11927_v8 = vld [vmem:[#allocation15 + $0x800] ss:$16 sps:$4 sm:$0xff]  }
 0xb9e   :  { %6559 = vmatpush1.bf16.msra.mxu0 %v11831_v54  ;;  %6158 = vmatprep.mubr.bf16.mxu0 %v12687_v55 }
 0xb9f   :  { %6560 = vmatprep.subr.bf16.mxu0 %v11836_v33 }
 0xba2   :  { %6561 = vmatpush1.bf16.msra.mxu0 %v11834_v48  ;;  %v11932_v48 = vld [vmem:[#allocation15 + $0x824] ss:$16 sps:$4 sm:$0xff]  }
 0xba3   :  { %6562 = vmatprep.subr.bf16.mxu0 %v11839_v30 }
 0xba5   :  { %10053 = vmatmul.mubr.msk.bf16.gmra.mrb[80].mxu0 %vm184_vm0, %v12430_v29  ;;  %v11935_v29 = vld [vmem:[#allocation15 + $0x844] ss:$16 sps:$4 sm:$0xff]  }
 0xba6   :  { %6563 = vmatpush1.bf16.msra.mxu0 %v11837_v0  ;;  %v11930_v0 = vld [vmem:[#allocation15 + $0x820] ss:$16 sps:$4 sm:$0xff]  }
 0xba7   :  { %6564 = vmatprep.subr.bf16.mxu0 %v11842_v6 }
 0xbaa   :  { %6565 = vmatpush1.bf16.msra.mxu0 %v11840_v31 }
 0xbab   :  { %6566 = vmatprep.subr.bf16.mxu0 %v11845_v13 }
 0xbae   :  { %6567 = vmatpush1.bf16.msra.mxu0 %v11843_v15 }
 0xbaf   :  { %6568 = vmatprep.subr.bf16.mxu0 %v11848_v42 }
 0xbb2   :  { %6569 = vmatpush1.bf16.msra.mxu0 %v11846_v19  ;;  %v11933_v19 = vld [vmem:[#allocation15 + $0x840] ss:$16 sps:$4 sm:$0xff]  }
 0xbb3   :  { %6570 = vmatprep.subr.bf16.mxu0 %v11851_v20  ;;  %v11938_v20 = vld [vmem:[#allocation15 + $0x864] ss:$16 sps:$4 sm:$0xff]  }
 0xbb6   :  { %6571 = vmatpush1.bf16.msra.mxu0 %v11849_v21  ;;  %v11936_v21 = vld [vmem:[#allocation15 + $0x860] ss:$16 sps:$4 sm:$0xff]  }
 0xbb7   :  { %6572 = vmatprep.subr.bf16.mxu0 %v11854_v37  ;;  %v11941_v37 = vld [vmem:[#allocation15 + $0x884] ss:$16 sps:$4 sm:$0xff]  }
 0xbba   :  { %6573 = vmatpush1.bf16.msra.mxu0 %v11852_v11  ;;  %v11939_v11 = vld [vmem:[#allocation15 + $0x880] ss:$16 sps:$4 sm:$0xff]  }
 0xbbb   :  { %6574 = vmatprep.subr.bf16.mxu0 %v11857_v49  ;;  %v11944_v49 = vld [vmem:[#allocation15 + $0x8a4] ss:$16 sps:$4 sm:$0xff]  }
 0xbbe   :  { %6575 = vmatpush1.bf16.msra.mxu0 %v11855_v40  ;;  %v12431_v40 = vld [vmem:[#allocation2 + $0x50] sm:$0xff]  }
 0xbbf   :  { %6576 = vmatprep.subr.bf16.mxu0 %v11860_v50  ;;  %v11942_v50 = vld [vmem:[#allocation15 + $0x8a0] ss:$16 sps:$4 sm:$0xff]  }
 0xbc2   :  { %6577 = vmatpush1.bf16.msra.mxu0 %v11858_v9  ;;  %v11947_v9 = vld [vmem:[#allocation15 + $0x8c4] ss:$16 sps:$4 sm:$0xff]  }
 0xbc3   :  { %6578 = vmatprep.subr.bf16.mxu0 %v11863_v22  ;;  %v11945_v22 = vld [vmem:[#allocation15 + $0x8c0] ss:$16 sps:$4 sm:$0xff]  }
 0xbc6   :  { %6579 = vmatpush1.bf16.msra.mxu0 %v11861_v23  ;;  %v11950_v23 = vld [vmem:[#allocation15 + $0x8e4] ss:$16 sps:$4 sm:$0xff]  }
 0xbc7   :  { %6580 = vmatprep.subr.bf16.mxu0 %v11866_v24  ;;  %v12432_v24 = vld [vmem:[#allocation2 + $0x58] sm:$0xff]  }
 0xbca   :  { %6581 = vmatpush1.bf16.msra.mxu0 %v11864_v5  ;;  %v11948_v5 = vld [vmem:[#allocation15 + $0x8e0] ss:$16 sps:$4 sm:$0xff]  }
 0xbcb   :  { %6582 = vmatprep.subr.bf16.mxu0 %v11869_v25  ;;  %v11953_v25 = vld [vmem:[#allocation15 + $0x904] ss:$16 sps:$4 sm:$0xff]  }
 0xbce   :  { %6583 = vmatpush1.bf16.msra.mxu0 %v11867_v32  ;;  %v11951_v32 = vld [vmem:[#allocation15 + $0x900] ss:$16 sps:$4 sm:$0xff]  }
 0xbcf   :  { %6584 = vmatprep.subr.bf16.mxu0 %v11872_v53  ;;  %v11956_v53 = vld [vmem:[#allocation15 + $0x924] ss:$16 sps:$4 sm:$0xff]  }
 0xbd2   :  { %6585 = vmatpush1.bf16.msra.mxu0 %v11870_v45  ;;  %v12433_v45 = vld [vmem:[#allocation2 + $0x60] sm:$0xff]  }
 0xbd3   :  { %6586 = vmatprep.subr.bf16.mxu0 %v11875_v27  ;;  %v11954_v27 = vld [vmem:[#allocation15 + $0x920] ss:$16 sps:$4 sm:$0xff]  }
 0xbd6   :  { %6587 = vmatpush1.bf16.msra.mxu0 %v11873_v28  ;;  %v11959_v28 = vld [vmem:[#allocation15 + $0x944] ss:$16 sps:$4 sm:$0xff]  }
 0xbd7   :  { %6588 = vmatprep.subr.bf16.mxu0 %v11878_v46  ;;  %v11957_v46 = vld [vmem:[#allocation15 + $0x940] ss:$16 sps:$4 sm:$0xff]  }
 0xbda   :  { %6589 = vmatpush1.bf16.msra.mxu0 %v11876_v51  ;;  %v11962_v51 = vld [vmem:[#allocation15 + $0x964] ss:$16 sps:$4 sm:$0xff]  }
 0xbdb   :  { %7187 = vmatprep.subr.bf16.mxu0 %v13345_v26 }
 0xc60   :  { %v13423_v2 = vpop.f32.mrb[60].mxu0 }
 0xc61   :  { %v13425_v4 = vpop.f32.mrb[61].mxu0 }
 0xc62   :  { %v13427_v10 = vpop.f32.mrb[62].mxu0 }
 0xc63   :  { %v13429_v14 = vpop.f32.mrb[63].mxu0 }
 0xc68   :  { %v13431_v3 = vpop.f32.mrb[64].mxu0 }
 0xc69   :  { %v13433_v7 = vpop.f32.mrb[65].mxu0 }
 0xc6a   :  { %v13435_v52 = vpop.f32.mrb[66].mxu0 }
 0xc6b   :  { %v13437_v47 = vpop.f32.mrb[67].mxu0 }
 0xc70   :  { %v6150_v56 = vpop.f32.mrb[76].mxu0 }
 0xc71   :  { %v6152_v59 = vpop.f32.mrb[77].mxu0 }
 0xc72   :  { %v6154_v35 = vpop.f32.mrb[78].mxu0 }
 0xc73   :  { %v6169_v38 = vpack.c.bf16 %v6154_v35, %v6150_v56  ;;  %v6156_v54 = vpop.f32.mrb[79].mxu0  ;;  %v11972_v56 = vld [vmem:[#allocation15 + $0x9e0] ss:$16 sps:$4 sm:$0xff]   ;;  %v11975_v35 = vld [vmem:[#allocation15 + $0x808] ss:$16 sps:$4 sm:$0xff]  }
 0xc74   :  { %v6170_v33 = vpack.c.bf16 %v6156_v54, %v6152_v59  ;;  %v11977_v59 = vld [vmem:[#allocation15 + $0x80c] ss:$16 sps:$4 sm:$0xff]   ;;  %v12437_v54 = vld [vmem:[#allocation2 + $0x80] sm:$0xff]  }
 0xc76   :  { %6590 = vmatprep.mubr.bf16.mxu0 %v6170_v33  ;;  %6643 = vmatprep.mubr.bf16.mxu1 %v6170_v33  ;;  %v11978_v33 = vld [vmem:[#allocation15 + $0x828] ss:$16 sps:$4 sm:$0xff]  }
 0xc77   :  { %6591 = vmatmul.mubr.bf16.vlgmr.msra.gmra.mrb[52].mxu0 %v6169_v38  ;;  %6644 = vmatmul.mubr.bf16.vlgmr.msra.gmra.mrb[76].mxu1 %v6169_v38  ;;  %v11980_v38 = vld [vmem:[#allocation15 + $0x82c] ss:$16 sps:$4 sm:$0xff]  }
 0xc78   :  { %7066 = vmatpush1.bf16.msra.mxu1 %v11927_v8  ;;  %7188 = vmatpush1.bf16.msra.mxu0 %v13343_v58  ;;  %v6160_v30 = vpop.f32.mrb[80].mxu0  ;;  %v11983_v8 = vld [vmem:[#allocation15 + $0x84c] ss:$16 sps:$4 sm:$0xff]  }
 0xc79   :  { %7189 = vmatprep.subr.bf16.mxu0 %v13351_v16  ;;  %v6162_v6 = vpop.f32.mrb[81].mxu0  ;;  %7067 = vmatprep.subr.bf16.mxu1 %v11932_v48  ;;  %v11981_v48 = vld [vmem:[#allocation15 + $0x848] ss:$16 sps:$4 sm:$0xff]  }
 0xc7a   :  { %v6164_v31 = vpop.f32.mrb[82].mxu0 }
 0xc7b   :  { %v6171_v13 = vpack.c.bf16 %v6164_v31, %v6160_v30  ;;  %v6166_v15 = vpop.f32.mrb[83].mxu0  ;;  %v11986_v30 = vld [vmem:[#allocation15 + $0x86c] ss:$16 sps:$4 sm:$0xff]   ;;  %v11987_v31 = vld [vmem:[#allocation15 + $0x888] ss:$16 sps:$4 sm:$0xff]  }
 0xc7c   :  { %v6172_v42 = vpack.c.bf16 %v6166_v15, %v6162_v6  ;;  %7068 = vmatpush1.bf16.msra.mxu1 %v11930_v0  ;;  %7190 = vmatpush1.bf16.msra.mxu0 %v13349_v12  ;;  %v12438_v0 = vld [vmem:[#allocation2 + $0x88] sm:$0xff]  }
 0xc7d   :  { %7751 = vmatprep.subr.bf16.mxu0 %v13345_v26  ;;  %7069 = vmatprep.subr.bf16.mxu1 %v11935_v29  ;;  %v11984_v6 = vld [vmem:[#allocation15 + $0x868] ss:$16 sps:$4 sm:$0xff]   ;;  %v11989_v29 = vld [vmem:[#allocation15 + $0x88c] ss:$16 sps:$4 sm:$0xff]  }
 0xc7e   :  { %6600 = vmatprep.mubr.bf16.mxu0 %v6172_v42  ;;  %6653 = vmatprep.mubr.bf16.mxu1 %v6172_v42  ;;  %v11995_v15 = vld [vmem:[#allocation15 + $0x8cc] ss:$16 sps:$4 sm:$0xff]   ;;  %v11993_v42 = vld [vmem:[#allocation15 + $0x8c8] ss:$16 sps:$4 sm:$0xff]  }
 0xc7f   :  { %6601 = vmatmul.mubr.bf16.gmra.mrb[56].mxu0 %v6171_v13  ;;  %6654 = vmatmul.mubr.bf16.gmra.mrb[80].mxu1 %v6171_v13  ;;  %v11992_v13 = vld [vmem:[#allocation15 + $0x8ac] ss:$16 sps:$4 sm:$0xff]  }
 0xc80   :  { %7070 = vmatpush1.bf16.msra.mxu1 %v11933_v19  ;;  %7097 = vmatprep.mubr.bf16.mxu1 %v13345_v26  ;;  %v11998_v19 = vld [vmem:[#allocation15 + $0x8ec] ss:$16 sps:$4 sm:$0xff]  }
 0xc81   :  { %7071 = vmatprep.subr.bf16.mxu1 %v11938_v20  ;;  %7219 = vmatprep.mubr.bf16.mxu0 %v12687_v55  ;;  %v11996_v20 = vld [vmem:[#allocation15 + $0x8e8] ss:$16 sps:$4 sm:$0xff]  }
 0xc84   :  { %7072 = vmatpush1.bf16.msra.mxu1 %v11936_v21  ;;  %v12001_v21 = vld [vmem:[#allocation15 + $0x90c] ss:$16 sps:$4 sm:$0xff]  }
 0xc85   :  { %7073 = vmatprep.subr.bf16.mxu1 %v11941_v37  ;;  %v12004_v37 = vld [vmem:[#allocation15 + $0x92c] ss:$16 sps:$4 sm:$0xff]  }
 0xc87   :  { %10182 = vmatmul.mubr.msk.bf16.vlgmr.msra.gmra.mrb[84].mxu0 %vm184_vm0, %v12431_v40  ;;  %v12005_v40 = vld [vmem:[#allocation15 + $0x948] ss:$16 sps:$4 sm:$0xff]  }
 0xc88   :  { %7074 = vmatpush1.bf16.msra.mxu1 %v11939_v11  ;;  %7752 = vmatpush1.bf16.msra.mxu0 %v13343_v58  ;;  %v12002_v11 = vld [vmem:[#allocation15 + $0x928] ss:$16 sps:$4 sm:$0xff]  }
 0xc89   :  { %7753 = vmatprep.subr.bf16.mxu0 %v13351_v16  ;;  %7075 = vmatprep.subr.bf16.mxu1 %v11944_v49  ;;  %v12007_v49 = vld [vmem:[#allocation15 + $0x94c] ss:$16 sps:$4 sm:$0xff]  }
 0xc8a   :  { %7229 = vmatprep.mubr.bf16.mxu0 %v12687_v55 }
 0xc8c   :  { %7076 = vmatpush1.bf16.msra.mxu1 %v11942_v50  ;;  %7754 = vmatpush1.bf16.msra.mxu0 %v13349_v12  ;;  %v12010_v50 = vld [vmem:[#allocation15 + $0x96c] ss:$16 sps:$4 sm:$0xff]  }
 0xc8d   :  { %8315 = vmatprep.subr.bf16.mxu0 %v13345_v26  ;;  %7077 = vmatprep.subr.bf16.mxu1 %v11947_v9  ;;  %v12008_v9 = vld [vmem:[#allocation15 + $0x968] ss:$16 sps:$4 sm:$0xff]  }
 0xc8f   :  { %10183 = vmatmul.mubr.msk.bf16.gmra.mrb[88].mxu0 %vm184_vm0, %v12432_v24  ;;  %v12016_v24 = vld [vmem:[#allocation15 + $0x9ac] ss:$16 sps:$4 sm:$0xff]  }
 0xc90   :  { %7078 = vmatpush1.bf16.msra.mxu1 %v11945_v22  ;;  %7783 = vmatprep.mubr.bf16.mxu0 %v12687_v55  ;;  %v12013_v22 = vld [vmem:[#allocation15 + $0x98c] ss:$16 sps:$4 sm:$0xff]  }
 0xc91   :  { %7079 = vmatprep.subr.bf16.mxu1 %v11950_v23  ;;  %v12011_v23 = vld [vmem:[#allocation15 + $0x988] ss:$16 sps:$4 sm:$0xff]  }
 0xc94   :  { %7080 = vmatpush1.bf16.msra.mxu1 %v11948_v5  ;;  %v12014_v5 = vld [vmem:[#allocation15 + $0x9a8] ss:$16 sps:$4 sm:$0xff]  }
 0xc95   :  { %7081 = vmatprep.subr.bf16.mxu1 %v11953_v25  ;;  %v12019_v25 = vld [vmem:[#allocation15 + $0x9cc] ss:$16 sps:$4 sm:$0xff]  }
 0xc97   :  { %10248 = vmatmul.mubr.msk.bf16.vlgmr.msra.gmra.mrb[92].mxu0 %vm184_vm0, %v12433_v45  ;;  %v12020_v45 = vld [vmem:[#allocation15 + $0x9e8] ss:$16 sps:$4 sm:$0xff]  }
 0xc98   :  { %7082 = vmatpush1.bf16.msra.mxu1 %v11951_v32  ;;  %8316 = vmatpush1.bf16.msra.mxu0 %v13343_v58  ;;  %v12017_v32 = vld [vmem:[#allocation15 + $0x9c8] ss:$16 sps:$4 sm:$0xff]  }
 0xc99   :  { %8317 = vmatprep.subr.bf16.mxu0 %v13351_v16  ;;  %7083 = vmatprep.subr.bf16.mxu1 %v11956_v53  ;;  %v12022_v53 = vld [vmem:[#allocation15 + $0x9ec] ss:$16 sps:$4 sm:$0xff]  }
 0xc9a   :  { %7793 = vmatprep.mubr.bf16.mxu0 %v12687_v55 }
 0xc9c   :  { %7084 = vmatpush1.bf16.msra.mxu1 %v11954_v27  ;;  %8318 = vmatpush1.bf16.msra.mxu0 %v13349_v12  ;;  %v12025_v27 = vld [vmem:[#allocation15 + $0xa04] ss:$16 sps:$4 sm:$0xff]  }
 0xc9d   :  { %8879 = vmatprep.subr.bf16.mxu0 %v13345_v26  ;;  %7085 = vmatprep.subr.bf16.mxu1 %v11959_v28  ;;  %v12023_v28 = vld [vmem:[#allocation15 + $0xa00] ss:$16 sps:$4 sm:$0xff]  }
 0xc9f   :  { %10249 = vmatmul.mubr.msk.bf16.gmra.mrb[96].mxu0 %vm184_vm0, %v12434_v43  ;;  %v12031_v43 = vld [vmem:[#allocation15 + $0xa44] ss:$16 sps:$4 sm:$0xff]  }
 0xca0   :  { %7086 = vmatpush1.bf16.msra.mxu1 %v11957_v46  ;;  %8347 = vmatprep.mubr.bf16.mxu0 %v12687_v55  ;;  %v12028_v46 = vld [vmem:[#allocation15 + $0xa24] ss:$16 sps:$4 sm:$0xff]  }
 0xca1   :  { %7087 = vmatprep.subr.bf16.mxu1 %v11962_v51  ;;  %v12026_v51 = vld [vmem:[#allocation15 + $0xa20] ss:$16 sps:$4 sm:$0xff]  }
 0xca4   :  { %7088 = vmatpush1.bf16.msra.mxu1 %v11960_v44  ;;  %v12029_v44 = vld [vmem:[#allocation15 + $0xa40] ss:$16 sps:$4 sm:$0xff]  }
 0xca5   :  { %7089 = vmatprep.subr.bf16.mxu1 %v11965_v34  ;;  %v12034_v34 = vld [vmem:[#allocation15 + $0xa64] ss:$16 sps:$4 sm:$0xff]  }
 0xca7   :  { %10314 = vmatmul.mubr.msk.bf16.vlgmr.msra.gmra.mrb[100].mxu0 %vm184_vm0, %v12435_v60  ;;  %v12035_v60 = vld [vmem:[#allocation15 + $0xa80] ss:$16 sps:$4 sm:$0xff]  }
 0xca8   :  { %7090 = vmatpush1.bf16.msra.mxu1 %v11963_v36  ;;  %8880 = vmatpush1.bf16.msra.mxu0 %v13343_v58  ;;  %v12032_v36 = vld [vmem:[#allocation15 + $0xa60] ss:$16 sps:$4 sm:$0xff]  }
 0xca9   :  { %8881 = vmatprep.subr.bf16.mxu0 %v13351_v16  ;;  %7091 = vmatprep.subr.bf16.mxu1 %v11968_v57  ;;  %v12037_v57 = vld [vmem:[#allocation15 + $0xa84] ss:$16 sps:$4 sm:$0xff]  }
 0xcaa   :  { %8357 = vmatprep.mubr.bf16.mxu0 %v12687_v55 }
 0xcac   :  { %7092 = vmatpush1.bf16.msra.mxu1 %v11966_v61  ;;  %8882 = vmatpush1.bf16.msra.mxu0 %v13349_v12  ;;  %v12043_v61 = vld [vmem:[#allocation15 + $0xac4] ss:$16 sps:$4 sm:$0xff]  }
 0xcad   :  { %7093 = vmatprep.subr.bf16.mxu1 %v11971_v62  ;;  %v12041_v62 = vld [vmem:[#allocation15 + $0xac0] ss:$16 sps:$4 sm:$0xff]  }
 0xcaf   :  { %10315 = vmatmul.mubr.msk.bf16.gmra.mrb[104].mxu0 %vm184_vm0, %v12436_v1  ;;  %v12047_v1 = vld [vmem:[#allocation15 + $0xb00] ss:$16 sps:$4 sm:$0xff]  }
 0xcb0   :  { %7094 = vmatpush1.bf16.msra.mxu1 %v11969_v17  ;;  %8911 = vmatprep.mubr.bf16.mxu0 %v12687_v55  ;;  %v12046_v17 = vld [vmem:[#allocation15 + $0xae4] ss:$16 sps:$4 sm:$0xff]  }
 0xcb1   :  { %7095 = vmatprep.subr.bf16.mxu1 %v11974_v63  ;;  %v12044_v63 = vld [vmem:[#allocation15 + $0xae0] ss:$16 sps:$4 sm:$0xff]  }
 0xcb4   :  { %7096 = vmatpush1.bf16.msra.mxu1 %v11972_v56  ;;  %v12052_v56 = vld [vmem:[#allocation15 + $0xb24] ss:$16 sps:$4 sm:$0xff]  }
 0xcb5   :  { %7118 = vmatprep.subr.bf16.mxu1 %v11977_v59  ;;  %v12050_v59 = vld [vmem:[#allocation15 + $0xb20] ss:$16 sps:$4 sm:$0xff]  }
 0xcb7   :  { %7098 = vmatmul.mubr.bf16.vlgmr.msra.gmra.mrb[84].mxu1 %v13343_v58  ;;  %10380 = vmatmul.mubr.msk.bf16.vlgmr.msra.gmra.mrb[108].mxu0 %vm184_vm0, %v12437_v54  ;;  %v12058_v54 = vld [vmem:[#allocation15 + $0xb64] ss:$16 sps:$4 sm:$0xff]  }
 0xcb8   :  { %7107 = vmatprep.mubr.bf16.mxu1 %v13351_v16  ;;  %7119 = vmatpush1.bf16.msra.mxu1 %v11975_v35  ;;  %v12055_v35 = vld [vmem:[#allocation15 + $0xb44] ss:$16 sps:$4 sm:$0xff]  }
 0xcb9   :  { %7120 = vmatprep.subr.bf16.mxu1 %v11980_v38  ;;  %8921 = vmatprep.mubr.bf16.mxu0 %v12687_v55  ;;  %v11990_v55 = vld [vmem:[#allocation15 + $0x8a8] ss:$16 sps:$4 sm:$0xff]   ;;  %v12053_v38 = vld [vmem:[#allocation15 + $0xb40] ss:$16 sps:$4 sm:$0xff]  }
 0xcbc   :  { %7121 = vmatpush1.bf16.msra.mxu1 %v11978_v33  ;;  %v12056_v33 = vld [vmem:[#allocation15 + $0xb60] ss:$16 sps:$4 sm:$0xff]  }
 0xcbd   :  { %7122 = vmatprep.subr.bf16.mxu1 %v11983_v8  ;;  %v12061_v8 = vld [vmem:[#allocation15 + $0xb84] ss:$16 sps:$4 sm:$0xff]  }
 0xcbf   :  { %7108 = vmatmul.mubr.bf16.gmra.mrb[88].mxu1 %v13349_v12  ;;  %10381 = vmatmul.mubr.msk.bf16.gmra.mrb[112].mxu0 %vm184_vm0, %v12438_v0  ;;  %v12062_v0 = vld [vmem:[#allocation15 + $0xba0] ss:$16 sps:$4 sm:$0xff]  }
 0xcc0   :  { %7123 = vmatpush1.bf16.msra.mxu1 %v11981_v48  ;;  %7150 = vmatprep.mubr.bf16.mxu1 %v13345_v26  ;;  %v11999_v26 = vld [vmem:[#allocation15 + $0x908] ss:$16 sps:$4 sm:$0xff]   ;;  %v12059_v48 = vld [vmem:[#allocation15 + $0xb80] ss:$16 sps:$4 sm:$0xff]  }
 0xcc1   :  { %7124 = vmatprep.subr.bf16.mxu1 %v11986_v30  ;;  %v12064_v30 = vld [vmem:[#allocation15 + $0xba4] ss:$16 sps:$4 sm:$0xff]  }
 0xcc4   :  { %7125 = vmatpush1.bf16.msra.mxu1 %v11984_v6  ;;  %v12067_v6 = vld [vmem:[#allocation15 + $0xbc4] ss:$16 sps:$4 sm:$0xff]  }
 0xcc5   :  { %7126 = vmatprep.subr.bf16.mxu1 %v11989_v29  ;;  %v12065_v29 = vld [vmem:[#allocation15 + $0xbc0] ss:$16 sps:$4 sm:$0xff]  }
 0xcc8   :  { %7127 = vmatpush1.bf16.msra.mxu1 %v11987_v31  ;;  %v12070_v31 = vld [vmem:[#allocation15 + $0xbe4] ss:$16 sps:$4 sm:$0xff]  }
 0xcc9   :  { %7128 = vmatprep.subr.bf16.mxu1 %v11992_v13  ;;  %v12068_v13 = vld [vmem:[#allocation15 + $0xbe0] ss:$16 sps:$4 sm:$0xff]  }
 0xccc   :  { %7129 = vmatpush1.bf16.msra.mxu1 %v11990_v55  ;;  %v12073_v55 = vld [vmem:[#allocation15 + $0xa0c] ss:$16 sps:$4 sm:$0xff]  }
 0xccd   :  { %7130 = vmatprep.subr.bf16.mxu1 %v11995_v15 }
 0xcd0   :  { %7131 = vmatpush1.bf16.msra.mxu1 %v11993_v42 }
 0xcd1   :  { %7132 = vmatprep.subr.bf16.mxu1 %v11998_v19 }
 0xcd4   :  { %7133 = vmatpush1.bf16.msra.mxu1 %v11996_v20 }
 0xcd5   :  { %7134 = vmatprep.subr.bf16.mxu1 %v12001_v21 }
 0xcd8   :  { %7135 = vmatpush1.bf16.msra.mxu1 %v11999_v26 }
 0xcd9   :  { %7136 = vmatprep.subr.bf16.mxu1 %v12004_v37 }
 0xcdc   :  { %7137 = vmatpush1.bf16.msra.mxu1 %v12002_v11 }
 0xcdd   :  { %7138 = vmatprep.subr.bf16.mxu1 %v12007_v49 }
 0xce0   :  { %7139 = vmatpush1.bf16.msra.mxu1 %v12005_v40 }
 0xce1   :  { %7140 = vmatprep.subr.bf16.mxu1 %v12010_v50 }
 0xce4   :  { %7141 = vmatpush1.bf16.msra.mxu1 %v12008_v9 }
 0xce5   :  { %7142 = vmatprep.subr.bf16.mxu1 %v12013_v22 }
 0xce8   :  { %7143 = vmatpush1.bf16.msra.mxu1 %v12011_v23 }
 0xce9   :  { %7144 = vmatprep.subr.bf16.mxu1 %v12016_v24  ;;  %v12071_v24 = vld [vmem:[#allocation15 + $0xa08] ss:$16 sps:$4 sm:$0xff]  }
 0xcec   :  { %7145 = vmatpush1.bf16.msra.mxu1 %v12014_v5  ;;  %v12076_v5 = vld [vmem:[#allocation15 + $0xa2c] ss:$16 sps:$4 sm:$0xff]  }
 0xced   :  { %7146 = vmatprep.subr.bf16.mxu1 %v12019_v25 }
 0xcf0   :  { %7147 = vmatpush1.bf16.msra.mxu1 %v12017_v32  ;;  %v12074_v32 = vld [vmem:[#allocation15 + $0xa28] ss:$16 sps:$4 sm:$0xff]  }
 0xcf1   :  { %7148 = vmatprep.subr.bf16.mxu1 %v12022_v53 }
 0xcf4   :  { %7149 = vmatpush1.bf16.msra.mxu1 %v12020_v45  ;;  %v12079_v45 = vld [vmem:[#allocation15 + $0xa4c] ss:$16 sps:$4 sm:$0xff]  }
 0xcf5   :  { %7629 = vmatprep.subr.bf16.mxu1 %v12025_v27 }
 0xcf7   :  { %7151 = vmatmul.mubr.bf16.vlgmr.msra.gmra.mrb[76].mxu1 %v13343_v58  ;;  %v12040_v58 = vld [vmem:[#allocation15 + $0xaa4] ss:$16 sps:$4 sm:$0xff]  }
 0xcf8   :  { %7160 = vmatprep.mubr.bf16.mxu1 %v13351_v16  ;;  %7630 = vmatpush1.bf16.msra.mxu1 %v12023_v28  ;;  %v12038_v16 = vld [vmem:[#allocation15 + $0xaa0] ss:$16 sps:$4 sm:$0xff]  }
 0xcf9   :  { %7631 = vmatprep.subr.bf16.mxu1 %v12028_v46 }
 0xcfc   :  { %7632 = vmatpush1.bf16.msra.mxu1 %v12026_v51 }
 0xcfd   :  { %7633 = vmatprep.subr.bf16.mxu1 %v12031_v43  ;;  %v12077_v43 = vld [vmem:[#allocation15 + $0xa48] ss:$16 sps:$4 sm:$0xff]  }
 0xcff   :  { %7161 = vmatmul.mubr.bf16.gmra.mrb[80].mxu1 %v13349_v12  ;;  %v12049_v12 = vld [vmem:[#allocation15 + $0xb04] ss:$16 sps:$4 sm:$0xff]  }
 0xd00   :  { %7634 = vmatpush1.bf16.msra.mxu1 %v12029_v44  ;;  %v12082_v44 = vld [vmem:[#allocation15 + $0xa6c] ss:$16 sps:$4 sm:$0xff]  }
 0xd01   :  { %7635 = vmatprep.subr.bf16.mxu1 %v12034_v34  ;;  %v12080_v34 = vld [vmem:[#allocation15 + $0xa68] ss:$16 sps:$4 sm:$0xff]  }
 0xd04   :  { %7636 = vmatpush1.bf16.msra.mxu1 %v12032_v36 }
 0xd05   :  { %7637 = vmatprep.subr.bf16.mxu1 %v12037_v57  ;;  %v12085_v57 = vld [vmem:[#allocation15 + $0xa8c] ss:$16 sps:$4 sm:$0xff]  }
 0xd08   :  { %7638 = vmatpush1.bf16.msra.mxu1 %v12035_v60 }
 0xd09   :  { %7639 = vmatprep.subr.bf16.mxu1 %v12040_v58 }
 0xd0c   :  { %7640 = vmatpush1.bf16.msra.mxu1 %v12038_v16 }
 0xd0d   :  { %7641 = vmatprep.subr.bf16.mxu1 %v12043_v61 }
 0xd10   :  { %7642 = vmatpush1.bf16.msra.mxu1 %v12041_v62  ;;  %v12083_v62 = vld [vmem:[#allocation15 + $0xa88] ss:$16 sps:$4 sm:$0xff]  }
 0xd11   :  { %7643 = vmatprep.subr.bf16.mxu1 %v12046_v17 }
 0xd14   :  { %7644 = vmatpush1.bf16.msra.mxu1 %v12044_v63  ;;  %v12088_v63 = vld [vmem:[#allocation15 + $0xaac] ss:$16 sps:$4 sm:$0xff]  }
 0xd15   :  { %7645 = vmatprep.subr.bf16.mxu1 %v12049_v12  ;;  %v12086_v12 = vld [vmem:[#allocation15 + $0xaa8] ss:$16 sps:$4 sm:$0xff]  }
 0xd18   :  { %7646 = vmatpush1.bf16.msra.mxu1 %v12047_v1 }
 0xd19   :  { %7647 = vmatprep.subr.bf16.mxu1 %v12052_v56  ;;  %v12091_v56 = vld [vmem:[#allocation15 + $0xacc] ss:$16 sps:$4 sm:$0xff]  }
 0xd1c   :  { %7648 = vmatpush1.bf16.msra.mxu1 %v12050_v59 }
 0xd1d   :  { %7649 = vmatprep.subr.bf16.mxu1 %v12055_v35 }
 0xd20   :  { %7650 = vmatpush1.bf16.msra.mxu1 %v12053_v38 }
 0xd21   :  { %7651 = vmatprep.subr.bf16.mxu1 %v12058_v54 }
 0xd24   :  { %7652 = vmatpush1.bf16.msra.mxu1 %v12056_v33  ;;  %v12089_v33 = vld [vmem:[#allocation15 + $0xac8] ss:$16 sps:$4 sm:$0xff]  }
 0xd25   :  { %7653 = vmatprep.subr.bf16.mxu1 %v12061_v8 }
 0xd28   :  { %7654 = vmatpush1.bf16.msra.mxu1 %v12059_v48  ;;  %v12094_v48 = vld [vmem:[#allocation15 + $0xaec] ss:$16 sps:$4 sm:$0xff]  }
 0xd29   :  { %7655 = vmatprep.subr.bf16.mxu1 %v12064_v30  ;;  %v12092_v30 = vld [vmem:[#allocation15 + $0xae8] ss:$16 sps:$4 sm:$0xff]  }
 0xd2c   :  { %7656 = vmatpush1.bf16.msra.mxu1 %v12062_v0  ;;  %v12097_v0 = vld [vmem:[#allocation15 + $0xb0c] ss:$16 sps:$4 sm:$0xff]  }
 0xd2d   :  { %7657 = vmatprep.subr.bf16.mxu1 %v12067_v6  ;;  %v12095_v6 = vld [vmem:[#allocation15 + $0xb08] ss:$16 sps:$4 sm:$0xff]  }
 0xd30   :  { %7658 = vmatpush1.bf16.msra.mxu1 %v12065_v29  ;;  %v12100_v29 = vld [vmem:[#allocation15 + $0xb2c] ss:$16 sps:$4 sm:$0xff]  }
 0xd31   :  { %7659 = vmatprep.subr.bf16.mxu1 %v12070_v31  ;;  %v12098_v31 = vld [vmem:[#allocation15 + $0xb28] ss:$16 sps:$4 sm:$0xff]  }
 0xd34   :  { %7660 = vmatpush1.bf16.msra.mxu1 %v12068_v13  ;;  %v12103_v13 = vld [vmem:[#allocation15 + $0xb4c] ss:$16 sps:$4 sm:$0xff]  }
 0xd35   :  { %7682 = vmatprep.subr.bf16.mxu1 %v12073_v55  ;;  %v12101_v55 = vld [vmem:[#allocation15 + $0xb48] ss:$16 sps:$4 sm:$0xff]  }
 0xd4a   :  { %v13478_v15 = vpop.f32.mrb[52].mxu0 }
 0xd4b   :  { %v13480_v42 = vpop.f32.mrb[53].mxu0 }
 0xd4c   :  { %v13482_v19 = vpop.f32.mrb[54].mxu0 }
 0xd4d   :  { %v13484_v20 = vpop.f32.mrb[55].mxu0 }
 0xd52   :  { %v13486_v21 = vpop.f32.mrb[56].mxu0 }
 0xd53   :  { %v13488_v26 = vpop.f32.mrb[57].mxu0 }
 0xd54   :  { %v13490_v37 = vpop.f32.mrb[58].mxu0 }
 0xd55   :  { %v13492_v11 = vpop.f32.mrb[59].mxu0 }
 0xd5a   :  { %v7221_v49 = vpop.f32.mrb[84].mxu0 }
 0xd5b   :  { %v7223_v40 = vpop.f32.mrb[85].mxu0 }
 0xd5c   :  { %v7225_v50 = vpop.f32.mrb[86].mxu0 }
 0xd5d   :  { %v13494_v9 = vpack.c.bf16 %v7225_v50, %v7221_v49  ;;  %v7227_v22 = vpop.f32.mrb[87].mxu0  ;;  %v12106_v49 = vld [vmem:[#allocation15 + $0xb6c] ss:$16 sps:$4 sm:$0xff]  }
 0xd5e   :  { %v7241_v23 = vpack.c.bf16 %v7227_v22, %v7223_v40  ;;  %v12104_v40 = vld [vmem:[#allocation15 + $0xb68] ss:$16 sps:$4 sm:$0xff]   ;;  %v12109_v50 = vld [vmem:[#allocation15 + $0xb8c] ss:$16 sps:$4 sm:$0xff]  }
 0xd5f   :  { %v12107_v22 = vld [vmem:[#allocation15 + $0xb88] ss:$16 sps:$4 sm:$0xff]  }
 0xd60   :  { %7661 = vmatprep.mubr.bf16.mxu1 %v7241_v23 }
 0xd61   :  { %7662 = vmatmul.mubr.bf16.vlgmr.msra.gmra.mrb[84].mxu1 %v13494_v9 }
 0xd62   :  { %7683 = vmatpush1.bf16.msra.mxu1 %v12071_v24  ;;  %v7231_v25 = vpop.f32.mrb[88].mxu0  ;;  %v12110_v24 = vld [vmem:[#allocation15 + $0xba8] ss:$16 sps:$4 sm:$0xff]  }
 0xd63   :  { %v7233_v53 = vpop.f32.mrb[89].mxu0  ;;  %7684 = vmatprep.subr.bf16.mxu1 %v12076_v5  ;;  %v12115_v5 = vld [vmem:[#allocation15 + $0xbcc] ss:$16 sps:$4 sm:$0xff]  }
 0xd64   :  { %v7235_v27 = vpop.f32.mrb[90].mxu0 }
 0xd65   :  { %v13497_v28 = vpack.c.bf16 %v7235_v27, %v7231_v25  ;;  %v7237_v46 = vpop.f32.mrb[91].mxu0  ;;  %v12113_v25 = vld [vmem:[#allocation15 + $0xbc8] ss:$16 sps:$4 sm:$0xff]   ;;  %v12119_v27 = vld [vmem:[#allocation15 + $0xc00] ss:$16 sps:$4 sm:$0xff]  }
 0xd66   :  { %v13499_v51 = vpack.c.bf16 %v7237_v46, %v7233_v53  ;;  %7685 = vmatpush1.bf16.msra.mxu1 %v12074_v32  ;;  %v12118_v32 = vld [vmem:[#allocation15 + $0xbec] ss:$16 sps:$4 sm:$0xff]   ;;  %v12116_v53 = vld [vmem:[#allocation15 + $0xbe8] ss:$16 sps:$4 sm:$0xff]   ;;  %v12124_v46 = vld [vmem:[#allocation15 + $0xc24] ss:$16 sps:$4 sm:$0xff]  }
 0xd67   :  { %7686 = vmatprep.subr.bf16.mxu1 %v12079_v45  ;;  %v12121_v45 = vld [vmem:[#allocation15 + $0xc04] ss:$16 sps:$4 sm:$0xff]  }
 0xd68   :  { %7671 = vmatprep.mubr.bf16.mxu1 %v13499_v51 }
 0xd69   :  { %7672 = vmatmul.mubr.bf16.gmra.mrb[88].mxu1 %v13497_v28 }
 0xd6a   :  { %7687 = vmatpush1.bf16.msra.mxu1 %v12077_v43  ;;  %7714 = vmatprep.mubr.bf16.mxu1 %v7241_v23  ;;  %v7785_v36 = vpop.f32.mrb[92].mxu0  ;;  %v12112_v23 = vld [vmem:[#allocation15 + $0xbac] ss:$16 sps:$4 sm:$0xff]   ;;  %v12122_v43 = vld [vmem:[#allocation15 + $0xc20] ss:$16 sps:$4 sm:$0xff]  }
 0xd6b   :  { %7688 = vmatprep.subr.bf16.mxu1 %v12082_v44  ;;  %v7787_v60 = vpop.f32.mrb[93].mxu0  ;;  %v12127_v44 = vld [vmem:[#allocation15 + $0xc44] ss:$16 sps:$4 sm:$0xff]  }
 0xd6c   :  { %v7789_v58 = vpop.f32.mrb[94].mxu0 }
 0xd6d   :  { %v13503_v16 = vpack.c.bf16 %v7789_v58, %v7785_v36  ;;  %v7791_v61 = vpop.f32.mrb[95].mxu0  ;;  %v12130_v36 = vld [vmem:[#allocation15 + $0xc64] ss:$16 sps:$4 sm:$0xff]   ;;  %v12134_v58 = vld [vmem:[#allocation15 + $0xca0] ss:$16 sps:$4 sm:$0xff]  }
 0xd6e   :  { %7689 = vmatpush1.bf16.msra.mxu1 %v12080_v34  ;;  %v13505_v17 = vpack.c.bf16 %v7791_v61, %v7787_v60  ;;  %v12125_v34 = vld [vmem:[#allocation15 + $0xc40] ss:$16 sps:$4 sm:$0xff]   ;;  %v12133_v60 = vld [vmem:[#allocation15 + $0xc84] ss:$16 sps:$4 sm:$0xff]  }
 0xd6f   :  { %7690 = vmatprep.subr.bf16.mxu1 %v12085_v57  ;;  %v12128_v57 = vld [vmem:[#allocation15 + $0xc60] ss:$16 sps:$4 sm:$0xff]   ;;  %v12139_v61 = vld [vmem:[#allocation15 + $0xcc4] ss:$16 sps:$4 sm:$0xff]  }
 0xd72   :  { %7691 = vmatpush1.bf16.msra.mxu1 %v12083_v62  ;;  %v7795_v1 = vpop.f32.mrb[96].mxu0  ;;  %v12137_v62 = vld [vmem:[#allocation15 + $0xcc0] ss:$16 sps:$4 sm:$0xff]  }
 0xd73   :  { %7692 = vmatprep.subr.bf16.mxu1 %v12088_v63  ;;  %v7797_v59 = vpop.f32.mrb[97].mxu0  ;;  %v12142_v63 = vld [vmem:[#allocation15 + $0xce4] ss:$16 sps:$4 sm:$0xff]  }
 0xd74   :  { %v7799_v35 = vpop.f32.mrb[98].mxu0 }
 0xd75   :  { %v13507_v38 = vpack.c.bf16 %v7799_v35, %v7795_v1  ;;  %v7801_v54 = vpop.f32.mrb[99].mxu0  ;;  %v12143_v1 = vld [vmem:[#allocation15 + $0xd00] ss:$16 sps:$4 sm:$0xff]   ;;  %v12151_v35 = vld [vmem:[#allocation15 + $0xd44] ss:$16 sps:$4 sm:$0xff]  }
 0xd76   :  { %7693 = vmatpush1.bf16.msra.mxu1 %v12086_v12  ;;  %v13509_v8 = vpack.c.bf16 %v7801_v54, %v7797_v59  ;;  %v12145_v12 = vld [vmem:[#allocation15 + $0xd04] ss:$16 sps:$4 sm:$0xff]   ;;  %v12146_v59 = vld [vmem:[#allocation15 + $0xd20] ss:$16 sps:$4 sm:$0xff]  }
 0xd77   :  { %7694 = vmatprep.subr.bf16.mxu1 %v12091_v56  ;;  %v12148_v56 = vld [vmem:[#allocation15 + $0xd24] ss:$16 sps:$4 sm:$0xff]   ;;  %v12149_v54 = vld [vmem:[#allocation15 + $0xd40] ss:$16 sps:$4 sm:$0xff]  }
 0xd7a   :  { %7695 = vmatpush1.bf16.msra.mxu1 %v12089_v33  ;;  %v12154_v33 = vld [vmem:[#allocation15 + $0xd64] ss:$16 sps:$4 sm:$0xff]  }
 0xd7b   :  { %7696 = vmatprep.subr.bf16.mxu1 %v12094_v48  ;;  %v12152_v48 = vld [vmem:[#allocation15 + $0xd60] ss:$16 sps:$4 sm:$0xff]  }
 0xd7e   :  { %7697 = vmatpush1.bf16.msra.mxu1 %v12092_v30  ;;  %v12157_v30 = vld [vmem:[#allocation15 + $0xd84] ss:$16 sps:$4 sm:$0xff]  }
 0xd7f   :  { %7698 = vmatprep.subr.bf16.mxu1 %v12097_v0  ;;  %v12155_v0 = vld [vmem:[#allocation15 + $0xd80] ss:$16 sps:$4 sm:$0xff]  }
 0xd82   :  { %7699 = vmatpush1.bf16.msra.mxu1 %v12095_v6  ;;  %v12160_v6 = vld [vmem:[#allocation15 + $0xda4] ss:$16 sps:$4 sm:$0xff]  }
 0xd83   :  { %7700 = vmatprep.subr.bf16.mxu1 %v12100_v29  ;;  %v12158_v29 = vld [vmem:[#allocation15 + $0xda0] ss:$16 sps:$4 sm:$0xff]  }
 0xd86   :  { %7701 = vmatpush1.bf16.msra.mxu1 %v12098_v31  ;;  %v12163_v31 = vld [vmem:[#allocation15 + $0xdc4] ss:$16 sps:$4 sm:$0xff]  }
 0xd87   :  { %7702 = vmatprep.subr.bf16.mxu1 %v12103_v13  ;;  %v12161_v13 = vld [vmem:[#allocation15 + $0xdc0] ss:$16 sps:$4 sm:$0xff]  }
 0xd8a   :  { %7703 = vmatpush1.bf16.msra.mxu1 %v12101_v55  ;;  %v8349_v55 = vpop.f32.mrb[100].mxu0 }
 0xd8b   :  { %7704 = vmatprep.subr.bf16.mxu1 %v12106_v49  ;;  %v12166_v49 = vld [vmem:[#allocation15 + $0xde4] ss:$16 sps:$4 sm:$0xff]  }
 0xd8e   :  { %7705 = vmatpush1.bf16.msra.mxu1 %v12104_v40  ;;  %v8351_v40 = vpop.f32.mrb[101].mxu0 }
 0xd8f   :  { %7706 = vmatprep.subr.bf16.mxu1 %v12109_v50  ;;  %v12164_v50 = vld [vmem:[#allocation15 + $0xde0] ss:$16 sps:$4 sm:$0xff]  }
 0xd92   :  { %7707 = vmatpush1.bf16.msra.mxu1 %v12107_v22  ;;  %v8353_v22 = vpop.f32.mrb[102].mxu0 }
 0xd93   :  { %7708 = vmatprep.subr.bf16.mxu1 %v12112_v23  ;;  %v12169_v23 = vld [vmem:[#allocation15 + $0xc0c] ss:$16 sps:$4 sm:$0xff]  }
 0xd96   :  { %7709 = vmatpush1.bf16.msra.mxu1 %v12110_v24  ;;  %v13515_v24 = vpack.c.bf16 %v8353_v22, %v8349_v55  ;;  %v12211_v55 = vld [vmem:[#allocation15 + $0xdcc] ss:$16 sps:$4 sm:$0xff]   ;;  %v12217_v22 = vld [vmem:[#allocation15 + $0xe04] ss:$16 sps:$4 sm:$0xff]  }
 0xd97   :  { %7710 = vmatprep.subr.bf16.mxu1 %v12115_v5  ;;  %v8355_v5 = vpop.f32.mrb[103].mxu0 }
 0xd9a   :  { %7711 = vmatpush1.bf16.msra.mxu1 %v12113_v25  ;;  %v13517_v25 = vpack.c.bf16 %v8355_v5, %v8351_v40  ;;  %v12214_v40 = vld [vmem:[#allocation15 + $0xdec] ss:$16 sps:$4 sm:$0xff]   ;;  %v12220_v5 = vld [vmem:[#allocation15 + $0xe24] ss:$16 sps:$4 sm:$0xff]  }
 0xd9b   :  { %7712 = vmatprep.subr.bf16.mxu1 %v12118_v32  ;;  %v12167_v32 = vld [vmem:[#allocation15 + $0xc08] ss:$16 sps:$4 sm:$0xff]  }
 0xd9e   :  { %7713 = vmatpush1.bf16.msra.mxu1 %v12116_v53  ;;  %v12172_v53 = vld [vmem:[#allocation15 + $0xc2c] ss:$16 sps:$4 sm:$0xff]  }
 0xd9f   :  { %8193 = vmatprep.subr.bf16.mxu1 %v12121_v45  ;;  %v8359_v45 = vpop.f32.mrb[104].mxu0 }
 0xda1   :  { %7715 = vmatmul.mubr.bf16.vlgmr.msra.gmra.mrb[76].mxu1 %v13494_v9  ;;  %v12131_v9 = vld [vmem:[#allocation15 + $0xc80] ss:$16 sps:$4 sm:$0xff]  }
 0xda2   :  { %7724 = vmatprep.mubr.bf16.mxu1 %v13499_v51  ;;  %8194 = vmatpush1.bf16.msra.mxu1 %v12119_v27  ;;  %v12136_v51 = vld [vmem:[#allocation15 + $0xca4] ss:$16 sps:$4 sm:$0xff]   ;;  %v12170_v27 = vld [vmem:[#allocation15 + $0xc28] ss:$16 sps:$4 sm:$0xff]  }
 0xda3   :  { %8195 = vmatprep.subr.bf16.mxu1 %v12124_v46  ;;  %v8361_v46 = vpop.f32.mrb[105].mxu0 }
 0xda6   :  { %8196 = vmatpush1.bf16.msra.mxu1 %v12122_v43  ;;  %v12175_v43 = vld [vmem:[#allocation15 + $0xc4c] ss:$16 sps:$4 sm:$0xff]  }
 0xda7   :  { %8197 = vmatprep.subr.bf16.mxu1 %v12127_v44  ;;  %v8363_v44 = vpop.f32.mrb[106].mxu0 }
 0xda9   :  { %7725 = vmatmul.mubr.bf16.gmra.mrb[80].mxu1 %v13497_v28  ;;  %v12140_v28 = vld [vmem:[#allocation15 + $0xce0] ss:$16 sps:$4 sm:$0xff]  }
 0xdaa   :  { %8198 = vmatpush1.bf16.msra.mxu1 %v12125_v34  ;;  %8225 = vmatprep.mubr.bf16.mxu1 %v13505_v17  ;;  %v13521_v34 = vpack.c.bf16 %v8363_v44, %v8359_v45  ;;  %v12221_v45 = vld [vmem:[#allocation15 + $0xe40] ss:$16 sps:$4 sm:$0xff]  }
 0xdab   :  { %8199 = vmatprep.subr.bf16.mxu1 %v12130_v36  ;;  %v8365_v36 = vpop.f32.mrb[107].mxu0  ;;  %v12230_v44 = vld [vmem:[#allocation15 + $0xea0] ss:$16 sps:$4 sm:$0xff]  }
 0xdae   :  { %8200 = vmatpush1.bf16.msra.mxu1 %v12128_v57  ;;  %v13523_v57 = vpack.c.bf16 %v8365_v36, %v8361_v46  ;;  %v12224_v46 = vld [vmem:[#allocation15 + $0xe60] ss:$16 sps:$4 sm:$0xff]   ;;  %v12235_v36 = vld [vmem:[#allocation15 + $0xec4] ss:$16 sps:$4 sm:$0xff]  }
 0xdaf   :  { %8201 = vmatprep.subr.bf16.mxu1 %v12133_v60  ;;  %v12173_v60 = vld [vmem:[#allocation15 + $0xc48] ss:$16 sps:$4 sm:$0xff]  }
 0xdb2   :  { %8202 = vmatpush1.bf16.msra.mxu1 %v12131_v9  ;;  %v12178_v9 = vld [vmem:[#allocation15 + $0xc6c] ss:$16 sps:$4 sm:$0xff]  }
 0xdb3   :  { %8203 = vmatprep.subr.bf16.mxu1 %v12136_v51  ;;  %v12176_v51 = vld [vmem:[#allocation15 + $0xc68] ss:$16 sps:$4 sm:$0xff]  }
 0xdb6   :  { %8204 = vmatpush1.bf16.msra.mxu1 %v12134_v58  ;;  %v12181_v58 = vld [vmem:[#allocation15 + $0xc8c] ss:$16 sps:$4 sm:$0xff]  }
 0xdb7   :  { %8205 = vmatprep.subr.bf16.mxu1 %v12139_v61  ;;  %v12179_v61 = vld [vmem:[#allocation15 + $0xc88] ss:$16 sps:$4 sm:$0xff]  }
 0xdba   :  { %8206 = vmatpush1.bf16.msra.mxu1 %v12137_v62  ;;  %v12184_v62 = vld [vmem:[#allocation15 + $0xcac] ss:$16 sps:$4 sm:$0xff]  }
 0xdbb   :  { %8207 = vmatprep.subr.bf16.mxu1 %v12142_v63  ;;  %v12182_v63 = vld [vmem:[#allocation15 + $0xca8] ss:$16 sps:$4 sm:$0xff]  }
 0xdbe   :  { %8208 = vmatpush1.bf16.msra.mxu1 %v12140_v28  ;;  %v12187_v28 = vld [vmem:[#allocation15 + $0xccc] ss:$16 sps:$4 sm:$0xff]  }
 0xdbf   :  { %8209 = vmatprep.subr.bf16.mxu1 %v12145_v12  ;;  %v12185_v12 = vld [vmem:[#allocation15 + $0xcc8] ss:$16 sps:$4 sm:$0xff]  }
 0xdc2   :  { %8210 = vmatpush1.bf16.msra.mxu1 %v12143_v1  ;;  %v12190_v1 = vld [vmem:[#allocation15 + $0xcec] ss:$16 sps:$4 sm:$0xff]  }
 0xdc3   :  { %8211 = vmatprep.subr.bf16.mxu1 %v12148_v56  ;;  %v12188_v56 = vld [vmem:[#allocation15 + $0xce8] ss:$16 sps:$4 sm:$0xff]  }
 0xdc6   :  { %8212 = vmatpush1.bf16.msra.mxu1 %v12146_v59  ;;  %v12193_v59 = vld [vmem:[#allocation15 + $0xd0c] ss:$16 sps:$4 sm:$0xff]  }
 0xdc7   :  { %8213 = vmatprep.subr.bf16.mxu1 %v12151_v35  ;;  %v12196_v35 = vld [vmem:[#allocation15 + $0xd2c] ss:$16 sps:$4 sm:$0xff]  }
 0xdca   :  { %8214 = vmatpush1.bf16.msra.mxu1 %v12149_v54  ;;  %v12194_v54 = vld [vmem:[#allocation15 + $0xd28] ss:$16 sps:$4 sm:$0xff]  }
 0xdcb   :  { %8215 = vmatprep.subr.bf16.mxu1 %v12154_v33  ;;  %v12199_v33 = vld [vmem:[#allocation15 + $0xd4c] ss:$16 sps:$4 sm:$0xff]  }
 0xdce   :  { %8216 = vmatpush1.bf16.msra.mxu1 %v12152_v48  ;;  %v12197_v48 = vld [vmem:[#allocation15 + $0xd48] ss:$16 sps:$4 sm:$0xff]  }
 0xdcf   :  { %8217 = vmatprep.subr.bf16.mxu1 %v12157_v30  ;;  %v12202_v30 = vld [vmem:[#allocation15 + $0xd6c] ss:$16 sps:$4 sm:$0xff]  }
 0xdd2   :  { %8218 = vmatpush1.bf16.msra.mxu1 %v12155_v0  ;;  %v12200_v0 = vld [vmem:[#allocation15 + $0xd68] ss:$16 sps:$4 sm:$0xff]  }
 0xdd3   :  { %8219 = vmatprep.subr.bf16.mxu1 %v12160_v6  ;;  %v12205_v6 = vld [vmem:[#allocation15 + $0xd8c] ss:$16 sps:$4 sm:$0xff]  }
 0xdd6   :  { %8220 = vmatpush1.bf16.msra.mxu1 %v12158_v29  ;;  %v12203_v29 = vld [vmem:[#allocation15 + $0xd88] ss:$16 sps:$4 sm:$0xff]  }
 0xdd7   :  { %8221 = vmatprep.subr.bf16.mxu1 %v12163_v31  ;;  %v12208_v31 = vld [vmem:[#allocation15 + $0xdac] ss:$16 sps:$4 sm:$0xff]  }
 0xdda   :  { %8222 = vmatpush1.bf16.msra.mxu1 %v12161_v13  ;;  %v12206_v13 = vld [vmem:[#allocation15 + $0xda8] ss:$16 sps:$4 sm:$0xff]  }
 0xddb   :  { %8223 = vmatprep.subr.bf16.mxu1 %v12166_v49  ;;  %v12209_v49 = vld [vmem:[#allocation15 + $0xdc8] ss:$16 sps:$4 sm:$0xff]  }
 0xdde   :  { %8224 = vmatpush1.bf16.msra.mxu1 %v12164_v50  ;;  %v12212_v50 = vld [vmem:[#allocation15 + $0xde8] ss:$16 sps:$4 sm:$0xff]  }
 0xddf   :  { %8246 = vmatprep.subr.bf16.mxu1 %v12169_v23  ;;  %v12215_v23 = vld [vmem:[#allocation15 + $0xe00] ss:$16 sps:$4 sm:$0xff]  }
 0xde1   :  { %8226 = vmatmul.mubr.bf16.vlgmr.msra.gmra.mrb[84].mxu1 %v13503_v16 }
 0xde2   :  { %8247 = vmatpush1.bf16.msra.mxu1 %v12167_v32  ;;  %8235 = vmatprep.mubr.bf16.mxu1 %v13509_v8  ;;  %v12218_v32 = vld [vmem:[#allocation15 + $0xe20] ss:$16 sps:$4 sm:$0xff]  }
 0xde3   :  { %8248 = vmatprep.subr.bf16.mxu1 %v12172_v53  ;;  %v12223_v53 = vld [vmem:[#allocation15 + $0xe44] ss:$16 sps:$4 sm:$0xff]  }
 0xde6   :  { %8249 = vmatpush1.bf16.msra.mxu1 %v12170_v27  ;;  %v12226_v27 = vld [vmem:[#allocation15 + $0xe64] ss:$16 sps:$4 sm:$0xff]  }
 0xde7   :  { %8250 = vmatprep.subr.bf16.mxu1 %v12175_v43  ;;  %v12229_v43 = vld [vmem:[#allocation15 + $0xe84] ss:$16 sps:$4 sm:$0xff]  }
 0xde9   :  { %8236 = vmatmul.mubr.bf16.gmra.mrb[88].mxu1 %v13507_v38 }
 0xdea   :  { %8251 = vmatpush1.bf16.msra.mxu1 %v12173_v60  ;;  %8278 = vmatprep.mubr.bf16.mxu1 %v13505_v17  ;;  %v12191_v17 = vld [vmem:[#allocation15 + $0xd08] ss:$16 sps:$4 sm:$0xff]   ;;  %v12233_v60 = vld [vmem:[#allocation15 + $0xec0] ss:$16 sps:$4 sm:$0xff]  }
 0xdeb   :  { %8252 = vmatprep.subr.bf16.mxu1 %v12178_v9  ;;  %v12238_v9 = vld [vmem:[#allocation15 + $0xee4] ss:$16 sps:$4 sm:$0xff]  }
 0xdee   :  { %8253 = vmatpush1.bf16.msra.mxu1 %v12176_v51  ;;  %v12241_v51 = vld [vmem:[#allocation15 + $0xf04] ss:$16 sps:$4 sm:$0xff]  }
 0xdef   :  { %8254 = vmatprep.subr.bf16.mxu1 %v12181_v58  ;;  %v12239_v58 = vld [vmem:[#allocation15 + $0xf00] ss:$16 sps:$4 sm:$0xff]  }
 0xdf2   :  { %8255 = vmatpush1.bf16.msra.mxu1 %v12179_v61  ;;  %v12244_v61 = vld [vmem:[#allocation15 + $0xf24] ss:$16 sps:$4 sm:$0xff]  }
 0xdf3   :  { %8256 = vmatprep.subr.bf16.mxu1 %v12184_v62  ;;  %v12242_v62 = vld [vmem:[#allocation15 + $0xf20] ss:$16 sps:$4 sm:$0xff]  }
 0xdf6   :  { %8257 = vmatpush1.bf16.msra.mxu1 %v12182_v63  ;;  %v12247_v63 = vld [vmem:[#allocation15 + $0xf44] ss:$16 sps:$4 sm:$0xff]  }
 0xdf7   :  { %8258 = vmatprep.subr.bf16.mxu1 %v12187_v28  ;;  %v12245_v28 = vld [vmem:[#allocation15 + $0xf40] ss:$16 sps:$4 sm:$0xff]  }
 0xdfa   :  { %8259 = vmatpush1.bf16.msra.mxu1 %v12185_v12  ;;  %v12250_v12 = vld [vmem:[#allocation15 + $0xf64] ss:$16 sps:$4 sm:$0xff]  }
 0xdfb   :  { %8260 = vmatprep.subr.bf16.mxu1 %v12190_v1  ;;  %v12248_v1 = vld [vmem:[#allocation15 + $0xf60] ss:$16 sps:$4 sm:$0xff]  }
 0xdfe   :  { %8261 = vmatpush1.bf16.msra.mxu1 %v12188_v56  ;;  %v12253_v56 = vld [vmem:[#allocation15 + $0xf84] ss:$16 sps:$4 sm:$0xff]  }
 0xdff   :  { %8262 = vmatprep.subr.bf16.mxu1 %v12193_v59  ;;  %v12251_v59 = vld [vmem:[#allocation15 + $0xf80] ss:$16 sps:$4 sm:$0xff]  }
 0xe02   :  { %8263 = vmatpush1.bf16.msra.mxu1 %v12191_v17  ;;  %v12256_v17 = vld [vmem:[#allocation15 + $0xfa4] ss:$16 sps:$4 sm:$0xff]  }
 0xe03   :  { %8264 = vmatprep.subr.bf16.mxu1 %v12196_v35  ;;  %v12254_v35 = vld [vmem:[#allocation15 + $0xfa0] ss:$16 sps:$4 sm:$0xff]  }
 0xe06   :  { %8265 = vmatpush1.bf16.msra.mxu1 %v12194_v54  ;;  %v12259_v54 = vld [vmem:[#allocation15 + $0xfc4] ss:$16 sps:$4 sm:$0xff]  }
 0xe07   :  { %8266 = vmatprep.subr.bf16.mxu1 %v12199_v33  ;;  %v12257_v33 = vld [vmem:[#allocation15 + $0xfc0] ss:$16 sps:$4 sm:$0xff]  }
 0xe0a   :  { %8267 = vmatpush1.bf16.msra.mxu1 %v12197_v48  ;;  %v8913_v48 = vpop.f32.mrb[108].mxu0 }
 0xe0b   :  { %8268 = vmatprep.subr.bf16.mxu1 %v12202_v30  ;;  %v12262_v30 = vld [vmem:[#allocation15 + $0xfe4] ss:$16 sps:$4 sm:$0xff]  }
 0xe0e   :  { %8269 = vmatpush1.bf16.msra.mxu1 %v12200_v0  ;;  %v8915_v0 = vpop.f32.mrb[109].mxu0 }
 0xe0f   :  { %8270 = vmatprep.subr.bf16.mxu1 %v12205_v6  ;;  %v12260_v6 = vld [vmem:[#allocation15 + $0xfe0] ss:$16 sps:$4 sm:$0xff]  }
 0xe12   :  { %8271 = vmatpush1.bf16.msra.mxu1 %v12203_v29  ;;  %v8917_v29 = vpop.f32.mrb[110].mxu0 }
 0xe13   :  { %8272 = vmatprep.subr.bf16.mxu1 %v12208_v31  ;;  %v12265_v31 = vld [vmem:[#allocation15 + $0xe0c] ss:$16 sps:$4 sm:$0xff]  }
 0xe16   :  { %8273 = vmatpush1.bf16.msra.mxu1 %v12206_v13  ;;  %v13531_v13 = vpack.c.bf16 %v8917_v29, %v8913_v48  ;;  %v12307_v48 = vld [vmem:[#allocation15 + $0xfcc] ss:$16 sps:$4 sm:$0xff]   ;;  %v12313_v29 = vld [vmem:[#allocation15 + $0x1004] ss:$16 sps:$4 sm:$0xff]  }
 0xe17   :  { %8274 = vmatprep.subr.bf16.mxu1 %v12211_v55  ;;  %v8919_v55 = vpop.f32.mrb[111].mxu0 }
 0xe1a   :  { %8275 = vmatpush1.bf16.msra.mxu1 %v12209_v49  ;;  %v13533_v49 = vpack.c.bf16 %v8919_v55, %v8915_v0  ;;  %v12310_v0 = vld [vmem:[#allocation15 + $0xfec] ss:$16 sps:$4 sm:$0xff]   ;;  %v12316_v55 = vld [vmem:[#allocation15 + $0x1024] ss:$16 sps:$4 sm:$0xff]  }
 0xe1b   :  { %8276 = vmatprep.subr.bf16.mxu1 %v12214_v40  ;;  %v12263_v40 = vld [vmem:[#allocation15 + $0xe08] ss:$16 sps:$4 sm:$0xff]  }
 0xe1e   :  { %8277 = vmatpush1.bf16.msra.mxu1 %v12212_v50  ;;  %v12268_v50 = vld [vmem:[#allocation15 + $0xe2c] ss:$16 sps:$4 sm:$0xff]  }
 0xe1f   :  { %8757 = vmatprep.subr.bf16.mxu1 %v12217_v22  ;;  %v8923_v22 = vpop.f32.mrb[112].mxu0 }
 0xe21   :  { %8279 = vmatmul.mubr.bf16.vlgmr.msra.gmra.mrb[76].mxu1 %v13503_v16  ;;  %v12227_v16 = vld [vmem:[#allocation15 + $0xe80] ss:$16 sps:$4 sm:$0xff]  }
 0xe22   :  { %8288 = vmatprep.mubr.bf16.mxu1 %v13509_v8  ;;  %8758 = vmatpush1.bf16.msra.mxu1 %v12215_v23  ;;  %v12232_v8 = vld [vmem:[#allocation15 + $0xea4] ss:$16 sps:$4 sm:$0xff]   ;;  %v12266_v23 = vld [vmem:[#allocation15 + $0xe28] ss:$16 sps:$4 sm:$0xff]  }
 0xe23   :  { %8759 = vmatprep.subr.bf16.mxu1 %v12220_v5  ;;  %v8925_v5 = vpop.f32.mrb[113].mxu0 }
 0xe26   :  { %8760 = vmatpush1.bf16.msra.mxu1 %v12218_v32  ;;  %v12271_v32 = vld [vmem:[#allocation15 + $0xe4c] ss:$16 sps:$4 sm:$0xff]  }
 0xe27   :  { %8761 = vmatprep.subr.bf16.mxu1 %v12223_v53  ;;  %v8927_v53 = vpop.f32.mrb[114].mxu0 }
 0xe29   :  { %8289 = vmatmul.mubr.bf16.gmra.mrb[80].mxu1 %v13507_v38  ;;  %v12236_v38 = vld [vmem:[#allocation15 + $0xee0] ss:$16 sps:$4 sm:$0xff]  }
 0xe2a   :  { %8762 = vmatpush1.bf16.msra.mxu1 %v12221_v45  ;;  %8789 = vmatprep.mubr.bf16.mxu1 %v13517_v25  ;;  %v13537_v45 = vpack.c.bf16 %v8927_v53, %v8923_v22  ;;  %v12317_v22 = vld [vmem:[#allocation15 + $0x1040] ss:$16 sps:$4 sm:$0xff]  }
 0xe2b   :  { %8763 = vmatprep.subr.bf16.mxu1 %v12226_v27  ;;  %v8929_v27 = vpop.f32.mrb[115].mxu0  ;;  %v12326_v53 = vld [vmem:[#allocation15 + $0x10a0] ss:$16 sps:$4 sm:$0xff]  }
 0xe2e   :  { %8764 = vmatpush1.bf16.msra.mxu1 %v12224_v46  ;;  %v13539_v46 = vpack.c.bf16 %v8929_v27, %v8925_v5  ;;  %v12320_v5 = vld [vmem:[#allocation15 + $0x1060] ss:$16 sps:$4 sm:$0xff]   ;;  %v12331_v27 = vld [vmem:[#allocation15 + $0x10c4] ss:$16 sps:$4 sm:$0xff]  }
 0xe2f   :  { %8765 = vmatprep.subr.bf16.mxu1 %v12229_v43  ;;  %v12269_v43 = vld [vmem:[#allocation15 + $0xe48] ss:$16 sps:$4 sm:$0xff]  }
 0xe32   :  { %8766 = vmatpush1.bf16.msra.mxu1 %v12227_v16  ;;  %v12274_v16 = vld [vmem:[#allocation15 + $0xe6c] ss:$16 sps:$4 sm:$0xff]  }
 0xe33   :  { %8767 = vmatprep.subr.bf16.mxu1 %v12232_v8  ;;  %v12272_v8 = vld [vmem:[#allocation15 + $0xe68] ss:$16 sps:$4 sm:$0xff]  }
 0xe36   :  { %8768 = vmatpush1.bf16.msra.mxu1 %v12230_v44  ;;  %v12277_v44 = vld [vmem:[#allocation15 + $0xe8c] ss:$16 sps:$4 sm:$0xff]  }
 0xe37   :  { %8769 = vmatprep.subr.bf16.mxu1 %v12235_v36  ;;  %v12275_v36 = vld [vmem:[#allocation15 + $0xe88] ss:$16 sps:$4 sm:$0xff]  }
 0xe3a   :  { %8770 = vmatpush1.bf16.msra.mxu1 %v12233_v60  ;;  %v12280_v60 = vld [vmem:[#allocation15 + $0xeac] ss:$16 sps:$4 sm:$0xff]  }
 0xe3b   :  { %8771 = vmatprep.subr.bf16.mxu1 %v12238_v9  ;;  %v12278_v9 = vld [vmem:[#allocation15 + $0xea8] ss:$16 sps:$4 sm:$0xff]  }
 0xe3e   :  { %8772 = vmatpush1.bf16.msra.mxu1 %v12236_v38  ;;  %v12283_v38 = vld [vmem:[#allocation15 + $0xecc] ss:$16 sps:$4 sm:$0xff]  }
 0xe3f   :  { %8773 = vmatprep.subr.bf16.mxu1 %v12241_v51  ;;  %v12281_v51 = vld [vmem:[#allocation15 + $0xec8] ss:$16 sps:$4 sm:$0xff]  }
 0xe42   :  { %8774 = vmatpush1.bf16.msra.mxu1 %v12239_v58  ;;  %v12286_v58 = vld [vmem:[#allocation15 + $0xeec] ss:$16 sps:$4 sm:$0xff]  }
 0xe43   :  { %8775 = vmatprep.subr.bf16.mxu1 %v12244_v61  ;;  %v12284_v61 = vld [vmem:[#allocation15 + $0xee8] ss:$16 sps:$4 sm:$0xff]  }
 0xe46   :  { %8776 = vmatpush1.bf16.msra.mxu1 %v12242_v62  ;;  %v12289_v62 = vld [vmem:[#allocation15 + $0xf0c] ss:$16 sps:$4 sm:$0xff]  }
 0xe47   :  { %8777 = vmatprep.subr.bf16.mxu1 %v12247_v63  ;;  %v12292_v63 = vld [vmem:[#allocation15 + $0xf2c] ss:$16 sps:$4 sm:$0xff]  }
 0xe4a   :  { %8778 = vmatpush1.bf16.msra.mxu1 %v12245_v28  ;;  %v12290_v28 = vld [vmem:[#allocation15 + $0xf28] ss:$16 sps:$4 sm:$0xff]  }
 0xe4b   :  { %8779 = vmatprep.subr.bf16.mxu1 %v12250_v12  ;;  %v12295_v12 = vld [vmem:[#allocation15 + $0xf4c] ss:$16 sps:$4 sm:$0xff]  }
 0xe4e   :  { %8780 = vmatpush1.bf16.msra.mxu1 %v12248_v1  ;;  %v12293_v1 = vld [vmem:[#allocation15 + $0xf48] ss:$16 sps:$4 sm:$0xff]  }
 0xe4f   :  { %8781 = vmatprep.subr.bf16.mxu1 %v12253_v56  ;;  %v12298_v56 = vld [vmem:[#allocation15 + $0xf6c] ss:$16 sps:$4 sm:$0xff]  }
 0xe52   :  { %8782 = vmatpush1.bf16.msra.mxu1 %v12251_v59  ;;  %v12296_v59 = vld [vmem:[#allocation15 + $0xf68] ss:$16 sps:$4 sm:$0xff]  }
 0xe53   :  { %8783 = vmatprep.subr.bf16.mxu1 %v12256_v17  ;;  %v12301_v17 = vld [vmem:[#allocation15 + $0xf8c] ss:$16 sps:$4 sm:$0xff]  }
 0xe56   :  { %8784 = vmatpush1.bf16.msra.mxu1 %v12254_v35  ;;  %v12299_v35 = vld [vmem:[#allocation15 + $0xf88] ss:$16 sps:$4 sm:$0xff]  }
 0xe57   :  { %8785 = vmatprep.subr.bf16.mxu1 %v12259_v54  ;;  %v12304_v54 = vld [vmem:[#allocation15 + $0xfac] ss:$16 sps:$4 sm:$0xff]  }
 0xe5a   :  { %8786 = vmatpush1.bf16.msra.mxu1 %v12257_v33  ;;  %v12302_v33 = vld [vmem:[#allocation15 + $0xfa8] ss:$16 sps:$4 sm:$0xff]  }
 0xe5b   :  { %8787 = vmatprep.subr.bf16.mxu1 %v12262_v30  ;;  %v12305_v30 = vld [vmem:[#allocation15 + $0xfc8] ss:$16 sps:$4 sm:$0xff]  }
 0xe5e   :  { %8788 = vmatpush1.bf16.msra.mxu1 %v12260_v6  ;;  %v12308_v6 = vld [vmem:[#allocation15 + $0xfe8] ss:$16 sps:$4 sm:$0xff]  }
 0xe5f   :  { %8810 = vmatprep.subr.bf16.mxu1 %v12265_v31  ;;  %v12311_v31 = vld [vmem:[#allocation15 + $0x1000] ss:$16 sps:$4 sm:$0xff]  }
 0xe61   :  { %8790 = vmatmul.mubr.bf16.vlgmr.msra.gmra.mrb[84].mxu1 %v13515_v24 }
 0xe62   :  { %8811 = vmatpush1.bf16.msra.mxu1 %v12263_v40  ;;  %8799 = vmatprep.mubr.bf16.mxu1 %v13523_v57  ;;  %v12314_v40 = vld [vmem:[#allocation15 + $0x1020] ss:$16 sps:$4 sm:$0xff]  }
 0xe63   :  { %8812 = vmatprep.subr.bf16.mxu1 %v12268_v50  ;;  %v12319_v50 = vld [vmem:[#allocation15 + $0x1044] ss:$16 sps:$4 sm:$0xff]  }
 0xe66   :  { %8813 = vmatpush1.bf16.msra.mxu1 %v12266_v23  ;;  %v12322_v23 = vld [vmem:[#allocation15 + $0x1064] ss:$16 sps:$4 sm:$0xff]  }
 0xe67   :  { %8814 = vmatprep.subr.bf16.mxu1 %v12271_v32  ;;  %v12325_v32 = vld [vmem:[#allocation15 + $0x1084] ss:$16 sps:$4 sm:$0xff]  }
 0xe69   :  { %8800 = vmatmul.mubr.bf16.gmra.mrb[88].mxu1 %v13521_v34 }
 0xe6a   :  { %8815 = vmatpush1.bf16.msra.mxu1 %v12269_v43  ;;  %8842 = vmatprep.mubr.bf16.mxu1 %v13517_v25  ;;  %v12287_v25 = vld [vmem:[#allocation15 + $0xf08] ss:$16 sps:$4 sm:$0xff]   ;;  %v12329_v43 = vld [vmem:[#allocation15 + $0x10c0] ss:$16 sps:$4 sm:$0xff]  }
 0xe6b   :  { %8816 = vmatprep.subr.bf16.mxu1 %v12274_v16  ;;  %v12334_v16 = vld [vmem:[#allocation15 + $0x10e4] ss:$16 sps:$4 sm:$0xff]  }
 0xe6e   :  { %8817 = vmatpush1.bf16.msra.mxu1 %v12272_v8  ;;  %v12337_v8 = vld [vmem:[#allocation15 + $0x1104] ss:$16 sps:$4 sm:$0xff]  }
 0xe6f   :  { %8818 = vmatprep.subr.bf16.mxu1 %v12277_v44  ;;  %v12335_v44 = vld [vmem:[#allocation15 + $0x1100] ss:$16 sps:$4 sm:$0xff]  }
 0xe72   :  { %8819 = vmatpush1.bf16.msra.mxu1 %v12275_v36  ;;  %v12340_v36 = vld [vmem:[#allocation15 + $0x1124] ss:$16 sps:$4 sm:$0xff]  }
 0xe73   :  { %8820 = vmatprep.subr.bf16.mxu1 %v12280_v60  ;;  %v12338_v60 = vld [vmem:[#allocation15 + $0x1120] ss:$16 sps:$4 sm:$0xff]  }
 0xe76   :  { %8821 = vmatpush1.bf16.msra.mxu1 %v12278_v9  ;;  %v12343_v9 = vld [vmem:[#allocation15 + $0x1144] ss:$16 sps:$4 sm:$0xff]  }
 0xe77   :  { %8822 = vmatprep.subr.bf16.mxu1 %v12283_v38  ;;  %v12341_v38 = vld [vmem:[#allocation15 + $0x1140] ss:$16 sps:$4 sm:$0xff]  }
 0xe7a   :  { %8823 = vmatpush1.bf16.msra.mxu1 %v12281_v51  ;;  %v12346_v51 = vld [vmem:[#allocation15 + $0x1164] ss:$16 sps:$4 sm:$0xff]  }
 0xe7b   :  { %8824 = vmatprep.subr.bf16.mxu1 %v12286_v58  ;;  %v12344_v58 = vld [vmem:[#allocation15 + $0x1160] ss:$16 sps:$4 sm:$0xff]  }
 0xe7e   :  { %8825 = vmatpush1.bf16.msra.mxu1 %v12284_v61  ;;  %v12349_v61 = vld [vmem:[#allocation15 + $0x1184] ss:$16 sps:$4 sm:$0xff]  }
 0xe7f   :  { %8826 = vmatprep.subr.bf16.mxu1 %v12289_v62  ;;  %v12347_v62 = vld [vmem:[#allocation15 + $0x1180] ss:$16 sps:$4 sm:$0xff]  }
 0xe82   :  { %8827 = vmatpush1.bf16.msra.mxu1 %v12287_v25  ;;  %v12352_v25 = vld [vmem:[#allocation15 + $0x11a4] ss:$16 sps:$4 sm:$0xff]  }
 0xe83   :  { %8828 = vmatprep.subr.bf16.mxu1 %v12292_v63  ;;  %v12350_v63 = vld [vmem:[#allocation15 + $0x11a0] ss:$16 sps:$4 sm:$0xff]  }
 0xe86   :  { %8829 = vmatpush1.bf16.msra.mxu1 %v12290_v28  ;;  %v12355_v28 = vld [vmem:[#allocation15 + $0x11c4] ss:$16 sps:$4 sm:$0xff]  }
 0xe87   :  { %8830 = vmatprep.subr.bf16.mxu1 %v12295_v12  ;;  %v12353_v12 = vld [vmem:[#allocation15 + $0x11c0] ss:$16 sps:$4 sm:$0xff]  }
 0xe8a   :  { %8831 = vmatpush1.bf16.msra.mxu1 %v12293_v1  ;;  %v12358_v1 = vld [vmem:[#allocation15 + $0x11e4] ss:$16 sps:$4 sm:$0xff]  }
 0xe8b   :  { %8832 = vmatprep.subr.bf16.mxu1 %v12298_v56  ;;  %v12356_v56 = vld [vmem:[#allocation15 + $0x11e0] ss:$16 sps:$4 sm:$0xff]  }
 0xe8e   :  { %8833 = vmatpush1.bf16.msra.mxu1 %v12296_v59  ;;  %v12361_v59 = vld [vmem:[#allocation15 + $0x100c] ss:$16 sps:$4 sm:$0xff]  }
 0xe8f   :  { %8834 = vmatprep.subr.bf16.mxu1 %v12301_v17  ;;  %v12359_v17 = vld [vmem:[#allocation15 + $0x1008] ss:$16 sps:$4 sm:$0xff]  }
 0xe92   :  { %8835 = vmatpush1.bf16.msra.mxu1 %v12299_v35  ;;  %v12364_v35 = vld [vmem:[#allocation15 + $0x102c] ss:$16 sps:$4 sm:$0xff]  }
 0xe93   :  { %8836 = vmatprep.subr.bf16.mxu1 %v12304_v54  ;;  %v12362_v54 = vld [vmem:[#allocation15 + $0x1028] ss:$16 sps:$4 sm:$0xff]  }
 0xe96   :  { %8837 = vmatpush1.bf16.msra.mxu1 %v12302_v33  ;;  %v12367_v33 = vld [vmem:[#allocation15 + $0x104c] ss:$16 sps:$4 sm:$0xff]  }
 0xe97   :  { %8838 = vmatprep.subr.bf16.mxu1 %v12307_v48  ;;  %v12365_v48 = vld [vmem:[#allocation15 + $0x1048] ss:$16 sps:$4 sm:$0xff]  }
 0xe9a   :  { %8839 = vmatpush1.bf16.msra.mxu1 %v12305_v30  ;;  %v12370_v30 = vld [vmem:[#allocation15 + $0x106c] ss:$16 sps:$4 sm:$0xff]  }
 0xe9b   :  { %8840 = vmatprep.subr.bf16.mxu1 %v12310_v0  ;;  %v12368_v0 = vld [vmem:[#allocation15 + $0x1068] ss:$16 sps:$4 sm:$0xff]  }
 0xe9e   :  { %8841 = vmatpush1.bf16.msra.mxu1 %v12308_v6  ;;  %v12373_v6 = vld [vmem:[#allocation15 + $0x108c] ss:$16 sps:$4 sm:$0xff]  }
 0xe9f   :  { %9321 = vmatprep.subr.bf16.mxu1 %v12313_v29  ;;  %v12371_v29 = vld [vmem:[#allocation15 + $0x1088] ss:$16 sps:$4 sm:$0xff]  }
 0xea1   :  { %8843 = vmatmul.mubr.bf16.vlgmr.msra.gmra.mrb[76].mxu1 %v13515_v24  ;;  %v12323_v24 = vld [vmem:[#allocation15 + $0x1080] ss:$16 sps:$4 sm:$0xff]  }
 0xea2   :  { %8852 = vmatprep.mubr.bf16.mxu1 %v13523_v57  ;;  %9322 = vmatpush1.bf16.msra.mxu1 %v12311_v31  ;;  %v12328_v57 = vld [vmem:[#allocation15 + $0x10a4] ss:$16 sps:$4 sm:$0xff]   ;;  %v12376_v31 = vld [vmem:[#allocation15 + $0x10ac] ss:$16 sps:$4 sm:$0xff]  }
 0xea3   :  { %9323 = vmatprep.subr.bf16.mxu1 %v12316_v55  ;;  %v12374_v55 = vld [vmem:[#allocation15 + $0x10a8] ss:$16 sps:$4 sm:$0xff]  }
 0xea6   :  { %9324 = vmatpush1.bf16.msra.mxu1 %v12314_v40  ;;  %v12379_v40 = vld [vmem:[#allocation15 + $0x10cc] ss:$16 sps:$4 sm:$0xff]  }
 0xea7   :  { %9325 = vmatprep.subr.bf16.mxu1 %v12319_v50  ;;  %v12377_v50 = vld [vmem:[#allocation15 + $0x10c8] ss:$16 sps:$4 sm:$0xff]  }
 0xea9   :  { %8853 = vmatmul.mubr.bf16.gmra.mrb[80].mxu1 %v13521_v34  ;;  %v12332_v34 = vld [vmem:[#allocation15 + $0x10e0] ss:$16 sps:$4 sm:$0xff]  }
 0xeaa   :  { %9326 = vmatpush1.bf16.msra.mxu1 %v12317_v22  ;;  %9353 = vmatprep.mubr.bf16.mxu1 %v13533_v49  ;;  %v12382_v22 = vld [vmem:[#allocation15 + $0x10ec] ss:$16 sps:$4 sm:$0xff]  }
 0xeab   :  { %9327 = vmatprep.subr.bf16.mxu1 %v12322_v23  ;;  %v12380_v23 = vld [vmem:[#allocation15 + $0x10e8] ss:$16 sps:$4 sm:$0xff]  }
 0xeae   :  { %9328 = vmatpush1.bf16.msra.mxu1 %v12320_v5  ;;  %v12385_v5 = vld [vmem:[#allocation15 + $0x110c] ss:$16 sps:$4 sm:$0xff]  }
 0xeaf   :  { %9329 = vmatprep.subr.bf16.mxu1 %v12325_v32  ;;  %v12388_v32 = vld [vmem:[#allocation15 + $0x112c] ss:$16 sps:$4 sm:$0xff]  }
 0xeb2   :  { %9330 = vmatpush1.bf16.msra.mxu1 %v12323_v24  ;;  %v12386_v24 = vld [vmem:[#allocation15 + $0x1128] ss:$16 sps:$4 sm:$0xff]  }
 0xeb3   :  { %9331 = vmatprep.subr.bf16.mxu1 %v12328_v57  ;;  %v12391_v57 = vld [vmem:[#allocation15 + $0x114c] ss:$16 sps:$4 sm:$0xff]  }
 0xeb6   :  { %9332 = vmatpush1.bf16.msra.mxu1 %v12326_v53  ;;  %v12389_v53 = vld [vmem:[#allocation15 + $0x1148] ss:$16 sps:$4 sm:$0xff]  }
 0xeb7   :  { %9333 = vmatprep.subr.bf16.mxu1 %v12331_v27  ;;  %v12394_v27 = vld [vmem:[#allocation15 + $0x116c] ss:$16 sps:$4 sm:$0xff]  }
 0xeba   :  { %9334 = vmatpush1.bf16.msra.mxu1 %v12329_v43  ;;  %v12392_v43 = vld [vmem:[#allocation15 + $0x1168] ss:$16 sps:$4 sm:$0xff]  }
 0xebb   :  { %9335 = vmatprep.subr.bf16.mxu1 %v12334_v16  ;;  %v12397_v16 = vld [vmem:[#allocation15 + $0x118c] ss:$16 sps:$4 sm:$0xff]  }
 0xebe   :  { %9336 = vmatpush1.bf16.msra.mxu1 %v12332_v34  ;;  %v12395_v34 = vld [vmem:[#allocation15 + $0x1188] ss:$16 sps:$4 sm:$0xff]  }
 0xebf   :  { %9337 = vmatprep.subr.bf16.mxu1 %v12337_v8  ;;  %v12400_v8 = vld [vmem:[#allocation15 + $0x11ac] ss:$16 sps:$4 sm:$0xff]  }
 0xec2   :  { %9338 = vmatpush1.bf16.msra.mxu1 %v12335_v44  ;;  %v12398_v44 = vld [vmem:[#allocation15 + $0x11a8] ss:$16 sps:$4 sm:$0xff]  }
 0xec3   :  { %9339 = vmatprep.subr.bf16.mxu1 %v12340_v36  ;;  %v12403_v36 = vld [vmem:[#allocation15 + $0x11cc] ss:$16 sps:$4 sm:$0xff]  }
 0xec6   :  { %9340 = vmatpush1.bf16.msra.mxu1 %v12338_v60  ;;  %v12401_v60 = vld [vmem:[#allocation15 + $0x11c8] ss:$16 sps:$4 sm:$0xff]  }
 0xec7   :  { %9341 = vmatprep.subr.bf16.mxu1 %v12343_v9  ;;  %v12406_v9 = vld [vmem:[#allocation15 + $0x11ec] ss:$16 sps:$4 sm:$0xff]  }
 0xeca   :  { %9342 = vmatpush1.bf16.msra.mxu1 %v12341_v38  ;;  %v12404_v38 = vld [vmem:[#allocation15 + $0x11e8] ss:$16 sps:$4 sm:$0xff]  }
 0xecb   :  { %9343 = vmatprep.subr.bf16.mxu1 %v12346_v51  ;;  %v9443_v51 = vld [vmem:[#allocation16] sm:$0xf] }
 0xece   :  { %9344 = vmatpush1.bf16.msra.mxu1 %v12344_v58  ;;  %v9448_v58 = vrot.slane %v9443_v51, %v4429_v41 }
 0xecf   :  { %9345 = vmatprep.subr.bf16.mxu1 %v12349_v61 }
 0xed2   :  { %9346 = vmatpush1.bf16.msra.mxu1 %v12347_v62  ;;  %v9452_v62 = vrot.slane %v9443_v51, %v4433_v18 }
 0xed3   :  { %9347 = vmatprep.subr.bf16.mxu1 %v12352_v25 }
 0xed6   :  { %9348 = vmatpush1.bf16.msra.mxu1 %v12350_v63 }
 0xed7   :  { %9349 = vmatprep.subr.bf16.mxu1 %v12355_v28 }
 0xeda   :  { %9350 = vmatpush1.bf16.msra.mxu1 %v12353_v12 }
 0xedb   :  { %9351 = vmatprep.subr.bf16.mxu1 %v12358_v1 }
 0xede   :  { %9352 = vmatpush1.bf16.msra.mxu1 %v12356_v56 }
 0xedf   :  { %9374 = vmatprep.subr.bf16.mxu1 %v12361_v59 }
 0xee1   :  { %9354 = vmatmul.mubr.bf16.vlgmr.msra.gmra.mrb[84].mxu1 %v13531_v13 }
 0xee2   :  { %9375 = vmatpush1.bf16.msra.mxu1 %v12359_v17  ;;  %9363 = vmatprep.mubr.bf16.mxu1 %v13539_v46 }
 0xee3   :  { %9376 = vmatprep.subr.bf16.mxu1 %v12364_v35 }
 0xee6   :  { %9377 = vmatpush1.bf16.msra.mxu1 %v12362_v54 }
 0xee7   :  { %9378 = vmatprep.subr.bf16.mxu1 %v12367_v33 }
 0xee9   :  { %9364 = vmatmul.mubr.bf16.gmra.mrb[88].mxu1 %v13537_v45 }
 0xeea   :  { %9379 = vmatpush1.bf16.msra.mxu1 %v12365_v48  ;;  %9406 = vmatprep.mubr.bf16.mxu1 %v13533_v49  ;;  %v12383_v49 = vld [vmem:[#allocation15 + $0x1108] ss:$16 sps:$4 sm:$0xff]  }
 0xeeb   :  { %9380 = vmatprep.subr.bf16.mxu1 %v12370_v30 }
 0xeee   :  { %9381 = vmatpush1.bf16.msra.mxu1 %v12368_v0 }
 0xeef   :  { %9382 = vmatprep.subr.bf16.mxu1 %v12373_v6 }
 0xef2   :  { %9383 = vmatpush1.bf16.msra.mxu1 %v12371_v29 }
 0xef3   :  { %9384 = vmatprep.subr.bf16.mxu1 %v12376_v31 }
 0xef6   :  { %9385 = vmatpush1.bf16.msra.mxu1 %v12374_v55 }
 0xef7   :  { %9386 = vmatprep.subr.bf16.mxu1 %v12379_v40 }
 0xefa   :  { %9387 = vmatpush1.bf16.msra.mxu1 %v12377_v50 }
 0xefb   :  { %9388 = vmatprep.subr.bf16.mxu1 %v12382_v22 }
 0xefe   :  { %9389 = vmatpush1.bf16.msra.mxu1 %v12380_v23 }
 0xeff   :  { %9390 = vmatprep.subr.bf16.mxu1 %v12385_v5 }
 0xf02   :  { %9391 = vmatpush1.bf16.msra.mxu1 %v12383_v49 }
 0xf03   :  { %9392 = vmatprep.subr.bf16.mxu1 %v12388_v32 }
 0xf06   :  { %9393 = vmatpush1.bf16.msra.mxu1 %v12386_v24 }
 0xf07   :  { %9394 = vmatprep.subr.bf16.mxu1 %v12391_v57 }
 0xf0a   :  { %9395 = vmatpush1.bf16.msra.mxu1 %v12389_v53 }
 0xf0b   :  { %9396 = vmatprep.subr.bf16.mxu1 %v12394_v27 }
 0xf0e   :  { %9397 = vmatpush1.bf16.msra.mxu1 %v12392_v43 }
 0xf0f   :  { %9398 = vmatprep.subr.bf16.mxu1 %v12397_v16 }
 0xf12   :  { %9399 = vmatpush1.bf16.msra.mxu1 %v12395_v34 }
 0xf13   :  { %9400 = vmatprep.subr.bf16.mxu1 %v12400_v8 }
 0xf16   :  { %9401 = vmatpush1.bf16.msra.mxu1 %v12398_v44 }
 0xf17   :  { %9402 = vmatprep.subr.bf16.mxu1 %v12403_v36 }
 0xf1a   :  { %9403 = vmatpush1.bf16.msra.mxu1 %v12401_v60 }
 0xf1b   :  { %9404 = vmatprep.subr.bf16.mxu1 %v12406_v9 }
 0xf1e   :  { %9405 = vmatpush1.bf16.msra.mxu1 %v12404_v38 }
 0xf21   :  { %9407 = vmatmul.mubr.bf16.vlgmr.msra.gmra.mrb[76].mxu1 %v13531_v13 }
 0xf22   :  { %9416 = vmatprep.mubr.bf16.mxu1 %v13539_v46 }
 0xf29   :  { %9417 = vmatmul.mubr.bf16.gmra.mrb[80].mxu1 %v13537_v45 }
 0xfb4   :  { %v9355_v61 = vpop.f32.mrb[84].mxu1 }
 0xfb5   :  { %v10993_v25 = vadd.f32 %v9355_v61, %v13478_v15  ;;  %v9357_v63 = vpop.f32.mrb[85].mxu1 }
 0xfb6   :  { %v10994_v28 = vadd.f32 %v9357_v63, %v13480_v42  ;;  %v9359_v12 = vpop.f32.mrb[86].mxu1 }
 0xfb7   :  { %v9465_v1 = vadd.f32 %v10993_v25, %v9448_v58  ;;  %v10995_v13 = vadd.f32 %v9359_v12, %v13482_v19  ;;  %v9361_v46 = vpop.f32.mrb[87].mxu1 }
 0xfb8   :  { %v9466_v56 = vadd.f32 %v10994_v28, %v9452_v62  ;;  %v10996_v45 = vadd.f32 %v9361_v46, %v13484_v20 }
 0xfb9   :  { %v9481_v59 = vmax.f32 %v9465_v1, 0.0  ;;  %v9469_v17 = vadd.f32 %v10995_v13, %v9448_v58 }
 0xfba   :  { %v9482_v41 = vmax.f32 %v9466_v56, 0.0  ;;  %v9470_v35 = vadd.f32 %v10996_v45, %v9452_v62 }
 0xfbb   :  { %v9485_v54 = vmax.f32 %v9469_v17, 0.0 }
 0xfbc   :  { %v10454_v33 = vpack.c.bf16 %v9482_v41, %v9481_v59  ;;  %v9486_v18 = vmax.f32 %v9470_v35, 0.0  ;;  %v9365_v48 = vpop.f32.mrb[88].mxu1 }
 0xfbd   :  { %v10997_v15 = vadd.f32 %v9365_v48, %v13486_v21  ;;  %v9367_v30 = vpop.f32.mrb[89].mxu1 }
 0xfbe   :  { %9545 = vst [vmem:[%s13610_s10] sm:$0xff] %v10454_v33  ;;  %v10456_v42 = vpack.c.bf16 %v9486_v18, %v9485_v54  ;;  %v10998_v19 = vadd.f32 %v9367_v30, %v13488_v26  ;;  %v9369_v0 = vpop.f32.mrb[90].mxu1 }
 0xfbf   :  { %v9473_v20 = vadd.f32 %v10997_v15, %v9448_v58  ;;  %v10999_v6 = vadd.f32 %v9369_v0, %v13490_v37  ;;  %v9371_v29 = vpop.f32.mrb[91].mxu1  ;;  %v9455_v37 = vsub.s32 2, %v13335_v39 }
 0xfc0   :  { %9547 = vst [vmem:[%s13610_s10 + $0x10] sm:$0xff] %v10456_v42  ;;  %v9474_v31 = vadd.f32 %v10998_v19, %v9452_v62  ;;  %v11000_v21 = vadd.f32 %v9371_v29, %v13492_v11  ;;  %v9459_v11 = vsub.s32 3, %v13335_v39 }
 0xfc1   :  { %v9489_v55 = vmax.f32 %v9473_v20, 0.0  ;;  %v9477_v40 = vadd.f32 %v10999_v6, %v9448_v58  ;;  %v9456_v32 = vrot.slane %v9443_v51, %v9455_v37 }
 0xfc2   :  { %v9490_v50 = vmax.f32 %v9474_v31, 0.0  ;;  %v9478_v22 = vadd.f32 %v11000_v21, %v9452_v62  ;;  %v9460_v57 = vrot.slane %v9443_v51, %v9459_v11 }
 0xfc3   :  { %v9493_v23 = vmax.f32 %v9477_v40, 0.0 }
 0xfc4   :  { %v10458_v5 = vpack.c.bf16 %v9490_v50, %v9489_v55  ;;  %v9494_v49 = vmax.f32 %v9478_v22, 0.0 }
 0xfc6   :  { %9549 = vst [vmem:[%s13610_s10 + $0x20] sm:$0xff] %v10458_v5  ;;  %v10460_v26 = vpack.c.bf16 %v9494_v49, %v9493_v23 }
 0xfc8   :  { %9551 = vst [vmem:[%s13610_s10 + $0x30] sm:$0xff] %v10460_v26 }
 0xff4   :  { %v9408_v24 = vpop.f32.mrb[76].mxu1 }
 0xff5   :  { %v11001_v53 = vadd.f32 %v9408_v24, %v13423_v2  ;;  %v9410_v27 = vpop.f32.mrb[77].mxu1 }
 0xff6   :  { %v11002_v43 = vadd.f32 %v9410_v27, %v13425_v4  ;;  %v9412_v16 = vpop.f32.mrb[78].mxu1 }
 0xff7   :  { %v9467_v34 = vadd.f32 %v11001_v53, %v9456_v32  ;;  %v11003_v8 = vadd.f32 %v9412_v16, %v13427_v10  ;;  %v9414_v44 = vpop.f32.mrb[79].mxu1 }
 0xff8   :  { %v9468_v36 = vadd.f32 %v11002_v43, %v9460_v57  ;;  %v11004_v60 = vadd.f32 %v9414_v44, %v13429_v14 }
 0xff9   :  { %v9483_v9 = vmax.f32 %v9467_v34, 0.0  ;;  %v9471_v38 = vadd.f32 %v11003_v8, %v9456_v32 }
 0xffa   :  { %v9484_v58 = vmax.f32 %v9468_v36, 0.0  ;;  %v9472_v39 = vadd.f32 %v11004_v60, %v9460_v57 }
 0xffb   :  { %v9487_v61 = vmax.f32 %v9471_v38, 0.0 }
 0xffc   :  { %v10455_v62 = vpack.c.bf16 %v9484_v58, %v9483_v9  ;;  %v9488_v51 = vmax.f32 %v9472_v39, 0.0  ;;  %v9418_v25 = vpop.f32.mrb[80].mxu1 }
 0xffd   :  { %v11005_v2 = vadd.f32 %v9418_v25, %v13431_v3  ;;  %v9420_v63 = vpop.f32.mrb[81].mxu1 }
 0xffe   :  { %9546 = vst [vmem:[%s13610_s10 + $0x8] sm:$0xff] %v10455_v62  ;;  %v10457_v4 = vpack.c.bf16 %v9488_v51, %v9487_v61  ;;  %v11006_v10 = vadd.f32 %v9420_v63, %v13433_v7  ;;  %v9422_v28 = vpop.f32.mrb[82].mxu1 }
 0xfff   :  { %v9475_v14 = vadd.f32 %v11005_v2, %v9456_v32  ;;  %v11007_v12 = vadd.f32 %v9422_v28, %v13435_v52  ;;  %v9424_v1 = vpop.f32.mrb[83].mxu1 }
0x1000   :  { %9548 = vst [vmem:[%s13610_s10 + $0x18] sm:$0xff] %v10457_v4  ;;  %v9476_v13 = vadd.f32 %v11006_v10, %v9460_v57  ;;  %v11008_v3 = vadd.f32 %v9424_v1, %v13437_v47 }
0x1001   :  { %v9491_v46 = vmax.f32 %v9475_v14, 0.0  ;;  %v9479_v56 = vadd.f32 %v11007_v12, %v9456_v32 }
0x1002   :  { %v9492_v45 = vmax.f32 %v9476_v13, 0.0  ;;  %v9480_v59 = vadd.f32 %v11008_v3, %v9460_v57 }
0x1003   :  { %v9495_v17 = vmax.f32 %v9479_v56, 0.0 }
0x1004   :  { %v10459_v41 = vpack.c.bf16 %v9492_v45, %v9491_v46  ;;  %v9496_v35 = vmax.f32 %v9480_v59, 0.0 }
0x1006   :  { %9550 = vst [vmem:[%s13610_s10 + $0x28] sm:$0xff] %v10459_v41  ;;  %v10461_v7 = vpack.c.bf16 %v9496_v35, %v9495_v17 }
0x1008   :  { %9552 = vst [vmem:[%s13610_s10 + $0x38] sm:$0xff] %v10461_v7 }
0x1009   :  { %9557 = vsyncpa [#allocation3], 1 }
0x100a   :  { %9558 = vsyncpa [#allocation5], 1 }
0x100b   :  { %9559 = vsyncpa [#allocation8], 1 }
0x100c   :  { %9560 = vsyncpa [#allocation11], 1 }
0x100d   :  { %9561 = vsyncpa [#allocation14], 1 }
0x100e   :  { %9562 = vsyncpa [#allocation17], 1 }

</bundles_post_ra>
